<compile_context>
chip_gen: v5e
topology: v5e:2x2
jax: 0.10.0
libtpu: 0.0.40
codegen_flags: <defaults>
</compile_context>

<pallas_src>
import jax
import jax.numpy as jnp
from jax.experimental import pallas as pl
from jax.experimental.pallas import tpu as pltpu

EPS = 1e-5
DROP_P = 0.4
K1, H1, H2, OUT = 4096, 1024, 512, 40
OUT_PAD = 128          # lane-dense padded output width (cols 40..127 are zero)
TK = 2048              # K-reduction tile for the 4096 -> 1024 matmul (grid of 2)


def neuralnet_kernel(x_ref, w1_ref, b1_ref, g1_ref, be1_ref,
                     w2_ref, b2_ref, g2_ref, be2_ref,
                     w3_ref, b3_ref, drop_ref,
                     o_ref, acc_ref):
    k = pl.program_id(0)

    @pl.when(k == 0)
    def _():
        acc_ref[...] = jnp.zeros_like(acc_ref)

    # Partial fn1: stream (TK, 1024) bf16 slabs of w1, accumulate in f32.
    acc_ref[...] += jnp.dot(x_ref[...], w1_ref[...],
                            preferred_element_type=jnp.float32)

    @pl.when(k == pl.num_programs(0) - 1)
    def _():
        # fn1 bias + ReLU
        h = jnp.maximum(acc_ref[...] + b1_ref[...], 0.0)            # (B, 1024) f32

        # bn1: batch stats (two-pass biased variance), eps=1e-5
        m = jnp.mean(h, axis=0, keepdims=True)
        c = h - m
        v = jnp.mean(c * c, axis=0, keepdims=True)
        h = c * jax.lax.rsqrt(v + EPS) * g1_ref[...] + be1_ref[...]

        # fn2 + ReLU
        h = jnp.dot(h.astype(jnp.bfloat16), w2_ref[...],
                    preferred_element_type=jnp.float32) + b2_ref[...]
        h = jnp.maximum(h, 0.0)                                      # (B, 512)

        # bn2
        m = jnp.mean(h, axis=0, keepdims=True)
        c = h - m
        v = jnp.mean(c * c, axis=0, keepdims=True)
        h = c * jax.lax.rsqrt(v + EPS) * g2_ref[...] + be2_ref[...]

        # dropout(p=0.4): bf16 0/1 keep mask from the wrapper, exact f32 scale here
        h = h * drop_ref[...].astype(jnp.float32) * jnp.float32(1.0 / (1.0 - DROP_P))

        # fn3 into a lane-dense 128-wide slab (extra output columns are zero)
        o_ref[...] = jnp.dot(h.astype(jnp.bfloat16), w3_ref[...],
                             preferred_element_type=jnp.float32) + b3_ref[...]


@jax.jit
def neuralnet_forward(x, params, drop_key):
    """x: any shape reshapeable to (-1, 4096), like torch's view(-1, 4096)."""
    xf = x.reshape(-1, K1).astype(jnp.bfloat16)
    B = xf.shape[0]
    # Batch stays fully resident (BatchNorm needs whole-batch statistics); the
    # (B, H1) f32 accumulator + (B, TK) blocks bound how large B can get.
    assert B <= 512, "batch too large for single-block BatchNorm kernel"
    w1, b1, g1, be1, w2, b2, g2, be2, w3p, b3p = params

    # TODO(synk): dropout mask uses jax.random (fused into this jit), not torch's RNG
    # stream; keep-probability and 1/(1-p) scaling semantics are identical. Could be
    # moved fully in-kernel with pltpu.prng_seed/prng_random_bits, but the mask is
    # only 8 KiB so the win is negligible once the wrapper is jitted.
    keep = jax.random.bernoulli(drop_key, 1.0 - DROP_P, (B, H2)).astype(jnp.bfloat16)

    operands = (xf, w1, b1, g1, be1, w2, b2, g2, be2, w3p, b3p, keep)

    def full(shape):
        nd = len(shape)
        return pl.BlockSpec(shape, lambda k: (0,) * nd)

    in_specs = [
        pl.BlockSpec((B, TK), lambda k: (0, k)),      # x:  K-tiled (bf16)
        pl.BlockSpec((TK, H1), lambda k: (k, 0)),     # w1: K-tiled, double-buffered
        full((1, H1)), full((1, H1)), full((1, H1)),  # b1, g1, be1
        full((H1, H2)),                               # w2
        full((1, H2)), full((1, H2)), full((1, H2)),  # b2, g2, be2
        full((H2, OUT_PAD)),                          # w3 (padded, bf16)
        full((1, OUT_PAD)),                           # b3 (padded)
        full((B, H2)),                                # dropout keep mask (bf16)
    ]

    grid_spec = pltpu.PrefetchScalarGridSpec(
        num_scalar_prefetch=0,
        grid=(K1 // TK,),
        in_specs=in_specs,
        out_specs=pl.BlockSpec((B, OUT_PAD), lambda k: (0, 0)),
        scratch_shapes=[pltpu.VMEM((B, H1), jnp.float32)],
    )

    out_padded = pl.pallas_call(
        neuralnet_kernel,
        out_shape=jax.ShapeDtypeStruct((B, OUT_PAD), jnp.float32),
        grid_spec=grid_spec,
        compiler_params=pltpu.CompilerParams(
            dimension_semantics=("arbitrary",),        # K axis is a reduction
            vmem_limit_bytes=24 * 1024 * 1024,
        ),
    )(*operands)

    return out_padded[:, :OUT]


def init_params(key):
    """Deterministic init mirroring torch defaults (uniform +-1/sqrt(fan_in); BN gamma=1, beta=0)."""
    ks = jax.random.split(key, 3)

    def linear(k, fan_in, fan_out):
        bound = 1.0 / (fan_in ** 0.5)
        kw, kb = jax.random.split(k)
        w = jax.random.uniform(kw, (fan_in, fan_out), jnp.float32, -bound, bound)
        b = jax.random.uniform(kb, (1, fan_out), jnp.float32, -bound, bound)
        return w, b

    w1, b1 = linear(ks[0], K1, H1)
    w2, b2 = linear(ks[1], H1, H2)
    w3, b3 = linear(ks[2], H2, OUT)

    # bf16 weights in HBM (halves the dominant DMA bytes); f32 MXU accumulation in-kernel.
    w1 = w1.astype(jnp.bfloat16)
    w2 = w2.astype(jnp.bfloat16)
    # fn3 padded to a lane-dense 128-wide output; extra columns/bias entries are zero.
    w3p = jnp.zeros((H2, OUT_PAD), jnp.bfloat16).at[:, :OUT].set(w3.astype(jnp.bfloat16))
    b3p = jnp.zeros((1, OUT_PAD), jnp.float32).at[:, :OUT].set(b3)

    g1, be1 = jnp.ones((1, H1), jnp.float32), jnp.zeros((1, H1), jnp.float32)
    g2, be2 = jnp.ones((1, H2), jnp.float32), jnp.zeros((1, H2), jnp.float32)
    return (w1, b1, g1, be1, w2, b2, g2, be2, w3p, b3p)


if __name__ == "__main__":
    key = jax.random.PRNGKey(0)
    k_param, k_x, k_drop = jax.random.split(key, 3)

    params = init_params(k_param)
    # Input like a flattened 64x64 image batch; forward does view(-1, 4096) -> (8, 4096).
    x = jax.random.normal(k_x, (8, 64, 64), dtype=jnp.float32)

    out = neuralnet_forward(x, params, k_drop)
    out = jax.block_until_ready(out)

    assert out.shape == (8, OUT) and out.dtype == jnp.float32
    assert bool(jnp.all(jnp.isfinite(out)))
    print("KERNEL_OK")
</pallas_src>

<mosaic_0001>
module attributes {stable_mosaic.version = 11 : i64} {
  func.func @neuralnet_kernel(%arg0: i32, %arg1: memref<8x2048xbf16, #tpu.memory_space<vmem>>, %arg2: memref<2048x1024xbf16, #tpu.memory_space<vmem>>, %arg3: memref<1x1024xf32, #tpu.memory_space<vmem>>, %arg4: memref<1x1024xf32, #tpu.memory_space<vmem>>, %arg5: memref<1x1024xf32, #tpu.memory_space<vmem>>, %arg6: memref<1024x512xbf16, #tpu.memory_space<vmem>>, %arg7: memref<1x512xf32, #tpu.memory_space<vmem>>, %arg8: memref<1x512xf32, #tpu.memory_space<vmem>>, %arg9: memref<1x512xf32, #tpu.memory_space<vmem>>, %arg10: memref<512x128xbf16, #tpu.memory_space<vmem>>, %arg11: memref<1x128xf32, #tpu.memory_space<vmem>>, %arg12: memref<8x512xbf16, #tpu.memory_space<vmem>>, %arg13: memref<8x128xf32, #tpu.memory_space<vmem>>, %arg14: memref<8x1024xf32, #tpu.memory_space<vmem>>) attributes {dimension_semantics = [#tpu.dimension_semantics<arbitrary>], iteration_bounds = array<i64: 2>, scalar_prefetch = 0 : i64, scratch_operands = 1 : i64, tpu.core_type = #tpu.core_type<tc>, window_params = [{transform_indices = @transform_0, window_bounds = array<i64: 8, 2048>}, {transform_indices = @transform_1, window_bounds = array<i64: 2048, 1024>}, {pipeline_mode = #tpu.pipeline_mode<synchronous>, transform_indices = @transform_2, window_bounds = array<i64: 1, 1024>}, {pipeline_mode = #tpu.pipeline_mode<synchronous>, transform_indices = @transform_3, window_bounds = array<i64: 1, 1024>}, {pipeline_mode = #tpu.pipeline_mode<synchronous>, transform_indices = @transform_4, window_bounds = array<i64: 1, 1024>}, {pipeline_mode = #tpu.pipeline_mode<synchronous>, transform_indices = @transform_5, window_bounds = array<i64: 1024, 512>}, {pipeline_mode = #tpu.pipeline_mode<synchronous>, transform_indices = @transform_6, window_bounds = array<i64: 1, 512>}, {pipeline_mode = #tpu.pipeline_mode<synchronous>, transform_indices = @transform_7, window_bounds = array<i64: 1, 512>}, {pipeline_mode = #tpu.pipeline_mode<synchronous>, transform_indices = @transform_8, window_bounds = array<i64: 1, 512>}, {pipeline_mode = #tpu.pipeline_mode<synchronous>, transform_indices = @transform_9, window_bounds = array<i64: 512, 128>}, {pipeline_mode = #tpu.pipeline_mode<synchronous>, transform_indices = @transform_10, window_bounds = array<i64: 1, 128>}, {pipeline_mode = #tpu.pipeline_mode<synchronous>, transform_indices = @transform_11, window_bounds = array<i64: 8, 512>}, {pipeline_mode = #tpu.pipeline_mode<synchronous>, transform_indices = @transform_12, window_bounds = array<i64: 8, 128>}]} {
    %c0_i32 = arith.constant 0 : i32
    %0 = arith.cmpi eq, %arg0, %c0_i32 : i32
    %1 = arith.extui %0 : i1 to i32
    %c0_i32_0 = arith.constant 0 : i32
    %2 = arith.cmpi ne, %1, %c0_i32_0 : i32
    scf.if %2 {
      %cst_9 = arith.constant 0.000000e+00 : f32
      %12 = vector.broadcast %cst_9 : f32 to vector<8x1024xf32>
      %c0_10 = arith.constant 0 : index
      %c0_11 = arith.constant 0 : index
      %13 = vector.load %arg14[%c0_10, %c0_11] : memref<8x1024xf32, #tpu.memory_space<vmem>>, vector<8x1024xf32>
      tpu.vector_store %arg14[%c0_10, %c0_11], %12 {strides = array<i32>} : memref<8x1024xf32, #tpu.memory_space<vmem>>, vector<8x1024xf32>,
    } else {
    }
    %c0 = arith.constant 0 : index
    %c0_1 = arith.constant 0 : index
    %3 = vector.load %arg14[%c0, %c0_1] : memref<8x1024xf32, #tpu.memory_space<vmem>>, vector<8x1024xf32>
    %c0_2 = arith.constant 0 : index
    %c0_3 = arith.constant 0 : index
    %4 = vector.load %arg1[%c0_2, %c0_3] : memref<8x2048xbf16, #tpu.memory_space<vmem>>, vector<8x2048xbf16>
    %c0_4 = arith.constant 0 : index
    %c0_5 = arith.constant 0 : index
    %5 = vector.load %arg2[%c0_4, %c0_5] : memref<2048x1024xbf16, #tpu.memory_space<vmem>>, vector<2048x1024xbf16>
    %cst = arith.constant dense<0.000000e+00> : vector<8x1024xf32>
    %6 = tpu.matmul %4, %5, %cst {dimension_numbers = #tpu.dot_dimension_numbers<[1], [0], [0], [1], [0, 0, 1, 1], [], []>} : vector<8x2048xbf16>, vector<2048x1024xbf16>, vector<8x1024xf32> -> vector<8x1024xf32>
    %7 = arith.addf %3, %6 : vector<8x1024xf32>
    %c0_6 = arith.constant 0 : index
    %c0_7 = arith.constant 0 : index
    %8 = vector.load %arg14[%c0_6, %c0_7] : memref<8x1024xf32, #tpu.memory_space<vmem>>, vector<8x1024xf32>
    tpu.vector_store %arg14[%c0_6, %c0_7], %7 {strides = array<i32>} : memref<8x1024xf32, #tpu.memory_space<vmem>>, vector<8x1024xf32>,
    %c1_i32 = arith.constant 1 : i32
    %9 = arith.cmpi eq, %arg0, %c1_i32 : i32
    %10 = arith.extui %9 : i1 to i32
    %c0_i32_8 = arith.constant 0 : i32
    %11 = arith.cmpi ne, %10, %c0_i32_8 : i32
    scf.if %11 {
      %c0_9 = arith.constant 0 : index
      %c0_10 = arith.constant 0 : index
      %12 = vector.load %arg14[%c0_9, %c0_10] : memref<8x1024xf32, #tpu.memory_space<vmem>>, vector<8x1024xf32>
      %c0_11 = arith.constant 0 : index
      %c0_12 = arith.constant 0 : index
      %13 = vector.load %arg3[%c0_11, %c0_12] : memref<1x1024xf32, #tpu.memory_space<vmem>>, vector<1x1024xf32>
      %14 = vector.broadcast %13 : vector<1x1024xf32> to vector<8x1024xf32>
      %15 = arith.addf %12, %14 : vector<8x1024xf32>
      %cst_13 = arith.constant 0.000000e+00 : f32
      %16 = vector.broadcast %cst_13 : f32 to vector<8x1024xf32>
      %17 = arith.maximumf %15, %16 : vector<8x1024xf32>
      %cst_14 = arith.constant dense<0.000000e+00> : vector<1024xf32>
      %18 = vector.multi_reduction <add>, %17, %cst_14 [0] : vector<8x1024xf32> to vector<1024xf32>
      %19 = vector.shape_cast %18 : vector<1024xf32> to vector<1x1024xf32>
      %cst_15 = arith.constant 8.000000e+00 : f32
      %20 = vector.broadcast %cst_15 : f32 to vector<1x1024xf32>
      %21 = arith.divf %19, %20 : vector<1x1024xf32>
      %22 = vector.broadcast %21 : vector<1x1024xf32> to vector<8x1024xf32>
      %23 = arith.subf %17, %22 : vector<8x1024xf32>
      %24 = arith.mulf %23, %23 : vector<8x1024xf32>
      %cst_16 = arith.constant dense<0.000000e+00> : vector<1024xf32>
      %25 = vector.multi_reduction <add>, %24, %cst_16 [0] : vector<8x1024xf32> to vector<1024xf32>
      %26 = vector.shape_cast %25 : vector<1024xf32> to vector<1x1024xf32>
      %cst_17 = arith.constant 8.000000e+00 : f32
      %27 = vector.broadcast %cst_17 : f32 to vector<1x1024xf32>
      %28 = arith.divf %26, %27 : vector<1x1024xf32>
      %cst_18 = arith.constant 9.99999974E-6 : f32
      %29 = vector.broadcast %cst_18 : f32 to vector<1x1024xf32>
      %30 = arith.addf %28, %29 : vector<1x1024xf32>
      %31 = math.rsqrt %30 : vector<1x1024xf32>
      %32 = vector.broadcast %31 : vector<1x1024xf32> to vector<8x1024xf32>
      %33 = arith.mulf %23, %32 : vector<8x1024xf32>
      %c0_19 = arith.constant 0 : index
      %c0_20 = arith.constant 0 : index
      %34 = vector.load %arg4[%c0_19, %c0_20] : memref<1x1024xf32, #tpu.memory_space<vmem>>, vector<1x1024xf32>
      %35 = vector.broadcast %34 : vector<1x1024xf32> to vector<8x1024xf32>
      %36 = arith.mulf %33, %35 : vector<8x1024xf32>
      %c0_21 = arith.constant 0 : index
      %c0_22 = arith.constant 0 : index
      %37 = vector.load %arg5[%c0_21, %c0_22] : memref<1x1024xf32, #tpu.memory_space<vmem>>, vector<1x1024xf32>
      %38 = vector.broadcast %37 : vector<1x1024xf32> to vector<8x1024xf32>
      %39 = arith.addf %36, %38 : vector<8x1024xf32>
      %40 = arith.truncf %39 : vector<8x1024xf32> to vector<8x1024xbf16>
      %c0_23 = arith.constant 0 : index
      %c0_24 = arith.constant 0 : index
      %41 = vector.load %arg6[%c0_23, %c0_24] : memref<1024x512xbf16, #tpu.memory_space<vmem>>, vector<1024x512xbf16>
      %cst_25 = arith.constant dense<0.000000e+00> : vector<8x512xf32>
      %42 = tpu.matmul %40, %41, %cst_25 {dimension_numbers = #tpu.dot_dimension_numbers<[1], [0], [0], [1], [0, 0, 1, 1], [], []>} : vector<8x1024xbf16>, vector<1024x512xbf16>, vector<8x512xf32> -> vector<8x512xf32>
      %c0_26 = arith.constant 0 : index
      %c0_27 = arith.constant 0 : index
      %43 = vector.load %arg7[%c0_26, %c0_27] : memref<1x512xf32, #tpu.memory_space<vmem>>, vector<1x512xf32>
      %44 = vector.broadcast %43 : vector<1x512xf32> to vector<8x512xf32>
      %45 = arith.addf %42, %44 : vector<8x512xf32>
      %cst_28 = arith.constant 0.000000e+00 : f32
      %46 = vector.broadcast %cst_28 : f32 to vector<8x512xf32>
      %47 = arith.maximumf %45, %46 : vector<8x512xf32>
      %cst_29 = arith.constant dense<0.000000e+00> : vector<512xf32>
      %48 = vector.multi_reduction <add>, %47, %cst_29 [0] : vector<8x512xf32> to vector<512xf32>
      %49 = vector.shape_cast %48 : vector<512xf32> to vector<1x512xf32>
      %cst_30 = arith.constant 8.000000e+00 : f32
      %50 = vector.broadcast %cst_30 : f32 to vector<1x512xf32>
      %51 = arith.divf %49, %50 : vector<1x512xf32>
      %52 = vector.broadcast %51 : vector<1x512xf32> to vector<8x512xf32>
      %53 = arith.subf %47, %52 : vector<8x512xf32>
      %54 = arith.mulf %53, %53 : vector<8x512xf32>
      %cst_31 = arith.constant dense<0.000000e+00> : vector<512xf32>
      %55 = vector.multi_reduction <add>, %54, %cst_31 [0] : vector<8x512xf32> to vector<512xf32>
      %56 = vector.shape_cast %55 : vector<512xf32> to vector<1x512xf32>
      %cst_32 = arith.constant 8.000000e+00 : f32
      %57 = vector.broadcast %cst_32 : f32 to vector<1x512xf32>
      %58 = arith.divf %56, %57 : vector<1x512xf32>
      %cst_33 = arith.constant 9.99999974E-6 : f32
      %59 = vector.broadcast %cst_33 : f32 to vector<1x512xf32>
      %60 = arith.addf %58, %59 : vector<1x512xf32>
      %61 = math.rsqrt %60 : vector<1x512xf32>
      %62 = vector.broadcast %61 : vector<1x512xf32> to vector<8x512xf32>
      %63 = arith.mulf %53, %62 : vector<8x512xf32>
      %c0_34 = arith.constant 0 : index
      %c0_35 = arith.constant 0 : index
      %64 = vector.load %arg8[%c0_34, %c0_35] : memref<1x512xf32, #tpu.memory_space<vmem>>, vector<1x512xf32>
      %65 = vector.broadcast %64 : vector<1x512xf32> to vector<8x512xf32>
      %66 = arith.mulf %63, %65 : vector<8x512xf32>
      %c0_36 = arith.constant 0 : index
      %c0_37 = arith.constant 0 : index
      %67 = vector.load %arg9[%c0_36, %c0_37] : memref<1x512xf32, #tpu.memory_space<vmem>>, vector<1x512xf32>
      %68 = vector.broadcast %67 : vector<1x512xf32> to vector<8x512xf32>
      %69 = arith.addf %66, %68 : vector<8x512xf32>
      %c0_38 = arith.constant 0 : index
      %c0_39 = arith.constant 0 : index
      %70 = vector.load %arg12[%c0_38, %c0_39] : memref<8x512xbf16, #tpu.memory_space<vmem>>, vector<8x512xbf16>
      %71 = arith.extf %70 : vector<8x512xbf16> to vector<8x512xf32>
      %72 = arith.mulf %69, %71 : vector<8x512xf32>
      %cst_40 = arith.constant 1.66666663 : f32
      %73 = vector.broadcast %cst_40 : f32 to vector<8x512xf32>
      %74 = arith.mulf %72, %73 : vector<8x512xf32>
      %75 = arith.truncf %74 : vector<8x512xf32> to vector<8x512xbf16>
      %c0_41 = arith.constant 0 : index
      %c0_42 = arith.constant 0 : index
      %76 = vector.load %arg10[%c0_41, %c0_42] : memref<512x128xbf16, #tpu.memory_space<vmem>>, vector<512x128xbf16>
      %cst_43 = arith.constant dense<0.000000e+00> : vector<8x128xf32>
      %77 = tpu.matmul %75, %76, %cst_43 {dimension_numbers = #tpu.dot_dimension_numbers<[1], [0], [0], [1], [0, 0, 1, 1], [], []>} : vector<8x512xbf16>, vector<512x128xbf16>, vector<8x128xf32> -> vector<8x128xf32>
      %c0_44 = arith.constant 0 : index
      %c0_45 = arith.constant 0 : index
      %78 = vector.load %arg11[%c0_44, %c0_45] : memref<1x128xf32, #tpu.memory_space<vmem>>, vector<1x128xf32>
      %79 = vector.broadcast %78 : vector<1x128xf32> to vector<8x128xf32>
      %80 = arith.addf %77, %79 : vector<8x128xf32>
      %c0_46 = arith.constant 0 : index
      %c0_47 = arith.constant 0 : index
      %81 = vector.load %arg13[%c0_46, %c0_47] : memref<8x128xf32, #tpu.memory_space<vmem>>, vector<8x128xf32>
      tpu.vector_store %arg13[%c0_46, %c0_47], %80 {strides = array<i32>} : memref<8x128xf32, #tpu.memory_space<vmem>>, vector<8x128xf32>,
    } else {
    }
    return
  }
  func.func @transform_0(%arg0: i32) -> (i32, i32) {
    %c0_i32 = arith.constant 0 : i32
    %c0_i32_0 = arith.constant 0 : i32
    return %c0_i32, %arg0 : i32, i32
  }
  func.func @transform_1(%arg0: i32) -> (i32, i32) {
    %c0_i32 = arith.constant 0 : i32
    %c0_i32_0 = arith.constant 0 : i32
    return %arg0, %c0_i32 : i32, i32
  }
  func.func @transform_2(%arg0: i32) -> (i32, i32) {
    %c0_i32 = arith.constant 0 : i32
    %c0_i32_0 = arith.constant 0 : i32
    %c0_i32_1 = arith.constant 0 : i32
    return %c0_i32, %c0_i32_0 : i32, i32
  }
  func.func @transform_3(%arg0: i32) -> (i32, i32) {
    %c0_i32 = arith.constant 0 : i32
    %c0_i32_0 = arith.constant 0 : i32
    %c0_i32_1 = arith.constant 0 : i32
    return %c0_i32, %c0_i32_0 : i32, i32
  }
  func.func @transform_4(%arg0: i32) -> (i32, i32) {
    %c0_i32 = arith.constant 0 : i32
    %c0_i32_0 = arith.constant 0 : i32
    %c0_i32_1 = arith.constant 0 : i32
    return %c0_i32, %c0_i32_0 : i32, i32
  }
  func.func @transform_5(%arg0: i32) -> (i32, i32) {
    %c0_i32 = arith.constant 0 : i32
    %c0_i32_0 = arith.constant 0 : i32
    %c0_i32_1 = arith.constant 0 : i32
    return %c0_i32, %c0_i32_0 : i32, i32
  }
  func.func @transform_6(%arg0: i32) -> (i32, i32) {
    %c0_i32 = arith.constant 0 : i32
    %c0_i32_0 = arith.constant 0 : i32
    %c0_i32_1 = arith.constant 0 : i32
    return %c0_i32, %c0_i32_0 : i32, i32
  }
  func.func @transform_7(%arg0: i32) -> (i32, i32) {
    %c0_i32 = arith.constant 0 : i32
    %c0_i32_0 = arith.constant 0 : i32
    %c0_i32_1 = arith.constant 0 : i32
    return %c0_i32, %c0_i32_0 : i32, i32
  }
  func.func @transform_8(%arg0: i32) -> (i32, i32) {
    %c0_i32 = arith.constant 0 : i32
    %c0_i32_0 = arith.constant 0 : i32
    %c0_i32_1 = arith.constant 0 : i32
    return %c0_i32, %c0_i32_0 : i32, i32
  }
  func.func @transform_9(%arg0: i32) -> (i32, i32) {
    %c0_i32 = arith.constant 0 : i32
    %c0_i32_0 = arith.constant 0 : i32
    %c0_i32_1 = arith.constant 0 : i32
    return %c0_i32, %c0_i32_0 : i32, i32
  }
  func.func @transform_10(%arg0: i32) -> (i32, i32) {
    %c0_i32 = arith.constant 0 : i32
    %c0_i32_0 = arith.constant 0 : i32
    %c0_i32_1 = arith.constant 0 : i32
    return %c0_i32, %c0_i32_0 : i32, i32
  }
  func.func @transform_11(%arg0: i32) -> (i32, i32) {
    %c0_i32 = arith.constant 0 : i32
    %c0_i32_0 = arith.constant 0 : i32
    %c0_i32_1 = arith.constant 0 : i32
    return %c0_i32, %c0_i32_0 : i32, i32
  }
  func.func @transform_12(%arg0: i32) -> (i32, i32) {
    %c0_i32 = arith.constant 0 : i32
    %c0_i32_0 = arith.constant 0 : i32
    %c0_i32_1 = arith.constant 0 : i32
    return %c0_i32, %c0_i32_0 : i32, i32
  }
}

</mosaic_0001>

<bundles_post_ra>
// kernel: neuralnet_forward.1
= control target key start
LH: loop header
LB: loop body
LE: loop exit
PB: predicated region body
PF: predicated region fallthrough
CT: control target
= control target key end

     0   :  { %s21863_s0 = inlined_call_operand.vmem [shape: bf16[8,4096], index: 0, kind: input, shape index: {}]   ;;  %s21864_s1 = inlined_call_operand.hbm [shape: bf16[4096,1024], index: 1, kind: input, shape index: {}]   ;;  %s21865_s2 = inlined_call_operand.hbm [shape: f32[1,1024], index: 2, kind: input, shape index: {}]   ;;  %s21866_s3 = inlined_call_operand.hbm [shape: f32[1,1024], index: 3, kind: input, shape index: {}]   ;;  %s21867_s4 = inlined_call_operand.hbm [shape: f32[1,1024], index: 4, kind: input, shape index: {}]   ;;  %s21868_s5 = inlined_call_operand.hbm [shape: bf16[1024,512], index: 5, kind: input, shape index: {}]   ;;  %s21869_s6 = inlined_call_operand.hbm [shape: f32[1,512], index: 6, kind: input, shape index: {}]   ;;  %s21870_s7 = inlined_call_operand.hbm [shape: f32[1,512], index: 7, kind: input, shape index: {}]   ;;  %s21871_s8 = inlined_call_operand.hbm [shape: f32[1,512], index: 8, kind: input, shape index: {}]   ;;  %s21872_s9 = inlined_call_operand.hbm [shape: bf16[512,128], index: 9, kind: input, shape index: {}]   ;;  %s21873_s10 = inlined_call_operand.hbm [shape: f32[1,128], index: 10, kind: input, shape index: {}]   ;;  %s21874_s11 = inlined_call_operand.vmem [shape: bf16[8,512], index: 11, kind: input, shape index: {}]   ;;  %s21875_s12 = inlined_call_operand.hbm [shape: f32[8,128], index: 12, kind: output, shape index: {}]  }
   0x1   :  { %21876 = sst [smem:[#allocation28_spill]] %s21865_s2 }
   0x2   :  { %21877 = sst [smem:[#allocation29_spill]] %s21866_s3 }
   0x3   :  { %21878 = sst [smem:[#allocation30_spill]] %s21867_s4 }
   0x4   :  { %21879 = sst [smem:[#allocation31_spill]] %s21869_s6 }
   0x5   :  { %17 = vsyncpa [#allocation4], 0 }
   0x6   :  { %19 = vsyncpa [#allocation4 + $0x1], 0 }
   0x7   :  { %20 = vsyncpa [#allocation7], 0 }
   0x8   :  { %21 = vsyncpa [#allocation10], 0 }
   0x9   :  { %22 = vsyncpa [#allocation13], 0 }
   0xa   :  { %23 = vsyncpa [#allocation16], 0 }
   0xb   :  { %24 = vsyncpa [#allocation19], 0 }
   0xc   :  { %25 = vsyncpa [#allocation5], 0  ;;  %s18660_s21 = smov 0   ;;  %s18662_s22 = smov 0  }
   0xd   :  { %s18664_s23 = smov 0   ;;  %s18666_s24 = smov 0  }
   0xe LB: > { %s21880_s2 = sld [smem:[#allocation28_spill]]  ;;  %s18684_s28 = sadd.s32 4294967295, %s18575_s24   ;;  %s18575_s24 = sphi %s18666_s24, %s21915_s24   ;;  %s18571_s23 = sphi %s18664_s23, %s21914_s23   ;;  %s18567_s22 = sphi %s18662_s22, %s21913_s22   ;;  %s18563_s21 = sphi %s18660_s21, %s21912_s21  }
   0xf   : > { %p11421_p0 = scmp.ge.s32.totalorder %s18575_s24, 1  ;;  %p78_p1 = scmp.eq.s32.totalorder %s18684_s28, 0 }
  0x10   : > { %p319_p2 = scmp.lt.s32.totalorder %s18575_s24, 3  ;;  %p11422_p3 = scmp.ne.s32.totalorder %s18684_s28, 0 }
  0x11   : > { %s18577_s30 = smov [#allocation6]   ;;  %s21882_s4 = sld [smem:[#allocation30_spill]] }
  0x12   : > { %p18690_p4 = pnand %p11421_p0, %p319_p2  ;;  %s333_s13 = sshll.u32 %s18577_s30, 4  ;;  %s334_s13 = int_to_ptr.vmem [resolvable:$true] %s333_s13 }
  0x13   : > { %s18578_s18 = smov [#allocation9]   ;;  %s21884_s6 = sld [smem:[#allocation31_spill]] }
  0x14   : > { %s331_s27 = sshll.u32 %s21880_s2, 4  ;;  %p18059_p5 = pneg %p18690_p4  ;;  %s332_s27 = int_to_ptr.hbm [resolvable:$true] %s331_s27 }
  0x15   : > { %s357_s19 = sshll.u32 %s18578_s18, 4  ;;  %s405_s15 = sshll.u32 %s21871_s8, 4  ;;  %s358_s19 = int_to_ptr.vmem [resolvable:$true] %s357_s19  ;;  %s406_s15 = int_to_ptr.hbm [resolvable:$true] %s405_s15 }
  0x16   : > { %p18701_p6 = pnand %p18059_p5, %p78_p1  ;;  %s18579_s2 = smov [#allocation12]  }
  0x17   : > { %s355_s16 = sshll.u32 %s21882_s4, 4  ;;  %s383_s4 = sshll.u32 %s18579_s2, 4  ;;  %s356_s16 = int_to_ptr.hbm [resolvable:$true] %s355_s16  ;;  %s384_s4 = int_to_ptr.vmem [resolvable:$true] %s383_s4 }
  0x18   : > { %18062 = dma.hbm_to_vmem [thread:$0]  (!%p18701_p6), %s332_s27, 128, %s334_s13, [#allocation7]  }
  0x19   : > { %s381_s26 = sshll.u32 %s21884_s6, 4  ;;  %s18580_s18 = smov [#allocation15]   ;;  %s382_s26 = int_to_ptr.hbm [resolvable:$true] %s381_s26 }
  0x1a   : > { %18068 = dma.hbm_to_vmem [thread:$0]  (!%p18701_p6), %s356_s16, 128, %s358_s19, [#allocation10]  }
  0x1b   : > { %18074 = dma.hbm_to_vmem [thread:$0]  (!%p18701_p6), %s382_s26, 64, %s384_s4, [#allocation13]  }
  0x1c   : > { %s407_s20 = sshll.u32 %s18580_s18, 4  ;;  %s21885_s3 = sld [smem:[#allocation29_spill]]  ;;  %s408_s20 = int_to_ptr.vmem [resolvable:$true] %s407_s20 }
  0x1d   : > { %18080 = dma.hbm_to_vmem [thread:$0]  (!%p18701_p6), %s406_s15, 64, %s408_s20, [#allocation16]  }
  0x1e   : > { %s366_s19 = sshll.u32 %s21868_s5, 4  ;;  %s18581_s2 = smov [#allocation8]   ;;  %s367_s19 = int_to_ptr.hbm [resolvable:$true] %s366_s19 }
  0x1f   : > { %s345_s30 = sshll.u32 %s18581_s2, 4  ;;  %s18582_s4 = smov [#allocation11]   ;;  %s346_s30 = int_to_ptr.vmem [resolvable:$true] %s345_s30 }
  0x20   : > { %s368_s26 = sshll.u32 %s18582_s4, 4  ;;  %s18583_s6 = smov 256   ;;  %s369_s26 = int_to_ptr.vmem [resolvable:$true] %s368_s26 }
  0x21   : > { %s18584_s14 = smov 16   ;;  %s393_s20 = sshll.u32 %s21870_s7, 4  ;;  %s394_s20 = int_to_ptr.hbm [resolvable:$true] %s393_s20 }
  0x22   : > { %s343_s27 = sshll.u32 %s21885_s3, 4  ;;  %s18585_s25 = smov [#allocation14]   ;;  %s344_s27 = int_to_ptr.hbm [resolvable:$true] %s343_s27 }
  0x23   : > { %18065 = dma.hbm_to_vmem [thread:$0]  (!%p18701_p6), %s344_s27, 128, %s346_s30, [#allocation7]  }
  0x24   : > { %18071 = dma.hbm_to_vmem [thread:$0]  (!%p18701_p6), %s367_s19, 32768, %s369_s26, [#allocation10], %s18583_s6, %s18583_s6, %s18584_s14  }
  0x25   : > { %s395_s13 = sshll.u32 %s18585_s25, 4  ;;  %s416_s27 = sshll.u32 %s21872_s9, 4  ;;  %s396_s13 = int_to_ptr.vmem [resolvable:$true] %s395_s13  ;;  %s417_s27 = int_to_ptr.hbm [resolvable:$true] %s416_s27 }
  0x26   : > { %18077 = dma.hbm_to_vmem [thread:$0]  (!%p18701_p6), %s394_s20, 64, %s396_s13, [#allocation13]  }
  0x27   : > { %s18586_s19 = smov [#allocation17]   ;;  %s18587_s4 = smov 64  }
  0x28   : > { %s418_s30 = sshll.u32 %s18586_s19, 4  ;;  %s18588_s26 = smov 4   ;;  %s419_s30 = int_to_ptr.vmem [resolvable:$true] %s418_s30 }
  0x29   : > { %18083 = dma.hbm_to_vmem [thread:$0]  (!%p18701_p6), %s417_s27, 4096, %s419_s30, [#allocation16], %s18587_s4, %s18587_s4, %s18588_s26  }
  0x2a   : > { %s431_s15 = sshll.u32 %s21873_s10, 4  ;;  %s18589_s18 = smov [#allocation18]   ;;  %s432_s15 = int_to_ptr.hbm [resolvable:$true] %s431_s15 }
  0x2b   : > { %s433_s20 = sshll.u32 %s18589_s18, 4  ;;  %s18745_s25 = sadd.s32 1, %s18575_s24   ;;  %s434_s20 = int_to_ptr.vmem [resolvable:$true] %s433_s20 }
  0x2c   : > { %18086 = dma.hbm_to_vmem [thread:$0]  (!%p18701_p6), %s432_s15, 16, %s434_s20, [#allocation19]  }
  0x2d   : > { %s61_s13 = ssub.s32 %s18575_s24, %s18745_s25  ;;  %s64_s16 = sadd.s32 1, %s18571_s23 }
  0x2e   : > { %p62_p7 = scmp.eq.s32.totalorder %s61_s13, 0  ;;  %p71_p8 = scmp.ne.s32.totalorder %s18571_s23, %s18567_s22 }
  0x2f   : > { %p72_p9 = scmp.eq.s32.totalorder %s18575_s24, 0  ;;  %p77_p10 = scmp.ne.s32.totalorder %s18567_s22, %s18563_s21 }
  0x30   : > { %s18756_s2 = scalar_select %p62_p7, %s18571_s23, %s64_s16  }
  0x31   : > { %p73_p11 = por %p72_p9, %p71_p8  ;;  %p18760_p12 = por %p78_p1, %p77_p10 }
  0x32   : > { %p18100_p13 = scmp.lt.s32.totalorder %s18575_s24, 2  ;;  %s456_s17 = sand.u32 1, %s18571_s23  }
  0x33   : > { %s11432_s19 = sshll.u32 %s456_s17, 13  ;;  %s16704_s30 = sshll.u32 %s18575_s24, 13 }
  0x34   : > { %s466_s6 = scalar_lea.hbm %s21864_s1, %s16704_s30  ;;  %s460_s14 = scalar_lea.vmem [#allocation3], %s11432_s19 }
  0x35   : > { %s469_s15 = sshll.u32 %s460_s14, 4  ;;  %s467_s18 = sshll.u32 %s466_s6, 4  ;;  %s470_s15 = int_to_ptr.vmem [resolvable:$true] %s469_s15  ;;  %s468_s18 = int_to_ptr.hbm [resolvable:$true] %s467_s18 }
  0x36   : > { %p18770_p0 = pnand %p18100_p13, %p73_p11  ;;  %s457_s20 = scalar_lea.sflag [#allocation4], %s456_s17 }
  0x37   : > { %s18459_s13 = sshra.s32 %s468_s18, 4  ;;  %s18466_s30 = scalar_lea.hbm %s21864_s1, 16384  ;;  %s18460_s13 = int_to_ptr.hbm [resolvable:$true] %s18459_s13 }
  0x38   : > { %s18461_s16 = scalar_lea.hbm %s18460_s13, 8192  ;;  %p18463_p5 = pneg %p18770_p0 }
  0x39   : > { %p18462_p2 = scmp.ne.s32.totalorder %s18460_s13, %s18461_s16  ;;  %p18467_p8 = scmp.lt.s32.totalorder %s18460_s13, %s21864_s1 }
  0x3a   : > { %p18468_p9 = scmp.lt.s32.totalorder %s18466_s30, %s18461_s16 }
  0x3b   : > { %p18464_p6 = pnand %p18463_p5, %p18462_p2 }
  0x3c   : > { %p18469_p10 = por %p18468_p9, %p18467_p8 }
  0x3d   : > { %p18465_p7 = pneg %p18464_p6 }
  0x3f   : > { %p18470_p11 = pnand %p18469_p10, %p18465_p7 }
  0x41   : > { %18473 = shalt.err (!%p18470_p11)
}
  0x42   : > { %s18590_s17 = smov 512   ;;  %s18591_s6 = smov 32  }
  0x43   : > { %18090 = dma.hbm_to_vmem [thread:$0]  (!%p18770_p0), %s468_s18, 131072, %s470_s15, %s457_s20, %s18590_s17, %s18590_s17, %s18591_s6  }
  0x44   : > { %481 = sbr.rel (%p18690_p4) target bundleno = 2763 (0xacb), region = 68  ;;  %s483_s14 = sand.u32 (!%p18690_p4), 1, %s18567_s22  }
  0x45   : > { %s11437_s24 = sshll.u32 (!%p18690_p4), %s483_s14, 13  ;;  %s484_s19 = scalar_lea.sflag (!%p18690_p4), [#allocation4], %s483_s14 }
  0x46   : > { %s18787_s3 = scalar_lea.vmem (!%p18690_p4), [#allocation3], %s11437_s24 }
  0x49   : > { %18534 = dma.done.wait (%p18760_p12), %s484_s19, 131072  }
  0x4a   : > { %18536 = vsyncadd (%p18760_p12), %s484_s19, 4294836224 }
  0x4b   : > { %18538 = dma.done.wait (%p78_p1), [#allocation7], 256  }
  0x4c   : > { %18540 = vsyncadd (%p78_p1), [#allocation7], 4294967040 }
  0x4d   : > { %18542 = dma.done.wait (%p78_p1), [#allocation10], 32896  }
  0x4e   : > { %18544 = vsyncadd (%p78_p1), [#allocation10], 4294934400 }
  0x4f   : > { %18546 = dma.done.wait (%p78_p1), [#allocation13], 128  }
  0x50   : > { %18548 = vsyncadd (%p78_p1), [#allocation13], 4294967168 }
  0x51   : > { %18550 = dma.done.wait (%p78_p1), [#allocation16], 4160  }
  0x52   : > { %18552 = vsyncadd (%p78_p1), [#allocation16], 4294963136 }
  0x53   : > { %18554 = dma.done.wait (%p78_p1), [#allocation19], 16  }
  0x54   : > { %18556 = vsyncadd (%p78_p1), [#allocation19], 4294967280  ;;  %s11447_s29 = sshll.u32 %s18684_s28, 4 }
  0x55   : > { %p575_p4 = scmp.lt.s32.totalorder %s11447_s29, 31  ;;  %584 = sbr.rel (%p11422_p3) target bundleno = 99 (0x63), region = 112 }
  0x57   : > { %s21917_s29 = smov (!%p575_p4, %s11447_s29), 31 }
  0x58   : > { %s11448_s27 = sshll.u32 %s21917_s29, 2 }
  0x59   : > { %s18817_s21 = scalar_lea.vmem %s21863_s0, %s11448_s27 }
  0x5a   : > { %v18592_v0 = vmov 0.0  }
  0x5b   : > { %585 = vst [vmem:[#allocation2 + $0x30] sm:$0xff] %v18592_v0 }
  0x5c   : > { %586 = vst [vmem:[#allocation2] sm:$0xff] %v18592_v0 }
  0x5d   : > { %587 = vst [vmem:[#allocation2 + $0x18] sm:$0xff] %v18592_v0 }
  0x5e   : > { %588 = vst [vmem:[#allocation2 + $0x10] sm:$0xff] %v18592_v0 }
  0x5f   : > { %589 = vst [vmem:[#allocation2 + $0x8] sm:$0xff] %v18592_v0 }
  0x60   : > { %590 = vst [vmem:[#allocation2 + $0x20] sm:$0xff] %v18592_v0 }
  0x61   : > { %591 = vst [vmem:[#allocation2 + $0x28] sm:$0xff] %v18592_v0 }
  0x62   : > { %592 = vst [vmem:[#allocation2 + $0x38] sm:$0xff] %v18592_v0 }
  0x63 PF: > { %v11676_v1 = vld [vmem:[%s18787_s3 + $0x1c0] sm:$0xf]  ;;  %p15546_p1 = scmp.ne.s32.totalorder %s18684_s28, 1 }
  0x64   : > { %v16765_v2 = vld [vmem:[%s18787_s3 + $0x1dc] sm:$0xf0] }
  0x65   : > { %v11932_v3 = vld [vmem:[%s18787_s3 + $0x3c0] sm:$0xf]  ;;  %v11677_v4 = vor.u32 %v16765_v2, %v11676_v1 }
  0x66   : > { %v16829_v5 = vld [vmem:[%s18787_s3 + $0x3dc] sm:$0xf0] }
  0x67   : > { %v12188_v6 = vld [vmem:[%s18787_s3 + $0x5c0] sm:$0xf]  ;;  %v11933_v8 = vor.u32 %v16829_v5, %v11932_v3  ;;  %6809 = vmatpush.bf16.msra.mxu0 %v11677_v4 }
  0x68   : > { %v16893_v7 = vld [vmem:[%s18787_s3 + $0x5dc] sm:$0xf0] }
  0x69   : > { %v12189_v9 = vor.u32 %v16893_v7, %v12188_v6  ;;  %v12444_v10 = vld [vmem:[%s18787_s3 + $0x7c0] sm:$0xf]  ;;  %6822 = vmatpush.bf16.msra.mxu1 %v11933_v8 }
  0x6a   : > { %v16957_v11 = vld [vmem:[%s18787_s3 + $0x7dc] sm:$0xf0] }
  0x6b   : > { %v11644_v12 = vld [vmem:[%s18787_s3 + $0x180] sm:$0xf]  ;;  %v12445_v13 = vor.u32 %v16957_v11, %v12444_v10  ;;  %6835 = vmatpush.bf16.msra.mxu2 %v12189_v9 }
  0x6c   : > { %v16757_v14 = vld [vmem:[%s18787_s3 + $0x19c] sm:$0xf0] }
  0x6d   : > { %v11900_v15 = vld [vmem:[%s18787_s3 + $0x380] sm:$0xf]  ;;  %v11645_v17 = vor.u32 %v16757_v14, %v11644_v12  ;;  %6848 = vmatpush.bf16.msra.mxu3 %v12445_v13 }
  0x6e   : > { %v16821_v16 = vld [vmem:[%s18787_s3 + $0x39c] sm:$0xf0] }
  0x6f   : > { %v11901_v18 = vor.u32 %v16821_v16, %v11900_v15  ;;  %v12156_v19 = vld [vmem:[%s18787_s3 + $0x580] sm:$0xf]  ;;  %6810 = vmatpush.bf16.msra.mxu0 %v11645_v17 }
  0x70   : > { %v16885_v20 = vld [vmem:[%s18787_s3 + $0x59c] sm:$0xf0] }
  0x71   : > { %v12412_v21 = vld [vmem:[%s18787_s3 + $0x780] sm:$0xf]  ;;  %v12157_v22 = vor.u32 %v16885_v20, %v12156_v19  ;;  %6823 = vmatpush.bf16.msra.mxu1 %v11901_v18 }
  0x72   : > { %v16949_v23 = vld [vmem:[%s18787_s3 + $0x79c] sm:$0xf0] }
  0x73   : > { %v11612_v24 = vld [vmem:[%s18787_s3 + $0x140] sm:$0xf]  ;;  %v12413_v26 = vor.u32 %v16949_v23, %v12412_v21  ;;  %6836 = vmatpush.bf16.msra.mxu2 %v12157_v22 }
  0x74   : > { %v16749_v25 = vld [vmem:[%s18787_s3 + $0x15c] sm:$0xf0] }
  0x75   : > { %v11868_v27 = vld [vmem:[%s18787_s3 + $0x340] sm:$0xf]  ;;  %v11613_v30 = vor.u32 %v16749_v25, %v11612_v24  ;;  %6849 = vmatpush.bf16.msra.mxu3 %v12413_v26 }
  0x76   : > { %v16813_v28 = vld [vmem:[%s18787_s3 + $0x35c] sm:$0xf0] }
  0x77   : > { %v12124_v29 = vld [vmem:[%s18787_s3 + $0x540] sm:$0xf]  ;;  %v11869_v34 = vor.u32 %v16813_v28, %v11868_v27  ;;  %6811 = vmatpush.bf16.msra.mxu0 %v11613_v30 }
  0x78   : > { %v16877_v31 = vld [vmem:[%s18787_s3 + $0x55c] sm:$0xf0] }
  0x79   : > { %v12380_v32 = vld [vmem:[%s18787_s3 + $0x740] sm:$0xf]  ;;  %v12125_v35 = vor.u32 %v16877_v31, %v12124_v29  ;;  %6824 = vmatpush.bf16.msra.mxu1 %v11869_v34 }
  0x7a   : > { %v16941_v33 = vld [vmem:[%s18787_s3 + $0x75c] sm:$0xf0] }
  0x7b   : > { %v11580_v36 = vld [vmem:[%s18787_s3 + $0x100] sm:$0xf]  ;;  %v12381_v39 = vor.u32 %v16941_v33, %v12380_v32  ;;  %6837 = vmatpush.bf16.msra.mxu2 %v12125_v35 }
  0x7c   : > { %v16741_v37 = vld [vmem:[%s18787_s3 + $0x11c] sm:$0xf0] }
  0x7d   : > { %v11836_v38 = vld [vmem:[%s18787_s3 + $0x300] sm:$0xf]  ;;  %v11581_v45 = vor.u32 %v16741_v37, %v11580_v36  ;;  %6850 = vmatpush.bf16.msra.mxu3 %v12381_v39 }
  0x7e   : > { %v16805_v40 = vld [vmem:[%s18787_s3 + $0x31c] sm:$0xf0] }
  0x7f   : > { %v12092_v41 = vld [vmem:[%s18787_s3 + $0x500] sm:$0xf]  ;;  %v11837_v46 = vor.u32 %v16805_v40, %v11836_v38  ;;  %6812 = vmatpush.bf16.msra.mxu0 %v11581_v45 }
  0x80   : > { %v16869_v42 = vld [vmem:[%s18787_s3 + $0x51c] sm:$0xf0] }
  0x81   : > { %v12348_v43 = vld [vmem:[%s18787_s3 + $0x700] sm:$0xf]  ;;  %v12093_v47 = vor.u32 %v16869_v42, %v12092_v41  ;;  %6825 = vmatpush.bf16.msra.mxu1 %v11837_v46 }
  0x82   : > { %v16933_v44 = vld [vmem:[%s18787_s3 + $0x71c] sm:$0xf0] }
  0x83   : > { %v11548_v48 = vld [vmem:[%s18787_s3 + $0xc0] sm:$0xf]  ;;  %v12349_v51 = vor.u32 %v16933_v44, %v12348_v43  ;;  %6838 = vmatpush.bf16.msra.mxu2 %v12093_v47 }
  0x84   : > { %v16733_v49 = vld [vmem:[%s18787_s3 + $0xdc] sm:$0xf0] }
  0x85   : > { %v11804_v50 = vld [vmem:[%s18787_s3 + $0x2c0] sm:$0xf]  ;;  %v11549_v57 = vor.u32 %v16733_v49, %v11548_v48  ;;  %6851 = vmatpush.bf16.msra.mxu3 %v12349_v51 }
  0x86   : > { %v16797_v52 = vld [vmem:[%s18787_s3 + $0x2dc] sm:$0xf0] }
  0x87   : > { %v12060_v53 = vld [vmem:[%s18787_s3 + $0x4c0] sm:$0xf]  ;;  %v11805_v58 = vor.u32 %v16797_v52, %v11804_v50  ;;  %6813 = vmatpush.bf16.msra.mxu0 %v11549_v57 }
  0x88   : > { %v16861_v54 = vld [vmem:[%s18787_s3 + $0x4dc] sm:$0xf0] }
  0x89   : > { %v12316_v55 = vld [vmem:[%s18787_s3 + $0x6c0] sm:$0xf]  ;;  %v12061_v59 = vor.u32 %v16861_v54, %v12060_v53  ;;  %6826 = vmatpush.bf16.msra.mxu1 %v11805_v58 }
  0x8a   : > { %v16925_v56 = vld [vmem:[%s18787_s3 + $0x6dc] sm:$0xf0] }
  0x8b   : > { %v11516_v60 = vld [vmem:[%s18787_s3 + $0x80] sm:$0xf]  ;;  %v12317_v63 = vor.u32 %v16925_v56, %v12316_v55  ;;  %6839 = vmatpush.bf16.msra.mxu2 %v12061_v59  ;;  %v602_v59 = vld [vmem:[%s18817_s21 + $0x8] sm:$0xff] }
  0x8c   : > { %v16725_v61 = vld [vmem:[%s18787_s3 + $0x9c] sm:$0xf0] }
  0x8d   : > { %v11772_v62 = vld [vmem:[%s18787_s3 + $0x280] sm:$0xf]  ;;  %v11517_v5 = vor.u32 %v16725_v61, %v11516_v60  ;;  %6852 = vmatpush.bf16.msra.mxu3 %v12317_v63 }
  0x8e   : > { %v16789_v0 = vld [vmem:[%s18787_s3 + $0x29c] sm:$0xf0] }
  0x8f   : > { %v12028_v1 = vld [vmem:[%s18787_s3 + $0x480] sm:$0xf]  ;;  %v11773_v6 = vor.u32 %v16789_v0, %v11772_v62  ;;  %6814 = vmatpush.bf16.msra.mxu0 %v11517_v5  ;;  %v1643_v0 = vunpack.c.l.b16 %v602_v59 }
  0x90   : > { %v16853_v2 = vld [vmem:[%s18787_s3 + $0x49c] sm:$0xf0] }
  0x91   : > { %v12284_v3 = vld [vmem:[%s18787_s3 + $0x680] sm:$0xf]  ;;  %v12029_v7 = vor.u32 %v16853_v2, %v12028_v1  ;;  %6827 = vmatpush.bf16.msra.mxu1 %v11773_v6  ;;  %v1644_v1 = vunpack.c.h.b16 %v602_v59  ;;  %v18910_v5 = vpack.c.b16 %v1643_v0, %v1643_v0 }
  0x92   : > { %v16917_v4 = vld [vmem:[%s18787_s3 + $0x69c] sm:$0xf0] }
  0x93   : > { %v11484_v8 = vld [vmem:[%s18787_s3 + $0x40] sm:$0xf]  ;;  %v12285_v11 = vor.u32 %v16917_v4, %v12284_v3  ;;  %6840 = vmatpush.bf16.msra.mxu2 %v12029_v7  ;;  %v18913_v7 = vpack.c.b16 %v1644_v1, %v1644_v1 }
  0x94   : > { %v16717_v9 = vld [vmem:[%s18787_s3 + $0x5c] sm:$0xf0] }
  0x95   : > { %v11740_v10 = vld [vmem:[%s18787_s3 + $0x240] sm:$0xf]  ;;  %v11485_v17 = vor.u32 %v16717_v9, %v11484_v8  ;;  %6853 = vmatpush.bf16.msra.mxu3 %v12285_v11 }
  0x96   : > { %v16781_v12 = vld [vmem:[%s18787_s3 + $0x25c] sm:$0xf0] }
  0x97   : > { %v11996_v13 = vld [vmem:[%s18787_s3 + $0x440] sm:$0xf]  ;;  %v11741_v20 = vor.u32 %v16781_v12, %v11740_v10  ;;  %6815 = vmatpush.bf16.msra.mxu0 %v11485_v17 }
  0x98   : > { %v16845_v14 = vld [vmem:[%s18787_s3 + $0x45c] sm:$0xf0] }
  0x99   : > { %v12252_v15 = vld [vmem:[%s18787_s3 + $0x640] sm:$0xf]  ;;  %v11997_v21 = vor.u32 %v16845_v14, %v11996_v13  ;;  %6828 = vmatpush.bf16.msra.mxu1 %v11741_v20 }
  0x9a   : > { %v16909_v16 = vld [vmem:[%s18787_s3 + $0x65c] sm:$0xf0] }
  0x9b   : > { %v11452_v18 = vld [vmem:[%s18787_s3] sm:$0xf]  ;;  %v12253_v25 = vor.u32 %v16909_v16, %v12252_v15  ;;  %6841 = vmatpush.bf16.msra.mxu2 %v11997_v21 }
  0x9c   : > { %v16709_v19 = vld [vmem:[%s18787_s3 + $0x1c] sm:$0xf0] }
  0x9d   : > { %v11708_v22 = vld [vmem:[%s18787_s3 + $0x200] sm:$0xf]  ;;  %v11453_v32 = vor.u32 %v16709_v19, %v11452_v18  ;;  %6854 = vmatpush.bf16.msra.mxu3 %v12253_v25 }
  0x9e   : > { %v16773_v23 = vld [vmem:[%s18787_s3 + $0x21c] sm:$0xf0] }
  0x9f   : > { %v11964_v24 = vld [vmem:[%s18787_s3 + $0x400] sm:$0xf]  ;;  %v11709_v36 = vor.u32 %v16773_v23, %v11708_v22  ;;  %6816 = vmatpush.bf16.msra.mxu0 %v11453_v32 }
  0xa0   : > { %v16837_v26 = vld [vmem:[%s18787_s3 + $0x41c] sm:$0xf0] }
  0xa1   : > { %v12220_v27 = vld [vmem:[%s18787_s3 + $0x600] sm:$0xf]  ;;  %v11965_v37 = vor.u32 %v16837_v26, %v11964_v24  ;;  %6829 = vmatpush.bf16.msra.mxu1 %v11709_v36 }
  0xa2   : > { %v16901_v28 = vld [vmem:[%s18787_s3 + $0x61c] sm:$0xf0] }
  0xa3   : > { %v12700_v29 = vld [vmem:[%s18787_s3 + $0x9c0] sm:$0xf]  ;;  %v12221_v40 = vor.u32 %v16901_v28, %v12220_v27  ;;  %6842 = vmatpush.bf16.msra.mxu2 %v11965_v37 }
  0xa4   : > { %v17021_v30 = vld [vmem:[%s18787_s3 + $0x9dc] sm:$0xf0] }
  0xa5   : > { %v12956_v31 = vld [vmem:[%s18787_s3 + $0xbc0] sm:$0xf]  ;;  %v12701_v41 = vor.u32 %v17021_v30, %v12700_v29  ;;  %6855 = vmatpush.bf16.msra.mxu3 %v12221_v40 }
  0xa6   : > { %v17085_v33 = vld [vmem:[%s18787_s3 + $0xbdc] sm:$0xf0]  ;;  %6843 = vmatmul.bf16.vlgmr.msra.gmra.mxu2 %v18910_v5 }
  0xa7   : > { %v13212_v34 = vld [vmem:[%s18787_s3 + $0xdc0] sm:$0xf]  ;;  %v12957_v42 = vor.u32 %v17085_v33, %v12956_v31  ;;  %6861 = vmatpush.bf16.msrb.mxu0 %v12701_v41 }
  0xa8   : > { %v17149_v35 = vld [vmem:[%s18787_s3 + $0xddc] sm:$0xf0]  ;;  %6856 = vmatmul.bf16.vlgmr.msra.gmra.mxu3 %v18913_v7 }
  0xa9   : > { %v13468_v38 = vld [vmem:[%s18787_s3 + $0xfc0] sm:$0xf]  ;;  %v13213_v43 = vor.u32 %v17149_v35, %v13212_v34  ;;  %6874 = vmatpush.bf16.msrb.mxu1 %v12957_v42 }
  0xaa   : > { %v17213_v39 = vld [vmem:[%s18787_s3 + $0xfdc] sm:$0xf0] }
  0xab   : > { %v12668_v44 = vld [vmem:[%s18787_s3 + $0x980] sm:$0xf]  ;;  %v13469_v47 = vor.u32 %v17213_v39, %v13468_v38  ;;  %6887 = vmatpush.bf16.msrb.mxu2 %v13213_v43 }
  0xac   : > { %v17013_v45 = vld [vmem:[%s18787_s3 + $0x99c] sm:$0xf0] }
  0xad   : > { %v12924_v46 = vld [vmem:[%s18787_s3 + $0xb80] sm:$0xf]  ;;  %v12669_v53 = vor.u32 %v17013_v45, %v12668_v44  ;;  %6900 = vmatpush.bf16.msrb.mxu3 %v13469_v47 }
  0xae   : > { %v17077_v48 = vld [vmem:[%s18787_s3 + $0xb9c] sm:$0xf0] }
  0xaf   : > { %v13180_v49 = vld [vmem:[%s18787_s3 + $0xd80] sm:$0xf]  ;;  %v12925_v55 = vor.u32 %v17077_v48, %v12924_v46  ;;  %6862 = vmatpush.bf16.msrb.mxu0 %v12669_v53 }
  0xb0   : > { %v17141_v50 = vld [vmem:[%s18787_s3 + $0xd9c] sm:$0xf0] }
  0xb1   : > { %v13436_v51 = vld [vmem:[%s18787_s3 + $0xf80] sm:$0xf]  ;;  %v13181_v56 = vor.u32 %v17141_v50, %v13180_v49  ;;  %6875 = vmatpush.bf16.msrb.mxu1 %v12925_v55 }
  0xb2   : > { %v17205_v52 = vld [vmem:[%s18787_s3 + $0xf9c] sm:$0xf0] }
  0xb3   : > { %v12636_v54 = vld [vmem:[%s18787_s3 + $0x940] sm:$0xf]  ;;  %v13437_v60 = vor.u32 %v17205_v52, %v13436_v51  ;;  %6888 = vmatpush.bf16.msrb.mxu2 %v13181_v56 }
  0xb4   : > { %v17005_v57 = vld [vmem:[%s18787_s3 + $0x95c] sm:$0xf0] }
  0xb5   : > { %v12892_v58 = vld [vmem:[%s18787_s3 + $0xb40] sm:$0xf]  ;;  %v12637_v4 = vor.u32 %v17005_v57, %v12636_v54  ;;  %6901 = vmatpush.bf16.msrb.mxu3 %v13437_v60 }
  0xb6   : > { %v17069_v61 = vld [vmem:[%s18787_s3 + $0xb5c] sm:$0xf0] }
  0xb7   : > { %v13148_v62 = vld [vmem:[%s18787_s3 + $0xd40] sm:$0xf]  ;;  %v12893_v8 = vor.u32 %v17069_v61, %v12892_v58  ;;  %6863 = vmatpush.bf16.msrb.mxu0 %v12637_v4  ;;  %v604_v4 = vld [vmem:[%s18817_s21 + $0x18] sm:$0xff] }
  0xb8   : > { %v17133_v63 = vld [vmem:[%s18787_s3 + $0xd5c] sm:$0xf0] }
  0xb9   : > { %v13404_v2 = vld [vmem:[%s18787_s3 + $0xf40] sm:$0xf]  ;;  %v13149_v9 = vor.u32 %v17133_v63, %v13148_v62  ;;  %6876 = vmatpush.bf16.msrb.mxu1 %v12893_v8 }
  0xba   : > { %v17197_v3 = vld [vmem:[%s18787_s3 + $0xf5c] sm:$0xf0] }
  0xbb   : > { %v601_v6 = vld [vmem:[%s18817_s21] sm:$0xff]  ;;  %v13405_v15 = vor.u32 %v17197_v3, %v13404_v2  ;;  %6889 = vmatpush.bf16.msrb.mxu2 %v13149_v9 }
  0xbc   : > { %v12604_v10 = vld [vmem:[%s18787_s3 + $0x900] sm:$0xf]  ;;  %v1641_v13 = vunpack.c.l.b16 %v601_v6  ;;  %v1642_v14 = vunpack.c.h.b16 %v601_v6 }
  0xbd   : > { %v16997_v11 = vld [vmem:[%s18787_s3 + $0x91c] sm:$0xf0]  ;;  %6902 = vmatpush.bf16.msrb.mxu3 %v13405_v15 }
  0xbe   : > { %v12860_v12 = vld [vmem:[%s18787_s3 + $0xb00] sm:$0xf]  ;;  %v18924_v21 = vpack.c.b16 %v1641_v13, %v1641_v13  ;;  %v18927_v22 = vpack.c.b16 %v1642_v14, %v1642_v14  ;;  %v12605_v23 = vor.u32 %v16997_v11, %v12604_v10  ;;  %v603_v10 = vld [vmem:[%s18817_s21 + $0x10] sm:$0xff] }
  0xbf   : > { %v17061_v16 = vld [vmem:[%s18787_s3 + $0xb1c] sm:$0xf0] }
  0xc0   : > { %v13116_v17 = vld [vmem:[%s18787_s3 + $0xd00] sm:$0xf]  ;;  %v12861_v24 = vor.u32 %v17061_v16, %v12860_v12  ;;  %6817 = vmatmul.bf16.vlgmr.msra.gmra.mxu0 %v18924_v21  ;;  %6830 = vmatmul.bf16.vlgmr.msra.gmra.mxu1 %v18927_v22 }
  0xc1   : > { %v17125_v18 = vld [vmem:[%s18787_s3 + $0xd1c] sm:$0xf0]  ;;  %6864 = vmatpush.bf16.msrb.mxu0 %v12605_v23 }
  0xc2   : > { %v13372_v19 = vld [vmem:[%s18787_s3 + $0xf00] sm:$0xf]  ;;  %v13117_v25 = vor.u32 %v17125_v18, %v13116_v17  ;;  %6877 = vmatpush.bf16.msrb.mxu1 %v12861_v24  ;;  %v1647_v18 = vunpack.c.l.b16 %v604_v4 }
  0xc3   : > { %v17189_v20 = vld [vmem:[%s18787_s3 + $0xf1c] sm:$0xf0] }
  0xc4   : > { %v12572_v26 = vld [vmem:[%s18787_s3 + $0x8c0] sm:$0xf]  ;;  %v13373_v29 = vor.u32 %v17189_v20, %v13372_v19  ;;  %6890 = vmatpush.bf16.msrb.mxu2 %v13117_v25  ;;  %v1645_v25 = vunpack.c.l.b16 %v603_v10 }
  0xc5   : > { %v16989_v27 = vld [vmem:[%s18787_s3 + $0x8dc] sm:$0xf0] }
  0xc6   : > { %v12828_v28 = vld [vmem:[%s18787_s3 + $0xac0] sm:$0xf]  ;;  %v12573_v35 = vor.u32 %v16989_v27, %v12572_v26  ;;  %6903 = vmatpush.bf16.msrb.mxu3 %v13373_v29  ;;  %v1648_v26 = vunpack.c.h.b16 %v604_v4  ;;  %v1646_v29 = vunpack.c.h.b16 %v603_v10 }
  0xc7   : > { %v17053_v30 = vld [vmem:[%s18787_s3 + $0xadc] sm:$0xf0] }
  0xc8   : > { %v13084_v31 = vld [vmem:[%s18787_s3 + $0xcc0] sm:$0xf]  ;;  %v12829_v36 = vor.u32 %v17053_v30, %v12828_v28  ;;  %6865 = vmatpush.bf16.msrb.mxu0 %v12573_v35 }
  0xc9   : > { %v17117_v32 = vld [vmem:[%s18787_s3 + $0xcdc] sm:$0xf0] }
  0xca   : > { %v13340_v33 = vld [vmem:[%s18787_s3 + $0xec0] sm:$0xf]  ;;  %v13085_v37 = vor.u32 %v17117_v32, %v13084_v31  ;;  %6878 = vmatpush.bf16.msrb.mxu1 %v12829_v36 }
  0xcb   : > { %v17181_v34 = vld [vmem:[%s18787_s3 + $0xedc] sm:$0xf0] }
  0xcc   : > { %v12540_v38 = vld [vmem:[%s18787_s3 + $0x880] sm:$0xf]  ;;  %v13341_v41 = vor.u32 %v17181_v34, %v13340_v33  ;;  %6891 = vmatpush.bf16.msrb.mxu2 %v13085_v37 }
  0xcd   : > { %v16981_v39 = vld [vmem:[%s18787_s3 + $0x89c] sm:$0xf0] }
  0xce   : > { %v12796_v40 = vld [vmem:[%s18787_s3 + $0xa80] sm:$0xf]  ;;  %v12541_v47 = vor.u32 %v16981_v39, %v12540_v38  ;;  %6904 = vmatpush.bf16.msrb.mxu3 %v13341_v41  ;;  %v18979_v39 = vpack.c.b16 %v1647_v18, %v1647_v18 }
  0xcf   : > { %v17045_v42 = vld [vmem:[%s18787_s3 + $0xa9c] sm:$0xf0] }
  0xd0   : > { %v13052_v43 = vld [vmem:[%s18787_s3 + $0xc80] sm:$0xf]  ;;  %v12797_v48 = vor.u32 %v17045_v42, %v12796_v40  ;;  %6866 = vmatpush.bf16.msrb.mxu0 %v12541_v47  ;;  %v18983_v42 = vpack.c.b16 %v1645_v25, %v1645_v25 }
  0xd1   : > { %v17109_v44 = vld [vmem:[%s18787_s3 + $0xc9c] sm:$0xf0] }
  0xd2   : > { %v13308_v45 = vld [vmem:[%s18787_s3 + $0xe80] sm:$0xf]  ;;  %v13053_v49 = vor.u32 %v17109_v44, %v13052_v43  ;;  %6879 = vmatpush.bf16.msrb.mxu1 %v12797_v48  ;;  %v18985_v43 = vpack.c.b16 %v1648_v26, %v1648_v26 }
  0xd3   : > { %v17173_v46 = vld [vmem:[%s18787_s3 + $0xe9c] sm:$0xf0] }
  0xd4   : > { %v12508_v50 = vld [vmem:[%s18787_s3 + $0x840] sm:$0xf]  ;;  %v13309_v53 = vor.u32 %v17173_v46, %v13308_v45  ;;  %6892 = vmatpush.bf16.msrb.mxu2 %v13053_v49  ;;  %v18987_v45 = vpack.c.b16 %v1646_v29, %v1646_v29 }
  0xd5   : > { %v16973_v51 = vld [vmem:[%s18787_s3 + $0x85c] sm:$0xf0] }
  0xd6   : > { %v12764_v52 = vld [vmem:[%s18787_s3 + $0xa40] sm:$0xf]  ;;  %v12509_v60 = vor.u32 %v16973_v51, %v12508_v50  ;;  %6905 = vmatpush.bf16.msrb.mxu3 %v13309_v53 }
  0xd7   : > { %v17037_v54 = vld [vmem:[%s18787_s3 + $0xa5c] sm:$0xf0] }
  0xd8   : > { %v13020_v55 = vld [vmem:[%s18787_s3 + $0xc40] sm:$0xf]  ;;  %v12765_v0 = vor.u32 %v17037_v54, %v12764_v52  ;;  %6867 = vmatpush.bf16.msrb.mxu0 %v12509_v60 }
  0xd9   : > { %v17101_v56 = vld [vmem:[%s18787_s3 + $0xc5c] sm:$0xf0] }
  0xda   : > { %v13276_v57 = vld [vmem:[%s18787_s3 + $0xe40] sm:$0xf]  ;;  %v13021_v1 = vor.u32 %v17101_v56, %v13020_v55  ;;  %6880 = vmatpush.bf16.msrb.mxu1 %v12765_v0 }
  0xdb   : > { %v17165_v58 = vld [vmem:[%s18787_s3 + $0xe5c] sm:$0xf0] }
  0xdc   : > { %v12476_v59 = vld [vmem:[%s18787_s3 + $0x800] sm:$0xf]  ;;  %v13277_v6 = vor.u32 %v17165_v58, %v13276_v57  ;;  %6893 = vmatpush.bf16.msrb.mxu2 %v13021_v1 }
  0xdd   : > { %v16965_v61 = vld [vmem:[%s18787_s3 + $0x81c] sm:$0xf0] }
  0xde   : > { %v12732_v62 = vld [vmem:[%s18787_s3 + $0xa00] sm:$0xf]  ;;  %v12477_v14 = vor.u32 %v16965_v61, %v12476_v59  ;;  %6906 = vmatpush.bf16.msrb.mxu3 %v13277_v6 }
  0xdf   : > { %v17029_v63 = vld [vmem:[%s18787_s3 + $0xa1c] sm:$0xf0] }
  0xe0   : > { %v12988_v2 = vld [vmem:[%s18787_s3 + $0xc00] sm:$0xf]  ;;  %v12733_v19 = vor.u32 %v17029_v63, %v12732_v62  ;;  %6868 = vmatpush.bf16.msrb.mxu0 %v12477_v14 }
  0xe1   : > { %v17093_v3 = vld [vmem:[%s18787_s3 + $0xc1c] sm:$0xf0] }
  0xe2   : > { %v13244_v8 = vld [vmem:[%s18787_s3 + $0xe00] sm:$0xf]  ;;  %v12989_v20 = vor.u32 %v17093_v3, %v12988_v2  ;;  %6881 = vmatpush.bf16.msrb.mxu1 %v12733_v19 }
  0xe3   : > { %v17157_v9 = vld [vmem:[%s18787_s3 + $0xe1c] sm:$0xf0]  ;;  %6869 = vmatmul.bf16.vlgmr.msrb.gmra.mxu0 %v18983_v42 }
  0xe4   : > { %v13724_v11 = vld [vmem:[%s18787_s3 + $0x11c0] sm:$0xf]  ;;  %v13245_v27 = vor.u32 %v17157_v9, %v13244_v8  ;;  %6894 = vmatpush.bf16.msrb.mxu2 %v12989_v20 }
  0xe5   : > { %v17277_v12 = vld [vmem:[%s18787_s3 + $0x11dc] sm:$0xf0]  ;;  %6882 = vmatmul.bf16.vlgmr.msrb.gmra.mxu1 %v18987_v45 }
  0xe6   : > { %v13980_v13 = vld [vmem:[%s18787_s3 + $0x13c0] sm:$0xf]  ;;  %v13725_v28 = vor.u32 %v17277_v12, %v13724_v11  ;;  %6907 = vmatpush.bf16.msrb.mxu3 %v13245_v27 }
  0xe7   : > { %v17341_v15 = vld [vmem:[%s18787_s3 + $0x13dc] sm:$0xf0]  ;;  %6895 = vmatmul.bf16.vlgmr.msrb.gmra.mxu2 %v18979_v39 }
  0xe8   : > { %v14236_v16 = vld [vmem:[%s18787_s3 + $0x15c0] sm:$0xf]  ;;  %v13981_v30 = vor.u32 %v17341_v15, %v13980_v13  ;;  %6913 = vmatpush.bf16.msra.mxu0 %v13725_v28 }
  0xe9   : > { %v17405_v17 = vld [vmem:[%s18787_s3 + $0x15dc] sm:$0xf0]  ;;  %6908 = vmatmul.bf16.vlgmr.msrb.gmra.mxu3 %v18985_v43 }
  0xea   : > { %v14492_v23 = vld [vmem:[%s18787_s3 + $0x17c0] sm:$0xf]  ;;  %v14237_v31 = vor.u32 %v17405_v17, %v14236_v16  ;;  %6926 = vmatpush.bf16.msra.mxu1 %v13981_v30 }
  0xeb   : > { %v17469_v24 = vld [vmem:[%s18787_s3 + $0x17dc] sm:$0xf0] }
  0xec   : > { %v13692_v32 = vld [vmem:[%s18787_s3 + $0x1180] sm:$0xf]  ;;  %v14493_v35 = vor.u32 %v17469_v24, %v14492_v23  ;;  %6939 = vmatpush.bf16.msra.mxu2 %v14237_v31 }
  0xed   : > { %v17269_v33 = vld [vmem:[%s18787_s3 + $0x119c] sm:$0xf0] }
  0xee   : > { %v13948_v34 = vld [vmem:[%s18787_s3 + $0x1380] sm:$0xf]  ;;  %v13693_v44 = vor.u32 %v17269_v33, %v13692_v32  ;;  %6952 = vmatpush.bf16.msra.mxu3 %v14493_v35 }
  0xef   : > { %v17333_v36 = vld [vmem:[%s18787_s3 + $0x139c] sm:$0xf0] }
  0xf0   : > { %v14204_v37 = vld [vmem:[%s18787_s3 + $0x1580] sm:$0xf]  ;;  %v13949_v46 = vor.u32 %v17333_v36, %v13948_v34  ;;  %6914 = vmatpush.bf16.msra.mxu0 %v13693_v44 }
  0xf1   : > { %v17397_v38 = vld [vmem:[%s18787_s3 + $0x159c] sm:$0xf0] }
  0xf2   : > { %v14460_v40 = vld [vmem:[%s18787_s3 + $0x1780] sm:$0xf]  ;;  %v14205_v47 = vor.u32 %v17397_v38, %v14204_v37  ;;  %6927 = vmatpush.bf16.msra.mxu1 %v13949_v46 }
  0xf3   : > { %v17461_v41 = vld [vmem:[%s18787_s3 + $0x179c] sm:$0xf0] }
  0xf4   : > { %v13660_v48 = vld [vmem:[%s18787_s3 + $0x1140] sm:$0xf]  ;;  %v14461_v51 = vor.u32 %v17461_v41, %v14460_v40  ;;  %6940 = vmatpush.bf16.msra.mxu2 %v14205_v47 }
  0xf5   : > { %v17261_v49 = vld [vmem:[%s18787_s3 + $0x115c] sm:$0xf0] }
  0xf6   : > { %v13916_v50 = vld [vmem:[%s18787_s3 + $0x1340] sm:$0xf]  ;;  %v13661_v57 = vor.u32 %v17261_v49, %v13660_v48  ;;  %6953 = vmatpush.bf16.msra.mxu3 %v14461_v51 }
  0xf7   : > { %v17325_v52 = vld [vmem:[%s18787_s3 + $0x135c] sm:$0xf0] }
  0xf8   : > { %v14172_v53 = vld [vmem:[%s18787_s3 + $0x1540] sm:$0xf]  ;;  %v13917_v58 = vor.u32 %v17325_v52, %v13916_v50  ;;  %6915 = vmatpush.bf16.msra.mxu0 %v13661_v57 }
  0xf9   : > { %v17389_v54 = vld [vmem:[%s18787_s3 + $0x155c] sm:$0xf0] }
  0xfa   : > { %v14428_v55 = vld [vmem:[%s18787_s3 + $0x1740] sm:$0xf]  ;;  %v14173_v59 = vor.u32 %v17389_v54, %v14172_v53  ;;  %6928 = vmatpush.bf16.msra.mxu1 %v13917_v58 }
  0xfb   : > { %v17453_v56 = vld [vmem:[%s18787_s3 + $0x175c] sm:$0xf0] }
  0xfc   : > { %v13628_v60 = vld [vmem:[%s18787_s3 + $0x1100] sm:$0xf]  ;;  %v14429_v63 = vor.u32 %v17453_v56, %v14428_v55  ;;  %6941 = vmatpush.bf16.msra.mxu2 %v14173_v59 }
  0xfd   : > { %v17253_v61 = vld [vmem:[%s18787_s3 + $0x111c] sm:$0xf0] }
  0xfe   : > { %v13884_v62 = vld [vmem:[%s18787_s3 + $0x1300] sm:$0xf]  ;;  %v13629_v6 = vor.u32 %v17253_v61, %v13628_v60  ;;  %6954 = vmatpush.bf16.msra.mxu3 %v14429_v63 }
  0xff   : > { %v17317_v0 = vld [vmem:[%s18787_s3 + $0x131c] sm:$0xf0] }
 0x100   : > { %v14140_v1 = vld [vmem:[%s18787_s3 + $0x1500] sm:$0xf]  ;;  %v13885_v8 = vor.u32 %v17317_v0, %v13884_v62  ;;  %6916 = vmatpush.bf16.msra.mxu0 %v13629_v6  ;;  %v606_v62 = vld [vmem:[%s18817_s21 + $0x28] sm:$0xff] }
 0x101   : > { %v17381_v2 = vld [vmem:[%s18787_s3 + $0x151c] sm:$0xf0] }
 0x102   : > { %v14396_v3 = vld [vmem:[%s18787_s3 + $0x1700] sm:$0xf]  ;;  %v14141_v9 = vor.u32 %v17381_v2, %v14140_v1  ;;  %6929 = vmatpush.bf16.msra.mxu1 %v13885_v8 }
 0x103   : > { %v17445_v4 = vld [vmem:[%s18787_s3 + $0x171c] sm:$0xf0] }
 0x104   : > { %v13596_v10 = vld [vmem:[%s18787_s3 + $0x10c0] sm:$0xf]  ;;  %v14397_v13 = vor.u32 %v17445_v4, %v14396_v3  ;;  %6942 = vmatpush.bf16.msra.mxu2 %v14141_v9 }
 0x105   : > { %v17245_v11 = vld [vmem:[%s18787_s3 + $0x10dc] sm:$0xf0] }
 0x106   : > { %v13852_v12 = vld [vmem:[%s18787_s3 + $0x12c0] sm:$0xf]  ;;  %v13597_v19 = vor.u32 %v17245_v11, %v13596_v10  ;;  %6955 = vmatpush.bf16.msra.mxu3 %v14397_v13  ;;  %v1651_v13 = vunpack.c.l.b16 %v606_v62 }
 0x107   : > { %v17309_v14 = vld [vmem:[%s18787_s3 + $0x12dc] sm:$0xf0] }
 0x108   : > { %v14108_v15 = vld [vmem:[%s18787_s3 + $0x14c0] sm:$0xf]  ;;  %v13853_v20 = vor.u32 %v17309_v14, %v13852_v12  ;;  %6917 = vmatpush.bf16.msra.mxu0 %v13597_v19 }
 0x109   : > { %v17373_v16 = vld [vmem:[%s18787_s3 + $0x14dc] sm:$0xf0] }
 0x10a   : > { %v14364_v17 = vld [vmem:[%s18787_s3 + $0x16c0] sm:$0xf]  ;;  %v14109_v23 = vor.u32 %v17373_v16, %v14108_v15  ;;  %6930 = vmatpush.bf16.msra.mxu1 %v13853_v20 }
 0x10b   : > { %v17437_v18 = vld [vmem:[%s18787_s3 + $0x16dc] sm:$0xf0] }
 0x10c   : > { %v13564_v24 = vld [vmem:[%s18787_s3 + $0x1080] sm:$0xf]  ;;  %v14365_v27 = vor.u32 %v17437_v18, %v14364_v17  ;;  %6943 = vmatpush.bf16.msra.mxu2 %v14109_v23  ;;  %v1652_v17 = vunpack.c.h.b16 %v606_v62 }
 0x10d   : > { %v17237_v25 = vld [vmem:[%s18787_s3 + $0x109c] sm:$0xf0] }
 0x10e   : > { %v13820_v26 = vld [vmem:[%s18787_s3 + $0x1280] sm:$0xf]  ;;  %v13565_v33 = vor.u32 %v17237_v25, %v13564_v24  ;;  %6956 = vmatpush.bf16.msra.mxu3 %v14365_v27 }
 0x10f   : > { %v17301_v28 = vld [vmem:[%s18787_s3 + $0x129c] sm:$0xf0] }
 0x110   : > { %v14076_v29 = vld [vmem:[%s18787_s3 + $0x1480] sm:$0xf]  ;;  %v13821_v34 = vor.u32 %v17301_v28, %v13820_v26  ;;  %6918 = vmatpush.bf16.msra.mxu0 %v13565_v33 }
 0x111   : > { %v17365_v30 = vld [vmem:[%s18787_s3 + $0x149c] sm:$0xf0] }
 0x112   : > { %v14332_v31 = vld [vmem:[%s18787_s3 + $0x1680] sm:$0xf]  ;;  %v14077_v35 = vor.u32 %v17365_v30, %v14076_v29  ;;  %6931 = vmatpush.bf16.msra.mxu1 %v13821_v34  ;;  %v19059_v30 = vpack.c.b16 %v1651_v13, %v1651_v13  ;;  %v19065_v34 = vpack.c.b16 %v1652_v17, %v1652_v17 }
 0x113   : > { %v17429_v32 = vld [vmem:[%s18787_s3 + $0x169c] sm:$0xf0] }
 0x114   : > { %v13532_v36 = vld [vmem:[%s18787_s3 + $0x1040] sm:$0xf]  ;;  %v14333_v40 = vor.u32 %v17429_v32, %v14332_v31  ;;  %6944 = vmatpush.bf16.msra.mxu2 %v14077_v35 }
 0x115   : > { %v17229_v37 = vld [vmem:[%s18787_s3 + $0x105c] sm:$0xf0] }
 0x116   : > { %v13788_v38 = vld [vmem:[%s18787_s3 + $0x1240] sm:$0xf]  ;;  %v13533_v50 = vor.u32 %v17229_v37, %v13532_v36  ;;  %6957 = vmatpush.bf16.msra.mxu3 %v14333_v40 }
 0x117   : > { %v17293_v41 = vld [vmem:[%s18787_s3 + $0x125c] sm:$0xf0] }
 0x118   : > { %v14044_v44 = vld [vmem:[%s18787_s3 + $0x1440] sm:$0xf]  ;;  %v13789_v54 = vor.u32 %v17293_v41, %v13788_v38  ;;  %6919 = vmatpush.bf16.msra.mxu0 %v13533_v50 }
 0x119   : > { %v17357_v46 = vld [vmem:[%s18787_s3 + $0x145c] sm:$0xf0] }
 0x11a   : > { %v14300_v47 = vld [vmem:[%s18787_s3 + $0x1640] sm:$0xf]  ;;  %v14045_v55 = vor.u32 %v17357_v46, %v14044_v44  ;;  %6932 = vmatpush.bf16.msra.mxu1 %v13789_v54 }
 0x11b   : > { %v17421_v48 = vld [vmem:[%s18787_s3 + $0x165c] sm:$0xf0] }
 0x11c   : > { %v13500_v49 = vld [vmem:[%s18787_s3 + $0x1000] sm:$0xf]  ;;  %v14301_v59 = vor.u32 %v17421_v48, %v14300_v47  ;;  %6945 = vmatpush.bf16.msra.mxu2 %v14045_v55 }
 0x11d   : > { %v17221_v51 = vld [vmem:[%s18787_s3 + $0x101c] sm:$0xf0] }
 0x11e   : > { %v13756_v52 = vld [vmem:[%s18787_s3 + $0x1200] sm:$0xf]  ;;  %v13501_v2 = vor.u32 %v17221_v51, %v13500_v49  ;;  %6958 = vmatpush.bf16.msra.mxu3 %v14301_v59 }
 0x11f   : > { %v17285_v53 = vld [vmem:[%s18787_s3 + $0x121c] sm:$0xf0] }
 0x120   : > { %v14012_v56 = vld [vmem:[%s18787_s3 + $0x1400] sm:$0xf]  ;;  %v13757_v9 = vor.u32 %v17285_v53, %v13756_v52  ;;  %6920 = vmatpush.bf16.msra.mxu0 %v13501_v2 }
 0x121   : > { %v17349_v57 = vld [vmem:[%s18787_s3 + $0x141c] sm:$0xf0] }
 0x122   : > { %v605_v58 = vld [vmem:[%s18817_s21 + $0x20] sm:$0xff]  ;;  %v14013_v10 = vor.u32 %v17349_v57, %v14012_v56  ;;  %6933 = vmatpush.bf16.msra.mxu1 %v13757_v9 }
 0x123   : > { %v14268_v60 = vld [vmem:[%s18787_s3 + $0x1600] sm:$0xf]  ;;  %v1649_v8 = vunpack.c.l.b16 %v605_v58  ;;  %v1650_v14 = vunpack.c.h.b16 %v605_v58 }
 0x124   : > { %v17413_v61 = vld [vmem:[%s18787_s3 + $0x161c] sm:$0xf0]  ;;  %6946 = vmatpush.bf16.msra.mxu2 %v14013_v10 }
 0x125   : > { %v14748_v63 = vld [vmem:[%s18787_s3 + $0x19c0] sm:$0xf]  ;;  %v14269_v15 = vor.u32 %v17413_v61, %v14268_v60  ;;  %v19054_v26 = vpack.c.b16 %v1649_v8, %v1649_v8  ;;  %v19061_v31 = vpack.c.b16 %v1650_v14, %v1650_v14 }
 0x126   : > { %v17533_v0 = vld [vmem:[%s18787_s3 + $0x19dc] sm:$0xf0] }
 0x127   : > { %v15004_v1 = vld [vmem:[%s18787_s3 + $0x1bc0] sm:$0xf]  ;;  %v14749_v16 = vor.u32 %v17533_v0, %v14748_v63  ;;  %6959 = vmatpush.bf16.msra.mxu3 %v14269_v15  ;;  %6921 = vmatmul.bf16.vlgmr.msra.gmra.mxu0 %v19054_v26 }
 0x128   : > { %v17597_v3 = vld [vmem:[%s18787_s3 + $0x1bdc] sm:$0xf0]  ;;  %6947 = vmatmul.bf16.vlgmr.msra.gmra.mxu2 %v19059_v30  ;;  %6934 = vmatmul.bf16.vlgmr.msra.gmra.mxu1 %v19061_v31 }
 0x129   : > { %v15260_v4 = vld [vmem:[%s18787_s3 + $0x1dc0] sm:$0xf]  ;;  %v15005_v18 = vor.u32 %v17597_v3, %v15004_v1  ;;  %6965 = vmatpush.bf16.msrb.mxu0 %v14749_v16 }
 0x12a   : > { %v17661_v6 = vld [vmem:[%s18787_s3 + $0x1ddc] sm:$0xf0]  ;;  %6960 = vmatmul.bf16.vlgmr.msra.gmra.mxu3 %v19065_v34 }
 0x12b   : > { %v15516_v11 = vld [vmem:[%s18787_s3 + $0x1fc0] sm:$0xf]  ;;  %v15261_v19 = vor.u32 %v17661_v6, %v15260_v4  ;;  %6978 = vmatpush.bf16.msrb.mxu1 %v15005_v18 }
 0x12c   : > { %v17725_v12 = vld [vmem:[%s18787_s3 + $0x1fdc] sm:$0xf0] }
 0x12d   : > { %v14716_v20 = vld [vmem:[%s18787_s3 + $0x1980] sm:$0xf]  ;;  %v15517_v25 = vor.u32 %v17725_v12, %v15516_v11  ;;  %6991 = vmatpush.bf16.msrb.mxu2 %v15261_v19 }
 0x12e   : > { %v17525_v23 = vld [vmem:[%s18787_s3 + $0x199c] sm:$0xf0] }
 0x12f   : > { %v14972_v24 = vld [vmem:[%s18787_s3 + $0x1b80] sm:$0xf]  ;;  %v14717_v35 = vor.u32 %v17525_v23, %v14716_v20  ;;  %7004 = vmatpush.bf16.msrb.mxu3 %v15517_v25 }
 0x130   : > { %v17589_v27 = vld [vmem:[%s18787_s3 + $0x1b9c] sm:$0xf0] }
 0x131   : > { %v15228_v28 = vld [vmem:[%s18787_s3 + $0x1d80] sm:$0xf]  ;;  %v14973_v36 = vor.u32 %v17589_v27, %v14972_v24  ;;  %6966 = vmatpush.bf16.msrb.mxu0 %v14717_v35 }
 0x132   : > { %v17653_v29 = vld [vmem:[%s18787_s3 + $0x1d9c] sm:$0xf0] }
 0x133   : > { %v15484_v32 = vld [vmem:[%s18787_s3 + $0x1f80] sm:$0xf]  ;;  %v15229_v37 = vor.u32 %v17653_v29, %v15228_v28  ;;  %6979 = vmatpush.bf16.msrb.mxu1 %v14973_v36 }
 0x134   : > { %v17717_v33 = vld [vmem:[%s18787_s3 + $0x1f9c] sm:$0xf0] }
 0x135   : > { %v14684_v38 = vld [vmem:[%s18787_s3 + $0x1940] sm:$0xf]  ;;  %v15485_v44 = vor.u32 %v17717_v33, %v15484_v32  ;;  %6992 = vmatpush.bf16.msrb.mxu2 %v15229_v37 }
 0x136   : > { %v17517_v40 = vld [vmem:[%s18787_s3 + $0x195c] sm:$0xf0] }
 0x137   : > { %v14940_v41 = vld [vmem:[%s18787_s3 + $0x1b40] sm:$0xf]  ;;  %v14685_v51 = vor.u32 %v17517_v40, %v14684_v38  ;;  %7005 = vmatpush.bf16.msrb.mxu3 %v15485_v44 }
 0x138   : > { %v17581_v46 = vld [vmem:[%s18787_s3 + $0x1b5c] sm:$0xf0] }
 0x139   : > { %v15196_v47 = vld [vmem:[%s18787_s3 + $0x1d40] sm:$0xf]  ;;  %v14941_v52 = vor.u32 %v17581_v46, %v14940_v41  ;;  %6967 = vmatpush.bf16.msrb.mxu0 %v14685_v51 }
 0x13a   : > { %v17645_v48 = vld [vmem:[%s18787_s3 + $0x1d5c] sm:$0xf0] }
 0x13b   : > { %v15452_v49 = vld [vmem:[%s18787_s3 + $0x1f40] sm:$0xf]  ;;  %v15197_v53 = vor.u32 %v17645_v48, %v15196_v47  ;;  %6980 = vmatpush.bf16.msrb.mxu1 %v14941_v52 }
 0x13c   : > { %v17709_v50 = vld [vmem:[%s18787_s3 + $0x1f5c] sm:$0xf0] }
 0x13d   : > { %v14652_v54 = vld [vmem:[%s18787_s3 + $0x1900] sm:$0xf]  ;;  %v15453_v57 = vor.u32 %v17709_v50, %v15452_v49  ;;  %6993 = vmatpush.bf16.msrb.mxu2 %v15197_v53 }
 0x13e   : > { %v17509_v55 = vld [vmem:[%s18787_s3 + $0x191c] sm:$0xf0] }
 0x13f   : > { %v14908_v56 = vld [vmem:[%s18787_s3 + $0x1b00] sm:$0xf]  ;;  %v14653_v63 = vor.u32 %v17509_v55, %v14652_v54  ;;  %7006 = vmatpush.bf16.msrb.mxu3 %v15453_v57 }
 0x140   : > { %v17573_v58 = vld [vmem:[%s18787_s3 + $0x1b1c] sm:$0xf0] }
 0x141   : > { %v15164_v59 = vld [vmem:[%s18787_s3 + $0x1d00] sm:$0xf]  ;;  %v14909_v0 = vor.u32 %v17573_v58, %v14908_v56  ;;  %6968 = vmatpush.bf16.msrb.mxu0 %v14653_v63  ;;  %v607_v56 = vld [vmem:[%s18817_s21 + $0x30] sm:$0xff]  ;;  %v16825_v63 = vld [vmem:[%s18787_s3 + $0x3c4] sm:$0xf] }
 0x142   : > { %v17637_v60 = vld [vmem:[%s18787_s3 + $0x1d1c] sm:$0xf0] }
 0x143   : > { %v15420_v61 = vld [vmem:[%s18787_s3 + $0x1f00] sm:$0xf]  ;;  %v15165_v1 = vor.u32 %v17637_v60, %v15164_v59  ;;  %6981 = vmatpush.bf16.msrb.mxu1 %v14909_v0  ;;  %v608_v60 = vld [vmem:[%s18817_s21 + $0x38] sm:$0xff] }
 0x144   : > { %v17701_v62 = vld [vmem:[%s18787_s3 + $0x1f1c] sm:$0xf0] }
 0x145   : > { %v14620_v2 = vld [vmem:[%s18787_s3 + $0x18c0] sm:$0xf]  ;;  %v15421_v6 = vor.u32 %v17701_v62, %v15420_v61  ;;  %6994 = vmatpush.bf16.msrb.mxu2 %v15165_v1  ;;  %v16761_v61 = vld [vmem:[%s18787_s3 + $0x1c4] sm:$0xf] }
 0x146   : > { %v17501_v3 = vld [vmem:[%s18787_s3 + $0x18dc] sm:$0xf0]  ;;  %v11678_v62 = vld [vmem:[%s18787_s3 + $0x1e0] sm:$0xf0] }
 0x147   : > { %v14876_v4 = vld [vmem:[%s18787_s3 + $0x1ac0] sm:$0xf]  ;;  %v14621_v13 = vor.u32 %v17501_v3, %v14620_v2  ;;  %7007 = vmatpush.bf16.msrb.mxu3 %v15421_v6  ;;  %v11934_v1 = vld [vmem:[%s18787_s3 + $0x3e0] sm:$0xf0] }
 0x148   : > { %v17565_v8 = vld [vmem:[%s18787_s3 + $0x1adc] sm:$0xf0]  ;;  %v16889_v2 = vld [vmem:[%s18787_s3 + $0x5c4] sm:$0xf] }
 0x149   : > { %v15132_v9 = vld [vmem:[%s18787_s3 + $0x1cc0] sm:$0xf]  ;;  %v14877_v14 = vor.u32 %v17565_v8, %v14876_v4  ;;  %6969 = vmatpush.bf16.msrb.mxu0 %v14621_v13  ;;  %v12190_v3 = vld [vmem:[%s18787_s3 + $0x5e0] sm:$0xf0]  ;;  %v1653_v4 = vunpack.c.l.b16 %v607_v56 }
 0x14a   : > { %v17629_v10 = vld [vmem:[%s18787_s3 + $0x1cdc] sm:$0xf0] }
 0x14b   : > { %v15388_v11 = vld [vmem:[%s18787_s3 + $0x1ec0] sm:$0xf]  ;;  %v15133_v15 = vor.u32 %v17629_v10, %v15132_v9  ;;  %6982 = vmatpush.bf16.msrb.mxu1 %v14877_v14  ;;  %v16953_v9 = vld [vmem:[%s18787_s3 + $0x7c4] sm:$0xf]  ;;  %v11681_v14 = vor.u32 %v16761_v61, %v11678_v62 }
 0x14c   : > { %v17693_v12 = vld [vmem:[%s18787_s3 + $0x1edc] sm:$0xf0]  ;;  %v12446_v10 = vld [vmem:[%s18787_s3 + $0x7e0] sm:$0xf0] }
 0x14d   : > { %v14588_v16 = vld [vmem:[%s18787_s3 + $0x1880] sm:$0xf]  ;;  %v15389_v19 = vor.u32 %v17693_v12, %v15388_v11  ;;  %6995 = vmatpush.bf16.msrb.mxu2 %v15133_v15  ;;  %v1655_v11 = vunpack.c.l.b16 %v608_v60  ;;  %v1654_v12 = vunpack.c.h.b16 %v607_v56  ;;  %v1656_v15 = vunpack.c.h.b16 %v608_v60  ;;  %v16737_v56 = vld [vmem:[%s18787_s3 + $0x104] sm:$0xf] }
 0x14e   : > { %v17493_v17 = vld [vmem:[%s18787_s3 + $0x189c] sm:$0xf0]  ;;  %v11838_v60 = vld [vmem:[%s18787_s3 + $0x320] sm:$0xf0] }
 0x14f   : > { %v14844_v18 = vld [vmem:[%s18787_s3 + $0x1a80] sm:$0xf]  ;;  %v14589_v28 = vor.u32 %v17493_v17, %v14588_v16  ;;  %7008 = vmatpush.bf16.msrb.mxu3 %v15389_v19  ;;  %v11937_v16 = vor.u32 %v16825_v63, %v11934_v1  ;;  %v12193_v17 = vor.u32 %v16889_v2, %v12190_v3  ;;  %v11646_v19 = vld [vmem:[%s18787_s3 + $0x1a0] sm:$0xf0] }
 0x150   : > { %v17557_v20 = vld [vmem:[%s18787_s3 + $0x1a9c] sm:$0xf0]  ;;  %v16865_v61 = vld [vmem:[%s18787_s3 + $0x504] sm:$0xf] }
 0x151   : > { %v15100_v23 = vld [vmem:[%s18787_s3 + $0x1c80] sm:$0xf]  ;;  %v14845_v29 = vor.u32 %v17557_v20, %v14844_v18  ;;  %6970 = vmatpush.bf16.msrb.mxu0 %v14589_v28  ;;  %v16753_v18 = vld [vmem:[%s18787_s3 + $0x184] sm:$0xf] }
 0x152   : > { %v17621_v24 = vld [vmem:[%s18787_s3 + $0x1c9c] sm:$0xf0]  ;;  %v16817_v20 = vld [vmem:[%s18787_s3 + $0x384] sm:$0xf] }
 0x153   : > { %v15356_v25 = vld [vmem:[%s18787_s3 + $0x1e80] sm:$0xf]  ;;  %v15101_v32 = vor.u32 %v17621_v24, %v15100_v23  ;;  %6983 = vmatpush.bf16.msrb.mxu1 %v14845_v29  ;;  %v12449_v23 = vor.u32 %v16953_v9, %v12446_v10  ;;  %v19132_v24 = vpack.c.b16 %v1653_v4, %v1653_v4  ;;  %v12158_v28 = vld [vmem:[%s18787_s3 + $0x5a0] sm:$0xf0]  ;;  %v19137_v29 = vpack.c.b16 %v1655_v11, %v1655_v11 }
 0x154   : > { %v17685_v27 = vld [vmem:[%s18787_s3 + $0x1e9c] sm:$0xf0]  ;;  %v12094_v62 = vld [vmem:[%s18787_s3 + $0x520] sm:$0xf0] }
 0x155   : > { %v14556_v33 = vld [vmem:[%s18787_s3 + $0x1840] sm:$0xf]  ;;  %v15357_v37 = vor.u32 %v17685_v27, %v15356_v25  ;;  %6996 = vmatpush.bf16.msrb.mxu2 %v15101_v32  ;;  %v11902_v25 = vld [vmem:[%s18787_s3 + $0x3a0] sm:$0xf0]  ;;  %v19139_v32 = vpack.c.b16 %v1654_v12, %v1654_v12  ;;  %v12097_v3 = vor.u32 %v16865_v61, %v12094_v62 }
 0x156   : > { %v17485_v35 = vld [vmem:[%s18787_s3 + $0x185c] sm:$0xf0]  ;;  %v16881_v27 = vld [vmem:[%s18787_s3 + $0x584] sm:$0xf] }
 0x157   : > { %v14812_v36 = vld [vmem:[%s18787_s3 + $0x1a40] sm:$0xf]  ;;  %v14557_v48 = vor.u32 %v17485_v35, %v14556_v33  ;;  %7009 = vmatpush.bf16.msrb.mxu3 %v15357_v37  ;;  %v16945_v33 = vld [vmem:[%s18787_s3 + $0x784] sm:$0xf]  ;;  %v11649_v37 = vor.u32 %v16753_v18, %v11646_v19 }
 0x158   : > { %v17549_v38 = vld [vmem:[%s18787_s3 + $0x1a5c] sm:$0xf0]  ;;  %v12414_v35 = vld [vmem:[%s18787_s3 + $0x7a0] sm:$0xf0] }
 0x159   : > { %v15068_v40 = vld [vmem:[%s18787_s3 + $0x1c40] sm:$0xf]  ;;  %v14813_v52 = vor.u32 %v17549_v38, %v14812_v36  ;;  %6971 = vmatpush.bf16.msrb.mxu0 %v14557_v48  ;;  %v19143_v36 = vpack.c.b16 %v1656_v15, %v1656_v15  ;;  %v11905_v38 = vor.u32 %v16817_v20, %v11902_v25  ;;  %v11870_v48 = vld [vmem:[%s18787_s3 + $0x360] sm:$0xf0] }
 0x15a   : > { %v17613_v41 = vld [vmem:[%s18787_s3 + $0x1c5c] sm:$0xf0]  ;;  %v16929_v63 = vld [vmem:[%s18787_s3 + $0x704] sm:$0xf] }
 0x15b   : > { %v15324_v44 = vld [vmem:[%s18787_s3 + $0x1e40] sm:$0xf]  ;;  %v15069_v53 = vor.u32 %v17613_v41, %v15068_v40  ;;  %6984 = vmatpush.bf16.msrb.mxu1 %v14813_v52  ;;  %v12161_v40 = vor.u32 %v16881_v27, %v12158_v28  ;;  %v16745_v41 = vld [vmem:[%s18787_s3 + $0x144] sm:$0xf] }
 0x15c   : > { %v17677_v46 = vld [vmem:[%s18787_s3 + $0x1e5c] sm:$0xf0]  ;;  %v12382_v52 = vld [vmem:[%s18787_s3 + $0x760] sm:$0xf0] }
 0x15d   : > { %v14524_v47 = vld [vmem:[%s18787_s3 + $0x1800] sm:$0xf]  ;;  %v15325_v57 = vor.u32 %v17677_v46, %v15324_v44  ;;  %6997 = vmatpush.bf16.msrb.mxu2 %v15069_v53  ;;  %v11614_v44 = vld [vmem:[%s18787_s3 + $0x160] sm:$0xf0] }
 0x15e   : > { %v17477_v49 = vld [vmem:[%s18787_s3 + $0x181c] sm:$0xf0]  ;;  %v16809_v46 = vld [vmem:[%s18787_s3 + $0x344] sm:$0xf]  ;;  %v11617_v53 = vor.u32 %v16745_v41, %v11614_v44 }
 0x15f   : > { %v14780_v50 = vld [vmem:[%s18787_s3 + $0x1a00] sm:$0xf]  ;;  %v14525_v0 = vor.u32 %v17477_v49, %v14524_v47  ;;  %7010 = vmatpush.bf16.msrb.mxu3 %v15325_v57  ;;  %v12417_v47 = vor.u32 %v16945_v33, %v12414_v35  ;;  %v16873_v49 = vld [vmem:[%s18787_s3 + $0x544] sm:$0xf] }
 0x160   : > { %v17541_v51 = vld [vmem:[%s18787_s3 + $0x1a1c] sm:$0xf0]  ;;  %v11582_v57 = vld [vmem:[%s18787_s3 + $0x120] sm:$0xf0] }
 0x161   : > { %v15036_v54 = vld [vmem:[%s18787_s3 + $0x1c00] sm:$0xf]  ;;  %v14781_v6 = vor.u32 %v17541_v51, %v14780_v50  ;;  %6972 = vmatpush.bf16.msrb.mxu0 %v14525_v0  ;;  %v12126_v50 = vld [vmem:[%s18787_s3 + $0x560] sm:$0xf0]  ;;  %v11585_v1 = vor.u32 %v16737_v56, %v11582_v57 }
 0x162   : > { %v17605_v55 = vld [vmem:[%s18787_s3 + $0x1c1c] sm:$0xf0]  ;;  %v16937_v51 = vld [vmem:[%s18787_s3 + $0x744] sm:$0xf] }
 0x163   : > { %v15292_v58 = vld [vmem:[%s18787_s3 + $0x1e00] sm:$0xf]  ;;  %v15037_v8 = vor.u32 %v17605_v55, %v15036_v54  ;;  %6985 = vmatpush.bf16.msrb.mxu1 %v14781_v6  ;;  %v11873_v54 = vor.u32 %v16809_v46, %v11870_v48  ;;  %v12129_v55 = vor.u32 %v16873_v49, %v12126_v50  ;;  %v12350_v0 = vld [vmem:[%s18787_s3 + $0x720] sm:$0xf0] }
 0x164   : > { %v17669_v59 = vld [vmem:[%s18787_s3 + $0x1e1c] sm:$0xf0]  ;;  %6973 = vmatmul.bf16.vlgmr.msrb.gmra.mxu0 %v19132_v24  ;;  %v16729_v4 = vld [vmem:[%s18787_s3 + $0xc4] sm:$0xf]  ;;  %v12353_v9 = vor.u32 %v16929_v63, %v12350_v0 }
 0x165   : > { %v15293_v13 = vor.u32 %v17669_v59, %v15292_v58  ;;  %6998 = vmatpush.bf16.msrb.mxu2 %v15037_v8  ;;  %7017 = vmatpush.bf16.msra.mxu0 %v11681_v14  ;;  %v16801_v58 = vld [vmem:[%s18787_s3 + $0x304] sm:$0xf]  ;;  %v12385_v59 = vor.u32 %v16937_v51, %v12382_v52 }
 0x166   : > { %6986 = vmatmul.bf16.vlgmr.msrb.gmra.mxu1 %v19139_v32  ;;  %v11841_v2 = vor.u32 %v16801_v58, %v11838_v60  ;;  %v11550_v6 = vld [vmem:[%s18787_s3 + $0xe0] sm:$0xf0] }
 0x167   : > { %7011 = vmatpush.bf16.msrb.mxu3 %v15293_v13  ;;  %7030 = vmatpush.bf16.msra.mxu1 %v11937_v16  ;;  %v16793_v8 = vld [vmem:[%s18787_s3 + $0x2c4] sm:$0xf]  ;;  %v11553_v15 = vor.u32 %v16729_v4, %v11550_v6 }
 0x168   : > { %6999 = vmatmul.bf16.vlgmr.msrb.gmra.mxu2 %v19137_v29  ;;  %v11806_v10 = vld [vmem:[%s18787_s3 + $0x2e0] sm:$0xf0] }
 0x169   : > { %7043 = vmatpush.bf16.msra.mxu2 %v12193_v17  ;;  %7018 = vmatpush.bf16.msra.mxu0 %v11649_v37  ;;  %v16857_v11 = vld [vmem:[%s18787_s3 + $0x4c4] sm:$0xf]  ;;  %v11809_v16 = vor.u32 %v16793_v8, %v11806_v10 }
 0x16a   : > { %7012 = vmatmul.bf16.vlgmr.msrb.gmra.mxu3 %v19143_v36  ;;  %v12062_v12 = vld [vmem:[%s18787_s3 + $0x4e0] sm:$0xf0] }
 0x16b   : > { %7056 = vmatpush.bf16.msra.mxu3 %v12449_v23  ;;  %7031 = vmatpush.bf16.msra.mxu1 %v11905_v38  ;;  %v16921_v13 = vld [vmem:[%s18787_s3 + $0x6c4] sm:$0xf]  ;;  %v12065_v17 = vor.u32 %v16857_v11, %v12062_v12 }
 0x16c   : > { %v12318_v14 = vld [vmem:[%s18787_s3 + $0x6e0] sm:$0xf0] }
 0x16d   : > { %7044 = vmatpush.bf16.msra.mxu2 %v12161_v40  ;;  %7019 = vmatpush.bf16.msra.mxu0 %v11617_v53  ;;  %v16721_v18 = vld [vmem:[%s18787_s3 + $0x84] sm:$0xf]  ;;  %v12321_v23 = vor.u32 %v16921_v13, %v12318_v14 }
 0x16e   : > { %v11518_v19 = vld [vmem:[%s18787_s3 + $0xa0] sm:$0xf0] }
 0x16f   : > { %7057 = vmatpush.bf16.msra.mxu3 %v12417_v47  ;;  %7032 = vmatpush.bf16.msra.mxu1 %v11873_v54  ;;  %v16785_v20 = vld [vmem:[%s18787_s3 + $0x284] sm:$0xf]  ;;  %v11521_v37 = vor.u32 %v16721_v18, %v11518_v19 }
 0x170   : > { %v11774_v25 = vld [vmem:[%s18787_s3 + $0x2a0] sm:$0xf0] }
 0x171   : > { %7045 = vmatpush.bf16.msra.mxu2 %v12129_v55  ;;  %7020 = vmatpush.bf16.msra.mxu0 %v11585_v1  ;;  %v16849_v27 = vld [vmem:[%s18787_s3 + $0x484] sm:$0xf]  ;;  %v11777_v38 = vor.u32 %v16785_v20, %v11774_v25 }
 0x172   : > { %v12030_v28 = vld [vmem:[%s18787_s3 + $0x4a0] sm:$0xf0] }
 0x173   : > { %7058 = vmatpush.bf16.msra.mxu3 %v12385_v59  ;;  %7033 = vmatpush.bf16.msra.mxu1 %v11841_v2  ;;  %v16913_v33 = vld [vmem:[%s18787_s3 + $0x684] sm:$0xf]  ;;  %v12033_v40 = vor.u32 %v16849_v27, %v12030_v28 }
 0x174   : > { %v12286_v35 = vld [vmem:[%s18787_s3 + $0x6a0] sm:$0xf0] }
 0x175   : > { %7046 = vmatpush.bf16.msra.mxu2 %v12097_v3  ;;  %7021 = vmatpush.bf16.msra.mxu0 %v11553_v15  ;;  %v16713_v41 = vld [vmem:[%s18787_s3 + $0x44] sm:$0xf]  ;;  %v12289_v47 = vor.u32 %v16913_v33, %v12286_v35 }
 0x176   : > { %v11486_v44 = vld [vmem:[%s18787_s3 + $0x60] sm:$0xf0] }
 0x177   : > { %7059 = vmatpush.bf16.msra.mxu3 %v12353_v9  ;;  %7034 = vmatpush.bf16.msra.mxu1 %v11809_v16  ;;  %v16777_v46 = vld [vmem:[%s18787_s3 + $0x244] sm:$0xf]  ;;  %v11489_v53 = vor.u32 %v16713_v41, %v11486_v44 }
 0x178   : > { %v11742_v48 = vld [vmem:[%s18787_s3 + $0x260] sm:$0xf0] }
 0x179   : > { %7047 = vmatpush.bf16.msra.mxu2 %v12065_v17  ;;  %v16841_v49 = vld [vmem:[%s18787_s3 + $0x444] sm:$0xf]  ;;  %7022 = vmatpush.bf16.msra.mxu0 %v11521_v37  ;;  %v11745_v56 = vor.u32 %v16777_v46, %v11742_v48 }
 0x17a   : > { %v11998_v50 = vld [vmem:[%s18787_s3 + $0x460] sm:$0xf0] }
 0x17b   : > { %7060 = vmatpush.bf16.msra.mxu3 %v12321_v23  ;;  %v16905_v51 = vld [vmem:[%s18787_s3 + $0x644] sm:$0xf]  ;;  %7035 = vmatpush.bf16.msra.mxu1 %v11777_v38  ;;  %v12001_v57 = vor.u32 %v16841_v49, %v11998_v50 }
 0x17c   : > { %v12254_v52 = vld [vmem:[%s18787_s3 + $0x660] sm:$0xf0] }
 0x17d   : > { %v16705_v54 = vld [vmem:[%s18787_s3 + $0x4] sm:$0xf]  ;;  %7048 = vmatpush.bf16.msra.mxu2 %v12033_v40  ;;  %v12257_v61 = vor.u32 %v16905_v51, %v12254_v52  ;;  %7023 = vmatpush.bf16.msra.mxu0 %v11489_v53 }
 0x17e   : > { %v11454_v55 = vld [vmem:[%s18787_s3 + $0x20] sm:$0xf0] }
 0x17f   : > { %v16769_v58 = vld [vmem:[%s18787_s3 + $0x204] sm:$0xf]  ;;  %7061 = vmatpush.bf16.msra.mxu3 %v12289_v47  ;;  %v11457_v4 = vor.u32 %v16705_v54, %v11454_v55  ;;  %7036 = vmatpush.bf16.msra.mxu1 %v11745_v56 }
 0x180   : > { %v11710_v59 = vld [vmem:[%s18787_s3 + $0x220] sm:$0xf0] }
 0x181   : > { %v16833_v60 = vld [vmem:[%s18787_s3 + $0x404] sm:$0xf]  ;;  %7049 = vmatpush.bf16.msra.mxu2 %v12001_v57  ;;  %v11713_v10 = vor.u32 %v16769_v58, %v11710_v59  ;;  %7024 = vmatpush.bf16.msra.mxu0 %v11457_v4 }
 0x182   : > { %v11966_v62 = vld [vmem:[%s18787_s3 + $0x420] sm:$0xf0] }
 0x183   : > { %v16897_v63 = vld [vmem:[%s18787_s3 + $0x604] sm:$0xf]  ;;  %v11969_v11 = vor.u32 %v16833_v60, %v11966_v62  ;;  %7062 = vmatpush.bf16.msra.mxu3 %v12257_v61  ;;  %7037 = vmatpush.bf16.msra.mxu1 %v11713_v10 }
 0x184   : > { %v12222_v0 = vld [vmem:[%s18787_s3 + $0x620] sm:$0xf0]  ;;  %7025 = vmatmul.bf16.vlgmr.msra.gmra.mxu0 %v18924_v21 }
 0x185   : > { %v17017_v1 = vld [vmem:[%s18787_s3 + $0x9c4] sm:$0xf]  ;;  %v12225_v14 = vor.u32 %v16897_v63, %v12222_v0  ;;  %7050 = vmatpush.bf16.msra.mxu2 %v11969_v11 }
 0x186   : > { %v12702_v2 = vld [vmem:[%s18787_s3 + $0x9e0] sm:$0xf0]  ;;  %7038 = vmatmul.bf16.vlgmr.msra.gmra.mxu1 %v18927_v22 }
 0x187   : > { %v17081_v3 = vld [vmem:[%s18787_s3 + $0xbc4] sm:$0xf]  ;;  %v12705_v15 = vor.u32 %v17017_v1, %v12702_v2  ;;  %7063 = vmatpush.bf16.msra.mxu3 %v12225_v14 }
 0x188   : > { %v12958_v6 = vld [vmem:[%s18787_s3 + $0xbe0] sm:$0xf0]  ;;  %7051 = vmatmul.bf16.vlgmr.msra.gmra.mxu2 %v18910_v5 }
 0x189   : > { %v17145_v8 = vld [vmem:[%s18787_s3 + $0xdc4] sm:$0xf]  ;;  %v12961_v16 = vor.u32 %v17081_v3, %v12958_v6  ;;  %7069 = vmatpush.bf16.msrb.mxu0 %v12705_v15 }
 0x18a   : > { %v13214_v9 = vld [vmem:[%s18787_s3 + $0xde0] sm:$0xf0]  ;;  %7064 = vmatmul.bf16.vlgmr.msra.gmra.mxu3 %v18913_v7 }
 0x18b   : > { %v17209_v12 = vld [vmem:[%s18787_s3 + $0xfc4] sm:$0xf]  ;;  %v13217_v17 = vor.u32 %v17145_v8, %v13214_v9  ;;  %7082 = vmatpush.bf16.msrb.mxu1 %v12961_v16 }
 0x18c   : > { %v13470_v13 = vld [vmem:[%s18787_s3 + $0xfe0] sm:$0xf0] }
 0x18d   : > { %v17009_v18 = vld [vmem:[%s18787_s3 + $0x984] sm:$0xf]  ;;  %v13473_v23 = vor.u32 %v17209_v12, %v13470_v13  ;;  %7095 = vmatpush.bf16.msrb.mxu2 %v13217_v17 }
 0x18e   : > { %v12670_v19 = vld [vmem:[%s18787_s3 + $0x9a0] sm:$0xf0] }
 0x18f   : > { %v17073_v20 = vld [vmem:[%s18787_s3 + $0xb84] sm:$0xf]  ;;  %v12673_v37 = vor.u32 %v17009_v18, %v12670_v19  ;;  %7108 = vmatpush.bf16.msrb.mxu3 %v13473_v23 }
 0x190   : > { %v12926_v25 = vld [vmem:[%s18787_s3 + $0xba0] sm:$0xf0] }
 0x191   : > { %v17137_v27 = vld [vmem:[%s18787_s3 + $0xd84] sm:$0xf]  ;;  %v12929_v38 = vor.u32 %v17073_v20, %v12926_v25  ;;  %7070 = vmatpush.bf16.msrb.mxu0 %v12673_v37  ;;  %v19249_v37 = vpop.f32.mrf.mxu0 }
 0x192   : > { %v13182_v28 = vld [vmem:[%s18787_s3 + $0xda0] sm:$0xf0] }
 0x193   : > { %v17201_v33 = vld [vmem:[%s18787_s3 + $0xf84] sm:$0xf]  ;;  %v13185_v40 = vor.u32 %v17137_v27, %v13182_v28  ;;  %7083 = vmatpush.bf16.msrb.mxu1 %v12929_v38 }
 0x194   : > { %v13438_v35 = vld [vmem:[%s18787_s3 + $0xfa0] sm:$0xf0] }
 0x195   : > { %v17001_v41 = vld [vmem:[%s18787_s3 + $0x944] sm:$0xf]  ;;  %v13441_v47 = vor.u32 %v17201_v33, %v13438_v35  ;;  %7096 = vmatpush.bf16.msrb.mxu2 %v13185_v40  ;;  %v19251_v40 = vpop.f32.mrf.mxu1 }
 0x196   : > { %v12638_v44 = vld [vmem:[%s18787_s3 + $0x960] sm:$0xf0] }
 0x197   : > { %v17065_v46 = vld [vmem:[%s18787_s3 + $0xb44] sm:$0xf]  ;;  %v12641_v53 = vor.u32 %v17001_v41, %v12638_v44  ;;  %7109 = vmatpush.bf16.msrb.mxu3 %v13441_v47 }
 0x198   : > { %v12894_v48 = vld [vmem:[%s18787_s3 + $0xb60] sm:$0xf0] }
 0x199   : > { %v17129_v49 = vld [vmem:[%s18787_s3 + $0xd44] sm:$0xf]  ;;  %v12897_v54 = vor.u32 %v17065_v46, %v12894_v48  ;;  %7071 = vmatpush.bf16.msrb.mxu0 %v12641_v53 }
 0x19a   : > { %v13150_v50 = vld [vmem:[%s18787_s3 + $0xd60] sm:$0xf0] }
 0x19b   : > { %v17193_v51 = vld [vmem:[%s18787_s3 + $0xf44] sm:$0xf]  ;;  %v13153_v55 = vor.u32 %v17129_v49, %v13150_v50  ;;  %7084 = vmatpush.bf16.msrb.mxu1 %v12897_v54  ;;  %v19256_v49 = vpop.f32.mrf.mxu2  ;;  %v19261_v54 = vpop.f32.mrf.mxu3 }
 0x19c   : > { %v13406_v52 = vld [vmem:[%s18787_s3 + $0xf60] sm:$0xf0] }
 0x19d   : > { %v16993_v56 = vld [vmem:[%s18787_s3 + $0x904] sm:$0xf]  ;;  %v13409_v59 = vor.u32 %v17193_v51, %v13406_v52  ;;  %7097 = vmatpush.bf16.msrb.mxu2 %v13153_v55 }
 0x19e   : > { %v12606_v57 = vld [vmem:[%s18787_s3 + $0x920] sm:$0xf0] }
 0x19f   : > { %v17057_v58 = vld [vmem:[%s18787_s3 + $0xb04] sm:$0xf]  ;;  %v12609_v1 = vor.u32 %v16993_v56, %v12606_v57  ;;  %7110 = vmatpush.bf16.msrb.mxu3 %v13409_v59 }
 0x1a0   : > { %v12862_v60 = vld [vmem:[%s18787_s3 + $0xb20] sm:$0xf0] }
 0x1a1   : > { %v17121_v61 = vld [vmem:[%s18787_s3 + $0xd04] sm:$0xf]  ;;  %v12865_v2 = vor.u32 %v17057_v58, %v12862_v60  ;;  %7072 = vmatpush.bf16.msrb.mxu0 %v12609_v1 }
 0x1a2   : > { %v13118_v62 = vld [vmem:[%s18787_s3 + $0xd20] sm:$0xf0] }
 0x1a3   : > { %v17185_v63 = vld [vmem:[%s18787_s3 + $0xf04] sm:$0xf]  ;;  %v13121_v3 = vor.u32 %v17121_v61, %v13118_v62  ;;  %7085 = vmatpush.bf16.msrb.mxu1 %v12865_v2 }
 0x1a4   : > { %v13374_v0 = vld [vmem:[%s18787_s3 + $0xf20] sm:$0xf0] }
 0x1a5   : > { %v16985_v4 = vld [vmem:[%s18787_s3 + $0x8c4] sm:$0xf]  ;;  %v13377_v9 = vor.u32 %v17185_v63, %v13374_v0  ;;  %7098 = vmatpush.bf16.msrb.mxu2 %v13121_v3 }
 0x1a6   : > { %v12574_v6 = vld [vmem:[%s18787_s3 + $0x8e0] sm:$0xf0] }
 0x1a7   : > { %v17049_v8 = vld [vmem:[%s18787_s3 + $0xac4] sm:$0xf]  ;;  %v12577_v15 = vor.u32 %v16985_v4, %v12574_v6  ;;  %7111 = vmatpush.bf16.msrb.mxu3 %v13377_v9 }
 0x1a8   : > { %v12830_v10 = vld [vmem:[%s18787_s3 + $0xae0] sm:$0xf0] }
 0x1a9   : > { %v17113_v11 = vld [vmem:[%s18787_s3 + $0xcc4] sm:$0xf]  ;;  %v12833_v16 = vor.u32 %v17049_v8, %v12830_v10  ;;  %7073 = vmatpush.bf16.msrb.mxu0 %v12577_v15  ;;  %v6820_v10 = vpop.f32.mrf.mxu0  ;;  %v6833_v15 = vpop.f32.mrf.mxu1 }
 0x1aa   : > { %v13086_v12 = vld [vmem:[%s18787_s3 + $0xce0] sm:$0xf0] }
 0x1ab   : > { %v17177_v13 = vld [vmem:[%s18787_s3 + $0xec4] sm:$0xf]  ;;  %v13089_v17 = vor.u32 %v17113_v11, %v13086_v12  ;;  %7086 = vmatpush.bf16.msrb.mxu1 %v12833_v16 }
 0x1ac   : > { %v13342_v14 = vld [vmem:[%s18787_s3 + $0xee0] sm:$0xf0] }
 0x1ad   : > { %v16977_v18 = vld [vmem:[%s18787_s3 + $0x884] sm:$0xf]  ;;  %v13345_v23 = vor.u32 %v17177_v13, %v13342_v14  ;;  %7099 = vmatpush.bf16.msrb.mxu2 %v13089_v17 }
 0x1ae   : > { %v12542_v19 = vld [vmem:[%s18787_s3 + $0x8a0] sm:$0xf0] }
 0x1af   : > { %v17041_v20 = vld [vmem:[%s18787_s3 + $0xa84] sm:$0xf]  ;;  %v12545_v38 = vor.u32 %v16977_v18, %v12542_v19  ;;  %7112 = vmatpush.bf16.msrb.mxu3 %v13345_v23 }
 0x1b0   : > { %v12798_v25 = vld [vmem:[%s18787_s3 + $0xaa0] sm:$0xf0] }
 0x1b1   : > { %v17105_v27 = vld [vmem:[%s18787_s3 + $0xc84] sm:$0xf]  ;;  %v12801_v41 = vor.u32 %v17041_v20, %v12798_v25  ;;  %7074 = vmatpush.bf16.msrb.mxu0 %v12545_v38  ;;  %v6846_v20 = vpop.f32.mrf.mxu2 }
 0x1b2   : > { %v13054_v28 = vld [vmem:[%s18787_s3 + $0xca0] sm:$0xf0] }
 0x1b3   : > { %v17169_v33 = vld [vmem:[%s18787_s3 + $0xe84] sm:$0xf]  ;;  %v13057_v44 = vor.u32 %v17105_v27, %v13054_v28  ;;  %7087 = vmatpush.bf16.msrb.mxu1 %v12801_v41  ;;  %v6859_v27 = vpop.f32.mrf.mxu3 }
 0x1b4   : > { %v13310_v35 = vld [vmem:[%s18787_s3 + $0xea0] sm:$0xf0] }
 0x1b5   : > { %v16969_v46 = vld [vmem:[%s18787_s3 + $0x844] sm:$0xf]  ;;  %v13313_v50 = vor.u32 %v17169_v33, %v13310_v35  ;;  %7100 = vmatpush.bf16.msrb.mxu2 %v13057_v44 }
 0x1b6   : > { %v12510_v47 = vld [vmem:[%s18787_s3 + $0x860] sm:$0xf0] }
 0x1b7   : > { %v17033_v48 = vld [vmem:[%s18787_s3 + $0xa44] sm:$0xf]  ;;  %v12513_v57 = vor.u32 %v16969_v46, %v12510_v47  ;;  %7113 = vmatpush.bf16.msrb.mxu3 %v13313_v50 }
 0x1b8   : > { %v12766_v51 = vld [vmem:[%s18787_s3 + $0xa60] sm:$0xf0] }
 0x1b9   : > { %v17097_v52 = vld [vmem:[%s18787_s3 + $0xc44] sm:$0xf]  ;;  %v12769_v60 = vor.u32 %v17033_v48, %v12766_v51  ;;  %7075 = vmatpush.bf16.msrb.mxu0 %v12513_v57 }
 0x1ba   : > { %v13022_v53 = vld [vmem:[%s18787_s3 + $0xc60] sm:$0xf0] }
 0x1bb   : > { %v17161_v55 = vld [vmem:[%s18787_s3 + $0xe44] sm:$0xf]  ;;  %v13025_v61 = vor.u32 %v17097_v52, %v13022_v53  ;;  %7088 = vmatpush.bf16.msrb.mxu1 %v12769_v60 }
 0x1bc   : > { %v13278_v56 = vld [vmem:[%s18787_s3 + $0xe60] sm:$0xf0] }
 0x1bd   : > { %v16961_v58 = vld [vmem:[%s18787_s3 + $0x804] sm:$0xf]  ;;  %v13281_v1 = vor.u32 %v17161_v55, %v13278_v56  ;;  %7101 = vmatpush.bf16.msrb.mxu2 %v13025_v61 }
 0x1be   : > { %v12478_v59 = vld [vmem:[%s18787_s3 + $0x820] sm:$0xf0] }
 0x1bf   : > { %v17025_v62 = vld [vmem:[%s18787_s3 + $0xa04] sm:$0xf]  ;;  %v12481_v11 = vor.u32 %v16961_v58, %v12478_v59  ;;  %7114 = vmatpush.bf16.msrb.mxu3 %v13281_v1 }
 0x1c0   : > { %v12734_v63 = vld [vmem:[%s18787_s3 + $0xa20] sm:$0xf0] }
 0x1c1   : > { %v17089_v0 = vld [vmem:[%s18787_s3 + $0xc04] sm:$0xf]  ;;  %v12737_v16 = vor.u32 %v17025_v62, %v12734_v63  ;;  %7076 = vmatpush.bf16.msrb.mxu0 %v12481_v11 }
 0x1c2   : > { %v12990_v2 = vld [vmem:[%s18787_s3 + $0xc20] sm:$0xf0] }
 0x1c3   : > { %v17153_v3 = vld [vmem:[%s18787_s3 + $0xe04] sm:$0xf]  ;;  %v12993_v17 = vor.u32 %v17089_v0, %v12990_v2  ;;  %7089 = vmatpush.bf16.msrb.mxu1 %v12737_v16  ;;  %v19309_v16 = vpop.f32.mrf.mxu0 }
 0x1c4   : > { %v13246_v4 = vld [vmem:[%s18787_s3 + $0xe20] sm:$0xf0]  ;;  %7077 = vmatmul.bf16.vlgmr.msrb.gmra.mxu0 %v18983_v42 }
 0x1c5   : > { %v17273_v6 = vld [vmem:[%s18787_s3 + $0x11c4] sm:$0xf]  ;;  %v13249_v23 = vor.u32 %v17153_v3, %v13246_v4  ;;  %7102 = vmatpush.bf16.msrb.mxu2 %v12993_v17 }
 0x1c6   : > { %v13726_v8 = vld [vmem:[%s18787_s3 + $0x11e0] sm:$0xf0]  ;;  %7090 = vmatmul.bf16.vlgmr.msrb.gmra.mxu1 %v18987_v45 }
 0x1c7   : > { %v17337_v9 = vld [vmem:[%s18787_s3 + $0x13c4] sm:$0xf]  ;;  %v13729_v25 = vor.u32 %v17273_v6, %v13726_v8  ;;  %7115 = vmatpush.bf16.msrb.mxu3 %v13249_v23 }
 0x1c8   : > { %v13982_v12 = vld [vmem:[%s18787_s3 + $0x13e0] sm:$0xf0]  ;;  %7103 = vmatmul.bf16.vlgmr.msrb.gmra.mxu2 %v18979_v39 }
 0x1c9   : > { %v17401_v13 = vld [vmem:[%s18787_s3 + $0x15c4] sm:$0xf]  ;;  %v13985_v28 = vor.u32 %v17337_v9, %v13982_v12  ;;  %7121 = vmatpush.bf16.msra.mxu0 %v13729_v25  ;;  %v19314_v25 = vpop.f32.mrf.mxu1 }
 0x1ca   : > { %v14238_v14 = vld [vmem:[%s18787_s3 + $0x15e0] sm:$0xf0]  ;;  %7116 = vmatmul.bf16.vlgmr.msrb.gmra.mxu3 %v18985_v43 }
 0x1cb   : > { %v17465_v18 = vld [vmem:[%s18787_s3 + $0x17c4] sm:$0xf]  ;;  %v14241_v33 = vor.u32 %v17401_v13, %v14238_v14  ;;  %7134 = vmatpush.bf16.msra.mxu1 %v13985_v28 }
 0x1cc   : > { %v14494_v19 = vld [vmem:[%s18787_s3 + $0x17e0] sm:$0xf0] }
 0x1cd   : > { %v17265_v35 = vld [vmem:[%s18787_s3 + $0x1184] sm:$0xf]  ;;  %v14497_v44 = vor.u32 %v17465_v18, %v14494_v19  ;;  %7147 = vmatpush.bf16.msra.mxu2 %v14241_v33 }
 0x1ce   : > { %v13694_v38 = vld [vmem:[%s18787_s3 + $0x11a0] sm:$0xf0] }
 0x1cf   : > { %v17329_v41 = vld [vmem:[%s18787_s3 + $0x1384] sm:$0xf]  ;;  %v13697_v52 = vor.u32 %v17265_v35, %v13694_v38  ;;  %7160 = vmatpush.bf16.msra.mxu3 %v14497_v44 }
 0x1d0   : > { %v13950_v46 = vld [vmem:[%s18787_s3 + $0x13a0] sm:$0xf0] }
 0x1d1   : > { %v17393_v47 = vld [vmem:[%s18787_s3 + $0x1584] sm:$0xf]  ;;  %v13953_v53 = vor.u32 %v17329_v41, %v13950_v46  ;;  %7122 = vmatpush.bf16.msra.mxu0 %v13697_v52  ;;  %v19324_v52 = vpop.f32.mrf.mxu2 }
 0x1d2   : > { %v14206_v48 = vld [vmem:[%s18787_s3 + $0x15a0] sm:$0xf0] }
 0x1d3   : > { %v17457_v50 = vld [vmem:[%s18787_s3 + $0x1784] sm:$0xf]  ;;  %v14209_v55 = vor.u32 %v17393_v47, %v14206_v48  ;;  %7135 = vmatpush.bf16.msra.mxu1 %v13953_v53 }
 0x1d4   : > { %v14462_v51 = vld [vmem:[%s18787_s3 + $0x17a0] sm:$0xf0] }
 0x1d5   : > { %v17257_v56 = vld [vmem:[%s18787_s3 + $0x1144] sm:$0xf]  ;;  %v14465_v59 = vor.u32 %v17457_v50, %v14462_v51  ;;  %7148 = vmatpush.bf16.msra.mxu2 %v14209_v55 }
 0x1d6   : > { %v13662_v57 = vld [vmem:[%s18787_s3 + $0x1160] sm:$0xf0] }
 0x1d7   : > { %v17321_v58 = vld [vmem:[%s18787_s3 + $0x1344] sm:$0xf]  ;;  %v13665_v1 = vor.u32 %v17257_v56, %v13662_v57  ;;  %7161 = vmatpush.bf16.msra.mxu3 %v14465_v59 }
 0x1d8   : > { %v13918_v60 = vld [vmem:[%s18787_s3 + $0x1360] sm:$0xf0] }
 0x1d9   : > { %v17385_v61 = vld [vmem:[%s18787_s3 + $0x1544] sm:$0xf]  ;;  %v13921_v2 = vor.u32 %v17321_v58, %v13918_v60  ;;  %7123 = vmatpush.bf16.msra.mxu0 %v13665_v1  ;;  %v19329_v58 = vpop.f32.mrf.mxu3 }
 0x1da   : > { %v14174_v62 = vld [vmem:[%s18787_s3 + $0x1560] sm:$0xf0] }
 0x1db   : > { %v17449_v63 = vld [vmem:[%s18787_s3 + $0x1744] sm:$0xf]  ;;  %v14177_v3 = vor.u32 %v17385_v61, %v14174_v62  ;;  %7136 = vmatpush.bf16.msra.mxu1 %v13921_v2  ;;  %v6872_v62 = vpop.f32.mrf.mxu0 }
 0x1dc   : > { %v14430_v0 = vld [vmem:[%s18787_s3 + $0x1760] sm:$0xf0] }
 0x1dd   : > { %v17249_v4 = vld [vmem:[%s18787_s3 + $0x1104] sm:$0xf]  ;;  %v14433_v9 = vor.u32 %v17449_v63, %v14430_v0  ;;  %7149 = vmatpush.bf16.msra.mxu2 %v14177_v3 }
 0x1de   : > { %v13630_v6 = vld [vmem:[%s18787_s3 + $0x1120] sm:$0xf0] }
 0x1df   : > { %v17313_v8 = vld [vmem:[%s18787_s3 + $0x1304] sm:$0xf]  ;;  %v13633_v15 = vor.u32 %v17249_v4, %v13630_v6  ;;  %7162 = vmatpush.bf16.msra.mxu3 %v14433_v9  ;;  %v6885_v4 = vpop.f32.mrf.mxu1 }
 0x1e0   : > { %v13886_v10 = vld [vmem:[%s18787_s3 + $0x1320] sm:$0xf0] }
 0x1e1   : > { %v17377_v11 = vld [vmem:[%s18787_s3 + $0x1504] sm:$0xf]  ;;  %v13889_v17 = vor.u32 %v17313_v8, %v13886_v10  ;;  %7124 = vmatpush.bf16.msra.mxu0 %v13633_v15 }
 0x1e2   : > { %v14142_v12 = vld [vmem:[%s18787_s3 + $0x1520] sm:$0xf0] }
 0x1e3   : > { %v17441_v13 = vld [vmem:[%s18787_s3 + $0x1704] sm:$0xf]  ;;  %v14145_v18 = vor.u32 %v17377_v11, %v14142_v12  ;;  %7137 = vmatpush.bf16.msra.mxu1 %v13889_v17 }
 0x1e4   : > { %v14398_v14 = vld [vmem:[%s18787_s3 + $0x1720] sm:$0xf0] }
 0x1e5   : > { %v17241_v19 = vld [vmem:[%s18787_s3 + $0x10c4] sm:$0xf]  ;;  %v14401_v27 = vor.u32 %v17441_v13, %v14398_v14  ;;  %7150 = vmatpush.bf16.msra.mxu2 %v14145_v18 }
 0x1e6   : > { %v13598_v20 = vld [vmem:[%s18787_s3 + $0x10e0] sm:$0xf0] }
 0x1e7   : > { %v17305_v23 = vld [vmem:[%s18787_s3 + $0x12c4] sm:$0xf]  ;;  %v13601_v44 = vor.u32 %v17241_v19, %v13598_v20  ;;  %7163 = vmatpush.bf16.msra.mxu3 %v14401_v27  ;;  %v6898_v27 = vpop.f32.mrf.mxu2 }
 0x1e8   : > { %v13854_v28 = vld [vmem:[%s18787_s3 + $0x12e0] sm:$0xf0] }
 0x1e9   : > { %v17369_v33 = vld [vmem:[%s18787_s3 + $0x14c4] sm:$0xf]  ;;  %v13857_v46 = vor.u32 %v17305_v23, %v13854_v28  ;;  %7125 = vmatpush.bf16.msra.mxu0 %v13601_v44 }
 0x1ea   : > { %v14110_v35 = vld [vmem:[%s18787_s3 + $0x14e0] sm:$0xf0] }
 0x1eb   : > { %v17433_v38 = vld [vmem:[%s18787_s3 + $0x16c4] sm:$0xf]  ;;  %v14113_v47 = vor.u32 %v17369_v33, %v14110_v35  ;;  %7138 = vmatpush.bf16.msra.mxu1 %v13857_v46 }
 0x1ec   : > { %v14366_v41 = vld [vmem:[%s18787_s3 + $0x16e0] sm:$0xf0] }
 0x1ed   : > { %v17233_v48 = vld [vmem:[%s18787_s3 + $0x1084] sm:$0xf]  ;;  %v14369_v53 = vor.u32 %v17433_v38, %v14366_v41  ;;  %7151 = vmatpush.bf16.msra.mxu2 %v14113_v47  ;;  %v6911_v41 = vpop.f32.mrf.mxu3 }
 0x1ee   : > { %v13566_v50 = vld [vmem:[%s18787_s3 + $0x10a0] sm:$0xf0] }
 0x1ef   : > { %v17297_v51 = vld [vmem:[%s18787_s3 + $0x1284] sm:$0xf]  ;;  %v13569_v61 = vor.u32 %v17233_v48, %v13566_v50  ;;  %7164 = vmatpush.bf16.msra.mxu3 %v14369_v53 }
 0x1f0   : > { %v13822_v55 = vld [vmem:[%s18787_s3 + $0x12a0] sm:$0xf0] }
 0x1f1   : > { %v17361_v56 = vld [vmem:[%s18787_s3 + $0x1484] sm:$0xf]  ;;  %v13825_v63 = vor.u32 %v17297_v51, %v13822_v55  ;;  %7126 = vmatpush.bf16.msra.mxu0 %v13569_v61 }
 0x1f2   : > { %v14078_v57 = vld [vmem:[%s18787_s3 + $0x14a0] sm:$0xf0] }
 0x1f3   : > { %v17425_v59 = vld [vmem:[%s18787_s3 + $0x1684] sm:$0xf]  ;;  %v14081_v0 = vor.u32 %v17361_v56, %v14078_v57  ;;  %7139 = vmatpush.bf16.msra.mxu1 %v13825_v63 }
 0x1f4   : > { %v14334_v60 = vld [vmem:[%s18787_s3 + $0x16a0] sm:$0xf0] }
 0x1f5   : > { %v17225_v1 = vld [vmem:[%s18787_s3 + $0x1044] sm:$0xf]  ;;  %v14337_v6 = vor.u32 %v17425_v59, %v14334_v60  ;;  %7152 = vmatpush.bf16.msra.mxu2 %v14081_v0 }
 0x1f6   : > { %v13534_v2 = vld [vmem:[%s18787_s3 + $0x1060] sm:$0xf0] }
 0x1f7   : > { %v17289_v3 = vld [vmem:[%s18787_s3 + $0x1244] sm:$0xf]  ;;  %v13537_v13 = vor.u32 %v17225_v1, %v13534_v2  ;;  %7165 = vmatpush.bf16.msra.mxu3 %v14337_v6 }
 0x1f8   : > { %v13790_v8 = vld [vmem:[%s18787_s3 + $0x1260] sm:$0xf0] }
 0x1f9   : > { %v17353_v9 = vld [vmem:[%s18787_s3 + $0x1444] sm:$0xf]  ;;  %v13793_v17 = vor.u32 %v17289_v3, %v13790_v8  ;;  %7127 = vmatpush.bf16.msra.mxu0 %v13537_v13 }
 0x1fa   : > { %v14046_v10 = vld [vmem:[%s18787_s3 + $0x1460] sm:$0xf0] }
 0x1fb   : > { %v17417_v11 = vld [vmem:[%s18787_s3 + $0x1644] sm:$0xf]  ;;  %v14049_v18 = vor.u32 %v17353_v9, %v14046_v10  ;;  %7140 = vmatpush.bf16.msra.mxu1 %v13793_v17 }
 0x1fc   : > { %v14302_v12 = vld [vmem:[%s18787_s3 + $0x1660] sm:$0xf0] }
 0x1fd   : > { %v17217_v14 = vld [vmem:[%s18787_s3 + $0x1004] sm:$0xf]  ;;  %v14305_v28 = vor.u32 %v17417_v11, %v14302_v12  ;;  %7153 = vmatpush.bf16.msra.mxu2 %v14049_v18  ;;  %v6832_v12 = vadd.f32 %v19251_v40, %v19249_v37 }
 0x1fe   : > { %v13502_v15 = vld [vmem:[%s18787_s3 + $0x1020] sm:$0xf0] }
 0x1ff   : > { %v17281_v19 = vld [vmem:[%s18787_s3 + $0x1204] sm:$0xf]  ;;  %v13505_v48 = vor.u32 %v17217_v14, %v13502_v15  ;;  %7166 = vmatpush.bf16.msra.mxu3 %v14305_v28 }
 0x200   : > { %v13758_v20 = vld [vmem:[%s18787_s3 + $0x1220] sm:$0xf0] }
 0x201   : > { %v17345_v23 = vld [vmem:[%s18787_s3 + $0x1404] sm:$0xf]  ;;  %v13761_v55 = vor.u32 %v17281_v19, %v13758_v20  ;;  %7128 = vmatpush.bf16.msra.mxu0 %v13505_v48 }
 0x202   : > { %v14014_v33 = vld [vmem:[%s18787_s3 + $0x1420] sm:$0xf0] }
 0x203   : > { %v17409_v35 = vld [vmem:[%s18787_s3 + $0x1604] sm:$0xf]  ;;  %v14017_v56 = vor.u32 %v17345_v23, %v14014_v33  ;;  %7141 = vmatpush.bf16.msra.mxu1 %v13761_v55  ;;  %v6845_v33 = vadd.f32 %v19256_v49, %v6832_v12 }
 0x204   : > { %v14270_v38 = vld [vmem:[%s18787_s3 + $0x1620] sm:$0xf0]  ;;  %7129 = vmatmul.bf16.vlgmr.msra.gmra.mxu0 %v19054_v26 }
 0x205   : > { %v17529_v44 = vld [vmem:[%s18787_s3 + $0x19c4] sm:$0xf]  ;;  %v14273_v60 = vor.u32 %v17409_v35, %v14270_v38  ;;  %7154 = vmatpush.bf16.msra.mxu2 %v14017_v56 }
 0x206   : > { %v14750_v46 = vld [vmem:[%s18787_s3 + $0x19e0] sm:$0xf0]  ;;  %7142 = vmatmul.bf16.vlgmr.msra.gmra.mxu1 %v19061_v31 }
 0x207   : > { %v17593_v47 = vld [vmem:[%s18787_s3 + $0x1bc4] sm:$0xf]  ;;  %v14753_v61 = vor.u32 %v17529_v44, %v14750_v46  ;;  %7167 = vmatpush.bf16.msra.mxu3 %v14273_v60 }
 0x208   : > { %v15006_v50 = vld [vmem:[%s18787_s3 + $0x1be0] sm:$0xf0]  ;;  %7155 = vmatmul.bf16.vlgmr.msra.gmra.mxu2 %v19059_v30 }
 0x209   : > { %v17657_v51 = vld [vmem:[%s18787_s3 + $0x1dc4] sm:$0xf]  ;;  %v15009_v62 = vor.u32 %v17593_v47, %v15006_v50  ;;  %7173 = vmatpush.bf16.msrb.mxu0 %v14753_v61 }
 0x20a   : > { %v15262_v53 = vld [vmem:[%s18787_s3 + $0x1de0] sm:$0xf0]  ;;  %7168 = vmatmul.bf16.vlgmr.msra.gmra.mxu3 %v19065_v34 }
 0x20b   : > { %v17721_v57 = vld [vmem:[%s18787_s3 + $0x1fc4] sm:$0xf]  ;;  %v15265_v63 = vor.u32 %v17657_v51, %v15262_v53  ;;  %7186 = vmatpush.bf16.msrb.mxu1 %v15009_v62  ;;  %v19386_v53 = vpop.f32.mrf.mxu0 }
 0x20c   : > { %v15518_v59 = vld [vmem:[%s18787_s3 + $0x1fe0] sm:$0xf0] }
 0x20d   : > { %v17521_v0 = vld [vmem:[%s18787_s3 + $0x1984] sm:$0xf]  ;;  %v15521_v3 = vor.u32 %v17721_v57, %v15518_v59  ;;  %7199 = vmatpush.bf16.msrb.mxu2 %v15265_v63  ;;  %v19390_v57 = vpop.f32.mrf.mxu1  ;;  %v6858_v59 = vadd.f32 %v19261_v54, %v6845_v33 }
 0x20e   : > { %v14718_v1 = vld [vmem:[%s18787_s3 + $0x19a0] sm:$0xf0] }
 0x20f   : > { %v17585_v2 = vld [vmem:[%s18787_s3 + $0x1b84] sm:$0xf]  ;;  %v14721_v11 = vor.u32 %v17521_v0, %v14718_v1  ;;  %7212 = vmatpush.bf16.msrb.mxu3 %v15521_v3 }
 0x210   : > { %v14974_v4 = vld [vmem:[%s18787_s3 + $0x1ba0] sm:$0xf0] }
 0x211   : > { %v17649_v6 = vld [vmem:[%s18787_s3 + $0x1d84] sm:$0xf]  ;;  %v14977_v13 = vor.u32 %v17585_v2, %v14974_v4  ;;  %7174 = vmatpush.bf16.msrb.mxu0 %v14721_v11 }
 0x212   : > { %v15230_v8 = vld [vmem:[%s18787_s3 + $0x1da0] sm:$0xf0] }
 0x213   : > { %v17713_v9 = vld [vmem:[%s18787_s3 + $0x1f84] sm:$0xf]  ;;  %v15233_v14 = vor.u32 %v17649_v6, %v15230_v8  ;;  %7187 = vmatpush.bf16.msrb.mxu1 %v14977_v13 }
 0x214   : > { %v15486_v10 = vld [vmem:[%s18787_s3 + $0x1fa0] sm:$0xf0] }
 0x215   : > { %v17513_v15 = vld [vmem:[%s18787_s3 + $0x1944] sm:$0xf]  ;;  %v15489_v19 = vor.u32 %v17713_v9, %v15486_v10  ;;  %7200 = vmatpush.bf16.msrb.mxu2 %v15233_v14  ;;  %v6871_v9 = vadd.f32 %v19309_v16, %v6858_v59 }
 0x216   : > { %v14686_v17 = vld [vmem:[%s18787_s3 + $0x1960] sm:$0xf0] }
 0x217   : > { %v17577_v18 = vld [vmem:[%s18787_s3 + $0x1b44] sm:$0xf]  ;;  %v14689_v28 = vor.u32 %v17513_v15, %v14686_v17  ;;  %7213 = vmatpush.bf16.msrb.mxu3 %v15489_v19  ;;  %v19405_v17 = vpop.f32.mrf.mxu2  ;;  %v6884_v33 = vadd.f32 %v19314_v25, %v6871_v9  ;;  %v11940_v9 = vld [vmem:[%s18787_s3 + $0x3c8] sm:$0xf] }
 0x218   : > { %v14942_v20 = vld [vmem:[%s18787_s3 + $0x1b60] sm:$0xf0] }
 0x219   : > { %v17641_v23 = vld [vmem:[%s18787_s3 + $0x1d44] sm:$0xf]  ;;  %v14945_v35 = vor.u32 %v17577_v18, %v14942_v20  ;;  %7175 = vmatpush.bf16.msrb.mxu0 %v14689_v28  ;;  %v6937_v28 = vpop.f32.mrf.mxu1 }
 0x21a   : > { %v15198_v27 = vld [vmem:[%s18787_s3 + $0x1d60] sm:$0xf0] }
 0x21b   : > { %v17705_v37 = vld [vmem:[%s18787_s3 + $0x1f44] sm:$0xf]  ;;  %v15201_v38 = vor.u32 %v17641_v23, %v15198_v27  ;;  %7188 = vmatpush.bf16.msrb.mxu1 %v14945_v35  ;;  %v19410_v23 = vpop.f32.mrf.mxu3 }
 0x21c   : > { %v15454_v40 = vld [vmem:[%s18787_s3 + $0x1f60] sm:$0xf0] }
 0x21d   : > { %v17505_v41 = vld [vmem:[%s18787_s3 + $0x1904] sm:$0xf]  ;;  %v15457_v47 = vor.u32 %v17705_v37, %v15454_v40  ;;  %7201 = vmatpush.bf16.msrb.mxu2 %v15201_v38  ;;  %v6924_v37 = vpop.f32.mrf.mxu0 }
 0x21e   : > { %v14654_v44 = vld [vmem:[%s18787_s3 + $0x1920] sm:$0xf0] }
 0x21f   : > { %v17569_v46 = vld [vmem:[%s18787_s3 + $0x1b04] sm:$0xf]  ;;  %v14657_v56 = vor.u32 %v17505_v41, %v14654_v44  ;;  %7214 = vmatpush.bf16.msrb.mxu3 %v15457_v47 }
 0x220   : > { %v14910_v48 = vld [vmem:[%s18787_s3 + $0x1b20] sm:$0xf0] }
 0x221   : > { %v17633_v50 = vld [vmem:[%s18787_s3 + $0x1d04] sm:$0xf]  ;;  %v14913_v60 = vor.u32 %v17569_v46, %v14910_v48  ;;  %7176 = vmatpush.bf16.msrb.mxu0 %v14657_v56 }
 0x222   : > { %v15166_v51 = vld [vmem:[%s18787_s3 + $0x1d20] sm:$0xf0] }
 0x223   : > { %v17697_v55 = vld [vmem:[%s18787_s3 + $0x1f04] sm:$0xf]  ;;  %v15169_v61 = vor.u32 %v17633_v50, %v15166_v51  ;;  %7189 = vmatpush.bf16.msrb.mxu1 %v14913_v60  ;;  %v6897_v60 = vadd.f32 %v19324_v52, %v6884_v33  ;;  %v11684_v52 = vld [vmem:[%s18787_s3 + $0x1c8] sm:$0xf] }
 0x224   : > { %v15422_v49 = vld [vmem:[%s18787_s3 + $0x1f20] sm:$0xf0] }
 0x225   : > { %v17497_v62 = vld [vmem:[%s18787_s3 + $0x18c4] sm:$0xf]  ;;  %v15425_v1 = vor.u32 %v17697_v55, %v15422_v49  ;;  %7202 = vmatpush.bf16.msrb.mxu2 %v15169_v61 }
 0x226   : > { %v14622_v63 = vld [vmem:[%s18787_s3 + $0x18e0] sm:$0xf0] }
 0x227   : > { %v17561_v0 = vld [vmem:[%s18787_s3 + $0x1ac4] sm:$0xf]  ;;  %v14625_v54 = vor.u32 %v17497_v62, %v14622_v63  ;;  %7215 = vmatpush.bf16.msrb.mxu3 %v15425_v1 }
 0x228   : > { %v14878_v2 = vld [vmem:[%s18787_s3 + $0x1ae0] sm:$0xf0] }
 0x229   : > { %v17625_v3 = vld [vmem:[%s18787_s3 + $0x1cc4] sm:$0xf]  ;;  %v14881_v10 = vor.u32 %v17561_v0, %v14878_v2  ;;  %7177 = vmatpush.bf16.msrb.mxu0 %v14625_v54  ;;  %v16766_v54 = vld [vmem:[%s18787_s3 + $0x1e4] sm:$0xf0] }
 0x22a   : > { %v15134_v4 = vld [vmem:[%s18787_s3 + $0x1ce0] sm:$0xf0]  ;;  %v11685_v37 = vor.u32 %v16766_v54, %v11684_v52  ;;  %v16806_v54 = vld [vmem:[%s18787_s3 + $0x324] sm:$0xf0] }
 0x22b   : > { %v17689_v6 = vld [vmem:[%s18787_s3 + $0x1ec4] sm:$0xf]  ;;  %v15137_v11 = vor.u32 %v17625_v3, %v15134_v4  ;;  %7190 = vmatpush.bf16.msrb.mxu1 %v14881_v10  ;;  %v6963_v10 = vpop.f32.mrf.mxu3 }
 0x22c   : > { %v15390_v8 = vld [vmem:[%s18787_s3 + $0x1ee0] sm:$0xf0]  ;;  %v16870_v10 = vld [vmem:[%s18787_s3 + $0x524] sm:$0xf0] }
 0x22d   : > { %v17489_v12 = vld [vmem:[%s18787_s3 + $0x1884] sm:$0xf]  ;;  %v15393_v15 = vor.u32 %v17689_v6, %v15390_v8  ;;  %7203 = vmatpush.bf16.msrb.mxu2 %v15137_v11  ;;  %v6950_v8 = vpop.f32.mrf.mxu2 }
 0x22e   : > { %v14590_v13 = vld [vmem:[%s18787_s3 + $0x18a0] sm:$0xf0]  ;;  %v11844_v8 = vld [vmem:[%s18787_s3 + $0x308] sm:$0xf] }
 0x22f   : > { %v17553_v14 = vld [vmem:[%s18787_s3 + $0x1a84] sm:$0xf]  ;;  %v14593_v40 = vor.u32 %v17489_v12, %v14590_v13  ;;  %7216 = vmatpush.bf16.msrb.mxu3 %v15393_v15  ;;  %v16830_v12 = vld [vmem:[%s18787_s3 + $0x3e4] sm:$0xf0]  ;;  %v6910_v15 = vadd.f32 %v19329_v58, %v6897_v60 }
 0x230   : > { %v14846_v18 = vld [vmem:[%s18787_s3 + $0x1aa0] sm:$0xf0]  ;;  %v12196_v13 = vld [vmem:[%s18787_s3 + $0x5c8] sm:$0xf]  ;;  %v11941_v28 = vor.u32 %v16830_v12, %v11940_v9  ;;  %v6974_v12 = vpop.f32.mrf.mxu0 }
 0x231   : > { %v17617_v19 = vld [vmem:[%s18787_s3 + $0x1c84] sm:$0xf]  ;;  %v14849_v35 = vor.u32 %v17553_v14, %v14846_v18  ;;  %7178 = vmatpush.bf16.msrb.mxu0 %v14593_v40  ;;  %v16894_v14 = vld [vmem:[%s18787_s3 + $0x5e4] sm:$0xf0]  ;;  %v6923_v40 = vadd.f32 %v19386_v53, %v6910_v15 }
 0x232   : > { %v15102_v20 = vld [vmem:[%s18787_s3 + $0x1ca0] sm:$0xf0]  ;;  %v12197_v33 = vor.u32 %v16894_v14, %v12196_v13  ;;  %v16758_v58 = vld [vmem:[%s18787_s3 + $0x1a4] sm:$0xf0] }
 0x233   : > { %v17681_v16 = vld [vmem:[%s18787_s3 + $0x1e84] sm:$0xf]  ;;  %v15105_v38 = vor.u32 %v17617_v19, %v15102_v20  ;;  %7191 = vmatpush.bf16.msrb.mxu1 %v14849_v35  ;;  %v12452_v20 = vld [vmem:[%s18787_s3 + $0x7c8] sm:$0xf] }
 0x234   : > { %v15358_v27 = vld [vmem:[%s18787_s3 + $0x1ea0] sm:$0xf0]  ;;  %v11652_v35 = vld [vmem:[%s18787_s3 + $0x188] sm:$0xf] }
 0x235   : > { %v17481_v41 = vld [vmem:[%s18787_s3 + $0x1844] sm:$0xf]  ;;  %v15361_v47 = vor.u32 %v17681_v16, %v15358_v27  ;;  %7204 = vmatpush.bf16.msrb.mxu2 %v15105_v38  ;;  %v16958_v16 = vld [vmem:[%s18787_s3 + $0x7e4] sm:$0xf0]  ;;  %v11653_v53 = vor.u32 %v16758_v58, %v11652_v35 }
 0x236   : > { %v14558_v44 = vld [vmem:[%s18787_s3 + $0x1860] sm:$0xf0]  ;;  %v11908_v38 = vld [vmem:[%s18787_s3 + $0x388] sm:$0xf] }
 0x237   : > { %v17545_v46 = vld [vmem:[%s18787_s3 + $0x1a44] sm:$0xf]  ;;  %v14561_v49 = vor.u32 %v17481_v41, %v14558_v44  ;;  %7217 = vmatpush.bf16.msrb.mxu3 %v15361_v47  ;;  %v12453_v41 = vor.u32 %v16958_v16, %v12452_v20  ;;  %v16822_v44 = vld [vmem:[%s18787_s3 + $0x3a4] sm:$0xf0]  ;;  %v11845_v20 = vor.u32 %v16806_v54, %v11844_v8 }
 0x238   : > { %v14814_v48 = vld [vmem:[%s18787_s3 + $0x1a60] sm:$0xf0]  ;;  %v16886_v47 = vld [vmem:[%s18787_s3 + $0x5a4] sm:$0xf0] }
 0x239   : > { %v17609_v50 = vld [vmem:[%s18787_s3 + $0x1c44] sm:$0xf]  ;;  %v14817_v61 = vor.u32 %v17545_v46, %v14814_v48  ;;  %7179 = vmatpush.bf16.msrb.mxu0 %v14561_v49  ;;  %v12164_v46 = vld [vmem:[%s18787_s3 + $0x588] sm:$0xf] }
 0x23a   : > { %v15070_v51 = vld [vmem:[%s18787_s3 + $0x1c60] sm:$0xf0]  ;;  %v12420_v48 = vld [vmem:[%s18787_s3 + $0x788] sm:$0xf] }
 0x23b   : > { %v17673_v55 = vld [vmem:[%s18787_s3 + $0x1e44] sm:$0xf]  ;;  %v15073_v62 = vor.u32 %v17609_v50, %v15070_v51  ;;  %7192 = vmatpush.bf16.msrb.mxu1 %v14817_v61  ;;  %v16950_v50 = vld [vmem:[%s18787_s3 + $0x7a4] sm:$0xf0]  ;;  %v6936_v51 = vadd.f32 %v19390_v57, %v6923_v40 }
 0x23c   : > { %v15326_v25 = vld [vmem:[%s18787_s3 + $0x1e60] sm:$0xf0]  ;;  %v11620_v49 = vld [vmem:[%s18787_s3 + $0x148] sm:$0xf]  ;;  %v12421_v60 = vor.u32 %v16950_v50, %v12420_v48 }
 0x23d   : > { %v17473_v56 = vld [vmem:[%s18787_s3 + $0x1804] sm:$0xf]  ;;  %v15329_v2 = vor.u32 %v17673_v55, %v15326_v25  ;;  %7205 = vmatpush.bf16.msrb.mxu2 %v15073_v62  ;;  %v11909_v55 = vor.u32 %v16822_v44, %v11908_v38  ;;  %v12165_v25 = vor.u32 %v16886_v47, %v12164_v46  ;;  %v16814_v61 = vld [vmem:[%s18787_s3 + $0x364] sm:$0xf0]  ;;  %v6949_v57 = vadd.f32 %v19405_v17, %v6936_v51 }
 0x23e   : > { %v14526_v59 = vld [vmem:[%s18787_s3 + $0x1820] sm:$0xf0]  ;;  %v12132_v62 = vld [vmem:[%s18787_s3 + $0x548] sm:$0xf] }
 0x23f   : > { %v17537_v63 = vld [vmem:[%s18787_s3 + $0x1a04] sm:$0xf]  ;;  %v14529_v11 = vor.u32 %v17473_v56, %v14526_v59  ;;  %7218 = vmatpush.bf16.msrb.mxu3 %v15329_v2  ;;  %v16750_v56 = vld [vmem:[%s18787_s3 + $0x164] sm:$0xf0] }
 0x240   : > { %v14782_v0 = vld [vmem:[%s18787_s3 + $0x1a20] sm:$0xf0]  ;;  %v11876_v59 = vld [vmem:[%s18787_s3 + $0x348] sm:$0xf]  ;;  %v11621_v2 = vor.u32 %v16750_v56, %v11620_v49 }
 0x241   : > { %v17601_v1 = vld [vmem:[%s18787_s3 + $0x1c04] sm:$0xf]  ;;  %v14785_v18 = vor.u32 %v17537_v63, %v14782_v0  ;;  %7180 = vmatpush.bf16.msrb.mxu0 %v14529_v11  ;;  %v16878_v63 = vld [vmem:[%s18787_s3 + $0x564] sm:$0xf0]  ;;  %v6962_v11 = vadd.f32 %v19410_v23, %v6949_v57  ;;  %v593_v57 = vld [vmem:[#allocation2 + $0x30] sm:$0xff] }
 0x242   : > { %v15038_v3 = vld [vmem:[%s18787_s3 + $0x1c20] sm:$0xf0]  ;;  %v12388_v0 = vld [vmem:[%s18787_s3 + $0x748] sm:$0xf] }
 0x243   : > { %v17665_v4 = vld [vmem:[%s18787_s3 + $0x1e04] sm:$0xf]  ;;  %v15041_v19 = vor.u32 %v17601_v1, %v15038_v3  ;;  %7193 = vmatpush.bf16.msrb.mxu1 %v14785_v18  ;;  %v16942_v1 = vld [vmem:[%s18787_s3 + $0x764] sm:$0xf0]  ;;  %v11877_v3 = vor.u32 %v16814_v61, %v11876_v59  ;;  %v6987_v18 = vpop.f32.mrf.mxu1 }
 0x244   : > { %v15294_v6 = vld [vmem:[%s18787_s3 + $0x1e20] sm:$0xf0]  ;;  %7181 = vmatmul.bf16.vlgmr.msrb.gmra.mxu0 %v19132_v24  ;;  %v11588_v17 = vld [vmem:[%s18787_s3 + $0x108] sm:$0xf]  ;;  %v12389_v52 = vor.u32 %v16942_v1, %v12388_v0 }
 0x245   : > { %v15297_v27 = vor.u32 %v17665_v4, %v15294_v6  ;;  %7206 = vmatpush.bf16.msrb.mxu2 %v15041_v19  ;;  %7225 = vmatpush.bf16.msra.mxu0 %v11685_v37  ;;  %v12133_v4 = vor.u32 %v16878_v63, %v12132_v62  ;;  %v16742_v6 = vld [vmem:[%s18787_s3 + $0x124] sm:$0xf0]  ;;  %v6975_v19 = vadd.f32 %v6974_v12, %v6962_v11  ;;  %v6976_v63 = vpop.f32.mrf.mxu0 }
 0x246   : > { %7194 = vmatmul.bf16.vlgmr.msrb.gmra.mxu1 %v19139_v32  ;;  %v12100_v9 = vld [vmem:[%s18787_s3 + $0x508] sm:$0xf]  ;;  %v11589_v15 = vor.u32 %v16742_v6, %v11588_v17 }
 0x247   : > { %7219 = vmatpush.bf16.msrb.mxu3 %v15297_v27  ;;  %7238 = vmatpush.bf16.msra.mxu1 %v11941_v28  ;;  %v12356_v13 = vld [vmem:[%s18787_s3 + $0x708] sm:$0xf]  ;;  %v12101_v16 = vor.u32 %v16870_v10, %v12100_v9  ;;  %v6988_v44 = vadd.f32 %v6987_v18, %v6975_v19 }
 0x248   : > { %7207 = vmatmul.bf16.vlgmr.msrb.gmra.mxu2 %v19137_v29  ;;  %v16934_v14 = vld [vmem:[%s18787_s3 + $0x724] sm:$0xf0] }
 0x249   : > { %7251 = vmatpush.bf16.msra.mxu2 %v12197_v33  ;;  %7226 = vmatpush.bf16.msra.mxu0 %v11653_v53  ;;  %v11556_v27 = vld [vmem:[%s18787_s3 + $0xc8] sm:$0xf]  ;;  %v12357_v40 = vor.u32 %v16934_v14, %v12356_v13 }
 0x24a   : > { %7220 = vmatmul.bf16.vlgmr.msrb.gmra.mxu3 %v19143_v36  ;;  %v16734_v37 = vld [vmem:[%s18787_s3 + $0xe4] sm:$0xf0] }
 0x24b   : > { %7264 = vmatpush.bf16.msra.mxu3 %v12453_v41  ;;  %7239 = vmatpush.bf16.msra.mxu1 %v11909_v55  ;;  %v11812_v23 = vld [vmem:[%s18787_s3 + $0x2c8] sm:$0xf]  ;;  %v11557_v41 = vor.u32 %v16734_v37, %v11556_v27  ;;  %v7000_v55 = vpop.f32.mrf.mxu2  ;;  %v6989_v1 = vpop.f32.mrf.mxu1 }
 0x24c   : > { %v16798_v28 = vld [vmem:[%s18787_s3 + $0x2e4] sm:$0xf0]  ;;  %v7001_v59 = vadd.f32 %v7000_v55, %v6988_v44 }
 0x24d   : > { %7252 = vmatpush.bf16.msra.mxu2 %v12165_v25  ;;  %7227 = vmatpush.bf16.msra.mxu0 %v11621_v2  ;;  %v12068_v33 = vld [vmem:[%s18787_s3 + $0x4c8] sm:$0xf]  ;;  %v11813_v46 = vor.u32 %v16798_v28, %v11812_v23 }
 0x24e   : > { %v16862_v35 = vld [vmem:[%s18787_s3 + $0x4e4] sm:$0xf0] }
 0x24f   : > { %7265 = vmatpush.bf16.msra.mxu3 %v12421_v60  ;;  %7240 = vmatpush.bf16.msra.mxu1 %v11877_v3  ;;  %v12324_v58 = vld [vmem:[%s18787_s3 + $0x6c8] sm:$0xf]  ;;  %v12069_v47 = vor.u32 %v16862_v35, %v12068_v33  ;;  %v7013_v60 = vpop.f32.mrf.mxu3 }
 0x250   : > { %v16926_v38 = vld [vmem:[%s18787_s3 + $0x6e4] sm:$0xf0]  ;;  %v7014_v2 = vadd.f32 %v7013_v60, %v7001_v59 }
 0x251   : > { %7253 = vmatpush.bf16.msra.mxu2 %v12133_v4  ;;  %7228 = vmatpush.bf16.msra.mxu0 %v11589_v15  ;;  %v11524_v48 = vld [vmem:[%s18787_s3 + $0x88] sm:$0xf]  ;;  %v12325_v51 = vor.u32 %v16926_v38, %v12324_v58 }
 0x252   : > { %v16726_v50 = vld [vmem:[%s18787_s3 + $0xa4] sm:$0xf0]  ;;  %v8473_v11 = vadd.f32 %v7014_v2, %v593_v57 }
 0x253   : > { %7266 = vmatpush.bf16.msra.mxu3 %v12389_v52  ;;  %7241 = vmatpush.bf16.msra.mxu1 %v11845_v20  ;;  %v11780_v53 = vld [vmem:[%s18787_s3 + $0x288] sm:$0xf]  ;;  %v11525_v0 = vor.u32 %v16726_v50, %v11524_v48  ;;  %v7002_v35 = vpop.f32.mrf.mxu2 }
 0x254   : > { %v16790_v25 = vld [vmem:[%s18787_s3 + $0x2a4] sm:$0xf0]  ;;  %8481 = vst [vmem:[#allocation2 + $0x30] sm:$0xff] %v8473_v11 }
 0x255   : > { %7254 = vmatpush.bf16.msra.mxu2 %v12101_v16  ;;  %v12036_v49 = vld [vmem:[%s18787_s3 + $0x488] sm:$0xf]  ;;  %7229 = vmatpush.bf16.msra.mxu0 %v11557_v41  ;;  %v11781_v3 = vor.u32 %v16790_v25, %v11780_v53 }
 0x256   : > { %v16854_v56 = vld [vmem:[%s18787_s3 + $0x4a4] sm:$0xf0] }
 0x257   : > { %7267 = vmatpush.bf16.msra.mxu3 %v12357_v40  ;;  %v12292_v61 = vld [vmem:[%s18787_s3 + $0x688] sm:$0xf]  ;;  %7242 = vmatpush.bf16.msra.mxu1 %v11813_v46  ;;  %v12037_v4 = vor.u32 %v16854_v56, %v12036_v49  ;;  %v7015_v44 = vpop.f32.mrf.mxu3 }
 0x258   : > { %v16918_v62 = vld [vmem:[%s18787_s3 + $0x6a4] sm:$0xf0] }
 0x259   : > { %7255 = vmatpush.bf16.msra.mxu2 %v12069_v47  ;;  %v11492_v17 = vld [vmem:[%s18787_s3 + $0x48] sm:$0xf]  ;;  %v12293_v52 = vor.u32 %v16918_v62, %v12292_v61  ;;  %7230 = vmatpush.bf16.msra.mxu0 %v11525_v0 }
 0x25a   : > { %v16718_v6 = vld [vmem:[%s18787_s3 + $0x64] sm:$0xf0] }
 0x25b   : > { %v11748_v8 = vld [vmem:[%s18787_s3 + $0x248] sm:$0xf]  ;;  %7268 = vmatpush.bf16.msra.mxu3 %v12325_v51  ;;  %v11493_v14 = vor.u32 %v16718_v6, %v11492_v17  ;;  %7243 = vmatpush.bf16.msra.mxu1 %v11781_v3 }
 0x25c   : > { %v16782_v54 = vld [vmem:[%s18787_s3 + $0x264] sm:$0xf0] }
 0x25d   : > { %v12004_v9 = vld [vmem:[%s18787_s3 + $0x448] sm:$0xf]  ;;  %7256 = vmatpush.bf16.msra.mxu2 %v12037_v4  ;;  %v11749_v20 = vor.u32 %v16782_v54, %v11748_v8  ;;  %7231 = vmatpush.bf16.msra.mxu0 %v11493_v14 }
 0x25e   : > { %v16846_v10 = vld [vmem:[%s18787_s3 + $0x464] sm:$0xf0] }
 0x25f   : > { %v12260_v12 = vld [vmem:[%s18787_s3 + $0x648] sm:$0xf]  ;;  %v12005_v16 = vor.u32 %v16846_v10, %v12004_v9  ;;  %7269 = vmatpush.bf16.msra.mxu3 %v12293_v52  ;;  %7244 = vmatpush.bf16.msra.mxu1 %v11749_v20 }
 0x260   : > { %v16910_v13 = vld [vmem:[%s18787_s3 + $0x664] sm:$0xf0] }
 0x261   : > { %v11460_v15 = vld [vmem:[%s18787_s3 + $0x8] sm:$0xf]  ;;  %v12261_v23 = vor.u32 %v16910_v13, %v12260_v12  ;;  %7257 = vmatpush.bf16.msra.mxu2 %v12005_v16 }
 0x262   : > { %v16710_v18 = vld [vmem:[%s18787_s3 + $0x24] sm:$0xf0] }
 0x263   : > { %v11716_v19 = vld [vmem:[%s18787_s3 + $0x208] sm:$0xf]  ;;  %v11461_v46 = vor.u32 %v16710_v18, %v11460_v15  ;;  %7270 = vmatpush.bf16.msra.mxu3 %v12261_v23 }
 0x264   : > { %v16774_v27 = vld [vmem:[%s18787_s3 + $0x224] sm:$0xf0] }
 0x265   : > { %v11972_v37 = vld [vmem:[%s18787_s3 + $0x408] sm:$0xf]  ;;  %v11717_v53 = vor.u32 %v16774_v27, %v11716_v19  ;;  %7232 = vmatpush.bf16.msra.mxu0 %v11461_v46 }
 0x266   : > { %v16838_v40 = vld [vmem:[%s18787_s3 + $0x424] sm:$0xf0] }
 0x267   : > { %v12228_v28 = vld [vmem:[%s18787_s3 + $0x608] sm:$0xf]  ;;  %v11973_v51 = vor.u32 %v16838_v40, %v11972_v37  ;;  %7245 = vmatpush.bf16.msra.mxu1 %v11717_v53  ;;  %v7039_v53 = vpop.f32.mrf.mxu1 }
 0x268   : > { %v16902_v33 = vld [vmem:[%s18787_s3 + $0x624] sm:$0xf0]  ;;  %7233 = vmatmul.bf16.vlgmr.msra.gmra.mxu0 %v18924_v21 }
 0x269   : > { %v12708_v58 = vld [vmem:[%s18787_s3 + $0x9c8] sm:$0xf]  ;;  %v12229_v49 = vor.u32 %v16902_v33, %v12228_v28  ;;  %7258 = vmatpush.bf16.msra.mxu2 %v11973_v51 }
 0x26a   : > { %v17022_v38 = vld [vmem:[%s18787_s3 + $0x9e4] sm:$0xf0]  ;;  %7246 = vmatmul.bf16.vlgmr.msra.gmra.mxu1 %v18927_v22 }
 0x26b   : > { %v12964_v41 = vld [vmem:[%s18787_s3 + $0xbc8] sm:$0xf]  ;;  %v12709_v56 = vor.u32 %v17022_v38, %v12708_v58  ;;  %7271 = vmatpush.bf16.msra.mxu3 %v12229_v49 }
 0x26c   : > { %v17086_v47 = vld [vmem:[%s18787_s3 + $0xbe4] sm:$0xf0]  ;;  %7259 = vmatmul.bf16.vlgmr.msra.gmra.mxu2 %v18910_v5 }
 0x26d   : > { %v13220_v48 = vld [vmem:[%s18787_s3 + $0xdc8] sm:$0xf]  ;;  %v12965_v59 = vor.u32 %v17086_v47, %v12964_v41  ;;  %7277 = vmatpush.bf16.msrb.mxu0 %v12709_v56  ;;  %v7026_v41 = vpop.f32.mrf.mxu0 }
 0x26e   : > { %v17150_v50 = vld [vmem:[%s18787_s3 + $0xde4] sm:$0xf0]  ;;  %7272 = vmatmul.bf16.vlgmr.msra.gmra.mxu3 %v18913_v7  ;;  %v7040_v56 = vadd.f32 %v7039_v53, %v7026_v41 }
 0x26f   : > { %v13476_v55 = vld [vmem:[%s18787_s3 + $0xfc8] sm:$0xf]  ;;  %v13221_v60 = vor.u32 %v17150_v50, %v13220_v48  ;;  %7290 = vmatpush.bf16.msrb.mxu1 %v12965_v59 }
 0x270   : > { %v17214_v25 = vld [vmem:[%s18787_s3 + $0xfe4] sm:$0xf0] }
 0x271   : > { %v12676_v61 = vld [vmem:[%s18787_s3 + $0x988] sm:$0xf]  ;;  %v13477_v57 = vor.u32 %v17214_v25, %v13476_v55  ;;  %7303 = vmatpush.bf16.msrb.mxu2 %v13221_v60 }
 0x272   : > { %v17014_v62 = vld [vmem:[%s18787_s3 + $0x9a4] sm:$0xf0] }
 0x273   : > { %v12932_v63 = vld [vmem:[%s18787_s3 + $0xb88] sm:$0xf]  ;;  %v12677_v17 = vor.u32 %v17014_v62, %v12676_v61  ;;  %7316 = vmatpush.bf16.msrb.mxu3 %v13477_v57 }
 0x274   : > { %v17078_v0 = vld [vmem:[%s18787_s3 + $0xba4] sm:$0xf0] }
 0x275   : > { %v13188_v1 = vld [vmem:[%s18787_s3 + $0xd88] sm:$0xf]  ;;  %v12933_v6 = vor.u32 %v17078_v0, %v12932_v63  ;;  %7278 = vmatpush.bf16.msrb.mxu0 %v12677_v17 }
 0x276   : > { %v17142_v2 = vld [vmem:[%s18787_s3 + $0xda4] sm:$0xf0] }
 0x277   : > { %v13444_v3 = vld [vmem:[%s18787_s3 + $0xf88] sm:$0xf]  ;;  %v13189_v8 = vor.u32 %v17142_v2, %v13188_v1  ;;  %7291 = vmatpush.bf16.msrb.mxu1 %v12933_v6  ;;  %v7052_v2 = vpop.f32.mrf.mxu2 }
 0x278   : > { %v17206_v4 = vld [vmem:[%s18787_s3 + $0xfa4] sm:$0xf0] }
 0x279   : > { %v12644_v52 = vld [vmem:[%s18787_s3 + $0x948] sm:$0xf]  ;;  %v13445_v10 = vor.u32 %v17206_v4, %v13444_v3  ;;  %7304 = vmatpush.bf16.msrb.mxu2 %v13189_v8  ;;  %v7053_v8 = vadd.f32 %v7052_v2, %v7040_v56 }
 0x27a   : > { %v17006_v54 = vld [vmem:[%s18787_s3 + $0x964] sm:$0xf0] }
 0x27b   : > { %v12900_v9 = vld [vmem:[%s18787_s3 + $0xb48] sm:$0xf]  ;;  %v12645_v18 = vor.u32 %v17006_v54, %v12644_v52  ;;  %7317 = vmatpush.bf16.msrb.mxu3 %v13445_v10  ;;  %v7065_v52 = vpop.f32.mrf.mxu3 }
 0x27c   : > { %v17070_v11 = vld [vmem:[%s18787_s3 + $0xb64] sm:$0xf0] }
 0x27d   : > { %v13156_v12 = vld [vmem:[%s18787_s3 + $0xd48] sm:$0xf]  ;;  %v12901_v19 = vor.u32 %v17070_v11, %v12900_v9  ;;  %7279 = vmatpush.bf16.msrb.mxu0 %v12645_v18  ;;  %v19557_v11 = vadd.f32 %v7065_v52, %v7053_v8 }
 0x27e   : > { %v17134_v13 = vld [vmem:[%s18787_s3 + $0xd64] sm:$0xf0] }
 0x27f   : > { %v13412_v14 = vld [vmem:[%s18787_s3 + $0xf48] sm:$0xf]  ;;  %v13157_v20 = vor.u32 %v17134_v13, %v13156_v12  ;;  %7292 = vmatpush.bf16.msrb.mxu1 %v12901_v19  ;;  %v7028_v12 = vpop.f32.mrf.mxu0 }
 0x280   : > { %v17198_v15 = vld [vmem:[%s18787_s3 + $0xf64] sm:$0xf0] }
 0x281   : > { %v12612_v16 = vld [vmem:[%s18787_s3 + $0x908] sm:$0xf]  ;;  %v13413_v23 = vor.u32 %v17198_v15, %v13412_v14  ;;  %7305 = vmatpush.bf16.msrb.mxu2 %v13157_v20  ;;  %v7041_v20 = vpop.f32.mrf.mxu1 }
 0x282   : > { %v16998_v27 = vld [vmem:[%s18787_s3 + $0x924] sm:$0xf0] }
 0x283   : > { %v12868_v37 = vld [vmem:[%s18787_s3 + $0xb08] sm:$0xf]  ;;  %v12613_v38 = vor.u32 %v16998_v27, %v12612_v16  ;;  %7318 = vmatpush.bf16.msrb.mxu3 %v13413_v23 }
 0x284   : > { %v17062_v40 = vld [vmem:[%s18787_s3 + $0xb24] sm:$0xf0] }
 0x285   : > { %v13124_v28 = vld [vmem:[%s18787_s3 + $0xd08] sm:$0xf]  ;;  %v12869_v44 = vor.u32 %v17062_v40, %v12868_v37  ;;  %7280 = vmatpush.bf16.msrb.mxu0 %v12613_v38 }
 0x286   : > { %v17126_v33 = vld [vmem:[%s18787_s3 + $0xd24] sm:$0xf0] }
 0x287   : > { %v13380_v35 = vld [vmem:[%s18787_s3 + $0xf08] sm:$0xf]  ;;  %v13125_v46 = vor.u32 %v17126_v33, %v13124_v28  ;;  %7293 = vmatpush.bf16.msrb.mxu1 %v12869_v44 }
 0x288   : > { %v17190_v58 = vld [vmem:[%s18787_s3 + $0xf24] sm:$0xf0] }
 0x289   : > { %v12580_v47 = vld [vmem:[%s18787_s3 + $0x8c8] sm:$0xf]  ;;  %v13381_v51 = vor.u32 %v17190_v58, %v13380_v35  ;;  %7306 = vmatpush.bf16.msrb.mxu2 %v13125_v46 }
 0x28a   : > { %v16990_v48 = vld [vmem:[%s18787_s3 + $0x8e4] sm:$0xf0] }
 0x28b   : > { %v12836_v50 = vld [vmem:[%s18787_s3 + $0xac8] sm:$0xf]  ;;  %v12581_v61 = vor.u32 %v16990_v48, %v12580_v47  ;;  %7319 = vmatpush.bf16.msrb.mxu3 %v13381_v51  ;;  %v7054_v48 = vpop.f32.mrf.mxu2 }
 0x28c   : > { %v17054_v55 = vld [vmem:[%s18787_s3 + $0xae4] sm:$0xf0] }
 0x28d   : > { %v13092_v25 = vld [vmem:[%s18787_s3 + $0xcc8] sm:$0xf]  ;;  %v12837_v62 = vor.u32 %v17054_v55, %v12836_v50  ;;  %7281 = vmatpush.bf16.msrb.mxu0 %v12581_v61 }
 0x28e   : > { %v17118_v49 = vld [vmem:[%s18787_s3 + $0xce4] sm:$0xf0] }
 0x28f   : > { %v13348_v59 = vld [vmem:[%s18787_s3 + $0xec8] sm:$0xf]  ;;  %v13093_v63 = vor.u32 %v17118_v49, %v13092_v25  ;;  %7294 = vmatpush.bf16.msrb.mxu1 %v12837_v62  ;;  %v7067_v25 = vpop.f32.mrf.mxu3 }
 0x290   : > { %v17182_v60 = vld [vmem:[%s18787_s3 + $0xee4] sm:$0xf0] }
 0x291   : > { %v12548_v57 = vld [vmem:[%s18787_s3 + $0x888] sm:$0xf]  ;;  %v13349_v3 = vor.u32 %v17182_v60, %v13348_v59  ;;  %7307 = vmatpush.bf16.msrb.mxu2 %v13093_v63 }
 0x292   : > { %v16982_v0 = vld [vmem:[%s18787_s3 + $0x8a4] sm:$0xf0] }
 0x293   : > { %v12804_v1 = vld [vmem:[%s18787_s3 + $0xa88] sm:$0xf]  ;;  %v12549_v10 = vor.u32 %v16982_v0, %v12548_v57  ;;  %7320 = vmatpush.bf16.msrb.mxu3 %v13349_v3 }
 0x294   : > { %v17046_v4 = vld [vmem:[%s18787_s3 + $0xaa4] sm:$0xf0] }
 0x295   : > { %v13060_v17 = vld [vmem:[%s18787_s3 + $0xc88] sm:$0xf]  ;;  %v12805_v13 = vor.u32 %v17046_v4, %v12804_v1  ;;  %7282 = vmatpush.bf16.msrb.mxu0 %v12549_v10 }
 0x296   : > { %v17110_v6 = vld [vmem:[%s18787_s3 + $0xca4] sm:$0xf0] }
 0x297   : > { %v13316_v54 = vld [vmem:[%s18787_s3 + $0xe88] sm:$0xf]  ;;  %v13061_v14 = vor.u32 %v17110_v6, %v13060_v17  ;;  %7295 = vmatpush.bf16.msrb.mxu1 %v12805_v13 }
 0x298   : > { %v17174_v9 = vld [vmem:[%s18787_s3 + $0xea4] sm:$0xf0] }
 0x299   : > { %v12516_v15 = vld [vmem:[%s18787_s3 + $0x848] sm:$0xf]  ;;  %v13317_v16 = vor.u32 %v17174_v9, %v13316_v54  ;;  %7308 = vmatpush.bf16.msrb.mxu2 %v13061_v14 }
 0x29a   : > { %v16974_v18 = vld [vmem:[%s18787_s3 + $0x864] sm:$0xf0] }
 0x29b   : > { %v12772_v19 = vld [vmem:[%s18787_s3 + $0xa48] sm:$0xf]  ;;  %v12517_v33 = vor.u32 %v16974_v18, %v12516_v15  ;;  %7321 = vmatpush.bf16.msrb.mxu3 %v13317_v16 }
 0x29c   : > { %v17038_v27 = vld [vmem:[%s18787_s3 + $0xa64] sm:$0xf0] }
 0x29d   : > { %v13028_v37 = vld [vmem:[%s18787_s3 + $0xc48] sm:$0xf]  ;;  %v12773_v38 = vor.u32 %v17038_v27, %v12772_v19  ;;  %7283 = vmatpush.bf16.msrb.mxu0 %v12517_v33 }
 0x29e   : > { %v17102_v23 = vld [vmem:[%s18787_s3 + $0xc64] sm:$0xf0] }
 0x29f   : > { %v13284_v40 = vld [vmem:[%s18787_s3 + $0xe48] sm:$0xf]  ;;  %v13029_v41 = vor.u32 %v17102_v23, %v13028_v37  ;;  %7296 = vmatpush.bf16.msrb.mxu1 %v12773_v38 }
 0x2a0   : > { %v17166_v28 = vld [vmem:[%s18787_s3 + $0xe64] sm:$0xf0] }
 0x2a1   : > { %v12484_v35 = vld [vmem:[%s18787_s3 + $0x808] sm:$0xf]  ;;  %v13285_v50 = vor.u32 %v17166_v28, %v13284_v40  ;;  %7309 = vmatpush.bf16.msrb.mxu2 %v13029_v41 }
 0x2a2   : > { %v16966_v58 = vld [vmem:[%s18787_s3 + $0x824] sm:$0xf0] }
 0x2a3   : > { %v12740_v44 = vld [vmem:[%s18787_s3 + $0xa08] sm:$0xf]  ;;  %v12485_v60 = vor.u32 %v16966_v58, %v12484_v35  ;;  %7322 = vmatpush.bf16.msrb.mxu3 %v13285_v50 }
 0x2a4   : > { %v17030_v46 = vld [vmem:[%s18787_s3 + $0xa24] sm:$0xf0] }
 0x2a5   : > { %v12996_v47 = vld [vmem:[%s18787_s3 + $0xc08] sm:$0xf]  ;;  %v12741_v57 = vor.u32 %v17030_v46, %v12740_v44  ;;  %7284 = vmatpush.bf16.msrb.mxu0 %v12485_v60 }
 0x2a6   : > { %v17094_v53 = vld [vmem:[%s18787_s3 + $0xc24] sm:$0xf0] }
 0x2a7   : > { %v13252_v51 = vld [vmem:[%s18787_s3 + $0xe08] sm:$0xf]  ;;  %v12997_v0 = vor.u32 %v17094_v53, %v12996_v47  ;;  %7297 = vmatpush.bf16.msrb.mxu1 %v12741_v57 }
 0x2a8   : > { %v17158_v55 = vld [vmem:[%s18787_s3 + $0xe24] sm:$0xf0]  ;;  %7285 = vmatmul.bf16.vlgmr.msrb.gmra.mxu0 %v18983_v42 }
 0x2a9   : > { %v13732_v49 = vld [vmem:[%s18787_s3 + $0x11c8] sm:$0xf]  ;;  %v13253_v3 = vor.u32 %v17158_v55, %v13252_v51  ;;  %7310 = vmatpush.bf16.msrb.mxu2 %v12997_v0  ;;  %v19616_v0 = vpop.f32.mrf.mxu1 }
 0x2aa   : > { %v17278_v56 = vld [vmem:[%s18787_s3 + $0x11e4] sm:$0xf0]  ;;  %7298 = vmatmul.bf16.vlgmr.msrb.gmra.mxu1 %v18987_v45 }
 0x2ab   : > { %v13988_v59 = vld [vmem:[%s18787_s3 + $0x13c8] sm:$0xf]  ;;  %v13733_v4 = vor.u32 %v17278_v56, %v13732_v49  ;;  %7323 = vmatpush.bf16.msrb.mxu3 %v13253_v3 }
 0x2ac   : > { %v17342_v61 = vld [vmem:[%s18787_s3 + $0x13e4] sm:$0xf0]  ;;  %7311 = vmatmul.bf16.vlgmr.msrb.gmra.mxu2 %v18979_v39 }
 0x2ad   : > { %v14244_v62 = vld [vmem:[%s18787_s3 + $0x15c8] sm:$0xf]  ;;  %v13989_v17 = vor.u32 %v17342_v61, %v13988_v59  ;;  %7329 = vmatpush.bf16.msra.mxu0 %v13733_v4  ;;  %v19611_v59 = vpop.f32.mrf.mxu0 }
 0x2ae   : > { %v17406_v63 = vld [vmem:[%s18787_s3 + $0x15e4] sm:$0xf0]  ;;  %7324 = vmatmul.bf16.vlgmr.msrb.gmra.mxu3 %v18985_v43 }
 0x2af   : > { %v14500_v1 = vld [vmem:[%s18787_s3 + $0x17c8] sm:$0xf]  ;;  %v14245_v6 = vor.u32 %v17406_v63, %v14244_v62  ;;  %7342 = vmatpush.bf16.msra.mxu1 %v13989_v17 }
 0x2b0   : > { %v17470_v2 = vld [vmem:[%s18787_s3 + $0x17e4] sm:$0xf0] }
 0x2b1   : > { %v13700_v8 = vld [vmem:[%s18787_s3 + $0x1188] sm:$0xf]  ;;  %v14501_v9 = vor.u32 %v17470_v2, %v14500_v1  ;;  %7355 = vmatpush.bf16.msra.mxu2 %v14245_v6 }
 0x2b2   : > { %v17270_v52 = vld [vmem:[%s18787_s3 + $0x11a4] sm:$0xf0] }
 0x2b3   : > { %v13956_v54 = vld [vmem:[%s18787_s3 + $0x1388] sm:$0xf]  ;;  %v13701_v18 = vor.u32 %v17270_v52, %v13700_v8  ;;  %7368 = vmatpush.bf16.msra.mxu3 %v14501_v9 }
 0x2b4   : > { %v17334_v10 = vld [vmem:[%s18787_s3 + $0x13a4] sm:$0xf0] }
 0x2b5   : > { %v14212_v12 = vld [vmem:[%s18787_s3 + $0x1588] sm:$0xf]  ;;  %v13957_v19 = vor.u32 %v17334_v10, %v13956_v54  ;;  %7330 = vmatpush.bf16.msra.mxu0 %v13701_v18 }
 0x2b6   : > { %v17398_v13 = vld [vmem:[%s18787_s3 + $0x15a4] sm:$0xf0] }
 0x2b7   : > { %v14468_v14 = vld [vmem:[%s18787_s3 + $0x1788] sm:$0xf]  ;;  %v14213_v20 = vor.u32 %v17398_v13, %v14212_v12  ;;  %7343 = vmatpush.bf16.msra.mxu1 %v13957_v19  ;;  %v19626_v13 = vpop.f32.mrf.mxu2 }
 0x2b8   : > { %v17462_v15 = vld [vmem:[%s18787_s3 + $0x17a4] sm:$0xf0] }
 0x2b9   : > { %v13668_v16 = vld [vmem:[%s18787_s3 + $0x1148] sm:$0xf]  ;;  %v14469_v23 = vor.u32 %v17462_v15, %v14468_v14  ;;  %7356 = vmatpush.bf16.msra.mxu2 %v14213_v20  ;;  %v19631_v20 = vpop.f32.mrf.mxu3 }
 0x2ba   : > { %v17262_v27 = vld [vmem:[%s18787_s3 + $0x1164] sm:$0xf0] }
 0x2bb   : > { %v13924_v37 = vld [vmem:[%s18787_s3 + $0x1348] sm:$0xf]  ;;  %v13669_v38 = vor.u32 %v17262_v27, %v13668_v16  ;;  %7369 = vmatpush.bf16.msra.mxu3 %v14469_v23  ;;  %v7080_v23 = vpop.f32.mrf.mxu0 }
 0x2bc   : > { %v17326_v40 = vld [vmem:[%s18787_s3 + $0x1364] sm:$0xf0] }
 0x2bd   : > { %v14180_v28 = vld [vmem:[%s18787_s3 + $0x1548] sm:$0xf]  ;;  %v13925_v41 = vor.u32 %v17326_v40, %v13924_v37  ;;  %7331 = vmatpush.bf16.msra.mxu0 %v13669_v38  ;;  %v7093_v38 = vpop.f32.mrf.mxu1 }
 0x2be   : > { %v17390_v33 = vld [vmem:[%s18787_s3 + $0x1564] sm:$0xf0] }
 0x2bf   : > { %v14436_v35 = vld [vmem:[%s18787_s3 + $0x1748] sm:$0xf]  ;;  %v14181_v44 = vor.u32 %v17390_v33, %v14180_v28  ;;  %7344 = vmatpush.bf16.msra.mxu1 %v13925_v41 }
 0x2c0   : > { %v17454_v58 = vld [vmem:[%s18787_s3 + $0x1764] sm:$0xf0] }
 0x2c1   : > { %v13636_v46 = vld [vmem:[%s18787_s3 + $0x1108] sm:$0xf]  ;;  %v14437_v50 = vor.u32 %v17454_v58, %v14436_v35  ;;  %7357 = vmatpush.bf16.msra.mxu2 %v14181_v44 }
 0x2c2   : > { %v17254_v47 = vld [vmem:[%s18787_s3 + $0x1124] sm:$0xf0] }
 0x2c3   : > { %v13892_v48 = vld [vmem:[%s18787_s3 + $0x1308] sm:$0xf]  ;;  %v13637_v56 = vor.u32 %v17254_v47, %v13636_v46  ;;  %7370 = vmatpush.bf16.msra.mxu3 %v14437_v50 }
 0x2c4   : > { %v17318_v53 = vld [vmem:[%s18787_s3 + $0x1324] sm:$0xf0] }
 0x2c5   : > { %v14148_v51 = vld [vmem:[%s18787_s3 + $0x1508] sm:$0xf]  ;;  %v13893_v60 = vor.u32 %v17318_v53, %v13892_v48  ;;  %7332 = vmatpush.bf16.msra.mxu0 %v13637_v56 }
 0x2c6   : > { %v17382_v55 = vld [vmem:[%s18787_s3 + $0x1524] sm:$0xf0] }
 0x2c7   : > { %v14404_v25 = vld [vmem:[%s18787_s3 + $0x1708] sm:$0xf]  ;;  %v14149_v61 = vor.u32 %v17382_v55, %v14148_v51  ;;  %7345 = vmatpush.bf16.msra.mxu1 %v13893_v60 }
 0x2c8   : > { %v17446_v49 = vld [vmem:[%s18787_s3 + $0x1724] sm:$0xf0] }
 0x2c9   : > { %v13604_v62 = vld [vmem:[%s18787_s3 + $0x10c8] sm:$0xf]  ;;  %v14405_v1 = vor.u32 %v17446_v49, %v14404_v25  ;;  %7358 = vmatpush.bf16.msra.mxu2 %v14149_v61 }
 0x2ca   : > { %v17246_v63 = vld [vmem:[%s18787_s3 + $0x10e4] sm:$0xf0] }
 0x2cb   : > { %v13860_v57 = vld [vmem:[%s18787_s3 + $0x12c8] sm:$0xf]  ;;  %v13605_v8 = vor.u32 %v17246_v63, %v13604_v62  ;;  %7371 = vmatpush.bf16.msra.mxu3 %v14405_v1  ;;  %v7106_v62 = vpop.f32.mrf.mxu2 }
 0x2cc   : > { %v17310_v2 = vld [vmem:[%s18787_s3 + $0x12e4] sm:$0xf0] }
 0x2cd   : > { %v14116_v3 = vld [vmem:[%s18787_s3 + $0x14c8] sm:$0xf]  ;;  %v13861_v52 = vor.u32 %v17310_v2, %v13860_v57  ;;  %7333 = vmatpush.bf16.msra.mxu0 %v13605_v8 }
 0x2ce   : > { %v17374_v4 = vld [vmem:[%s18787_s3 + $0x14e4] sm:$0xf0] }
 0x2cf   : > { %v14372_v17 = vld [vmem:[%s18787_s3 + $0x16c8] sm:$0xf]  ;;  %v14117_v54 = vor.u32 %v17374_v4, %v14116_v3  ;;  %7346 = vmatpush.bf16.msra.mxu1 %v13861_v52  ;;  %v7119_v3 = vpop.f32.mrf.mxu3 }
 0x2d0   : > { %v17438_v6 = vld [vmem:[%s18787_s3 + $0x16e4] sm:$0xf0] }
 0x2d1   : > { %v13572_v9 = vld [vmem:[%s18787_s3 + $0x1088] sm:$0xf]  ;;  %v14373_v14 = vor.u32 %v17438_v6, %v14372_v17  ;;  %7359 = vmatpush.bf16.msra.mxu2 %v14117_v54 }
 0x2d2   : > { %v17238_v10 = vld [vmem:[%s18787_s3 + $0x10a4] sm:$0xf0] }
 0x2d3   : > { %v13828_v12 = vld [vmem:[%s18787_s3 + $0x1288] sm:$0xf]  ;;  %v13573_v37 = vor.u32 %v17238_v10, %v13572_v9  ;;  %7372 = vmatpush.bf16.msra.mxu3 %v14373_v14 }
 0x2d4   : > { %v17302_v15 = vld [vmem:[%s18787_s3 + $0x12a4] sm:$0xf0] }
 0x2d5   : > { %v14084_v18 = vld [vmem:[%s18787_s3 + $0x1488] sm:$0xf]  ;;  %v13829_v40 = vor.u32 %v17302_v15, %v13828_v12  ;;  %7334 = vmatpush.bf16.msra.mxu0 %v13573_v37 }
 0x2d6   : > { %v17366_v19 = vld [vmem:[%s18787_s3 + $0x14a4] sm:$0xf0] }
 0x2d7   : > { %v14340_v16 = vld [vmem:[%s18787_s3 + $0x1688] sm:$0xf]  ;;  %v14085_v28 = vor.u32 %v17366_v19, %v14084_v18  ;;  %7347 = vmatpush.bf16.msra.mxu1 %v13829_v40 }
 0x2d8   : > { %v17430_v27 = vld [vmem:[%s18787_s3 + $0x16a4] sm:$0xf0] }
 0x2d9   : > { %v13540_v33 = vld [vmem:[%s18787_s3 + $0x1048] sm:$0xf]  ;;  %v14341_v41 = vor.u32 %v17430_v27, %v14340_v16  ;;  %7360 = vmatpush.bf16.msra.mxu2 %v14085_v28 }
 0x2da   : > { %v17230_v35 = vld [vmem:[%s18787_s3 + $0x1064] sm:$0xf0] }
 0x2db   : > { %v13796_v58 = vld [vmem:[%s18787_s3 + $0x1248] sm:$0xf]  ;;  %v13541_v53 = vor.u32 %v17230_v35, %v13540_v33  ;;  %7373 = vmatpush.bf16.msra.mxu3 %v14341_v41 }
 0x2dc   : > { %v17294_v44 = vld [vmem:[%s18787_s3 + $0x1264] sm:$0xf0] }
 0x2dd   : > { %v14052_v46 = vld [vmem:[%s18787_s3 + $0x1448] sm:$0xf]  ;;  %v13797_v25 = vor.u32 %v17294_v44, %v13796_v58  ;;  %7335 = vmatpush.bf16.msra.mxu0 %v13541_v53 }
 0x2de   : > { %v17358_v47 = vld [vmem:[%s18787_s3 + $0x1464] sm:$0xf0] }
 0x2df   : > { %v14308_v48 = vld [vmem:[%s18787_s3 + $0x1648] sm:$0xf]  ;;  %v14053_v49 = vor.u32 %v17358_v47, %v14052_v46  ;;  %7348 = vmatpush.bf16.msra.mxu1 %v13797_v25 }
 0x2e0   : > { %v17422_v50 = vld [vmem:[%s18787_s3 + $0x1664] sm:$0xf0] }
 0x2e1   : > { %v13508_v51 = vld [vmem:[%s18787_s3 + $0x1008] sm:$0xf]  ;;  %v14309_v63 = vor.u32 %v17422_v50, %v14308_v48  ;;  %7361 = vmatpush.bf16.msra.mxu2 %v14053_v49 }
 0x2e2   : > { %v17222_v55 = vld [vmem:[%s18787_s3 + $0x1024] sm:$0xf0] }
 0x2e3   : > { %v13764_v56 = vld [vmem:[%s18787_s3 + $0x1208] sm:$0xf]  ;;  %v13509_v8 = vor.u32 %v17222_v55, %v13508_v51  ;;  %7374 = vmatpush.bf16.msra.mxu3 %v14309_v63 }
 0x2e4   : > { %v17286_v60 = vld [vmem:[%s18787_s3 + $0x1224] sm:$0xf0] }
 0x2e5   : > { %v14020_v61 = vld [vmem:[%s18787_s3 + $0x1408] sm:$0xf]  ;;  %v13765_v10 = vor.u32 %v17286_v60, %v13764_v56  ;;  %7336 = vmatpush.bf16.msra.mxu0 %v13509_v8  ;;  %v19685_v8 = vpop.f32.mrf.mxu0 }
 0x2e6   : > { %v17350_v57 = vld [vmem:[%s18787_s3 + $0x1424] sm:$0xf0] }
 0x2e7   : > { %v14276_v1 = vld [vmem:[%s18787_s3 + $0x1608] sm:$0xf]  ;;  %v14021_v12 = vor.u32 %v17350_v57, %v14020_v61  ;;  %7349 = vmatpush.bf16.msra.mxu1 %v13765_v10  ;;  %v19689_v10 = vpop.f32.mrf.mxu1 }
 0x2e8   : > { %v17414_v2 = vld [vmem:[%s18787_s3 + $0x1624] sm:$0xf0]  ;;  %7337 = vmatmul.bf16.vlgmr.msra.gmra.mxu0 %v19054_v26 }
 0x2e9   : > { %v14756_v4 = vld [vmem:[%s18787_s3 + $0x19c8] sm:$0xf]  ;;  %v14277_v18 = vor.u32 %v17414_v2, %v14276_v1  ;;  %7362 = vmatpush.bf16.msra.mxu2 %v14021_v12 }
 0x2ea   : > { %v17534_v17 = vld [vmem:[%s18787_s3 + $0x19e4] sm:$0xf0]  ;;  %7350 = vmatmul.bf16.vlgmr.msra.gmra.mxu1 %v19061_v31 }
 0x2eb   : > { %v15012_v6 = vld [vmem:[%s18787_s3 + $0x1bc8] sm:$0xf]  ;;  %v14757_v19 = vor.u32 %v17534_v17, %v14756_v4  ;;  %7375 = vmatpush.bf16.msra.mxu3 %v14277_v18 }
 0x2ec   : > { %v17598_v52 = vld [vmem:[%s18787_s3 + $0x1be4] sm:$0xf0]  ;;  %7363 = vmatmul.bf16.vlgmr.msra.gmra.mxu2 %v19059_v30 }
 0x2ed   : > { %v15268_v54 = vld [vmem:[%s18787_s3 + $0x1dc8] sm:$0xf]  ;;  %v15013_v16 = vor.u32 %v17598_v52, %v15012_v6  ;;  %7381 = vmatpush.bf16.msrb.mxu0 %v14757_v19 }
 0x2ee   : > { %v17662_v9 = vld [vmem:[%s18787_s3 + $0x1de4] sm:$0xf0]  ;;  %7376 = vmatmul.bf16.vlgmr.msra.gmra.mxu3 %v19065_v34 }
 0x2ef   : > { %v15524_v14 = vld [vmem:[%s18787_s3 + $0x1fc8] sm:$0xf]  ;;  %v15269_v27 = vor.u32 %v17662_v9, %v15268_v54  ;;  %7394 = vmatpush.bf16.msrb.mxu1 %v15013_v16 }
 0x2f0   : > { %v17726_v15 = vld [vmem:[%s18787_s3 + $0x1fe4] sm:$0xf0] }
 0x2f1   : > { %v14724_v37 = vld [vmem:[%s18787_s3 + $0x1988] sm:$0xf]  ;;  %v15525_v28 = vor.u32 %v17726_v15, %v15524_v14  ;;  %7407 = vmatpush.bf16.msrb.mxu2 %v15269_v27 }
 0x2f2   : > { %v17526_v23 = vld [vmem:[%s18787_s3 + $0x19a4] sm:$0xf0] }
 0x2f3   : > { %v14980_v40 = vld [vmem:[%s18787_s3 + $0x1b88] sm:$0xf]  ;;  %v14725_v44 = vor.u32 %v17526_v23, %v14724_v37  ;;  %7420 = vmatpush.bf16.msrb.mxu3 %v15525_v28 }
 0x2f4   : > { %v17590_v33 = vld [vmem:[%s18787_s3 + $0x1ba4] sm:$0xf0] }
 0x2f5   : > { %v15236_v35 = vld [vmem:[%s18787_s3 + $0x1d88] sm:$0xf]  ;;  %v14981_v46 = vor.u32 %v17590_v33, %v14980_v40  ;;  %7382 = vmatpush.bf16.msrb.mxu0 %v14725_v44 }
 0x2f6   : > { %v17654_v58 = vld [vmem:[%s18787_s3 + $0x1da4] sm:$0xf0] }
 0x2f7   : > { %v15492_v38 = vld [vmem:[%s18787_s3 + $0x1f88] sm:$0xf]  ;;  %v15237_v47 = vor.u32 %v17654_v58, %v15236_v35  ;;  %7395 = vmatpush.bf16.msrb.mxu1 %v14981_v46  ;;  %v7079_v35 = vadd.f32 %v19611_v59, %v19557_v11 }
 0x2f8   : > { %v17718_v41 = vld [vmem:[%s18787_s3 + $0x1fa4] sm:$0xf0] }
 0x2f9   : > { %v14692_v48 = vld [vmem:[%s18787_s3 + $0x1948] sm:$0xf]  ;;  %v15493_v51 = vor.u32 %v17718_v41, %v15492_v38  ;;  %7408 = vmatpush.bf16.msrb.mxu2 %v15237_v47 }
 0x2fa   : > { %v17518_v50 = vld [vmem:[%s18787_s3 + $0x1964] sm:$0xf0] }
 0x2fb   : > { %v14948_v53 = vld [vmem:[%s18787_s3 + $0x1b48] sm:$0xf]  ;;  %v14693_v61 = vor.u32 %v17518_v50, %v14692_v48  ;;  %7421 = vmatpush.bf16.msrb.mxu3 %v15493_v51  ;;  %v19704_v48 = vpop.f32.mrf.mxu2 }
 0x2fc   : > { %v17582_v55 = vld [vmem:[%s18787_s3 + $0x1b64] sm:$0xf0] }
 0x2fd   : > { %v15204_v25 = vld [vmem:[%s18787_s3 + $0x1d48] sm:$0xf]  ;;  %v14949_v62 = vor.u32 %v17582_v55, %v14948_v53  ;;  %7383 = vmatpush.bf16.msrb.mxu0 %v14693_v61  ;;  %v19709_v55 = vpop.f32.mrf.mxu3 }
 0x2fe   : > { %v17646_v49 = vld [vmem:[%s18787_s3 + $0x1d64] sm:$0xf0] }
 0x2ff   : > { %v15460_v56 = vld [vmem:[%s18787_s3 + $0x1f48] sm:$0xf]  ;;  %v15205_v63 = vor.u32 %v17646_v49, %v15204_v25  ;;  %7396 = vmatpush.bf16.msrb.mxu1 %v14949_v62  ;;  %v7132_v25 = vpop.f32.mrf.mxu0 }
 0x300   : > { %v17710_v60 = vld [vmem:[%s18787_s3 + $0x1f64] sm:$0xf0] }
 0x301   : > { %v14660_v57 = vld [vmem:[%s18787_s3 + $0x1908] sm:$0xf]  ;;  %v15461_v3 = vor.u32 %v17710_v60, %v15460_v56  ;;  %7409 = vmatpush.bf16.msrb.mxu2 %v15205_v63  ;;  %v7145_v56 = vpop.f32.mrf.mxu1  ;;  %v7092_v60 = vadd.f32 %v19616_v0, %v7079_v35  ;;  %v16826_v35 = vld [vmem:[%s18787_s3 + $0x3cc] sm:$0xf] }
 0x302   : > { %v17510_v1 = vld [vmem:[%s18787_s3 + $0x1924] sm:$0xf0] }
 0x303   : > { %v14916_v2 = vld [vmem:[%s18787_s3 + $0x1b08] sm:$0xf]  ;;  %v14661_v9 = vor.u32 %v17510_v1, %v14660_v57  ;;  %7422 = vmatpush.bf16.msrb.mxu3 %v15461_v3 }
 0x304   : > { %v17574_v4 = vld [vmem:[%s18787_s3 + $0x1b24] sm:$0xf0] }
 0x305   : > { %v15172_v17 = vld [vmem:[%s18787_s3 + $0x1d08] sm:$0xf]  ;;  %v14917_v12 = vor.u32 %v17574_v4, %v14916_v2  ;;  %7384 = vmatpush.bf16.msrb.mxu0 %v14661_v9 }
 0x306   : > { %v17638_v6 = vld [vmem:[%s18787_s3 + $0x1d24] sm:$0xf0] }
 0x307   : > { %v15428_v52 = vld [vmem:[%s18787_s3 + $0x1f08] sm:$0xf]  ;;  %v15173_v14 = vor.u32 %v17638_v6, %v15172_v17  ;;  %7397 = vmatpush.bf16.msrb.mxu1 %v14917_v12  ;;  %v7105_v12 = vadd.f32 %v19626_v13, %v7092_v60  ;;  %v16762_v13 = vld [vmem:[%s18787_s3 + $0x1cc] sm:$0xf] }
 0x308   : > { %v17702_v54 = vld [vmem:[%s18787_s3 + $0x1f24] sm:$0xf0] }
 0x309   : > { %v14628_v15 = vld [vmem:[%s18787_s3 + $0x18c8] sm:$0xf]  ;;  %v15429_v16 = vor.u32 %v17702_v54, %v15428_v52  ;;  %7410 = vmatpush.bf16.msrb.mxu2 %v15173_v14 }
 0x30a   : > { %v17502_v18 = vld [vmem:[%s18787_s3 + $0x18e4] sm:$0xf0] }
 0x30b   : > { %v14884_v19 = vld [vmem:[%s18787_s3 + $0x1ac8] sm:$0xf]  ;;  %v14629_v33 = vor.u32 %v17502_v18, %v14628_v15  ;;  %7423 = vmatpush.bf16.msrb.mxu3 %v15429_v16 }
 0x30c   : > { %v17566_v27 = vld [vmem:[%s18787_s3 + $0x1ae4] sm:$0xf0] }
 0x30d   : > { %v15140_v37 = vld [vmem:[%s18787_s3 + $0x1cc8] sm:$0xf]  ;;  %v14885_v58 = vor.u32 %v17566_v27, %v14884_v19  ;;  %7385 = vmatpush.bf16.msrb.mxu0 %v14629_v33  ;;  %v11686_v33 = vld [vmem:[%s18787_s3 + $0x1e8] sm:$0xf0] }
 0x30e   : > { %v17630_v23 = vld [vmem:[%s18787_s3 + $0x1ce4] sm:$0xf0]  ;;  %v11689_v25 = vor.u32 %v16762_v13, %v11686_v33  ;;  %v11846_v33 = vld [vmem:[%s18787_s3 + $0x328] sm:$0xf0] }
 0x30f   : > { %v15396_v40 = vld [vmem:[%s18787_s3 + $0x1ec8] sm:$0xf]  ;;  %v15141_v38 = vor.u32 %v17630_v23, %v15140_v37  ;;  %7398 = vmatpush.bf16.msrb.mxu1 %v14885_v58  ;;  %v7171_v58 = vpop.f32.mrf.mxu3 }
 0x310   : > { %v17694_v28 = vld [vmem:[%s18787_s3 + $0x1ee4] sm:$0xf0]  ;;  %v12102_v58 = vld [vmem:[%s18787_s3 + $0x528] sm:$0xf0] }
 0x311   : > { %v14596_v41 = vld [vmem:[%s18787_s3 + $0x1888] sm:$0xf]  ;;  %v15397_v47 = vor.u32 %v17694_v28, %v15396_v40  ;;  %7411 = vmatpush.bf16.msrb.mxu2 %v15141_v38  ;;  %v7158_v28 = vpop.f32.mrf.mxu2 }
 0x312   : > { %v17494_v44 = vld [vmem:[%s18787_s3 + $0x18a4] sm:$0xf0]  ;;  %v16802_v28 = vld [vmem:[%s18787_s3 + $0x30c] sm:$0xf] }
 0x313   : > { %v14852_v46 = vld [vmem:[%s18787_s3 + $0x1a88] sm:$0xf]  ;;  %v14597_v49 = vor.u32 %v17494_v44, %v14596_v41  ;;  %7424 = vmatpush.bf16.msrb.mxu3 %v15397_v47  ;;  %v11942_v41 = vld [vmem:[%s18787_s3 + $0x3e8] sm:$0xf0]  ;;  %v7118_v47 = vadd.f32 %v19631_v20, %v7105_v12 }
 0x314   : > { %v17558_v50 = vld [vmem:[%s18787_s3 + $0x1aa4] sm:$0xf0]  ;;  %v16890_v44 = vld [vmem:[%s18787_s3 + $0x5cc] sm:$0xf]  ;;  %v11945_v56 = vor.u32 %v16826_v35, %v11942_v41  ;;  %v7182_v41 = vpop.f32.mrf.mxu0 }
 0x315   : > { %v15108_v53 = vld [vmem:[%s18787_s3 + $0x1c88] sm:$0xf]  ;;  %v14853_v61 = vor.u32 %v17558_v50, %v14852_v46  ;;  %7386 = vmatpush.bf16.msrb.mxu0 %v14597_v49  ;;  %v12198_v46 = vld [vmem:[%s18787_s3 + $0x5e8] sm:$0xf0]  ;;  %v7131_v49 = vadd.f32 %v19685_v8, %v7118_v47 }
 0x316   : > { %v17622_v51 = vld [vmem:[%s18787_s3 + $0x1ca4] sm:$0xf0]  ;;  %v12201_v60 = vor.u32 %v16890_v44, %v12198_v46  ;;  %v11654_v20 = vld [vmem:[%s18787_s3 + $0x1a8] sm:$0xf0] }
 0x317   : > { %v15364_v11 = vld [vmem:[%s18787_s3 + $0x1e88] sm:$0xf]  ;;  %v15109_v62 = vor.u32 %v17622_v51, %v15108_v53  ;;  %7399 = vmatpush.bf16.msrb.mxu1 %v14853_v61  ;;  %v16954_v51 = vld [vmem:[%s18787_s3 + $0x7cc] sm:$0xf] }
 0x318   : > { %v17686_v59 = vld [vmem:[%s18787_s3 + $0x1ea4] sm:$0xf0]  ;;  %v16754_v61 = vld [vmem:[%s18787_s3 + $0x18c] sm:$0xf] }
 0x319   : > { %v14564_v63 = vld [vmem:[%s18787_s3 + $0x1848] sm:$0xf]  ;;  %v15365_v2 = vor.u32 %v17686_v59, %v15364_v11  ;;  %7412 = vmatpush.bf16.msrb.mxu2 %v15109_v62  ;;  %v12454_v11 = vld [vmem:[%s18787_s3 + $0x7e8] sm:$0xf0]  ;;  %v11657_v8 = vor.u32 %v16754_v61, %v11654_v20 }
 0x31a   : > { %v17486_v57 = vld [vmem:[%s18787_s3 + $0x1864] sm:$0xf0]  ;;  %v16818_v62 = vld [vmem:[%s18787_s3 + $0x38c] sm:$0xf] }
 0x31b   : > { %v14820_v1 = vld [vmem:[%s18787_s3 + $0x1a48] sm:$0xf]  ;;  %v14565_v52 = vor.u32 %v17486_v57, %v14564_v63  ;;  %7425 = vmatpush.bf16.msrb.mxu3 %v15365_v2  ;;  %v12457_v63 = vor.u32 %v16954_v51, %v12454_v11  ;;  %v11910_v57 = vld [vmem:[%s18787_s3 + $0x3a8] sm:$0xf0]  ;;  %v11849_v51 = vor.u32 %v16802_v28, %v11846_v33 }
 0x31c   : > { %v17550_v3 = vld [vmem:[%s18787_s3 + $0x1a64] sm:$0xf0]  ;;  %v12166_v2 = vld [vmem:[%s18787_s3 + $0x5a8] sm:$0xf0] }
 0x31d   : > { %v15076_v4 = vld [vmem:[%s18787_s3 + $0x1c48] sm:$0xf]  ;;  %v14821_v14 = vor.u32 %v17550_v3, %v14820_v1  ;;  %7387 = vmatpush.bf16.msrb.mxu0 %v14565_v52  ;;  %v16882_v1 = vld [vmem:[%s18787_s3 + $0x58c] sm:$0xf] }
 0x31e   : > { %v17614_v17 = vld [vmem:[%s18787_s3 + $0x1c64] sm:$0xf0]  ;;  %v16946_v3 = vld [vmem:[%s18787_s3 + $0x78c] sm:$0xf] }
 0x31f   : > { %v15332_v6 = vld [vmem:[%s18787_s3 + $0x1e48] sm:$0xf]  ;;  %v15077_v15 = vor.u32 %v17614_v17, %v15076_v4  ;;  %7400 = vmatpush.bf16.msrb.mxu1 %v14821_v14  ;;  %v12422_v4 = vld [vmem:[%s18787_s3 + $0x7a8] sm:$0xf0]  ;;  %v7144_v17 = vadd.f32 %v19689_v10, %v7131_v49 }
 0x320   : > { %v17678_v0 = vld [vmem:[%s18787_s3 + $0x1e64] sm:$0xf0]  ;;  %v16746_v52 = vld [vmem:[%s18787_s3 + $0x14c] sm:$0xf]  ;;  %v12425_v12 = vor.u32 %v16946_v3, %v12422_v4 }
 0x321   : > { %v14532_v54 = vld [vmem:[%s18787_s3 + $0x1808] sm:$0xf]  ;;  %v15333_v27 = vor.u32 %v17678_v0, %v15332_v6  ;;  %7413 = vmatpush.bf16.msrb.mxu2 %v15077_v15  ;;  %v11913_v6 = vor.u32 %v16818_v62, %v11910_v57  ;;  %v12169_v0 = vor.u32 %v16882_v1, %v12166_v2  ;;  %v11878_v14 = vld [vmem:[%s18787_s3 + $0x368] sm:$0xf0]  ;;  %v7157_v10 = vadd.f32 %v19704_v48, %v7144_v17 }
 0x322   : > { %v17478_v9 = vld [vmem:[%s18787_s3 + $0x1824] sm:$0xf0]  ;;  %v16874_v15 = vld [vmem:[%s18787_s3 + $0x54c] sm:$0xf] }
 0x323   : > { %v14788_v18 = vld [vmem:[%s18787_s3 + $0x1a08] sm:$0xf]  ;;  %v14533_v38 = vor.u32 %v17478_v9, %v14532_v54  ;;  %7426 = vmatpush.bf16.msrb.mxu3 %v15333_v27  ;;  %v11622_v54 = vld [vmem:[%s18787_s3 + $0x168] sm:$0xf0] }
 0x324   : > { %v17542_v19 = vld [vmem:[%s18787_s3 + $0x1a24] sm:$0xf0]  ;;  %v16810_v9 = vld [vmem:[%s18787_s3 + $0x34c] sm:$0xf]  ;;  %v11625_v27 = vor.u32 %v16746_v52, %v11622_v54 }
 0x325   : > { %v15044_v16 = vld [vmem:[%s18787_s3 + $0x1c08] sm:$0xf]  ;;  %v14789_v50 = vor.u32 %v17542_v19, %v14788_v18  ;;  %7388 = vmatpush.bf16.msrb.mxu0 %v14533_v38  ;;  %v12134_v18 = vld [vmem:[%s18787_s3 + $0x568] sm:$0xf0]  ;;  %v7170_v38 = vadd.f32 %v19709_v55, %v7157_v10  ;;  %v594_v10 = vld [vmem:[#allocation2] sm:$0xff] }
 0x326   : > { %v17606_v37 = vld [vmem:[%s18787_s3 + $0x1c24] sm:$0xf0]  ;;  %v16938_v19 = vld [vmem:[%s18787_s3 + $0x74c] sm:$0xf] }
 0x327   : > { %v15300_v23 = vld [vmem:[%s18787_s3 + $0x1e08] sm:$0xf]  ;;  %v15045_v53 = vor.u32 %v17606_v37, %v15044_v16  ;;  %7401 = vmatpush.bf16.msrb.mxu1 %v14789_v50  ;;  %v12390_v16 = vld [vmem:[%s18787_s3 + $0x768] sm:$0xf0]  ;;  %v11881_v37 = vor.u32 %v16810_v9, %v11878_v14  ;;  %v7195_v50 = vpop.f32.mrf.mxu1 }
 0x328   : > { %v17670_v40 = vld [vmem:[%s18787_s3 + $0x1e24] sm:$0xf0]  ;;  %7389 = vmatmul.bf16.vlgmr.msrb.gmra.mxu0 %v19132_v24  ;;  %v16738_v48 = vld [vmem:[%s18787_s3 + $0x10c] sm:$0xf]  ;;  %v12393_v13 = vor.u32 %v16938_v19, %v12390_v16 }
 0x329   : > { %v15301_v59 = vor.u32 %v17670_v40, %v15300_v23  ;;  %7414 = vmatpush.bf16.msrb.mxu2 %v15045_v53  ;;  %7433 = vmatpush.bf16.msra.mxu0 %v11689_v25  ;;  %v12137_v23 = vor.u32 %v16874_v15, %v12134_v18  ;;  %v11590_v40 = vld [vmem:[%s18787_s3 + $0x128] sm:$0xf0]  ;;  %v7183_v53 = vadd.f32 %v7182_v41, %v7170_v38  ;;  %v7184_v18 = vpop.f32.mrf.mxu0 }
 0x32a   : > { %7402 = vmatmul.bf16.vlgmr.msrb.gmra.mxu1 %v19139_v32  ;;  %v16866_v35 = vld [vmem:[%s18787_s3 + $0x50c] sm:$0xf]  ;;  %v11593_v47 = vor.u32 %v16738_v48, %v11590_v40 }
 0x32b   : > { %7427 = vmatpush.bf16.msrb.mxu3 %v15301_v59  ;;  %7446 = vmatpush.bf16.msra.mxu1 %v11945_v56  ;;  %v16930_v44 = vld [vmem:[%s18787_s3 + $0x70c] sm:$0xf]  ;;  %v12105_v11 = vor.u32 %v16866_v35, %v12102_v58  ;;  %v7196_v57 = vadd.f32 %v7195_v50, %v7183_v53 }
 0x32c   : > { %7415 = vmatmul.bf16.vlgmr.msrb.gmra.mxu2 %v19137_v29  ;;  %v12358_v46 = vld [vmem:[%s18787_s3 + $0x728] sm:$0xf0] }
 0x32d   : > { %7459 = vmatpush.bf16.msra.mxu2 %v12201_v60  ;;  %7434 = vmatpush.bf16.msra.mxu0 %v11657_v8  ;;  %v16730_v59 = vld [vmem:[%s18787_s3 + $0xcc] sm:$0xf]  ;;  %v12361_v49 = vor.u32 %v16930_v44, %v12358_v46 }
 0x32e   : > { %7428 = vmatmul.bf16.vlgmr.msrb.gmra.mxu3 %v19143_v36  ;;  %v11558_v25 = vld [vmem:[%s18787_s3 + $0xe8] sm:$0xf0] }
 0x32f   : > { %7472 = vmatpush.bf16.msra.mxu3 %v12457_v63  ;;  %7447 = vmatpush.bf16.msra.mxu1 %v11913_v6  ;;  %v16794_v55 = vld [vmem:[%s18787_s3 + $0x2cc] sm:$0xf]  ;;  %v11561_v63 = vor.u32 %v16730_v59, %v11558_v25  ;;  %v7208_v6 = vpop.f32.mrf.mxu2  ;;  %v7197_v16 = vpop.f32.mrf.mxu1 }
 0x330   : > { %v11814_v56 = vld [vmem:[%s18787_s3 + $0x2e8] sm:$0xf0]  ;;  %v7209_v9 = vadd.f32 %v7208_v6, %v7196_v57 }
 0x331   : > { %7460 = vmatpush.bf16.msra.mxu2 %v12169_v0  ;;  %7435 = vmatpush.bf16.msra.mxu0 %v11625_v27  ;;  %v16858_v60 = vld [vmem:[%s18787_s3 + $0x4cc] sm:$0xf]  ;;  %v11817_v1 = vor.u32 %v16794_v55, %v11814_v56 }
 0x332   : > { %v12070_v61 = vld [vmem:[%s18787_s3 + $0x4e8] sm:$0xf0] }
 0x333   : > { %7473 = vmatpush.bf16.msra.mxu3 %v12425_v12  ;;  %7448 = vmatpush.bf16.msra.mxu1 %v11881_v37  ;;  %v16922_v20 = vld [vmem:[%s18787_s3 + $0x6cc] sm:$0xf]  ;;  %v12073_v2 = vor.u32 %v16858_v60, %v12070_v61  ;;  %v7221_v12 = vpop.f32.mrf.mxu3 }
 0x334   : > { %v12326_v62 = vld [vmem:[%s18787_s3 + $0x6e8] sm:$0xf0]  ;;  %v7222_v27 = vadd.f32 %v7221_v12, %v7209_v9 }
 0x335   : > { %7461 = vmatpush.bf16.msra.mxu2 %v12137_v23  ;;  %7436 = vmatpush.bf16.msra.mxu0 %v11593_v47  ;;  %v16722_v3 = vld [vmem:[%s18787_s3 + $0x8c] sm:$0xf]  ;;  %v12329_v17 = vor.u32 %v16922_v20, %v12326_v62 }
 0x336   : > { %v11526_v4 = vld [vmem:[%s18787_s3 + $0xa8] sm:$0xf0]  ;;  %v8474_v38 = vadd.f32 %v7222_v27, %v594_v10 }
 0x337   : > { %7474 = vmatpush.bf16.msra.mxu3 %v12393_v13  ;;  %7449 = vmatpush.bf16.msra.mxu1 %v11849_v51  ;;  %v16786_v8 = vld [vmem:[%s18787_s3 + $0x28c] sm:$0xf]  ;;  %v11529_v19 = vor.u32 %v16722_v3, %v11526_v4  ;;  %v7210_v61 = vpop.f32.mrf.mxu2 }
 0x338   : > { %v11782_v0 = vld [vmem:[%s18787_s3 + $0x2a8] sm:$0xf0]  ;;  %8482 = vst [vmem:[#allocation2] sm:$0xff] %v8474_v38 }
 0x339   : > { %7462 = vmatpush.bf16.msra.mxu2 %v12105_v11  ;;  %v16850_v52 = vld [vmem:[%s18787_s3 + $0x48c] sm:$0xf]  ;;  %7437 = vmatpush.bf16.msra.mxu0 %v11561_v63  ;;  %v11785_v37 = vor.u32 %v16786_v8, %v11782_v0 }
 0x33a   : > { %v12038_v54 = vld [vmem:[%s18787_s3 + $0x4a8] sm:$0xf0] }
 0x33b   : > { %7475 = vmatpush.bf16.msra.mxu3 %v12361_v49  ;;  %v16914_v14 = vld [vmem:[%s18787_s3 + $0x68c] sm:$0xf]  ;;  %7450 = vmatpush.bf16.msra.mxu1 %v11817_v1  ;;  %v12041_v23 = vor.u32 %v16850_v52, %v12038_v54  ;;  %v7223_v57 = vpop.f32.mrf.mxu3 }
 0x33c   : > { %v12294_v15 = vld [vmem:[%s18787_s3 + $0x6a8] sm:$0xf0] }
 0x33d   : > { %7463 = vmatpush.bf16.msra.mxu2 %v12073_v2  ;;  %v16714_v48 = vld [vmem:[%s18787_s3 + $0x4c] sm:$0xf]  ;;  %v12297_v13 = vor.u32 %v16914_v14, %v12294_v15  ;;  %7438 = vmatpush.bf16.msra.mxu0 %v11529_v19 }
 0x33e   : > { %v11494_v40 = vld [vmem:[%s18787_s3 + $0x68] sm:$0xf0] }
 0x33f   : > { %v16778_v28 = vld [vmem:[%s18787_s3 + $0x24c] sm:$0xf]  ;;  %7476 = vmatpush.bf16.msra.mxu3 %v12329_v17  ;;  %v11497_v46 = vor.u32 %v16714_v48, %v11494_v40  ;;  %7451 = vmatpush.bf16.msra.mxu1 %v11785_v37 }
 0x340   : > { %v11750_v33 = vld [vmem:[%s18787_s3 + $0x268] sm:$0xf0] }
 0x341   : > { %v16842_v35 = vld [vmem:[%s18787_s3 + $0x44c] sm:$0xf]  ;;  %7464 = vmatpush.bf16.msra.mxu2 %v12041_v23  ;;  %v11753_v51 = vor.u32 %v16778_v28, %v11750_v33  ;;  %7439 = vmatpush.bf16.msra.mxu0 %v11497_v46 }
 0x342   : > { %v12006_v58 = vld [vmem:[%s18787_s3 + $0x468] sm:$0xf0] }
 0x343   : > { %v16906_v41 = vld [vmem:[%s18787_s3 + $0x64c] sm:$0xf]  ;;  %v12009_v11 = vor.u32 %v16842_v35, %v12006_v58  ;;  %7477 = vmatpush.bf16.msra.mxu3 %v12297_v13  ;;  %7452 = vmatpush.bf16.msra.mxu1 %v11753_v51 }
 0x344   : > { %v12262_v44 = vld [vmem:[%s18787_s3 + $0x668] sm:$0xf0] }
 0x345   : > { %v16706_v47 = vld [vmem:[%s18787_s3 + $0xc] sm:$0xf]  ;;  %v12265_v55 = vor.u32 %v16906_v41, %v12262_v44  ;;  %7465 = vmatpush.bf16.msra.mxu2 %v12009_v11 }
 0x346   : > { %v11462_v50 = vld [vmem:[%s18787_s3 + $0x28] sm:$0xf0] }
 0x347   : > { %v16770_v53 = vld [vmem:[%s18787_s3 + $0x20c] sm:$0xf]  ;;  %v11465_v1 = vor.u32 %v16706_v47, %v11462_v50  ;;  %7478 = vmatpush.bf16.msra.mxu3 %v12265_v55 }
 0x348   : > { %v11718_v59 = vld [vmem:[%s18787_s3 + $0x228] sm:$0xf0] }
 0x349   : > { %v16834_v25 = vld [vmem:[%s18787_s3 + $0x40c] sm:$0xf]  ;;  %v11721_v8 = vor.u32 %v16770_v53, %v11718_v59  ;;  %7440 = vmatpush.bf16.msra.mxu0 %v11465_v1 }
 0x34a   : > { %v11974_v49 = vld [vmem:[%s18787_s3 + $0x428] sm:$0xf0] }
 0x34b   : > { %v16898_v56 = vld [vmem:[%s18787_s3 + $0x60c] sm:$0xf]  ;;  %v11977_v17 = vor.u32 %v16834_v25, %v11974_v49  ;;  %7453 = vmatpush.bf16.msra.mxu1 %v11721_v8  ;;  %v7247_v8 = vpop.f32.mrf.mxu1 }
 0x34c   : > { %v12230_v60 = vld [vmem:[%s18787_s3 + $0x628] sm:$0xf0]  ;;  %7441 = vmatmul.bf16.vlgmr.msra.gmra.mxu0 %v18924_v21 }
 0x34d   : > { %v17018_v20 = vld [vmem:[%s18787_s3 + $0x9cc] sm:$0xf]  ;;  %v12233_v52 = vor.u32 %v16898_v56, %v12230_v60  ;;  %7466 = vmatpush.bf16.msra.mxu2 %v11977_v17 }
 0x34e   : > { %v12710_v62 = vld [vmem:[%s18787_s3 + $0x9e8] sm:$0xf0]  ;;  %7454 = vmatmul.bf16.vlgmr.msra.gmra.mxu1 %v18927_v22 }
 0x34f   : > { %v17082_v63 = vld [vmem:[%s18787_s3 + $0xbcc] sm:$0xf]  ;;  %v12713_v54 = vor.u32 %v17018_v20, %v12710_v62  ;;  %7479 = vmatpush.bf16.msra.mxu3 %v12233_v52 }
 0x350   : > { %v12966_v2 = vld [vmem:[%s18787_s3 + $0xbe8] sm:$0xf0]  ;;  %7467 = vmatmul.bf16.vlgmr.msra.gmra.mxu2 %v18910_v5 }
 0x351   : > { %v17146_v3 = vld [vmem:[%s18787_s3 + $0xdcc] sm:$0xf]  ;;  %v12969_v9 = vor.u32 %v17082_v63, %v12966_v2  ;;  %7485 = vmatpush.bf16.msrb.mxu0 %v12713_v54  ;;  %v7234_v63 = vpop.f32.mrf.mxu0 }
 0x352   : > { %v13222_v4 = vld [vmem:[%s18787_s3 + $0xde8] sm:$0xf0]  ;;  %7480 = vmatmul.bf16.vlgmr.msra.gmra.mxu3 %v18913_v7  ;;  %v7248_v54 = vadd.f32 %v7247_v8, %v7234_v63 }
 0x353   : > { %v17210_v6 = vld [vmem:[%s18787_s3 + $0xfcc] sm:$0xf]  ;;  %v13225_v12 = vor.u32 %v17146_v3, %v13222_v4  ;;  %7498 = vmatpush.bf16.msrb.mxu1 %v12969_v9 }
 0x354   : > { %v13478_v0 = vld [vmem:[%s18787_s3 + $0xfe8] sm:$0xf0] }
 0x355   : > { %v17010_v14 = vld [vmem:[%s18787_s3 + $0x98c] sm:$0xf]  ;;  %v13481_v10 = vor.u32 %v17210_v6, %v13478_v0  ;;  %7511 = vmatpush.bf16.msrb.mxu2 %v13225_v12 }
 0x356   : > { %v12678_v15 = vld [vmem:[%s18787_s3 + $0x9a8] sm:$0xf0] }
 0x357   : > { %v17074_v18 = vld [vmem:[%s18787_s3 + $0xb8c] sm:$0xf]  ;;  %v12681_v48 = vor.u32 %v17010_v14, %v12678_v15  ;;  %7524 = vmatpush.bf16.msrb.mxu3 %v13481_v10 }
 0x358   : > { %v12934_v19 = vld [vmem:[%s18787_s3 + $0xba8] sm:$0xf0] }
 0x359   : > { %v17138_v16 = vld [vmem:[%s18787_s3 + $0xd8c] sm:$0xf]  ;;  %v12937_v40 = vor.u32 %v17074_v18, %v12934_v19  ;;  %7486 = vmatpush.bf16.msrb.mxu0 %v12681_v48 }
 0x35a   : > { %v13190_v27 = vld [vmem:[%s18787_s3 + $0xda8] sm:$0xf0] }
 0x35b   : > { %v17202_v37 = vld [vmem:[%s18787_s3 + $0xf8c] sm:$0xf]  ;;  %v13193_v28 = vor.u32 %v17138_v16, %v13190_v27  ;;  %7499 = vmatpush.bf16.msrb.mxu1 %v12937_v40  ;;  %v7260_v27 = vpop.f32.mrf.mxu2 }
 0x35c   : > { %v13446_v23 = vld [vmem:[%s18787_s3 + $0xfa8] sm:$0xf0] }
 0x35d   : > { %v17002_v13 = vld [vmem:[%s18787_s3 + $0x94c] sm:$0xf]  ;;  %v13449_v58 = vor.u32 %v17202_v37, %v13446_v23  ;;  %7512 = vmatpush.bf16.msrb.mxu2 %v13193_v28  ;;  %v7261_v28 = vadd.f32 %v7260_v27, %v7248_v54 }
 0x35e   : > { %v12646_v33 = vld [vmem:[%s18787_s3 + $0x968] sm:$0xf0] }
 0x35f   : > { %v17066_v35 = vld [vmem:[%s18787_s3 + $0xb4c] sm:$0xf]  ;;  %v12649_v50 = vor.u32 %v17002_v13, %v12646_v33  ;;  %7525 = vmatpush.bf16.msrb.mxu3 %v13449_v58  ;;  %v7273_v13 = vpop.f32.mrf.mxu3 }
 0x360   : > { %v12902_v38 = vld [vmem:[%s18787_s3 + $0xb68] sm:$0xf0] }
 0x361   : > { %v17130_v41 = vld [vmem:[%s18787_s3 + $0xd4c] sm:$0xf]  ;;  %v12905_v53 = vor.u32 %v17066_v35, %v12902_v38  ;;  %7487 = vmatpush.bf16.msrb.mxu0 %v12649_v50  ;;  %v19856_v38 = vadd.f32 %v7273_v13, %v7261_v28 }
 0x362   : > { %v13158_v44 = vld [vmem:[%s18787_s3 + $0xd68] sm:$0xf0] }
 0x363   : > { %v17194_v46 = vld [vmem:[%s18787_s3 + $0xf4c] sm:$0xf]  ;;  %v13161_v51 = vor.u32 %v17130_v41, %v13158_v44  ;;  %7500 = vmatpush.bf16.msrb.mxu1 %v12905_v53  ;;  %v7236_v41 = vpop.f32.mrf.mxu0 }
 0x364   : > { %v13414_v47 = vld [vmem:[%s18787_s3 + $0xf68] sm:$0xf0] }
 0x365   : > { %v16994_v11 = vld [vmem:[%s18787_s3 + $0x90c] sm:$0xf]  ;;  %v13417_v55 = vor.u32 %v17194_v46, %v13414_v47  ;;  %7513 = vmatpush.bf16.msrb.mxu2 %v13161_v51  ;;  %v7249_v51 = vpop.f32.mrf.mxu1 }
 0x366   : > { %v12614_v59 = vld [vmem:[%s18787_s3 + $0x928] sm:$0xf0] }
 0x367   : > { %v17058_v25 = vld [vmem:[%s18787_s3 + $0xb0c] sm:$0xf]  ;;  %v12617_v62 = vor.u32 %v16994_v11, %v12614_v59  ;;  %7526 = vmatpush.bf16.msrb.mxu3 %v13417_v55 }
 0x368   : > { %v12870_v49 = vld [vmem:[%s18787_s3 + $0xb28] sm:$0xf0] }
 0x369   : > { %v17122_v56 = vld [vmem:[%s18787_s3 + $0xd0c] sm:$0xf]  ;;  %v12873_v57 = vor.u32 %v17058_v25, %v12870_v49  ;;  %7488 = vmatpush.bf16.msrb.mxu0 %v12617_v62 }
 0x36a   : > { %v13126_v60 = vld [vmem:[%s18787_s3 + $0xd28] sm:$0xf0] }
 0x36b   : > { %v17186_v61 = vld [vmem:[%s18787_s3 + $0xf0c] sm:$0xf]  ;;  %v13129_v1 = vor.u32 %v17122_v56, %v13126_v60  ;;  %7501 = vmatpush.bf16.msrb.mxu1 %v12873_v57 }
 0x36c   : > { %v13382_v20 = vld [vmem:[%s18787_s3 + $0xf28] sm:$0xf0] }
 0x36d   : > { %v16986_v2 = vld [vmem:[%s18787_s3 + $0x8cc] sm:$0xf]  ;;  %v13385_v17 = vor.u32 %v17186_v61, %v13382_v20  ;;  %7514 = vmatpush.bf16.msrb.mxu2 %v13129_v1 }
 0x36e   : > { %v12582_v3 = vld [vmem:[%s18787_s3 + $0x8e8] sm:$0xf0] }
 0x36f   : > { %v17050_v4 = vld [vmem:[%s18787_s3 + $0xacc] sm:$0xf]  ;;  %v12585_v14 = vor.u32 %v16986_v2, %v12582_v3  ;;  %7527 = vmatpush.bf16.msrb.mxu3 %v13385_v17  ;;  %v7262_v3 = vpop.f32.mrf.mxu2 }
 0x370   : > { %v12838_v6 = vld [vmem:[%s18787_s3 + $0xae8] sm:$0xf0] }
 0x371   : > { %v17114_v0 = vld [vmem:[%s18787_s3 + $0xccc] sm:$0xf]  ;;  %v12841_v15 = vor.u32 %v17050_v4, %v12838_v6  ;;  %7489 = vmatpush.bf16.msrb.mxu0 %v12585_v14 }
 0x372   : > { %v13094_v52 = vld [vmem:[%s18787_s3 + $0xce8] sm:$0xf0] }
 0x373   : > { %v17178_v9 = vld [vmem:[%s18787_s3 + $0xecc] sm:$0xf]  ;;  %v13097_v18 = vor.u32 %v17114_v0, %v13094_v52  ;;  %7502 = vmatpush.bf16.msrb.mxu1 %v12841_v15  ;;  %v7275_v0 = vpop.f32.mrf.mxu3 }
 0x374   : > { %v13350_v12 = vld [vmem:[%s18787_s3 + $0xee8] sm:$0xf0] }
 0x375   : > { %v16978_v10 = vld [vmem:[%s18787_s3 + $0x88c] sm:$0xf]  ;;  %v13353_v37 = vor.u32 %v17178_v9, %v13350_v12  ;;  %7515 = vmatpush.bf16.msrb.mxu2 %v13097_v18 }
 0x376   : > { %v12550_v19 = vld [vmem:[%s18787_s3 + $0x8a8] sm:$0xf0] }
 0x377   : > { %v17042_v16 = vld [vmem:[%s18787_s3 + $0xa8c] sm:$0xf]  ;;  %v12553_v58 = vor.u32 %v16978_v10, %v12550_v19  ;;  %7528 = vmatpush.bf16.msrb.mxu3 %v13353_v37 }
 0x378   : > { %v12806_v23 = vld [vmem:[%s18787_s3 + $0xaa8] sm:$0xf0] }
 0x379   : > { %v17106_v48 = vld [vmem:[%s18787_s3 + $0xc8c] sm:$0xf]  ;;  %v12809_v44 = vor.u32 %v17042_v16, %v12806_v23  ;;  %7490 = vmatpush.bf16.msrb.mxu0 %v12553_v58 }
 0x37a   : > { %v13062_v40 = vld [vmem:[%s18787_s3 + $0xca8] sm:$0xf0] }
 0x37b   : > { %v17170_v33 = vld [vmem:[%s18787_s3 + $0xe8c] sm:$0xf]  ;;  %v13065_v46 = vor.u32 %v17106_v48, %v13062_v40  ;;  %7503 = vmatpush.bf16.msrb.mxu1 %v12809_v44 }
 0x37c   : > { %v13318_v35 = vld [vmem:[%s18787_s3 + $0xea8] sm:$0xf0] }
 0x37d   : > { %v16970_v47 = vld [vmem:[%s18787_s3 + $0x84c] sm:$0xf]  ;;  %v13321_v11 = vor.u32 %v17170_v33, %v13318_v35  ;;  %7516 = vmatpush.bf16.msrb.mxu2 %v13065_v46 }
 0x37e   : > { %v12518_v50 = vld [vmem:[%s18787_s3 + $0x868] sm:$0xf0] }
 0x37f   : > { %v17034_v53 = vld [vmem:[%s18787_s3 + $0xa4c] sm:$0xf]  ;;  %v12521_v60 = vor.u32 %v16970_v47, %v12518_v50  ;;  %7529 = vmatpush.bf16.msrb.mxu3 %v13321_v11 }
 0x380   : > { %v12774_v59 = vld [vmem:[%s18787_s3 + $0xa68] sm:$0xf0] }
 0x381   : > { %v17098_v25 = vld [vmem:[%s18787_s3 + $0xc4c] sm:$0xf]  ;;  %v12777_v62 = vor.u32 %v17034_v53, %v12774_v59  ;;  %7491 = vmatpush.bf16.msrb.mxu0 %v12521_v60 }
 0x382   : > { %v13030_v55 = vld [vmem:[%s18787_s3 + $0xc68] sm:$0xf0] }
 0x383   : > { %v17162_v49 = vld [vmem:[%s18787_s3 + $0xe4c] sm:$0xf]  ;;  %v13033_v63 = vor.u32 %v17098_v25, %v13030_v55  ;;  %7504 = vmatpush.bf16.msrb.mxu1 %v12777_v62 }
 0x384   : > { %v13286_v56 = vld [vmem:[%s18787_s3 + $0xe68] sm:$0xf0] }
 0x385   : > { %v16962_v61 = vld [vmem:[%s18787_s3 + $0x80c] sm:$0xf]  ;;  %v13289_v4 = vor.u32 %v17162_v49, %v13286_v56  ;;  %7517 = vmatpush.bf16.msrb.mxu2 %v13033_v63 }
 0x386   : > { %v12486_v20 = vld [vmem:[%s18787_s3 + $0x828] sm:$0xf0] }
 0x387   : > { %v17026_v57 = vld [vmem:[%s18787_s3 + $0xa0c] sm:$0xf]  ;;  %v12489_v12 = vor.u32 %v16962_v61, %v12486_v20  ;;  %7530 = vmatpush.bf16.msrb.mxu3 %v13289_v4 }
 0x388   : > { %v12742_v1 = vld [vmem:[%s18787_s3 + $0xa28] sm:$0xf0] }
 0x389   : > { %v17090_v2 = vld [vmem:[%s18787_s3 + $0xc0c] sm:$0xf]  ;;  %v12745_v10 = vor.u32 %v17026_v57, %v12742_v1  ;;  %7492 = vmatpush.bf16.msrb.mxu0 %v12489_v12 }
 0x38a   : > { %v12998_v8 = vld [vmem:[%s18787_s3 + $0xc28] sm:$0xf0] }
 0x38b   : > { %v17154_v17 = vld [vmem:[%s18787_s3 + $0xe0c] sm:$0xf]  ;;  %v13001_v19 = vor.u32 %v17090_v2, %v12998_v8  ;;  %7505 = vmatpush.bf16.msrb.mxu1 %v12745_v10 }
 0x38c   : > { %v13254_v6 = vld [vmem:[%s18787_s3 + $0xe28] sm:$0xf0]  ;;  %7493 = vmatmul.bf16.vlgmr.msrb.gmra.mxu0 %v18983_v42 }
 0x38d   : > { %v17274_v52 = vld [vmem:[%s18787_s3 + $0x11cc] sm:$0xf]  ;;  %v13257_v37 = vor.u32 %v17154_v17, %v13254_v6  ;;  %7518 = vmatpush.bf16.msrb.mxu2 %v13001_v19  ;;  %v19915_v19 = vpop.f32.mrf.mxu1 }
 0x38e   : > { %v13734_v54 = vld [vmem:[%s18787_s3 + $0x11e8] sm:$0xf0]  ;;  %7506 = vmatmul.bf16.vlgmr.msrb.gmra.mxu1 %v18987_v45 }
 0x38f   : > { %v17338_v9 = vld [vmem:[%s18787_s3 + $0x13cc] sm:$0xf]  ;;  %v13737_v23 = vor.u32 %v17274_v52, %v13734_v54  ;;  %7531 = vmatpush.bf16.msrb.mxu3 %v13257_v37 }
 0x390   : > { %v13990_v14 = vld [vmem:[%s18787_s3 + $0x13e8] sm:$0xf0]  ;;  %7519 = vmatmul.bf16.vlgmr.msrb.gmra.mxu2 %v18979_v39 }
 0x391   : > { %v17402_v15 = vld [vmem:[%s18787_s3 + $0x15cc] sm:$0xf]  ;;  %v13993_v48 = vor.u32 %v17338_v9, %v13990_v14  ;;  %7537 = vmatpush.bf16.msra.mxu0 %v13737_v23  ;;  %v19910_v9 = vpop.f32.mrf.mxu0 }
 0x392   : > { %v14246_v18 = vld [vmem:[%s18787_s3 + $0x15e8] sm:$0xf0]  ;;  %7532 = vmatmul.bf16.vlgmr.msrb.gmra.mxu3 %v18985_v43 }
 0x393   : > { %v17466_v16 = vld [vmem:[%s18787_s3 + $0x17cc] sm:$0xf]  ;;  %v14249_v40 = vor.u32 %v17402_v15, %v14246_v18  ;;  %7550 = vmatpush.bf16.msra.mxu1 %v13993_v48 }
 0x394   : > { %v14502_v27 = vld [vmem:[%s18787_s3 + $0x17e8] sm:$0xf0] }
 0x395   : > { %v17266_v28 = vld [vmem:[%s18787_s3 + $0x118c] sm:$0xf]  ;;  %v14505_v35 = vor.u32 %v17466_v16, %v14502_v27  ;;  %7563 = vmatpush.bf16.msra.mxu2 %v14249_v40 }
 0x396   : > { %v13702_v13 = vld [vmem:[%s18787_s3 + $0x11a8] sm:$0xf0] }
 0x397   : > { %v17330_v33 = vld [vmem:[%s18787_s3 + $0x138c] sm:$0xf]  ;;  %v13705_v50 = vor.u32 %v17266_v28, %v13702_v13  ;;  %7576 = vmatpush.bf16.msra.mxu3 %v14505_v35 }
 0x398   : > { %v13958_v58 = vld [vmem:[%s18787_s3 + $0x13a8] sm:$0xf0] }
 0x399   : > { %v17394_v41 = vld [vmem:[%s18787_s3 + $0x158c] sm:$0xf]  ;;  %v13961_v53 = vor.u32 %v17330_v33, %v13958_v58  ;;  %7538 = vmatpush.bf16.msra.mxu0 %v13705_v50 }
 0x39a   : > { %v14214_v44 = vld [vmem:[%s18787_s3 + $0x15a8] sm:$0xf0] }
 0x39b   : > { %v17458_v46 = vld [vmem:[%s18787_s3 + $0x178c] sm:$0xf]  ;;  %v14217_v51 = vor.u32 %v17394_v41, %v14214_v44  ;;  %7551 = vmatpush.bf16.msra.mxu1 %v13961_v53  ;;  %v19925_v44 = vpop.f32.mrf.mxu2 }
 0x39c   : > { %v14470_v47 = vld [vmem:[%s18787_s3 + $0x17a8] sm:$0xf0] }
 0x39d   : > { %v17258_v11 = vld [vmem:[%s18787_s3 + $0x114c] sm:$0xf]  ;;  %v14473_v55 = vor.u32 %v17458_v46, %v14470_v47  ;;  %7564 = vmatpush.bf16.msra.mxu2 %v14217_v51  ;;  %v19930_v51 = vpop.f32.mrf.mxu3 }
 0x39e   : > { %v13670_v59 = vld [vmem:[%s18787_s3 + $0x1168] sm:$0xf0] }
 0x39f   : > { %v17322_v25 = vld [vmem:[%s18787_s3 + $0x134c] sm:$0xf]  ;;  %v13673_v62 = vor.u32 %v17258_v11, %v13670_v59  ;;  %7577 = vmatpush.bf16.msra.mxu3 %v14473_v55  ;;  %v7288_v55 = vpop.f32.mrf.mxu0 }
 0x3a0   : > { %v13926_v49 = vld [vmem:[%s18787_s3 + $0x1368] sm:$0xf0] }
 0x3a1   : > { %v17386_v56 = vld [vmem:[%s18787_s3 + $0x154c] sm:$0xf]  ;;  %v13929_v63 = vor.u32 %v17322_v25, %v13926_v49  ;;  %7539 = vmatpush.bf16.msra.mxu0 %v13673_v62  ;;  %v7301_v62 = vpop.f32.mrf.mxu1 }
 0x3a2   : > { %v14182_v60 = vld [vmem:[%s18787_s3 + $0x1568] sm:$0xf0] }
 0x3a3   : > { %v17450_v61 = vld [vmem:[%s18787_s3 + $0x174c] sm:$0xf]  ;;  %v14185_v57 = vor.u32 %v17386_v56, %v14182_v60  ;;  %7552 = vmatpush.bf16.msra.mxu1 %v13929_v63 }
 0x3a4   : > { %v14438_v20 = vld [vmem:[%s18787_s3 + $0x1768] sm:$0xf0] }
 0x3a5   : > { %v17250_v1 = vld [vmem:[%s18787_s3 + $0x110c] sm:$0xf]  ;;  %v14441_v4 = vor.u32 %v17450_v61, %v14438_v20  ;;  %7565 = vmatpush.bf16.msra.mxu2 %v14185_v57 }
 0x3a6   : > { %v13638_v2 = vld [vmem:[%s18787_s3 + $0x1128] sm:$0xf0] }
 0x3a7   : > { %v17314_v3 = vld [vmem:[%s18787_s3 + $0x130c] sm:$0xf]  ;;  %v13641_v54 = vor.u32 %v17250_v1, %v13638_v2  ;;  %7578 = vmatpush.bf16.msra.mxu3 %v14441_v4 }
 0x3a8   : > { %v13894_v8 = vld [vmem:[%s18787_s3 + $0x1328] sm:$0xf0] }
 0x3a9   : > { %v17378_v17 = vld [vmem:[%s18787_s3 + $0x150c] sm:$0xf]  ;;  %v13897_v12 = vor.u32 %v17314_v3, %v13894_v8  ;;  %7540 = vmatpush.bf16.msra.mxu0 %v13641_v54 }
 0x3aa   : > { %v14150_v6 = vld [vmem:[%s18787_s3 + $0x1528] sm:$0xf0] }
 0x3ab   : > { %v17442_v0 = vld [vmem:[%s18787_s3 + $0x170c] sm:$0xf]  ;;  %v14153_v14 = vor.u32 %v17378_v17, %v14150_v6  ;;  %7553 = vmatpush.bf16.msra.mxu1 %v13897_v12 }
 0x3ac   : > { %v14406_v52 = vld [vmem:[%s18787_s3 + $0x1728] sm:$0xf0] }
 0x3ad   : > { %v17242_v15 = vld [vmem:[%s18787_s3 + $0x10cc] sm:$0xf]  ;;  %v14409_v16 = vor.u32 %v17442_v0, %v14406_v52  ;;  %7566 = vmatpush.bf16.msra.mxu2 %v14153_v14 }
 0x3ae   : > { %v13606_v18 = vld [vmem:[%s18787_s3 + $0x10e8] sm:$0xf0] }
 0x3af   : > { %v17306_v10 = vld [vmem:[%s18787_s3 + $0x12cc] sm:$0xf]  ;;  %v13609_v28 = vor.u32 %v17242_v15, %v13606_v18  ;;  %7579 = vmatpush.bf16.msra.mxu3 %v14409_v16  ;;  %v7314_v15 = vpop.f32.mrf.mxu2 }
 0x3b0   : > { %v13862_v27 = vld [vmem:[%s18787_s3 + $0x12e8] sm:$0xf0] }
 0x3b1   : > { %v17370_v37 = vld [vmem:[%s18787_s3 + $0x14cc] sm:$0xf]  ;;  %v13865_v13 = vor.u32 %v17306_v10, %v13862_v27  ;;  %7541 = vmatpush.bf16.msra.mxu0 %v13609_v28 }
 0x3b2   : > { %v14118_v23 = vld [vmem:[%s18787_s3 + $0x14e8] sm:$0xf0] }
 0x3b3   : > { %v17434_v48 = vld [vmem:[%s18787_s3 + $0x16cc] sm:$0xf]  ;;  %v14121_v33 = vor.u32 %v17370_v37, %v14118_v23  ;;  %7554 = vmatpush.bf16.msra.mxu1 %v13865_v13  ;;  %v7327_v37 = vpop.f32.mrf.mxu3 }
 0x3b4   : > { %v14374_v40 = vld [vmem:[%s18787_s3 + $0x16e8] sm:$0xf0] }
 0x3b5   : > { %v17234_v35 = vld [vmem:[%s18787_s3 + $0x108c] sm:$0xf]  ;;  %v14377_v46 = vor.u32 %v17434_v48, %v14374_v40  ;;  %7567 = vmatpush.bf16.msra.mxu2 %v14121_v33 }
 0x3b6   : > { %v13574_v58 = vld [vmem:[%s18787_s3 + $0x10a8] sm:$0xf0] }
 0x3b7   : > { %v17298_v41 = vld [vmem:[%s18787_s3 + $0x128c] sm:$0xf]  ;;  %v13577_v25 = vor.u32 %v17234_v35, %v13574_v58  ;;  %7580 = vmatpush.bf16.msra.mxu3 %v14377_v46 }
 0x3b8   : > { %v13830_v47 = vld [vmem:[%s18787_s3 + $0x12a8] sm:$0xf0] }
 0x3b9   : > { %v17362_v50 = vld [vmem:[%s18787_s3 + $0x148c] sm:$0xf]  ;;  %v13833_v49 = vor.u32 %v17298_v41, %v13830_v47  ;;  %7542 = vmatpush.bf16.msra.mxu0 %v13577_v25 }
 0x3ba   : > { %v14086_v53 = vld [vmem:[%s18787_s3 + $0x14a8] sm:$0xf0] }
 0x3bb   : > { %v17426_v11 = vld [vmem:[%s18787_s3 + $0x168c] sm:$0xf]  ;;  %v14089_v56 = vor.u32 %v17362_v50, %v14086_v53  ;;  %7555 = vmatpush.bf16.msra.mxu1 %v13833_v49 }
 0x3bc   : > { %v14342_v59 = vld [vmem:[%s18787_s3 + $0x16a8] sm:$0xf0] }
 0x3bd   : > { %v17226_v60 = vld [vmem:[%s18787_s3 + $0x104c] sm:$0xf]  ;;  %v14345_v63 = vor.u32 %v17426_v11, %v14342_v59  ;;  %7568 = vmatpush.bf16.msra.mxu2 %v14089_v56 }
 0x3be   : > { %v13542_v61 = vld [vmem:[%s18787_s3 + $0x1068] sm:$0xf0] }
 0x3bf   : > { %v17290_v20 = vld [vmem:[%s18787_s3 + $0x124c] sm:$0xf]  ;;  %v13545_v8 = vor.u32 %v17226_v60, %v13542_v61  ;;  %7581 = vmatpush.bf16.msra.mxu3 %v14345_v63 }
 0x3c0   : > { %v13798_v57 = vld [vmem:[%s18787_s3 + $0x1268] sm:$0xf0] }
 0x3c1   : > { %v17354_v1 = vld [vmem:[%s18787_s3 + $0x144c] sm:$0xf]  ;;  %v13801_v0 = vor.u32 %v17290_v20, %v13798_v57  ;;  %7543 = vmatpush.bf16.msra.mxu0 %v13545_v8 }
 0x3c2   : > { %v14054_v2 = vld [vmem:[%s18787_s3 + $0x1468] sm:$0xf0] }
 0x3c3   : > { %v17418_v3 = vld [vmem:[%s18787_s3 + $0x164c] sm:$0xf]  ;;  %v14057_v52 = vor.u32 %v17354_v1, %v14054_v2  ;;  %7556 = vmatpush.bf16.msra.mxu1 %v13801_v0 }
 0x3c4   : > { %v14310_v4 = vld [vmem:[%s18787_s3 + $0x1668] sm:$0xf0] }
 0x3c5   : > { %v17218_v17 = vld [vmem:[%s18787_s3 + $0x100c] sm:$0xf]  ;;  %v14313_v18 = vor.u32 %v17418_v3, %v14310_v4  ;;  %7569 = vmatpush.bf16.msra.mxu2 %v14057_v52 }
 0x3c6   : > { %v13510_v6 = vld [vmem:[%s18787_s3 + $0x1028] sm:$0xf0] }
 0x3c7   : > { %v17282_v54 = vld [vmem:[%s18787_s3 + $0x120c] sm:$0xf]  ;;  %v13513_v28 = vor.u32 %v17218_v17, %v13510_v6  ;;  %7582 = vmatpush.bf16.msra.mxu3 %v14313_v18 }
 0x3c8   : > { %v13766_v12 = vld [vmem:[%s18787_s3 + $0x1228] sm:$0xf0] }
 0x3c9   : > { %v17346_v14 = vld [vmem:[%s18787_s3 + $0x140c] sm:$0xf]  ;;  %v13769_v58 = vor.u32 %v17282_v54, %v13766_v12  ;;  %7544 = vmatpush.bf16.msra.mxu0 %v13513_v28  ;;  %v19984_v28 = vpop.f32.mrf.mxu0 }
 0x3ca   : > { %v14022_v10 = vld [vmem:[%s18787_s3 + $0x1428] sm:$0xf0] }
 0x3cb   : > { %v17410_v16 = vld [vmem:[%s18787_s3 + $0x160c] sm:$0xf]  ;;  %v14025_v41 = vor.u32 %v17346_v14, %v14022_v10  ;;  %7557 = vmatpush.bf16.msra.mxu1 %v13769_v58  ;;  %v19988_v58 = vpop.f32.mrf.mxu1 }
 0x3cc   : > { %v14278_v27 = vld [vmem:[%s18787_s3 + $0x1628] sm:$0xf0]  ;;  %7545 = vmatmul.bf16.vlgmr.msra.gmra.mxu0 %v19054_v26 }
 0x3cd   : > { %v17530_v23 = vld [vmem:[%s18787_s3 + $0x19cc] sm:$0xf]  ;;  %v14281_v50 = vor.u32 %v17410_v16, %v14278_v27  ;;  %7570 = vmatpush.bf16.msra.mxu2 %v14025_v41 }
 0x3ce   : > { %v14758_v48 = vld [vmem:[%s18787_s3 + $0x19e8] sm:$0xf0]  ;;  %7558 = vmatmul.bf16.vlgmr.msra.gmra.mxu1 %v19061_v31 }
 0x3cf   : > { %v17594_v40 = vld [vmem:[%s18787_s3 + $0x1bcc] sm:$0xf]  ;;  %v14761_v53 = vor.u32 %v17530_v23, %v14758_v48  ;;  %7583 = vmatpush.bf16.msra.mxu3 %v14281_v50 }
 0x3d0   : > { %v15014_v13 = vld [vmem:[%s18787_s3 + $0x1be8] sm:$0xf0]  ;;  %7571 = vmatmul.bf16.vlgmr.msra.gmra.mxu2 %v19059_v30 }
 0x3d1   : > { %v17658_v33 = vld [vmem:[%s18787_s3 + $0x1dcc] sm:$0xf]  ;;  %v15017_v11 = vor.u32 %v17594_v40, %v15014_v13  ;;  %7589 = vmatpush.bf16.msrb.mxu0 %v14761_v53 }
 0x3d2   : > { %v15270_v35 = vld [vmem:[%s18787_s3 + $0x1de8] sm:$0xf0]  ;;  %7584 = vmatmul.bf16.vlgmr.msra.gmra.mxu3 %v19065_v34 }
 0x3d3   : > { %v17722_v46 = vld [vmem:[%s18787_s3 + $0x1fcc] sm:$0xf]  ;;  %v15273_v59 = vor.u32 %v17658_v33, %v15270_v35  ;;  %7602 = vmatpush.bf16.msrb.mxu1 %v15017_v11 }
 0x3d4   : > { %v15526_v47 = vld [vmem:[%s18787_s3 + $0x1fe8] sm:$0xf0] }
 0x3d5   : > { %v17522_v25 = vld [vmem:[%s18787_s3 + $0x198c] sm:$0xf]  ;;  %v15529_v56 = vor.u32 %v17722_v46, %v15526_v47  ;;  %7615 = vmatpush.bf16.msrb.mxu2 %v15273_v59 }
 0x3d6   : > { %v14726_v55 = vld [vmem:[%s18787_s3 + $0x19a8] sm:$0xf0] }
 0x3d7   : > { %v17586_v49 = vld [vmem:[%s18787_s3 + $0x1b8c] sm:$0xf]  ;;  %v14729_v57 = vor.u32 %v17522_v25, %v14726_v55  ;;  %7628 = vmatpush.bf16.msrb.mxu3 %v15529_v56 }
 0x3d8   : > { %v14982_v60 = vld [vmem:[%s18787_s3 + $0x1ba8] sm:$0xf0] }
 0x3d9   : > { %v17650_v61 = vld [vmem:[%s18787_s3 + $0x1d8c] sm:$0xf]  ;;  %v14985_v1 = vor.u32 %v17586_v49, %v14982_v60  ;;  %7590 = vmatpush.bf16.msrb.mxu0 %v14729_v57 }
 0x3da   : > { %v15238_v20 = vld [vmem:[%s18787_s3 + $0x1da8] sm:$0xf0] }
 0x3db   : > { %v17714_v62 = vld [vmem:[%s18787_s3 + $0x1f8c] sm:$0xf]  ;;  %v15241_v2 = vor.u32 %v17650_v61, %v15238_v20  ;;  %7603 = vmatpush.bf16.msrb.mxu1 %v14985_v1  ;;  %v7287_v61 = vadd.f32 %v19910_v9, %v19856_v38 }
 0x3dc   : > { %v15494_v63 = vld [vmem:[%s18787_s3 + $0x1fa8] sm:$0xf0] }
 0x3dd   : > { %v17514_v3 = vld [vmem:[%s18787_s3 + $0x194c] sm:$0xf]  ;;  %v15497_v17 = vor.u32 %v17714_v62, %v15494_v63  ;;  %7616 = vmatpush.bf16.msrb.mxu2 %v15241_v2 }
 0x3de   : > { %v14694_v4 = vld [vmem:[%s18787_s3 + $0x1968] sm:$0xf0] }
 0x3df   : > { %v17578_v8 = vld [vmem:[%s18787_s3 + $0x1b4c] sm:$0xf]  ;;  %v14697_v14 = vor.u32 %v17514_v3, %v14694_v4  ;;  %7629 = vmatpush.bf16.msrb.mxu3 %v15497_v17  ;;  %v20003_v3 = vpop.f32.mrf.mxu2 }
 0x3e0   : > { %v14950_v6 = vld [vmem:[%s18787_s3 + $0x1b68] sm:$0xf0] }
 0x3e1   : > { %v17642_v0 = vld [vmem:[%s18787_s3 + $0x1d4c] sm:$0xf]  ;;  %v14953_v15 = vor.u32 %v17578_v8, %v14950_v6  ;;  %7591 = vmatpush.bf16.msrb.mxu0 %v14697_v14  ;;  %v20008_v6 = vpop.f32.mrf.mxu3 }
 0x3e2   : > { %v15206_v52 = vld [vmem:[%s18787_s3 + $0x1d68] sm:$0xf0] }
 0x3e3   : > { %v17706_v54 = vld [vmem:[%s18787_s3 + $0x1f4c] sm:$0xf]  ;;  %v15209_v18 = vor.u32 %v17642_v0, %v15206_v52  ;;  %7604 = vmatpush.bf16.msrb.mxu1 %v14953_v15  ;;  %v7340_v0 = vpop.f32.mrf.mxu0 }
 0x3e4   : > { %v15462_v12 = vld [vmem:[%s18787_s3 + $0x1f68] sm:$0xf0] }
 0x3e5   : > { %v17506_v10 = vld [vmem:[%s18787_s3 + $0x190c] sm:$0xf]  ;;  %v15465_v37 = vor.u32 %v17706_v54, %v15462_v12  ;;  %7617 = vmatpush.bf16.msrb.mxu2 %v15209_v18  ;;  %v7353_v54 = vpop.f32.mrf.mxu1  ;;  %v7300_v12 = vadd.f32 %v19915_v19, %v7287_v61  ;;  %v11948_v61 = vld [vmem:[%s18787_s3 + $0x3d0] sm:$0xf] }
 0x3e6   : > { %v14662_v16 = vld [vmem:[%s18787_s3 + $0x1928] sm:$0xf0] }
 0x3e7   : > { %v17570_v27 = vld [vmem:[%s18787_s3 + $0x1b0c] sm:$0xf]  ;;  %v14665_v35 = vor.u32 %v17506_v10, %v14662_v16  ;;  %7630 = vmatpush.bf16.msrb.mxu3 %v15465_v37 }
 0x3e8   : > { %v14918_v23 = vld [vmem:[%s18787_s3 + $0x1b28] sm:$0xf0] }
 0x3e9   : > { %v17634_v48 = vld [vmem:[%s18787_s3 + $0x1d0c] sm:$0xf]  ;;  %v14921_v41 = vor.u32 %v17570_v27, %v14918_v23  ;;  %7592 = vmatpush.bf16.msrb.mxu0 %v14665_v35 }
 0x3ea   : > { %v15174_v40 = vld [vmem:[%s18787_s3 + $0x1d28] sm:$0xf0] }
 0x3eb   : > { %v17698_v13 = vld [vmem:[%s18787_s3 + $0x1f0c] sm:$0xf]  ;;  %v15177_v46 = vor.u32 %v17634_v48, %v15174_v40  ;;  %7605 = vmatpush.bf16.msrb.mxu1 %v14921_v41  ;;  %v7313_v41 = vadd.f32 %v19925_v44, %v7300_v12  ;;  %v11692_v44 = vld [vmem:[%s18787_s3 + $0x1d0] sm:$0xf] }
 0x3ec   : > { %v15430_v33 = vld [vmem:[%s18787_s3 + $0x1f28] sm:$0xf0] }
 0x3ed   : > { %v17498_v47 = vld [vmem:[%s18787_s3 + $0x18cc] sm:$0xf]  ;;  %v15433_v11 = vor.u32 %v17698_v13, %v15430_v33  ;;  %7618 = vmatpush.bf16.msrb.mxu2 %v15177_v46 }
 0x3ee   : > { %v14630_v50 = vld [vmem:[%s18787_s3 + $0x18e8] sm:$0xf0] }
 0x3ef   : > { %v17562_v53 = vld [vmem:[%s18787_s3 + $0x1acc] sm:$0xf]  ;;  %v14633_v60 = vor.u32 %v17498_v47, %v14630_v50  ;;  %7631 = vmatpush.bf16.msrb.mxu3 %v15433_v11 }
 0x3f0   : > { %v14886_v59 = vld [vmem:[%s18787_s3 + $0x1ae8] sm:$0xf0] }
 0x3f1   : > { %v17626_v25 = vld [vmem:[%s18787_s3 + $0x1ccc] sm:$0xf]  ;;  %v14889_v20 = vor.u32 %v17562_v53, %v14886_v59  ;;  %7593 = vmatpush.bf16.msrb.mxu0 %v14633_v60  ;;  %v16767_v60 = vld [vmem:[%s18787_s3 + $0x1ec] sm:$0xf0] }
 0x3f2   : > { %v15142_v55 = vld [vmem:[%s18787_s3 + $0x1ce8] sm:$0xf0]  ;;  %v11693_v0 = vor.u32 %v16767_v60, %v11692_v44  ;;  %v16807_v60 = vld [vmem:[%s18787_s3 + $0x32c] sm:$0xf0] }
 0x3f3   : > { %v17690_v49 = vld [vmem:[%s18787_s3 + $0x1ecc] sm:$0xf]  ;;  %v15145_v62 = vor.u32 %v17626_v25, %v15142_v55  ;;  %7606 = vmatpush.bf16.msrb.mxu1 %v14889_v20  ;;  %v7379_v20 = vpop.f32.mrf.mxu3 }
 0x3f4   : > { %v15398_v56 = vld [vmem:[%s18787_s3 + $0x1ee8] sm:$0xf0]  ;;  %v16871_v20 = vld [vmem:[%s18787_s3 + $0x52c] sm:$0xf0] }
 0x3f5   : > { %v17490_v63 = vld [vmem:[%s18787_s3 + $0x188c] sm:$0xf]  ;;  %v15401_v2 = vor.u32 %v17690_v49, %v15398_v56  ;;  %7619 = vmatpush.bf16.msrb.mxu2 %v15145_v62  ;;  %v7366_v56 = vpop.f32.mrf.mxu2 }
 0x3f6   : > { %v14598_v57 = vld [vmem:[%s18787_s3 + $0x18a8] sm:$0xf0]  ;;  %v11852_v56 = vld [vmem:[%s18787_s3 + $0x310] sm:$0xf] }
 0x3f7   : > { %v17554_v1 = vld [vmem:[%s18787_s3 + $0x1a8c] sm:$0xf]  ;;  %v14601_v52 = vor.u32 %v17490_v63, %v14598_v57  ;;  %7632 = vmatpush.bf16.msrb.mxu3 %v15401_v2  ;;  %v16831_v63 = vld [vmem:[%s18787_s3 + $0x3ec] sm:$0xf0]  ;;  %v7326_v2 = vadd.f32 %v19930_v51, %v7313_v41 }
 0x3f8   : > { %v14854_v4 = vld [vmem:[%s18787_s3 + $0x1aa8] sm:$0xf0]  ;;  %v12204_v57 = vld [vmem:[%s18787_s3 + $0x5d0] sm:$0xf]  ;;  %v11949_v54 = vor.u32 %v16831_v63, %v11948_v61  ;;  %v7390_v63 = vpop.f32.mrf.mxu0 }
 0x3f9   : > { %v17618_v8 = vld [vmem:[%s18787_s3 + $0x1c8c] sm:$0xf]  ;;  %v14857_v14 = vor.u32 %v17554_v1, %v14854_v4  ;;  %7594 = vmatpush.bf16.msrb.mxu0 %v14601_v52  ;;  %v16895_v1 = vld [vmem:[%s18787_s3 + $0x5ec] sm:$0xf0]  ;;  %v7339_v52 = vadd.f32 %v19984_v28, %v7326_v2 }
 0x3fa   : > { %v15110_v17 = vld [vmem:[%s18787_s3 + $0x1ca8] sm:$0xf0]  ;;  %v12205_v12 = vor.u32 %v16895_v1, %v12204_v57  ;;  %v16759_v51 = vld [vmem:[%s18787_s3 + $0x1ac] sm:$0xf0] }
 0x3fb   : > { %v17682_v38 = vld [vmem:[%s18787_s3 + $0x1e8c] sm:$0xf]  ;;  %v15113_v15 = vor.u32 %v17618_v8, %v15110_v17  ;;  %7607 = vmatpush.bf16.msrb.mxu1 %v14857_v14  ;;  %v12460_v17 = vld [vmem:[%s18787_s3 + $0x7d0] sm:$0xf] }
 0x3fc   : > { %v15366_v9 = vld [vmem:[%s18787_s3 + $0x1ea8] sm:$0xf0]  ;;  %v11660_v14 = vld [vmem:[%s18787_s3 + $0x190] sm:$0xf] }
 0x3fd   : > { %v17482_v18 = vld [vmem:[%s18787_s3 + $0x184c] sm:$0xf]  ;;  %v15369_v27 = vor.u32 %v17682_v38, %v15366_v9  ;;  %7620 = vmatpush.bf16.msrb.mxu2 %v15113_v15  ;;  %v16959_v38 = vld [vmem:[%s18787_s3 + $0x7ec] sm:$0xf0]  ;;  %v11661_v28 = vor.u32 %v16759_v51, %v11660_v14 }
 0x3fe   : > { %v14566_v10 = vld [vmem:[%s18787_s3 + $0x1868] sm:$0xf0]  ;;  %v11916_v15 = vld [vmem:[%s18787_s3 + $0x390] sm:$0xf] }
 0x3ff   : > { %v17546_v16 = vld [vmem:[%s18787_s3 + $0x1a4c] sm:$0xf]  ;;  %v14569_v13 = vor.u32 %v17482_v18, %v14566_v10  ;;  %7633 = vmatpush.bf16.msrb.mxu3 %v15369_v27  ;;  %v12461_v18 = vor.u32 %v16959_v38, %v12460_v17  ;;  %v16823_v10 = vld [vmem:[%s18787_s3 + $0x3ac] sm:$0xf0]  ;;  %v11853_v17 = vor.u32 %v16807_v60, %v11852_v56 }
 0x400   : > { %v14822_v37 = vld [vmem:[%s18787_s3 + $0x1a68] sm:$0xf0]  ;;  %v16887_v27 = vld [vmem:[%s18787_s3 + $0x5ac] sm:$0xf0] }
 0x401   : > { %v17610_v23 = vld [vmem:[%s18787_s3 + $0x1c4c] sm:$0xf]  ;;  %v14825_v46 = vor.u32 %v17546_v16, %v14822_v37  ;;  %7595 = vmatpush.bf16.msrb.mxu0 %v14569_v13  ;;  %v12172_v16 = vld [vmem:[%s18787_s3 + $0x590] sm:$0xf] }
 0x402   : > { %v15078_v48 = vld [vmem:[%s18787_s3 + $0x1c68] sm:$0xf0]  ;;  %v12428_v37 = vld [vmem:[%s18787_s3 + $0x790] sm:$0xf] }
 0x403   : > { %v17674_v40 = vld [vmem:[%s18787_s3 + $0x1e4c] sm:$0xf]  ;;  %v15081_v47 = vor.u32 %v17610_v23, %v15078_v48  ;;  %7608 = vmatpush.bf16.msrb.mxu1 %v14825_v46  ;;  %v16951_v23 = vld [vmem:[%s18787_s3 + $0x7ac] sm:$0xf0]  ;;  %v7352_v48 = vadd.f32 %v19988_v58, %v7339_v52 }
 0x404   : > { %v15334_v19 = vld [vmem:[%s18787_s3 + $0x1e68] sm:$0xf0]  ;;  %v11628_v13 = vld [vmem:[%s18787_s3 + $0x150] sm:$0xf]  ;;  %v12429_v41 = vor.u32 %v16951_v23, %v12428_v37 }
 0x405   : > { %v17474_v33 = vld [vmem:[%s18787_s3 + $0x180c] sm:$0xf]  ;;  %v15337_v59 = vor.u32 %v17674_v40, %v15334_v19  ;;  %7621 = vmatpush.bf16.msrb.mxu2 %v15081_v47  ;;  %v11917_v40 = vor.u32 %v16823_v10, %v11916_v15  ;;  %v12173_v19 = vor.u32 %v16887_v27, %v12172_v16  ;;  %v16815_v46 = vld [vmem:[%s18787_s3 + $0x36c] sm:$0xf0]  ;;  %v7365_v58 = vadd.f32 %v20003_v3, %v7352_v48 }
 0x406   : > { %v14534_v35 = vld [vmem:[%s18787_s3 + $0x1828] sm:$0xf0]  ;;  %v12140_v47 = vld [vmem:[%s18787_s3 + $0x550] sm:$0xf] }
 0x407   : > { %v17538_v50 = vld [vmem:[%s18787_s3 + $0x1a0c] sm:$0xf]  ;;  %v14537_v62 = vor.u32 %v17474_v33, %v14534_v35  ;;  %7634 = vmatpush.bf16.msrb.mxu3 %v15337_v59  ;;  %v16751_v33 = vld [vmem:[%s18787_s3 + $0x16c] sm:$0xf0] }
 0x408   : > { %v14790_v53 = vld [vmem:[%s18787_s3 + $0x1a28] sm:$0xf0]  ;;  %v11884_v35 = vld [vmem:[%s18787_s3 + $0x350] sm:$0xf]  ;;  %v11629_v59 = vor.u32 %v16751_v33, %v11628_v13 }
 0x409   : > { %v17602_v11 = vld [vmem:[%s18787_s3 + $0x1c0c] sm:$0xf]  ;;  %v14793_v4 = vor.u32 %v17538_v50, %v14790_v53  ;;  %7596 = vmatpush.bf16.msrb.mxu0 %v14537_v62  ;;  %v16879_v50 = vld [vmem:[%s18787_s3 + $0x56c] sm:$0xf0]  ;;  %v7378_v62 = vadd.f32 %v20008_v6, %v7365_v58  ;;  %v595_v58 = vld [vmem:[#allocation2 + $0x18] sm:$0xff] }
 0x40a   : > { %v15046_v25 = vld [vmem:[%s18787_s3 + $0x1c28] sm:$0xf0]  ;;  %v12396_v53 = vld [vmem:[%s18787_s3 + $0x750] sm:$0xf] }
 0x40b   : > { %v17666_v55 = vld [vmem:[%s18787_s3 + $0x1e0c] sm:$0xf]  ;;  %v15049_v8 = vor.u32 %v17602_v11, %v15046_v25  ;;  %7609 = vmatpush.bf16.msrb.mxu1 %v14793_v4  ;;  %v16943_v11 = vld [vmem:[%s18787_s3 + $0x76c] sm:$0xf0]  ;;  %v11885_v25 = vor.u32 %v16815_v46, %v11884_v35  ;;  %v7403_v4 = vpop.f32.mrf.mxu1 }
 0x40c   : > { %v15302_v49 = vld [vmem:[%s18787_s3 + $0x1e28] sm:$0xf0]  ;;  %7597 = vmatmul.bf16.vlgmr.msrb.gmra.mxu0 %v19132_v24  ;;  %v11596_v3 = vld [vmem:[%s18787_s3 + $0x110] sm:$0xf]  ;;  %v12397_v44 = vor.u32 %v16943_v11, %v12396_v53 }
 0x40d   : > { %v15305_v9 = vor.u32 %v17666_v55, %v15302_v49  ;;  %7622 = vmatpush.bf16.msrb.mxu2 %v15049_v8  ;;  %7641 = vmatpush.bf16.msra.mxu0 %v11693_v0  ;;  %v12141_v55 = vor.u32 %v16879_v50, %v12140_v47  ;;  %v16743_v49 = vld [vmem:[%s18787_s3 + $0x12c] sm:$0xf0]  ;;  %v7391_v8 = vadd.f32 %v7390_v63, %v7378_v62  ;;  %v7392_v50 = vpop.f32.mrf.mxu0 }
 0x40e   : > { %7610 = vmatmul.bf16.vlgmr.msrb.gmra.mxu1 %v19139_v32  ;;  %v12108_v61 = vld [vmem:[%s18787_s3 + $0x510] sm:$0xf]  ;;  %v11597_v2 = vor.u32 %v16743_v49, %v11596_v3 }
 0x40f   : > { %7635 = vmatpush.bf16.msrb.mxu3 %v15305_v9  ;;  %7654 = vmatpush.bf16.msra.mxu1 %v11949_v54  ;;  %v12364_v57 = vld [vmem:[%s18787_s3 + $0x710] sm:$0xf]  ;;  %v12109_v38 = vor.u32 %v16871_v20, %v12108_v61  ;;  %v7404_v10 = vadd.f32 %v7403_v4, %v7391_v8 }
 0x410   : > { %7623 = vmatmul.bf16.vlgmr.msrb.gmra.mxu2 %v19137_v29  ;;  %v16935_v1 = vld [vmem:[%s18787_s3 + $0x72c] sm:$0xf0] }
 0x411   : > { %7667 = vmatpush.bf16.msra.mxu2 %v12205_v12  ;;  %7642 = vmatpush.bf16.msra.mxu0 %v11661_v28  ;;  %v11564_v9 = vld [vmem:[%s18787_s3 + $0xd0] sm:$0xf]  ;;  %v12365_v52 = vor.u32 %v16935_v1, %v12364_v57 }
 0x412   : > { %7636 = vmatmul.bf16.vlgmr.msrb.gmra.mxu3 %v19143_v36  ;;  %v16735_v0 = vld [vmem:[%s18787_s3 + $0xec] sm:$0xf0] }
 0x413   : > { %7680 = vmatpush.bf16.msra.mxu3 %v12461_v18  ;;  %7655 = vmatpush.bf16.msra.mxu1 %v11917_v40  ;;  %v11820_v6 = vld [vmem:[%s18787_s3 + $0x2d0] sm:$0xf]  ;;  %v11565_v18 = vor.u32 %v16735_v0, %v11564_v9  ;;  %v7416_v40 = vpop.f32.mrf.mxu2  ;;  %v7405_v11 = vpop.f32.mrf.mxu1 }
 0x414   : > { %v16799_v54 = vld [vmem:[%s18787_s3 + $0x2ec] sm:$0xf0]  ;;  %v7417_v35 = vadd.f32 %v7416_v40, %v7404_v10 }
 0x415   : > { %7668 = vmatpush.bf16.msra.mxu2 %v12173_v19  ;;  %7643 = vmatpush.bf16.msra.mxu0 %v11629_v59  ;;  %v12076_v12 = vld [vmem:[%s18787_s3 + $0x4d0] sm:$0xf]  ;;  %v11821_v16 = vor.u32 %v16799_v54, %v11820_v6 }
 0x416   : > { %v16863_v14 = vld [vmem:[%s18787_s3 + $0x4ec] sm:$0xf0] }
 0x417   : > { %7681 = vmatpush.bf16.msra.mxu3 %v12429_v41  ;;  %7656 = vmatpush.bf16.msra.mxu1 %v11885_v25  ;;  %v12332_v51 = vld [vmem:[%s18787_s3 + $0x6d0] sm:$0xf]  ;;  %v12077_v27 = vor.u32 %v16863_v14, %v12076_v12  ;;  %v7429_v41 = vpop.f32.mrf.mxu3 }
 0x418   : > { %v16927_v15 = vld [vmem:[%s18787_s3 + $0x6ec] sm:$0xf0]  ;;  %v7430_v59 = vadd.f32 %v7429_v41, %v7417_v35 }
 0x419   : > { %7669 = vmatpush.bf16.msra.mxu2 %v12141_v55  ;;  %7644 = vmatpush.bf16.msra.mxu0 %v11597_v2  ;;  %v11532_v37 = vld [vmem:[%s18787_s3 + $0x90] sm:$0xf]  ;;  %v12333_v48 = vor.u32 %v16927_v15, %v12332_v51 }
 0x41a   : > { %v16727_v23 = vld [vmem:[%s18787_s3 + $0xac] sm:$0xf0]  ;;  %v8475_v62 = vadd.f32 %v7430_v59, %v595_v58 }
 0x41b   : > { %7682 = vmatpush.bf16.msra.mxu3 %v12397_v44  ;;  %7657 = vmatpush.bf16.msra.mxu1 %v11853_v17  ;;  %v11788_v28 = vld [vmem:[%s18787_s3 + $0x290] sm:$0xf]  ;;  %v11533_v53 = vor.u32 %v16727_v23, %v11532_v37  ;;  %v7418_v14 = vpop.f32.mrf.mxu2 }
 0x41c   : > { %v16791_v19 = vld [vmem:[%s18787_s3 + $0x2ac] sm:$0xf0]  ;;  %8483 = vst [vmem:[#allocation2 + $0x18] sm:$0xff] %v8475_v62 }
 0x41d   : > { %7670 = vmatpush.bf16.msra.mxu2 %v12109_v38  ;;  %v12044_v13 = vld [vmem:[%s18787_s3 + $0x490] sm:$0xf]  ;;  %7645 = vmatpush.bf16.msra.mxu0 %v11565_v18  ;;  %v11789_v25 = vor.u32 %v16791_v19, %v11788_v28 }
 0x41e   : > { %v16855_v33 = vld [vmem:[%s18787_s3 + $0x4ac] sm:$0xf0] }
 0x41f   : > { %7683 = vmatpush.bf16.msra.mxu3 %v12365_v52  ;;  %v12300_v46 = vld [vmem:[%s18787_s3 + $0x690] sm:$0xf]  ;;  %7658 = vmatpush.bf16.msra.mxu1 %v11821_v16  ;;  %v12045_v55 = vor.u32 %v16855_v33, %v12044_v13  ;;  %v7431_v10 = vpop.f32.mrf.mxu3 }
 0x420   : > { %v16919_v47 = vld [vmem:[%s18787_s3 + $0x6ac] sm:$0xf0] }
 0x421   : > { %7671 = vmatpush.bf16.msra.mxu2 %v12077_v27  ;;  %v11500_v3 = vld [vmem:[%s18787_s3 + $0x50] sm:$0xf]  ;;  %v12301_v44 = vor.u32 %v16919_v47, %v12300_v46  ;;  %7646 = vmatpush.bf16.msra.mxu0 %v11533_v53 }
 0x422   : > { %v16719_v49 = vld [vmem:[%s18787_s3 + $0x6c] sm:$0xf0] }
 0x423   : > { %v11756_v56 = vld [vmem:[%s18787_s3 + $0x250] sm:$0xf]  ;;  %7684 = vmatpush.bf16.msra.mxu3 %v12333_v48  ;;  %v11501_v1 = vor.u32 %v16719_v49, %v11500_v3  ;;  %7659 = vmatpush.bf16.msra.mxu1 %v11789_v25 }
 0x424   : > { %v16783_v60 = vld [vmem:[%s18787_s3 + $0x26c] sm:$0xf0] }
 0x425   : > { %v12012_v61 = vld [vmem:[%s18787_s3 + $0x450] sm:$0xf]  ;;  %7672 = vmatpush.bf16.msra.mxu2 %v12045_v55  ;;  %v11757_v17 = vor.u32 %v16783_v60, %v11756_v56  ;;  %7647 = vmatpush.bf16.msra.mxu0 %v11501_v1 }
 0x426   : > { %v16847_v20 = vld [vmem:[%s18787_s3 + $0x46c] sm:$0xf0] }
 0x427   : > { %v12268_v63 = vld [vmem:[%s18787_s3 + $0x650] sm:$0xf]  ;;  %v12013_v38 = vor.u32 %v16847_v20, %v12012_v61  ;;  %7685 = vmatpush.bf16.msra.mxu3 %v12301_v44  ;;  %7660 = vmatpush.bf16.msra.mxu1 %v11757_v17 }
 0x428   : > { %v16911_v57 = vld [vmem:[%s18787_s3 + $0x66c] sm:$0xf0] }
 0x429   : > { %v11468_v2 = vld [vmem:[%s18787_s3 + $0x10] sm:$0xf]  ;;  %v12269_v6 = vor.u32 %v16911_v57, %v12268_v63  ;;  %7673 = vmatpush.bf16.msra.mxu2 %v12013_v38 }
 0x42a   : > { %v16711_v4 = vld [vmem:[%s18787_s3 + $0x2c] sm:$0xf0] }
 0x42b   : > { %v11724_v8 = vld [vmem:[%s18787_s3 + $0x210] sm:$0xf]  ;;  %v11469_v16 = vor.u32 %v16711_v4, %v11468_v2  ;;  %7686 = vmatpush.bf16.msra.mxu3 %v12269_v6 }
 0x42c   : > { %v16775_v9 = vld [vmem:[%s18787_s3 + $0x22c] sm:$0xf0] }
 0x42d   : > { %v11980_v0 = vld [vmem:[%s18787_s3 + $0x410] sm:$0xf]  ;;  %v11725_v28 = vor.u32 %v16775_v9, %v11724_v8  ;;  %7648 = vmatpush.bf16.msra.mxu0 %v11469_v16 }
 0x42e   : > { %v16839_v52 = vld [vmem:[%s18787_s3 + $0x42c] sm:$0xf0] }
 0x42f   : > { %v12236_v54 = vld [vmem:[%s18787_s3 + $0x610] sm:$0xf]  ;;  %v11981_v48 = vor.u32 %v16839_v52, %v11980_v0  ;;  %7661 = vmatpush.bf16.msra.mxu1 %v11725_v28  ;;  %v7455_v28 = vpop.f32.mrf.mxu1 }
 0x430   : > { %v16903_v12 = vld [vmem:[%s18787_s3 + $0x62c] sm:$0xf0]  ;;  %7649 = vmatmul.bf16.vlgmr.msra.gmra.mxu0 %v18924_v21 }
 0x431   : > { %v12716_v51 = vld [vmem:[%s18787_s3 + $0x9d0] sm:$0xf]  ;;  %v12237_v13 = vor.u32 %v16903_v12, %v12236_v54  ;;  %7674 = vmatpush.bf16.msra.mxu2 %v11981_v48 }
 0x432   : > { %v17023_v15 = vld [vmem:[%s18787_s3 + $0x9ec] sm:$0xf0]  ;;  %7662 = vmatmul.bf16.vlgmr.msra.gmra.mxu1 %v18927_v22 }
 0x433   : > { %v12972_v18 = vld [vmem:[%s18787_s3 + $0xbd0] sm:$0xf]  ;;  %v12717_v33 = vor.u32 %v17023_v15, %v12716_v51  ;;  %7687 = vmatpush.bf16.msra.mxu3 %v12237_v13 }
 0x434   : > { %v17087_v27 = vld [vmem:[%s18787_s3 + $0xbec] sm:$0xf0]  ;;  %7675 = vmatmul.bf16.vlgmr.msra.gmra.mxu2 %v18910_v5 }
 0x435   : > { %v13228_v37 = vld [vmem:[%s18787_s3 + $0xdd0] sm:$0xf]  ;;  %v12973_v35 = vor.u32 %v17087_v27, %v12972_v18  ;;  %7693 = vmatpush.bf16.msrb.mxu0 %v12717_v33  ;;  %v7442_v18 = vpop.f32.mrf.mxu0 }
 0x436   : > { %v17151_v23 = vld [vmem:[%s18787_s3 + $0xdec] sm:$0xf0]  ;;  %7688 = vmatmul.bf16.vlgmr.msra.gmra.mxu3 %v18913_v7  ;;  %v7456_v33 = vadd.f32 %v7455_v28, %v7442_v18 }
 0x437   : > { %v13484_v40 = vld [vmem:[%s18787_s3 + $0xfd0] sm:$0xf]  ;;  %v13229_v41 = vor.u32 %v17151_v23, %v13228_v37  ;;  %7706 = vmatpush.bf16.msrb.mxu1 %v12973_v35 }
 0x438   : > { %v17215_v19 = vld [vmem:[%s18787_s3 + $0xfec] sm:$0xf0] }
 0x439   : > { %v12684_v46 = vld [vmem:[%s18787_s3 + $0x990] sm:$0xf]  ;;  %v13485_v58 = vor.u32 %v17215_v19, %v13484_v40  ;;  %7719 = vmatpush.bf16.msrb.mxu2 %v13229_v41 }
 0x43a   : > { %v17015_v47 = vld [vmem:[%s18787_s3 + $0x9ac] sm:$0xf0] }
 0x43b   : > { %v12940_v50 = vld [vmem:[%s18787_s3 + $0xb90] sm:$0xf]  ;;  %v12685_v3 = vor.u32 %v17015_v47, %v12684_v46  ;;  %7732 = vmatpush.bf16.msrb.mxu3 %v13485_v58 }
 0x43c   : > { %v17079_v53 = vld [vmem:[%s18787_s3 + $0xbac] sm:$0xf0] }
 0x43d   : > { %v13196_v11 = vld [vmem:[%s18787_s3 + $0xd90] sm:$0xf]  ;;  %v12941_v49 = vor.u32 %v17079_v53, %v12940_v50  ;;  %7694 = vmatpush.bf16.msrb.mxu0 %v12685_v3 }
 0x43e   : > { %v17143_v59 = vld [vmem:[%s18787_s3 + $0xdac] sm:$0xf0] }
 0x43f   : > { %v13452_v25 = vld [vmem:[%s18787_s3 + $0xf90] sm:$0xf]  ;;  %v13197_v56 = vor.u32 %v17143_v59, %v13196_v11  ;;  %7707 = vmatpush.bf16.msrb.mxu1 %v12941_v49  ;;  %v7468_v59 = vpop.f32.mrf.mxu2 }
 0x440   : > { %v17207_v55 = vld [vmem:[%s18787_s3 + $0xfac] sm:$0xf0] }
 0x441   : > { %v12652_v44 = vld [vmem:[%s18787_s3 + $0x950] sm:$0xf]  ;;  %v13453_v20 = vor.u32 %v17207_v55, %v13452_v25  ;;  %7720 = vmatpush.bf16.msrb.mxu2 %v13197_v56  ;;  %v7469_v56 = vadd.f32 %v7468_v59, %v7456_v33 }
 0x442   : > { %v17007_v60 = vld [vmem:[%s18787_s3 + $0x96c] sm:$0xf0] }
 0x443   : > { %v12908_v61 = vld [vmem:[%s18787_s3 + $0xb50] sm:$0xf]  ;;  %v12653_v4 = vor.u32 %v17007_v60, %v12652_v44  ;;  %7733 = vmatpush.bf16.msrb.mxu3 %v13453_v20  ;;  %v7481_v44 = vpop.f32.mrf.mxu3 }
 0x444   : > { %v17071_v62 = vld [vmem:[%s18787_s3 + $0xb6c] sm:$0xf0] }
 0x445   : > { %v13164_v63 = vld [vmem:[%s18787_s3 + $0xd50] sm:$0xf]  ;;  %v12909_v8 = vor.u32 %v17071_v62, %v12908_v61  ;;  %7695 = vmatpush.bf16.msrb.mxu0 %v12653_v4  ;;  %v20155_v62 = vadd.f32 %v7481_v44, %v7469_v56 }
 0x446   : > { %v17135_v57 = vld [vmem:[%s18787_s3 + $0xd6c] sm:$0xf0] }
 0x447   : > { %v13420_v1 = vld [vmem:[%s18787_s3 + $0xf50] sm:$0xf]  ;;  %v13165_v17 = vor.u32 %v17135_v57, %v13164_v63  ;;  %7708 = vmatpush.bf16.msrb.mxu1 %v12909_v8  ;;  %v7444_v63 = vpop.f32.mrf.mxu0 }
 0x448   : > { %v17199_v2 = vld [vmem:[%s18787_s3 + $0xf6c] sm:$0xf0] }
 0x449   : > { %v12620_v38 = vld [vmem:[%s18787_s3 + $0x910] sm:$0xf]  ;;  %v13421_v6 = vor.u32 %v17199_v2, %v13420_v1  ;;  %7721 = vmatpush.bf16.msrb.mxu2 %v13165_v17  ;;  %v7457_v17 = vpop.f32.mrf.mxu1 }
 0x44a   : > { %v16999_v9 = vld [vmem:[%s18787_s3 + $0x92c] sm:$0xf0] }
 0x44b   : > { %v12876_v0 = vld [vmem:[%s18787_s3 + $0xb10] sm:$0xf]  ;;  %v12621_v15 = vor.u32 %v16999_v9, %v12620_v38  ;;  %7734 = vmatpush.bf16.msrb.mxu3 %v13421_v6 }
 0x44c   : > { %v17063_v52 = vld [vmem:[%s18787_s3 + $0xb2c] sm:$0xf0] }
 0x44d   : > { %v13132_v54 = vld [vmem:[%s18787_s3 + $0xd10] sm:$0xf]  ;;  %v12877_v10 = vor.u32 %v17063_v52, %v12876_v0  ;;  %7696 = vmatpush.bf16.msrb.mxu0 %v12621_v15 }
 0x44e   : > { %v17127_v12 = vld [vmem:[%s18787_s3 + $0xd2c] sm:$0xf0] }
 0x44f   : > { %v13388_v14 = vld [vmem:[%s18787_s3 + $0xf10] sm:$0xf]  ;;  %v13133_v16 = vor.u32 %v17127_v12, %v13132_v54  ;;  %7709 = vmatpush.bf16.msrb.mxu1 %v12877_v10 }
 0x450   : > { %v17191_v51 = vld [vmem:[%s18787_s3 + $0xf2c] sm:$0xf0] }
 0x451   : > { %v12588_v27 = vld [vmem:[%s18787_s3 + $0x8d0] sm:$0xf]  ;;  %v13389_v48 = vor.u32 %v17191_v51, %v13388_v14  ;;  %7722 = vmatpush.bf16.msrb.mxu2 %v13133_v16 }
 0x452   : > { %v16991_v37 = vld [vmem:[%s18787_s3 + $0x8ec] sm:$0xf0] }
 0x453   : > { %v12844_v23 = vld [vmem:[%s18787_s3 + $0xad0] sm:$0xf]  ;;  %v12589_v46 = vor.u32 %v16991_v37, %v12588_v27  ;;  %7735 = vmatpush.bf16.msrb.mxu3 %v13389_v48  ;;  %v7470_v37 = vpop.f32.mrf.mxu2 }
 0x454   : > { %v17055_v40 = vld [vmem:[%s18787_s3 + $0xaec] sm:$0xf0] }
 0x455   : > { %v13100_v19 = vld [vmem:[%s18787_s3 + $0xcd0] sm:$0xf]  ;;  %v12845_v47 = vor.u32 %v17055_v40, %v12844_v23  ;;  %7697 = vmatpush.bf16.msrb.mxu0 %v12589_v46 }
 0x456   : > { %v17119_v13 = vld [vmem:[%s18787_s3 + $0xcec] sm:$0xf0] }
 0x457   : > { %v13356_v35 = vld [vmem:[%s18787_s3 + $0xed0] sm:$0xf]  ;;  %v13101_v50 = vor.u32 %v17119_v13, %v13100_v19  ;;  %7710 = vmatpush.bf16.msrb.mxu1 %v12845_v47  ;;  %v7483_v19 = vpop.f32.mrf.mxu3 }
 0x458   : > { %v17183_v41 = vld [vmem:[%s18787_s3 + $0xeec] sm:$0xf0] }
 0x459   : > { %v12556_v58 = vld [vmem:[%s18787_s3 + $0x890] sm:$0xf]  ;;  %v13357_v25 = vor.u32 %v17183_v41, %v13356_v35  ;;  %7723 = vmatpush.bf16.msrb.mxu2 %v13101_v50 }
 0x45a   : > { %v16983_v53 = vld [vmem:[%s18787_s3 + $0x8ac] sm:$0xf0] }
 0x45b   : > { %v12812_v11 = vld [vmem:[%s18787_s3 + $0xa90] sm:$0xf]  ;;  %v12557_v20 = vor.u32 %v16983_v53, %v12556_v58  ;;  %7736 = vmatpush.bf16.msrb.mxu3 %v13357_v25 }
 0x45c   : > { %v17047_v55 = vld [vmem:[%s18787_s3 + $0xaac] sm:$0xf0] }
 0x45d   : > { %v13068_v3 = vld [vmem:[%s18787_s3 + $0xc90] sm:$0xf]  ;;  %v12813_v57 = vor.u32 %v17047_v55, %v12812_v11  ;;  %7698 = vmatpush.bf16.msrb.mxu0 %v12557_v20 }
 0x45e   : > { %v17111_v49 = vld [vmem:[%s18787_s3 + $0xcac] sm:$0xf0] }
 0x45f   : > { %v13324_v60 = vld [vmem:[%s18787_s3 + $0xe90] sm:$0xf]  ;;  %v13069_v1 = vor.u32 %v17111_v49, %v13068_v3  ;;  %7711 = vmatpush.bf16.msrb.mxu1 %v12813_v57 }
 0x460   : > { %v17175_v61 = vld [vmem:[%s18787_s3 + $0xeac] sm:$0xf0] }
 0x461   : > { %v12524_v2 = vld [vmem:[%s18787_s3 + $0x850] sm:$0xf]  ;;  %v13325_v38 = vor.u32 %v17175_v61, %v13324_v60  ;;  %7724 = vmatpush.bf16.msrb.mxu2 %v13069_v1 }
 0x462   : > { %v16975_v4 = vld [vmem:[%s18787_s3 + $0x86c] sm:$0xf0] }
 0x463   : > { %v12780_v8 = vld [vmem:[%s18787_s3 + $0xa50] sm:$0xf]  ;;  %v12525_v12 = vor.u32 %v16975_v4, %v12524_v2  ;;  %7737 = vmatpush.bf16.msrb.mxu3 %v13325_v38 }
 0x464   : > { %v17039_v9 = vld [vmem:[%s18787_s3 + $0xa6c] sm:$0xf0] }
 0x465   : > { %v13036_v0 = vld [vmem:[%s18787_s3 + $0xc50] sm:$0xf]  ;;  %v12781_v15 = vor.u32 %v17039_v9, %v12780_v8  ;;  %7699 = vmatpush.bf16.msrb.mxu0 %v12525_v12 }
 0x466   : > { %v17103_v6 = vld [vmem:[%s18787_s3 + $0xc6c] sm:$0xf0] }
 0x467   : > { %v13292_v52 = vld [vmem:[%s18787_s3 + $0xe50] sm:$0xf]  ;;  %v13037_v18 = vor.u32 %v17103_v6, %v13036_v0  ;;  %7712 = vmatpush.bf16.msrb.mxu1 %v12781_v15 }
 0x468   : > { %v17167_v54 = vld [vmem:[%s18787_s3 + $0xe6c] sm:$0xf0] }
 0x469   : > { %v12492_v14 = vld [vmem:[%s18787_s3 + $0x810] sm:$0xf]  ;;  %v13293_v23 = vor.u32 %v17167_v54, %v13292_v52  ;;  %7725 = vmatpush.bf16.msrb.mxu2 %v13037_v18 }
 0x46a   : > { %v16967_v51 = vld [vmem:[%s18787_s3 + $0x82c] sm:$0xf0] }
 0x46b   : > { %v12748_v10 = vld [vmem:[%s18787_s3 + $0xa10] sm:$0xf]  ;;  %v12493_v41 = vor.u32 %v16967_v51, %v12492_v14  ;;  %7738 = vmatpush.bf16.msrb.mxu3 %v13293_v23 }
 0x46c   : > { %v17031_v16 = vld [vmem:[%s18787_s3 + $0xa2c] sm:$0xf0] }
 0x46d   : > { %v13004_v27 = vld [vmem:[%s18787_s3 + $0xc10] sm:$0xf]  ;;  %v12749_v58 = vor.u32 %v17031_v16, %v12748_v10  ;;  %7700 = vmatpush.bf16.msrb.mxu0 %v12493_v41 }
 0x46e   : > { %v17095_v28 = vld [vmem:[%s18787_s3 + $0xc2c] sm:$0xf0] }
 0x46f   : > { %v13260_v48 = vld [vmem:[%s18787_s3 + $0xe10] sm:$0xf]  ;;  %v13005_v53 = vor.u32 %v17095_v28, %v13004_v27  ;;  %7713 = vmatpush.bf16.msrb.mxu1 %v12749_v58 }
 0x470   : > { %v17159_v40 = vld [vmem:[%s18787_s3 + $0xe2c] sm:$0xf0]  ;;  %7701 = vmatmul.bf16.vlgmr.msrb.gmra.mxu0 %v18983_v42 }
 0x471   : > { %v13740_v13 = vld [vmem:[%s18787_s3 + $0x11d0] sm:$0xf]  ;;  %v13261_v25 = vor.u32 %v17159_v40, %v13260_v48  ;;  %7726 = vmatpush.bf16.msrb.mxu2 %v13005_v53  ;;  %v20214_v53 = vpop.f32.mrf.mxu1 }
 0x472   : > { %v17279_v33 = vld [vmem:[%s18787_s3 + $0x11ec] sm:$0xf0]  ;;  %7714 = vmatmul.bf16.vlgmr.msrb.gmra.mxu1 %v18987_v45 }
 0x473   : > { %v13996_v35 = vld [vmem:[%s18787_s3 + $0x13d0] sm:$0xf]  ;;  %v13741_v55 = vor.u32 %v17279_v33, %v13740_v13  ;;  %7739 = vmatpush.bf16.msrb.mxu3 %v13261_v25 }
 0x474   : > { %v17343_v46 = vld [vmem:[%s18787_s3 + $0x13ec] sm:$0xf0]  ;;  %7727 = vmatmul.bf16.vlgmr.msrb.gmra.mxu2 %v18979_v39 }
 0x475   : > { %v14252_v47 = vld [vmem:[%s18787_s3 + $0x15d0] sm:$0xf]  ;;  %v13997_v3 = vor.u32 %v17343_v46, %v13996_v35  ;;  %7745 = vmatpush.bf16.msra.mxu0 %v13741_v55  ;;  %v20209_v35 = vpop.f32.mrf.mxu0 }
 0x476   : > { %v17407_v50 = vld [vmem:[%s18787_s3 + $0x15ec] sm:$0xf0]  ;;  %7740 = vmatmul.bf16.vlgmr.msrb.gmra.mxu3 %v18985_v43 }
 0x477   : > { %v14508_v11 = vld [vmem:[%s18787_s3 + $0x17d0] sm:$0xf]  ;;  %v14253_v49 = vor.u32 %v17407_v50, %v14252_v47  ;;  %7758 = vmatpush.bf16.msra.mxu1 %v13997_v3 }
 0x478   : > { %v17471_v59 = vld [vmem:[%s18787_s3 + $0x17ec] sm:$0xf0] }
 0x479   : > { %v13708_v56 = vld [vmem:[%s18787_s3 + $0x1190] sm:$0xf]  ;;  %v14509_v61 = vor.u32 %v17471_v59, %v14508_v11  ;;  %7771 = vmatpush.bf16.msra.mxu2 %v14253_v49 }
 0x47a   : > { %v17271_v44 = vld [vmem:[%s18787_s3 + $0x11ac] sm:$0xf0] }
 0x47b   : > { %v13964_v60 = vld [vmem:[%s18787_s3 + $0x1390] sm:$0xf]  ;;  %v13709_v4 = vor.u32 %v17271_v44, %v13708_v56  ;;  %7784 = vmatpush.bf16.msra.mxu3 %v14509_v61 }
 0x47c   : > { %v17335_v20 = vld [vmem:[%s18787_s3 + $0x13ac] sm:$0xf0] }
 0x47d   : > { %v14220_v63 = vld [vmem:[%s18787_s3 + $0x1590] sm:$0xf]  ;;  %v13965_v8 = vor.u32 %v17335_v20, %v13964_v60  ;;  %7746 = vmatpush.bf16.msra.mxu0 %v13709_v4 }
 0x47e   : > { %v17399_v57 = vld [vmem:[%s18787_s3 + $0x15ac] sm:$0xf0] }
 0x47f   : > { %v14476_v1 = vld [vmem:[%s18787_s3 + $0x1790] sm:$0xf]  ;;  %v14221_v17 = vor.u32 %v17399_v57, %v14220_v63  ;;  %7759 = vmatpush.bf16.msra.mxu1 %v13965_v8  ;;  %v20224_v57 = vpop.f32.mrf.mxu2 }
 0x480   : > { %v17463_v2 = vld [vmem:[%s18787_s3 + $0x17ac] sm:$0xf0] }
 0x481   : > { %v13676_v38 = vld [vmem:[%s18787_s3 + $0x1150] sm:$0xf]  ;;  %v14477_v6 = vor.u32 %v17463_v2, %v14476_v1  ;;  %7772 = vmatpush.bf16.msra.mxu2 %v14221_v17  ;;  %v20229_v17 = vpop.f32.mrf.mxu3 }
 0x482   : > { %v17263_v9 = vld [vmem:[%s18787_s3 + $0x116c] sm:$0xf0] }
 0x483   : > { %v13932_v0 = vld [vmem:[%s18787_s3 + $0x1350] sm:$0xf]  ;;  %v13677_v15 = vor.u32 %v17263_v9, %v13676_v38  ;;  %7785 = vmatpush.bf16.msra.mxu3 %v14477_v6  ;;  %v7496_v6 = vpop.f32.mrf.mxu0 }
 0x484   : > { %v17327_v52 = vld [vmem:[%s18787_s3 + $0x136c] sm:$0xf0] }
 0x485   : > { %v14188_v54 = vld [vmem:[%s18787_s3 + $0x1550] sm:$0xf]  ;;  %v13933_v18 = vor.u32 %v17327_v52, %v13932_v0  ;;  %7747 = vmatpush.bf16.msra.mxu0 %v13677_v15  ;;  %v7509_v15 = vpop.f32.mrf.mxu1 }
 0x486   : > { %v17391_v12 = vld [vmem:[%s18787_s3 + $0x156c] sm:$0xf0] }
 0x487   : > { %v14444_v14 = vld [vmem:[%s18787_s3 + $0x1750] sm:$0xf]  ;;  %v14189_v10 = vor.u32 %v17391_v12, %v14188_v54  ;;  %7760 = vmatpush.bf16.msra.mxu1 %v13933_v18 }
 0x488   : > { %v17455_v51 = vld [vmem:[%s18787_s3 + $0x176c] sm:$0xf0] }
 0x489   : > { %v13644_v16 = vld [vmem:[%s18787_s3 + $0x1110] sm:$0xf]  ;;  %v14445_v23 = vor.u32 %v17455_v51, %v14444_v14  ;;  %7773 = vmatpush.bf16.msra.mxu2 %v14189_v10 }
 0x48a   : > { %v17255_v27 = vld [vmem:[%s18787_s3 + $0x112c] sm:$0xf0] }
 0x48b   : > { %v13900_v37 = vld [vmem:[%s18787_s3 + $0x1310] sm:$0xf]  ;;  %v13645_v33 = vor.u32 %v17255_v27, %v13644_v16  ;;  %7786 = vmatpush.bf16.msra.mxu3 %v14445_v23 }
 0x48c   : > { %v17319_v28 = vld [vmem:[%s18787_s3 + $0x132c] sm:$0xf0] }
 0x48d   : > { %v14156_v48 = vld [vmem:[%s18787_s3 + $0x1510] sm:$0xf]  ;;  %v13901_v41 = vor.u32 %v17319_v28, %v13900_v37  ;;  %7748 = vmatpush.bf16.msra.mxu0 %v13645_v33 }
 0x48e   : > { %v17383_v40 = vld [vmem:[%s18787_s3 + $0x152c] sm:$0xf0] }
 0x48f   : > { %v14412_v19 = vld [vmem:[%s18787_s3 + $0x1710] sm:$0xf]  ;;  %v14157_v46 = vor.u32 %v17383_v40, %v14156_v48  ;;  %7761 = vmatpush.bf16.msra.mxu1 %v13901_v41 }
 0x490   : > { %v17447_v13 = vld [vmem:[%s18787_s3 + $0x172c] sm:$0xf0] }
 0x491   : > { %v13612_v47 = vld [vmem:[%s18787_s3 + $0x10d0] sm:$0xf]  ;;  %v14413_v11 = vor.u32 %v17447_v13, %v14412_v19  ;;  %7774 = vmatpush.bf16.msra.mxu2 %v14157_v46 }
 0x492   : > { %v17247_v50 = vld [vmem:[%s18787_s3 + $0x10ec] sm:$0xf0] }
 0x493   : > { %v13868_v58 = vld [vmem:[%s18787_s3 + $0x12d0] sm:$0xf]  ;;  %v13613_v56 = vor.u32 %v17247_v50, %v13612_v47  ;;  %7787 = vmatpush.bf16.msra.mxu3 %v14413_v11  ;;  %v7522_v47 = vpop.f32.mrf.mxu2 }
 0x494   : > { %v17311_v59 = vld [vmem:[%s18787_s3 + $0x12ec] sm:$0xf0] }
 0x495   : > { %v14124_v25 = vld [vmem:[%s18787_s3 + $0x14d0] sm:$0xf]  ;;  %v13869_v44 = vor.u32 %v17311_v59, %v13868_v58  ;;  %7749 = vmatpush.bf16.msra.mxu0 %v13613_v56 }
 0x496   : > { %v17375_v55 = vld [vmem:[%s18787_s3 + $0x14ec] sm:$0xf0] }
 0x497   : > { %v14380_v3 = vld [vmem:[%s18787_s3 + $0x16d0] sm:$0xf]  ;;  %v14125_v60 = vor.u32 %v17375_v55, %v14124_v25  ;;  %7762 = vmatpush.bf16.msra.mxu1 %v13869_v44  ;;  %v7535_v25 = vpop.f32.mrf.mxu3 }
 0x498   : > { %v17439_v49 = vld [vmem:[%s18787_s3 + $0x16ec] sm:$0xf0] }
 0x499   : > { %v13580_v61 = vld [vmem:[%s18787_s3 + $0x1090] sm:$0xf]  ;;  %v14381_v1 = vor.u32 %v17439_v49, %v14380_v3  ;;  %7775 = vmatpush.bf16.msra.mxu2 %v14125_v60 }
 0x49a   : > { %v17239_v20 = vld [vmem:[%s18787_s3 + $0x10ac] sm:$0xf0] }
 0x49b   : > { %v13836_v63 = vld [vmem:[%s18787_s3 + $0x1290] sm:$0xf]  ;;  %v13581_v0 = vor.u32 %v17239_v20, %v13580_v61  ;;  %7788 = vmatpush.bf16.msra.mxu3 %v14381_v1 }
 0x49c   : > { %v17303_v2 = vld [vmem:[%s18787_s3 + $0x12ac] sm:$0xf0] }
 0x49d   : > { %v14092_v4 = vld [vmem:[%s18787_s3 + $0x1490] sm:$0xf]  ;;  %v13837_v52 = vor.u32 %v17303_v2, %v13836_v63  ;;  %7750 = vmatpush.bf16.msra.mxu0 %v13581_v0 }
 0x49e   : > { %v17367_v8 = vld [vmem:[%s18787_s3 + $0x14ac] sm:$0xf0] }
 0x49f   : > { %v14348_v38 = vld [vmem:[%s18787_s3 + $0x1690] sm:$0xf]  ;;  %v14093_v54 = vor.u32 %v17367_v8, %v14092_v4  ;;  %7763 = vmatpush.bf16.msra.mxu1 %v13837_v52 }
 0x4a0   : > { %v17431_v9 = vld [vmem:[%s18787_s3 + $0x16ac] sm:$0xf0] }
 0x4a1   : > { %v13548_v12 = vld [vmem:[%s18787_s3 + $0x1050] sm:$0xf]  ;;  %v14349_v18 = vor.u32 %v17431_v9, %v14348_v38  ;;  %7776 = vmatpush.bf16.msra.mxu2 %v14093_v54 }
 0x4a2   : > { %v17231_v14 = vld [vmem:[%s18787_s3 + $0x106c] sm:$0xf0] }
 0x4a3   : > { %v13804_v51 = vld [vmem:[%s18787_s3 + $0x1250] sm:$0xf]  ;;  %v13549_v28 = vor.u32 %v17231_v14, %v13548_v12  ;;  %7789 = vmatpush.bf16.msra.mxu3 %v14349_v18 }
 0x4a4   : > { %v17295_v10 = vld [vmem:[%s18787_s3 + $0x126c] sm:$0xf0] }
 0x4a5   : > { %v14060_v16 = vld [vmem:[%s18787_s3 + $0x1450] sm:$0xf]  ;;  %v13805_v19 = vor.u32 %v17295_v10, %v13804_v51  ;;  %7751 = vmatpush.bf16.msra.mxu0 %v13549_v28 }
 0x4a6   : > { %v17359_v27 = vld [vmem:[%s18787_s3 + $0x146c] sm:$0xf0] }
 0x4a7   : > { %v14316_v37 = vld [vmem:[%s18787_s3 + $0x1650] sm:$0xf]  ;;  %v14061_v13 = vor.u32 %v17359_v27, %v14060_v16  ;;  %7764 = vmatpush.bf16.msra.mxu1 %v13805_v19 }
 0x4a8   : > { %v17423_v23 = vld [vmem:[%s18787_s3 + $0x166c] sm:$0xf0] }
 0x4a9   : > { %v13516_v48 = vld [vmem:[%s18787_s3 + $0x1010] sm:$0xf]  ;;  %v14317_v50 = vor.u32 %v17423_v23, %v14316_v37  ;;  %7777 = vmatpush.bf16.msra.mxu2 %v14061_v13 }
 0x4aa   : > { %v17223_v40 = vld [vmem:[%s18787_s3 + $0x102c] sm:$0xf0] }
 0x4ab   : > { %v13772_v33 = vld [vmem:[%s18787_s3 + $0x1210] sm:$0xf]  ;;  %v13517_v56 = vor.u32 %v17223_v40, %v13516_v48  ;;  %7790 = vmatpush.bf16.msra.mxu3 %v14317_v50 }
 0x4ac   : > { %v17287_v41 = vld [vmem:[%s18787_s3 + $0x122c] sm:$0xf0] }
 0x4ad   : > { %v14028_v46 = vld [vmem:[%s18787_s3 + $0x1410] sm:$0xf]  ;;  %v13773_v20 = vor.u32 %v17287_v41, %v13772_v33  ;;  %7752 = vmatpush.bf16.msra.mxu0 %v13517_v56  ;;  %v20283_v56 = vpop.f32.mrf.mxu0 }
 0x4ae   : > { %v17351_v58 = vld [vmem:[%s18787_s3 + $0x142c] sm:$0xf0] }
 0x4af   : > { %v14284_v11 = vld [vmem:[%s18787_s3 + $0x1610] sm:$0xf]  ;;  %v14029_v63 = vor.u32 %v17351_v58, %v14028_v46  ;;  %7765 = vmatpush.bf16.msra.mxu1 %v13773_v20  ;;  %v20287_v20 = vpop.f32.mrf.mxu1 }
 0x4b0   : > { %v17415_v59 = vld [vmem:[%s18787_s3 + $0x162c] sm:$0xf0]  ;;  %7753 = vmatmul.bf16.vlgmr.msra.gmra.mxu0 %v19054_v26 }
 0x4b1   : > { %v14764_v55 = vld [vmem:[%s18787_s3 + $0x19d0] sm:$0xf]  ;;  %v14285_v4 = vor.u32 %v17415_v59, %v14284_v11  ;;  %7778 = vmatpush.bf16.msra.mxu2 %v14029_v63 }
 0x4b2   : > { %v17535_v3 = vld [vmem:[%s18787_s3 + $0x19ec] sm:$0xf0]  ;;  %7766 = vmatmul.bf16.vlgmr.msra.gmra.mxu1 %v19061_v31 }
 0x4b3   : > { %v15020_v49 = vld [vmem:[%s18787_s3 + $0x1bd0] sm:$0xf]  ;;  %v14765_v8 = vor.u32 %v17535_v3, %v14764_v55  ;;  %7791 = vmatpush.bf16.msra.mxu3 %v14285_v4 }
 0x4b4   : > { %v17599_v44 = vld [vmem:[%s18787_s3 + $0x1bec] sm:$0xf0]  ;;  %7779 = vmatmul.bf16.vlgmr.msra.gmra.mxu2 %v19059_v30 }
 0x4b5   : > { %v15276_v60 = vld [vmem:[%s18787_s3 + $0x1dd0] sm:$0xf]  ;;  %v15021_v38 = vor.u32 %v17599_v44, %v15020_v49  ;;  %7797 = vmatpush.bf16.msrb.mxu0 %v14765_v8 }
 0x4b6   : > { %v17663_v61 = vld [vmem:[%s18787_s3 + $0x1dec] sm:$0xf0]  ;;  %7792 = vmatmul.bf16.vlgmr.msra.gmra.mxu3 %v19065_v34 }
 0x4b7   : > { %v15532_v1 = vld [vmem:[%s18787_s3 + $0x1fd0] sm:$0xf]  ;;  %v15277_v9 = vor.u32 %v17663_v61, %v15276_v60  ;;  %7810 = vmatpush.bf16.msrb.mxu1 %v15021_v38 }
 0x4b8   : > { %v17727_v2 = vld [vmem:[%s18787_s3 + $0x1fec] sm:$0xf0] }
 0x4b9   : > { %v14732_v0 = vld [vmem:[%s18787_s3 + $0x1990] sm:$0xf]  ;;  %v15533_v54 = vor.u32 %v17727_v2, %v15532_v1  ;;  %7823 = vmatpush.bf16.msrb.mxu2 %v15277_v9 }
 0x4ba   : > { %v17527_v6 = vld [vmem:[%s18787_s3 + $0x19ac] sm:$0xf0] }
 0x4bb   : > { %v14988_v52 = vld [vmem:[%s18787_s3 + $0x1b90] sm:$0xf]  ;;  %v14733_v10 = vor.u32 %v17527_v6, %v14732_v0  ;;  %7836 = vmatpush.bf16.msrb.mxu3 %v15533_v54 }
 0x4bc   : > { %v17591_v12 = vld [vmem:[%s18787_s3 + $0x1bac] sm:$0xf0] }
 0x4bd   : > { %v15244_v14 = vld [vmem:[%s18787_s3 + $0x1d90] sm:$0xf]  ;;  %v14989_v16 = vor.u32 %v17591_v12, %v14988_v52  ;;  %7798 = vmatpush.bf16.msrb.mxu0 %v14733_v10 }
 0x4be   : > { %v17655_v51 = vld [vmem:[%s18787_s3 + $0x1dac] sm:$0xf0] }
 0x4bf   : > { %v15500_v15 = vld [vmem:[%s18787_s3 + $0x1f90] sm:$0xf]  ;;  %v15245_v27 = vor.u32 %v17655_v51, %v15244_v14  ;;  %7811 = vmatpush.bf16.msrb.mxu1 %v14989_v16  ;;  %v7495_v14 = vadd.f32 %v20209_v35, %v20155_v62 }
 0x4c0   : > { %v17719_v18 = vld [vmem:[%s18787_s3 + $0x1fac] sm:$0xf0] }
 0x4c1   : > { %v14700_v37 = vld [vmem:[%s18787_s3 + $0x1950] sm:$0xf]  ;;  %v15501_v48 = vor.u32 %v17719_v18, %v15500_v15  ;;  %7824 = vmatpush.bf16.msrb.mxu2 %v15245_v27 }
 0x4c2   : > { %v17519_v23 = vld [vmem:[%s18787_s3 + $0x196c] sm:$0xf0] }
 0x4c3   : > { %v14956_v28 = vld [vmem:[%s18787_s3 + $0x1b50] sm:$0xf]  ;;  %v14701_v46 = vor.u32 %v17519_v23, %v14700_v37  ;;  %7837 = vmatpush.bf16.msrb.mxu3 %v15501_v48  ;;  %v20302_v37 = vpop.f32.mrf.mxu2 }
 0x4c4   : > { %v17583_v40 = vld [vmem:[%s18787_s3 + $0x1b6c] sm:$0xf0] }
 0x4c5   : > { %v15212_v19 = vld [vmem:[%s18787_s3 + $0x1d50] sm:$0xf]  ;;  %v14957_v47 = vor.u32 %v17583_v40, %v14956_v28  ;;  %7799 = vmatpush.bf16.msrb.mxu0 %v14701_v46  ;;  %v20307_v40 = vpop.f32.mrf.mxu3 }
 0x4c6   : > { %v17647_v13 = vld [vmem:[%s18787_s3 + $0x1d6c] sm:$0xf0] }
 0x4c7   : > { %v15468_v33 = vld [vmem:[%s18787_s3 + $0x1f50] sm:$0xf]  ;;  %v15213_v50 = vor.u32 %v17647_v13, %v15212_v19  ;;  %7812 = vmatpush.bf16.msrb.mxu1 %v14957_v47  ;;  %v7548_v19 = vpop.f32.mrf.mxu0 }
 0x4c8   : > { %v17711_v41 = vld [vmem:[%s18787_s3 + $0x1f6c] sm:$0xf0] }
 0x4c9   : > { %v14668_v58 = vld [vmem:[%s18787_s3 + $0x1910] sm:$0xf]  ;;  %v15469_v25 = vor.u32 %v17711_v41, %v15468_v33  ;;  %7825 = vmatpush.bf16.msrb.mxu2 %v15213_v50  ;;  %v7561_v33 = vpop.f32.mrf.mxu1  ;;  %v7508_v41 = vadd.f32 %v20214_v53, %v7495_v14  ;;  %v16827_v14 = vld [vmem:[%s18787_s3 + $0x3d4] sm:$0xf] }
 0x4ca   : > { %v17511_v11 = vld [vmem:[%s18787_s3 + $0x192c] sm:$0xf0] }
 0x4cb   : > { %v14924_v59 = vld [vmem:[%s18787_s3 + $0x1b10] sm:$0xf]  ;;  %v14669_v61 = vor.u32 %v17511_v11, %v14668_v58  ;;  %7838 = vmatpush.bf16.msrb.mxu3 %v15469_v25 }
 0x4cc   : > { %v17575_v55 = vld [vmem:[%s18787_s3 + $0x1b2c] sm:$0xf0] }
 0x4cd   : > { %v15180_v3 = vld [vmem:[%s18787_s3 + $0x1d10] sm:$0xf]  ;;  %v14925_v63 = vor.u32 %v17575_v55, %v14924_v59  ;;  %7800 = vmatpush.bf16.msrb.mxu0 %v14669_v61 }
 0x4ce   : > { %v17639_v49 = vld [vmem:[%s18787_s3 + $0x1d2c] sm:$0xf0] }
 0x4cf   : > { %v15436_v44 = vld [vmem:[%s18787_s3 + $0x1f10] sm:$0xf]  ;;  %v15181_v1 = vor.u32 %v17639_v49, %v15180_v3  ;;  %7813 = vmatpush.bf16.msrb.mxu1 %v14925_v63  ;;  %v7521_v63 = vadd.f32 %v20224_v57, %v7508_v41  ;;  %v16763_v57 = vld [vmem:[%s18787_s3 + $0x1d4] sm:$0xf] }
 0x4d0   : > { %v17703_v60 = vld [vmem:[%s18787_s3 + $0x1f2c] sm:$0xf0] }
 0x4d1   : > { %v14636_v2 = vld [vmem:[%s18787_s3 + $0x18d0] sm:$0xf]  ;;  %v15437_v38 = vor.u32 %v17703_v60, %v15436_v44  ;;  %7826 = vmatpush.bf16.msrb.mxu2 %v15181_v1 }
 0x4d2   : > { %v17503_v4 = vld [vmem:[%s18787_s3 + $0x18ec] sm:$0xf0] }
 0x4d3   : > { %v14892_v8 = vld [vmem:[%s18787_s3 + $0x1ad0] sm:$0xf]  ;;  %v14637_v12 = vor.u32 %v17503_v4, %v14636_v2  ;;  %7839 = vmatpush.bf16.msrb.mxu3 %v15437_v38 }
 0x4d4   : > { %v17567_v9 = vld [vmem:[%s18787_s3 + $0x1aec] sm:$0xf0] }
 0x4d5   : > { %v15148_v0 = vld [vmem:[%s18787_s3 + $0x1cd0] sm:$0xf]  ;;  %v14893_v51 = vor.u32 %v17567_v9, %v14892_v8  ;;  %7801 = vmatpush.bf16.msrb.mxu0 %v14637_v12  ;;  %v11694_v12 = vld [vmem:[%s18787_s3 + $0x1f0] sm:$0xf0] }
 0x4d6   : > { %v17631_v6 = vld [vmem:[%s18787_s3 + $0x1cec] sm:$0xf0]  ;;  %v11697_v19 = vor.u32 %v16763_v57, %v11694_v12  ;;  %v11854_v12 = vld [vmem:[%s18787_s3 + $0x330] sm:$0xf0] }
 0x4d7   : > { %v15404_v52 = vld [vmem:[%s18787_s3 + $0x1ed0] sm:$0xf]  ;;  %v15149_v15 = vor.u32 %v17631_v6, %v15148_v0  ;;  %7814 = vmatpush.bf16.msrb.mxu1 %v14893_v51  ;;  %v7587_v51 = vpop.f32.mrf.mxu3 }
 0x4d8   : > { %v17695_v54 = vld [vmem:[%s18787_s3 + $0x1eec] sm:$0xf0]  ;;  %v12110_v51 = vld [vmem:[%s18787_s3 + $0x530] sm:$0xf0] }
 0x4d9   : > { %v14604_v18 = vld [vmem:[%s18787_s3 + $0x1890] sm:$0xf]  ;;  %v15405_v27 = vor.u32 %v17695_v54, %v15404_v52  ;;  %7827 = vmatpush.bf16.msrb.mxu2 %v15149_v15  ;;  %v7574_v54 = vpop.f32.mrf.mxu2 }
 0x4da   : > { %v17495_v10 = vld [vmem:[%s18787_s3 + $0x18ac] sm:$0xf0]  ;;  %v16803_v54 = vld [vmem:[%s18787_s3 + $0x314] sm:$0xf] }
 0x4db   : > { %v14860_v16 = vld [vmem:[%s18787_s3 + $0x1a90] sm:$0xf]  ;;  %v14605_v13 = vor.u32 %v17495_v10, %v14604_v18  ;;  %7840 = vmatpush.bf16.msrb.mxu3 %v15405_v27  ;;  %v11950_v18 = vld [vmem:[%s18787_s3 + $0x3f0] sm:$0xf0]  ;;  %v7534_v27 = vadd.f32 %v20229_v17, %v7521_v63 }
 0x4dc   : > { %v17559_v23 = vld [vmem:[%s18787_s3 + $0x1aac] sm:$0xf0]  ;;  %v16891_v10 = vld [vmem:[%s18787_s3 + $0x5d4] sm:$0xf]  ;;  %v11953_v33 = vor.u32 %v16827_v14, %v11950_v18  ;;  %v7598_v18 = vpop.f32.mrf.mxu0 }
 0x4dd   : > { %v15116_v28 = vld [vmem:[%s18787_s3 + $0x1c90] sm:$0xf]  ;;  %v14861_v46 = vor.u32 %v17559_v23, %v14860_v16  ;;  %7802 = vmatpush.bf16.msrb.mxu0 %v14605_v13  ;;  %v12206_v16 = vld [vmem:[%s18787_s3 + $0x5f0] sm:$0xf0]  ;;  %v7547_v13 = vadd.f32 %v20283_v56, %v7534_v27 }
 0x4de   : > { %v17623_v48 = vld [vmem:[%s18787_s3 + $0x1cac] sm:$0xf0]  ;;  %v12209_v41 = vor.u32 %v16891_v10, %v12206_v16  ;;  %v11662_v17 = vld [vmem:[%s18787_s3 + $0x1b0] sm:$0xf0] }
 0x4df   : > { %v15372_v62 = vld [vmem:[%s18787_s3 + $0x1e90] sm:$0xf]  ;;  %v15117_v47 = vor.u32 %v17623_v48, %v15116_v28  ;;  %7815 = vmatpush.bf16.msrb.mxu1 %v14861_v46  ;;  %v16955_v48 = vld [vmem:[%s18787_s3 + $0x7d4] sm:$0xf] }
 0x4e0   : > { %v17687_v35 = vld [vmem:[%s18787_s3 + $0x1eac] sm:$0xf0]  ;;  %v16755_v46 = vld [vmem:[%s18787_s3 + $0x194] sm:$0xf] }
 0x4e1   : > { %v14572_v50 = vld [vmem:[%s18787_s3 + $0x1850] sm:$0xf]  ;;  %v15373_v59 = vor.u32 %v17687_v35, %v15372_v62  ;;  %7828 = vmatpush.bf16.msrb.mxu2 %v15117_v47  ;;  %v12462_v62 = vld [vmem:[%s18787_s3 + $0x7f0] sm:$0xf0]  ;;  %v11665_v56 = vor.u32 %v16755_v46, %v11662_v17 }
 0x4e2   : > { %v17487_v58 = vld [vmem:[%s18787_s3 + $0x186c] sm:$0xf0]  ;;  %v16819_v47 = vld [vmem:[%s18787_s3 + $0x394] sm:$0xf] }
 0x4e3   : > { %v14828_v11 = vld [vmem:[%s18787_s3 + $0x1a50] sm:$0xf]  ;;  %v14573_v44 = vor.u32 %v17487_v58, %v14572_v50  ;;  %7841 = vmatpush.bf16.msrb.mxu3 %v15373_v59  ;;  %v12465_v50 = vor.u32 %v16955_v48, %v12462_v62  ;;  %v11918_v58 = vld [vmem:[%s18787_s3 + $0x3b0] sm:$0xf0]  ;;  %v11857_v48 = vor.u32 %v16803_v54, %v11854_v12 }
 0x4e4   : > { %v17551_v25 = vld [vmem:[%s18787_s3 + $0x1a6c] sm:$0xf0]  ;;  %v12174_v59 = vld [vmem:[%s18787_s3 + $0x5b0] sm:$0xf0] }
 0x4e5   : > { %v15084_v55 = vld [vmem:[%s18787_s3 + $0x1c50] sm:$0xf]  ;;  %v14829_v1 = vor.u32 %v17551_v25, %v14828_v11  ;;  %7803 = vmatpush.bf16.msrb.mxu0 %v14573_v44  ;;  %v16883_v11 = vld [vmem:[%s18787_s3 + $0x594] sm:$0xf] }
 0x4e6   : > { %v17615_v3 = vld [vmem:[%s18787_s3 + $0x1c6c] sm:$0xf0]  ;;  %v16947_v25 = vld [vmem:[%s18787_s3 + $0x794] sm:$0xf] }
 0x4e7   : > { %v15340_v49 = vld [vmem:[%s18787_s3 + $0x1e50] sm:$0xf]  ;;  %v15085_v2 = vor.u32 %v17615_v3, %v15084_v55  ;;  %7816 = vmatpush.bf16.msrb.mxu1 %v14829_v1  ;;  %v12430_v55 = vld [vmem:[%s18787_s3 + $0x7b0] sm:$0xf0]  ;;  %v7560_v3 = vadd.f32 %v20287_v20, %v7547_v13 }
 0x4e8   : > { %v17679_v53 = vld [vmem:[%s18787_s3 + $0x1e6c] sm:$0xf0]  ;;  %v16747_v44 = vld [vmem:[%s18787_s3 + $0x154] sm:$0xf]  ;;  %v12433_v63 = vor.u32 %v16947_v25, %v12430_v55 }
 0x4e9   : > { %v14540_v60 = vld [vmem:[%s18787_s3 + $0x1810] sm:$0xf]  ;;  %v15341_v9 = vor.u32 %v17679_v53, %v15340_v49  ;;  %7829 = vmatpush.bf16.msrb.mxu2 %v15085_v2  ;;  %v11921_v49 = vor.u32 %v16819_v47, %v11918_v58  ;;  %v12177_v53 = vor.u32 %v16883_v11, %v12174_v59  ;;  %v11886_v1 = vld [vmem:[%s18787_s3 + $0x370] sm:$0xf0]  ;;  %v7573_v20 = vadd.f32 %v20302_v37, %v7560_v3 }
 0x4ea   : > { %v17479_v61 = vld [vmem:[%s18787_s3 + $0x182c] sm:$0xf0]  ;;  %v16875_v2 = vld [vmem:[%s18787_s3 + $0x554] sm:$0xf] }
 0x4eb   : > { %v14796_v4 = vld [vmem:[%s18787_s3 + $0x1a10] sm:$0xf]  ;;  %v14541_v15 = vor.u32 %v17479_v61, %v14540_v60  ;;  %7842 = vmatpush.bf16.msrb.mxu3 %v15341_v9  ;;  %v11630_v60 = vld [vmem:[%s18787_s3 + $0x170] sm:$0xf0] }
 0x4ec   : > { %v17543_v8 = vld [vmem:[%s18787_s3 + $0x1a2c] sm:$0xf0]  ;;  %v16811_v61 = vld [vmem:[%s18787_s3 + $0x354] sm:$0xf]  ;;  %v11633_v9 = vor.u32 %v16747_v44, %v11630_v60 }
 0x4ed   : > { %v15052_v38 = vld [vmem:[%s18787_s3 + $0x1c10] sm:$0xf]  ;;  %v14797_v23 = vor.u32 %v17543_v8, %v14796_v4  ;;  %7804 = vmatpush.bf16.msrb.mxu0 %v14541_v15  ;;  %v12142_v4 = vld [vmem:[%s18787_s3 + $0x570] sm:$0xf0]  ;;  %v7586_v15 = vadd.f32 %v20307_v40, %v7573_v20 }
 0x4ee   : > { %v17607_v0 = vld [vmem:[%s18787_s3 + $0x1c2c] sm:$0xf0]  ;;  %v16939_v8 = vld [vmem:[%s18787_s3 + $0x754] sm:$0xf] }
 0x4ef   : > { %v15308_v6 = vld [vmem:[%s18787_s3 + $0x1e10] sm:$0xf]  ;;  %v15053_v28 = vor.u32 %v17607_v0, %v15052_v38  ;;  %7817 = vmatpush.bf16.msrb.mxu1 %v14797_v23  ;;  %v12398_v38 = vld [vmem:[%s18787_s3 + $0x770] sm:$0xf0]  ;;  %v11889_v0 = vor.u32 %v16811_v61, %v11886_v1  ;;  %v7611_v23 = vpop.f32.mrf.mxu1 }
 0x4f0   : > { %v17671_v52 = vld [vmem:[%s18787_s3 + $0x1e2c] sm:$0xf0]  ;;  %7805 = vmatmul.bf16.vlgmr.msrb.gmra.mxu0 %v19132_v24  ;;  %v16739_v37 = vld [vmem:[%s18787_s3 + $0x114] sm:$0xf]  ;;  %v12401_v57 = vor.u32 %v16939_v8, %v12398_v38 }
 0x4f1   : > { %v15309_v35 = vor.u32 %v17671_v52, %v15308_v6  ;;  %7830 = vmatpush.bf16.msrb.mxu2 %v15053_v28  ;;  %7849 = vmatpush.bf16.msra.mxu0 %v11697_v19  ;;  %v12145_v6 = vor.u32 %v16875_v2, %v12142_v4  ;;  %v11598_v52 = vld [vmem:[%s18787_s3 + $0x130] sm:$0xf0]  ;;  %v7599_v28 = vadd.f32 %v7598_v18, %v7586_v15  ;;  %v7600_v4 = vpop.f32.mrf.mxu0 }
 0x4f2   : > { %7818 = vmatmul.bf16.vlgmr.msrb.gmra.mxu1 %v19139_v32  ;;  %v16867_v14 = vld [vmem:[%s18787_s3 + $0x514] sm:$0xf]  ;;  %v11601_v27 = vor.u32 %v16739_v37, %v11598_v52 }
 0x4f3   : > { %7843 = vmatpush.bf16.msrb.mxu3 %v15309_v35  ;;  %7862 = vmatpush.bf16.msra.mxu1 %v11953_v33  ;;  %v16931_v10 = vld [vmem:[%s18787_s3 + $0x714] sm:$0xf]  ;;  %v12113_v62 = vor.u32 %v16867_v14, %v12110_v51  ;;  %v7612_v58 = vadd.f32 %v7611_v23, %v7599_v28 }
 0x4f4   : > { %7831 = vmatmul.bf16.vlgmr.msrb.gmra.mxu2 %v19137_v29  ;;  %v12366_v16 = vld [vmem:[%s18787_s3 + $0x730] sm:$0xf0] }
 0x4f5   : > { %7875 = vmatpush.bf16.msra.mxu2 %v12209_v41  ;;  %7850 = vmatpush.bf16.msra.mxu0 %v11665_v56  ;;  %v16731_v35 = vld [vmem:[%s18787_s3 + $0xd4] sm:$0xf]  ;;  %v12369_v13 = vor.u32 %v16931_v10, %v12366_v16 }
 0x4f6   : > { %7844 = vmatmul.bf16.vlgmr.msrb.gmra.mxu3 %v19143_v36  ;;  %v11566_v19 = vld [vmem:[%s18787_s3 + $0xf0] sm:$0xf0] }
 0x4f7   : > { %7888 = vmatpush.bf16.msra.mxu3 %v12465_v50  ;;  %7863 = vmatpush.bf16.msra.mxu1 %v11921_v49  ;;  %v16795_v40 = vld [vmem:[%s18787_s3 + $0x2d4] sm:$0xf]  ;;  %v11569_v50 = vor.u32 %v16731_v35, %v11566_v19  ;;  %v7624_v49 = vpop.f32.mrf.mxu2  ;;  %v7613_v38 = vpop.f32.mrf.mxu1 }
 0x4f8   : > { %v11822_v33 = vld [vmem:[%s18787_s3 + $0x2f0] sm:$0xf0]  ;;  %v7625_v61 = vadd.f32 %v7624_v49, %v7612_v58 }
 0x4f9   : > { %7876 = vmatpush.bf16.msra.mxu2 %v12177_v53  ;;  %7851 = vmatpush.bf16.msra.mxu0 %v11633_v9  ;;  %v16859_v41 = vld [vmem:[%s18787_s3 + $0x4d4] sm:$0xf]  ;;  %v11825_v11 = vor.u32 %v16795_v40, %v11822_v33 }
 0x4fa   : > { %v12078_v46 = vld [vmem:[%s18787_s3 + $0x4f0] sm:$0xf0] }
 0x4fb   : > { %7889 = vmatpush.bf16.msra.mxu3 %v12433_v63  ;;  %7864 = vmatpush.bf16.msra.mxu1 %v11889_v0  ;;  %v16923_v17 = vld [vmem:[%s18787_s3 + $0x6d4] sm:$0xf]  ;;  %v12081_v59 = vor.u32 %v16859_v41, %v12078_v46  ;;  %v7637_v63 = vpop.f32.mrf.mxu3 }
 0x4fc   : > { %v12334_v47 = vld [vmem:[%s18787_s3 + $0x6f0] sm:$0xf0]  ;;  %v7638_v9 = vadd.f32 %v7637_v63, %v7625_v61 }
 0x4fd   : > { %7877 = vmatpush.bf16.msra.mxu2 %v12145_v6  ;;  %7852 = vmatpush.bf16.msra.mxu0 %v11601_v27  ;;  %v16723_v25 = vld [vmem:[%s18787_s3 + $0x94] sm:$0xf]  ;;  %v12337_v3 = vor.u32 %v16923_v17, %v12334_v47 }
 0x4fe   : > { %v11534_v55 = vld [vmem:[%s18787_s3 + $0xb0] sm:$0xf0] }
 0x4ff   : > { %7890 = vmatpush.bf16.msra.mxu3 %v12401_v57  ;;  %7865 = vmatpush.bf16.msra.mxu1 %v11857_v48  ;;  %v16787_v56 = vld [vmem:[%s18787_s3 + $0x294] sm:$0xf]  ;;  %v11537_v8 = vor.u32 %v16723_v25, %v11534_v55  ;;  %v7626_v46 = vpop.f32.mrf.mxu2 }
 0x500   : > { %v11790_v53 = vld [vmem:[%s18787_s3 + $0x2b0] sm:$0xf0] }
 0x501   : > { %7878 = vmatpush.bf16.msra.mxu2 %v12113_v62  ;;  %v16851_v44 = vld [vmem:[%s18787_s3 + $0x494] sm:$0xf]  ;;  %7853 = vmatpush.bf16.msra.mxu0 %v11569_v50  ;;  %v11793_v0 = vor.u32 %v16787_v56, %v11790_v53 }
 0x502   : > { %v12046_v60 = vld [vmem:[%s18787_s3 + $0x4b0] sm:$0xf0] }
 0x503   : > { %7891 = vmatpush.bf16.msra.mxu3 %v12369_v13  ;;  %v16915_v1 = vld [vmem:[%s18787_s3 + $0x694] sm:$0xf]  ;;  %7866 = vmatpush.bf16.msra.mxu1 %v11825_v11  ;;  %v12049_v6 = vor.u32 %v16851_v44, %v12046_v60  ;;  %v7639_v58 = vpop.f32.mrf.mxu3 }
 0x504   : > { %v12302_v2 = vld [vmem:[%s18787_s3 + $0x6b0] sm:$0xf0] }
 0x505   : > { %v596_v20 = vld [vmem:[#allocation2 + $0x10] sm:$0xff]  ;;  %7879 = vmatpush.bf16.msra.mxu2 %v12081_v59  ;;  %v12305_v57 = vor.u32 %v16915_v1, %v12302_v2  ;;  %7854 = vmatpush.bf16.msra.mxu0 %v11537_v8 }
 0x506   : > { %v16715_v37 = vld [vmem:[%s18787_s3 + $0x54] sm:$0xf]  ;;  %v8476_v15 = vadd.f32 %v7638_v9, %v596_v20 }
 0x507   : > { %v11502_v52 = vld [vmem:[%s18787_s3 + $0x70] sm:$0xf0]  ;;  %7892 = vmatpush.bf16.msra.mxu3 %v12337_v3  ;;  %7867 = vmatpush.bf16.msra.mxu1 %v11793_v0 }
 0x508   : > { %v16779_v54 = vld [vmem:[%s18787_s3 + $0x254] sm:$0xf]  ;;  %v11505_v16 = vor.u32 %v16715_v37, %v11502_v52  ;;  %8484 = vst [vmem:[#allocation2 + $0x10] sm:$0xff] %v8476_v15 }
 0x509   : > { %v11758_v12 = vld [vmem:[%s18787_s3 + $0x270] sm:$0xf0]  ;;  %7880 = vmatpush.bf16.msra.mxu2 %v12049_v6 }
 0x50a   : > { %v16843_v14 = vld [vmem:[%s18787_s3 + $0x454] sm:$0xf]  ;;  %v11761_v48 = vor.u32 %v16779_v54, %v11758_v12  ;;  %7855 = vmatpush.bf16.msra.mxu0 %v11505_v16 }
 0x50b   : > { %v12014_v51 = vld [vmem:[%s18787_s3 + $0x470] sm:$0xf0]  ;;  %7893 = vmatpush.bf16.msra.mxu3 %v12305_v57 }
 0x50c   : > { %v16907_v18 = vld [vmem:[%s18787_s3 + $0x654] sm:$0xf]  ;;  %v12017_v62 = vor.u32 %v16843_v14, %v12014_v51  ;;  %7868 = vmatpush.bf16.msra.mxu1 %v11761_v48 }
 0x50d   : > { %v12270_v10 = vld [vmem:[%s18787_s3 + $0x670] sm:$0xf0] }
 0x50e   : > { %v16707_v27 = vld [vmem:[%s18787_s3 + $0x14] sm:$0xf]  ;;  %v12273_v40 = vor.u32 %v16907_v18, %v12270_v10  ;;  %7881 = vmatpush.bf16.msra.mxu2 %v12017_v62 }
 0x50f   : > { %v11470_v23 = vld [vmem:[%s18787_s3 + $0x30] sm:$0xf0] }
 0x510   : > { %v16771_v28 = vld [vmem:[%s18787_s3 + $0x214] sm:$0xf]  ;;  %v11473_v11 = vor.u32 %v16707_v27, %v11470_v23  ;;  %7894 = vmatpush.bf16.msra.mxu3 %v12273_v40 }
 0x511   : > { %v11726_v35 = vld [vmem:[%s18787_s3 + $0x230] sm:$0xf0] }
 0x512   : > { %v16835_v19 = vld [vmem:[%s18787_s3 + $0x414] sm:$0xf]  ;;  %v11729_v56 = vor.u32 %v16771_v28, %v11726_v35  ;;  %7856 = vmatpush.bf16.msra.mxu0 %v11473_v11 }
 0x513   : > { %v11982_v13 = vld [vmem:[%s18787_s3 + $0x430] sm:$0xf0] }
 0x514   : > { %v16899_v33 = vld [vmem:[%s18787_s3 + $0x614] sm:$0xf]  ;;  %v11985_v3 = vor.u32 %v16835_v19, %v11982_v13  ;;  %7869 = vmatpush.bf16.msra.mxu1 %v11729_v56  ;;  %v7663_v56 = vpop.f32.mrf.mxu1 }
 0x515   : > { %v12238_v41 = vld [vmem:[%s18787_s3 + $0x630] sm:$0xf0]  ;;  %7857 = vmatmul.bf16.vlgmr.msra.gmra.mxu0 %v18924_v21 }
 0x516   : > { %v17019_v17 = vld [vmem:[%s18787_s3 + $0x9d4] sm:$0xf]  ;;  %v12241_v44 = vor.u32 %v16899_v33, %v12238_v41  ;;  %7882 = vmatpush.bf16.msra.mxu2 %v11985_v3 }
 0x517   : > { %v12718_v47 = vld [vmem:[%s18787_s3 + $0x9f0] sm:$0xf0]  ;;  %7870 = vmatmul.bf16.vlgmr.msra.gmra.mxu1 %v18927_v22 }
 0x518   : > { %v17083_v50 = vld [vmem:[%s18787_s3 + $0xbd4] sm:$0xf]  ;;  %v12721_v60 = vor.u32 %v17019_v17, %v12718_v47  ;;  %7895 = vmatpush.bf16.msra.mxu3 %v12241_v44 }
 0x519   : > { %v12974_v59 = vld [vmem:[%s18787_s3 + $0xbf0] sm:$0xf0]  ;;  %7883 = vmatmul.bf16.vlgmr.msra.gmra.mxu2 %v18910_v5 }
 0x51a   : > { %v17147_v25 = vld [vmem:[%s18787_s3 + $0xdd4] sm:$0xf]  ;;  %v12977_v61 = vor.u32 %v17083_v50, %v12974_v59  ;;  %7901 = vmatpush.bf16.msrb.mxu0 %v12721_v60  ;;  %v7650_v50 = vpop.f32.mrf.mxu0 }
 0x51b   : > { %v13230_v55 = vld [vmem:[%s18787_s3 + $0xdf0] sm:$0xf0]  ;;  %7896 = vmatmul.bf16.vlgmr.msra.gmra.mxu3 %v18913_v7  ;;  %v7664_v60 = vadd.f32 %v7663_v56, %v7650_v50 }
 0x51c   : > { %v17211_v49 = vld [vmem:[%s18787_s3 + $0xfd4] sm:$0xf]  ;;  %v13233_v63 = vor.u32 %v17147_v25, %v13230_v55  ;;  %7914 = vmatpush.bf16.msrb.mxu1 %v12977_v61 }
 0x51d   : > { %v13486_v53 = vld [vmem:[%s18787_s3 + $0xff0] sm:$0xf0] }
 0x51e   : > { %v17011_v1 = vld [vmem:[%s18787_s3 + $0x994] sm:$0xf]  ;;  %v13489_v20 = vor.u32 %v17211_v49, %v13486_v53  ;;  %7927 = vmatpush.bf16.msrb.mxu2 %v13233_v63 }
 0x51f   : > { %v12686_v2 = vld [vmem:[%s18787_s3 + $0x9b0] sm:$0xf0] }
 0x520   : > { %v17075_v4 = vld [vmem:[%s18787_s3 + $0xb94] sm:$0xf]  ;;  %v12689_v37 = vor.u32 %v17011_v1, %v12686_v2  ;;  %7940 = vmatpush.bf16.msrb.mxu3 %v13489_v20 }
 0x521   : > { %v12942_v8 = vld [vmem:[%s18787_s3 + $0xbb0] sm:$0xf0] }
 0x522   : > { %v17139_v38 = vld [vmem:[%s18787_s3 + $0xd94] sm:$0xf]  ;;  %v12945_v52 = vor.u32 %v17075_v4, %v12942_v8  ;;  %7902 = vmatpush.bf16.msrb.mxu0 %v12689_v37 }
 0x523   : > { %v13198_v9 = vld [vmem:[%s18787_s3 + $0xdb0] sm:$0xf0] }
 0x524   : > { %v17203_v0 = vld [vmem:[%s18787_s3 + $0xf94] sm:$0xf]  ;;  %v13201_v54 = vor.u32 %v17139_v38, %v13198_v9  ;;  %7915 = vmatpush.bf16.msrb.mxu1 %v12945_v52  ;;  %v7676_v9 = vpop.f32.mrf.mxu2 }
 0x525   : > { %v13454_v6 = vld [vmem:[%s18787_s3 + $0xfb0] sm:$0xf0] }
 0x526   : > { %v17003_v57 = vld [vmem:[%s18787_s3 + $0x954] sm:$0xf]  ;;  %v13457_v51 = vor.u32 %v17203_v0, %v13454_v6  ;;  %7928 = vmatpush.bf16.msrb.mxu2 %v13201_v54  ;;  %v7677_v54 = vadd.f32 %v7676_v9, %v7664_v60 }
 0x527   : > { %v12654_v12 = vld [vmem:[%s18787_s3 + $0x970] sm:$0xf0] }
 0x528   : > { %v17067_v14 = vld [vmem:[%s18787_s3 + $0xb54] sm:$0xf]  ;;  %v12657_v23 = vor.u32 %v17003_v57, %v12654_v12  ;;  %7941 = vmatpush.bf16.msrb.mxu3 %v13457_v51  ;;  %v7689_v57 = vpop.f32.mrf.mxu3 }
 0x529   : > { %v12910_v15 = vld [vmem:[%s18787_s3 + $0xb70] sm:$0xf0] }
 0x52a   : > { %v17131_v18 = vld [vmem:[%s18787_s3 + $0xd54] sm:$0xf]  ;;  %v12913_v28 = vor.u32 %v17067_v14, %v12910_v15  ;;  %7903 = vmatpush.bf16.msrb.mxu0 %v12657_v23  ;;  %v20454_v15 = vadd.f32 %v7689_v57, %v7677_v54 }
 0x52b   : > { %v13166_v10 = vld [vmem:[%s18787_s3 + $0xd70] sm:$0xf0] }
 0x52c   : > { %v17195_v16 = vld [vmem:[%s18787_s3 + $0xf54] sm:$0xf]  ;;  %v13169_v48 = vor.u32 %v17131_v18, %v13166_v10  ;;  %7916 = vmatpush.bf16.msrb.mxu1 %v12913_v28  ;;  %v7652_v18 = vpop.f32.mrf.mxu0 }
 0x52d   : > { %v13422_v27 = vld [vmem:[%s18787_s3 + $0xf70] sm:$0xf0] }
 0x52e   : > { %v16995_v62 = vld [vmem:[%s18787_s3 + $0x914] sm:$0xf]  ;;  %v13425_v40 = vor.u32 %v17195_v16, %v13422_v27  ;;  %7929 = vmatpush.bf16.msrb.mxu2 %v13169_v48  ;;  %v7665_v48 = vpop.f32.mrf.mxu1 }
 0x52f   : > { %v12622_v35 = vld [vmem:[%s18787_s3 + $0x930] sm:$0xf0] }
 0x530   : > { %v17059_v19 = vld [vmem:[%s18787_s3 + $0xb14] sm:$0xf]  ;;  %v12625_v47 = vor.u32 %v16995_v62, %v12622_v35  ;;  %7942 = vmatpush.bf16.msrb.mxu3 %v13425_v40 }
 0x531   : > { %v12878_v13 = vld [vmem:[%s18787_s3 + $0xb30] sm:$0xf0] }
 0x532   : > { %v17123_v33 = vld [vmem:[%s18787_s3 + $0xd14] sm:$0xf]  ;;  %v12881_v58 = vor.u32 %v17059_v19, %v12878_v13  ;;  %7904 = vmatpush.bf16.msrb.mxu0 %v12625_v47 }
 0x533   : > { %v13134_v41 = vld [vmem:[%s18787_s3 + $0xd30] sm:$0xf0] }
 0x534   : > { %v17187_v46 = vld [vmem:[%s18787_s3 + $0xf14] sm:$0xf]  ;;  %v13137_v11 = vor.u32 %v17123_v33, %v13134_v41  ;;  %7917 = vmatpush.bf16.msrb.mxu1 %v12881_v58 }
 0x535   : > { %v13390_v17 = vld [vmem:[%s18787_s3 + $0xf30] sm:$0xf0] }
 0x536   : > { %v16987_v59 = vld [vmem:[%s18787_s3 + $0x8d4] sm:$0xf]  ;;  %v13393_v3 = vor.u32 %v17187_v46, %v13390_v17  ;;  %7930 = vmatpush.bf16.msrb.mxu2 %v13137_v11 }
 0x537   : > { %v12590_v25 = vld [vmem:[%s18787_s3 + $0x8f0] sm:$0xf0] }
 0x538   : > { %v17051_v55 = vld [vmem:[%s18787_s3 + $0xad4] sm:$0xf]  ;;  %v12593_v1 = vor.u32 %v16987_v59, %v12590_v25  ;;  %7943 = vmatpush.bf16.msrb.mxu3 %v13393_v3  ;;  %v7678_v25 = vpop.f32.mrf.mxu2 }
 0x539   : > { %v12846_v49 = vld [vmem:[%s18787_s3 + $0xaf0] sm:$0xf0] }
 0x53a   : > { %v17115_v53 = vld [vmem:[%s18787_s3 + $0xcd4] sm:$0xf]  ;;  %v12849_v2 = vor.u32 %v17051_v55, %v12846_v49  ;;  %7905 = vmatpush.bf16.msrb.mxu0 %v12593_v1 }
 0x53b   : > { %v13102_v44 = vld [vmem:[%s18787_s3 + $0xcf0] sm:$0xf0] }
 0x53c   : > { %v17179_v61 = vld [vmem:[%s18787_s3 + $0xed4] sm:$0xf]  ;;  %v13105_v4 = vor.u32 %v17115_v53, %v13102_v44  ;;  %7918 = vmatpush.bf16.msrb.mxu1 %v12849_v2  ;;  %v7691_v53 = vpop.f32.mrf.mxu3 }
 0x53d   : > { %v13358_v63 = vld [vmem:[%s18787_s3 + $0xef0] sm:$0xf0] }
 0x53e   : > { %v16979_v20 = vld [vmem:[%s18787_s3 + $0x894] sm:$0xf]  ;;  %v13361_v0 = vor.u32 %v17179_v61, %v13358_v63  ;;  %7931 = vmatpush.bf16.msrb.mxu2 %v13105_v4 }
 0x53f   : > { %v12558_v8 = vld [vmem:[%s18787_s3 + $0x8b0] sm:$0xf0] }
 0x540   : > { %v17043_v38 = vld [vmem:[%s18787_s3 + $0xa94] sm:$0xf]  ;;  %v12561_v51 = vor.u32 %v16979_v20, %v12558_v8  ;;  %7944 = vmatpush.bf16.msrb.mxu3 %v13361_v0 }
 0x541   : > { %v12814_v6 = vld [vmem:[%s18787_s3 + $0xab0] sm:$0xf0] }
 0x542   : > { %v17107_v37 = vld [vmem:[%s18787_s3 + $0xc94] sm:$0xf]  ;;  %v12817_v10 = vor.u32 %v17043_v38, %v12814_v6  ;;  %7906 = vmatpush.bf16.msrb.mxu0 %v12561_v51 }
 0x543   : > { %v13070_v52 = vld [vmem:[%s18787_s3 + $0xcb0] sm:$0xf0] }
 0x544   : > { %v17171_v12 = vld [vmem:[%s18787_s3 + $0xe94] sm:$0xf]  ;;  %v13073_v16 = vor.u32 %v17107_v37, %v13070_v52  ;;  %7919 = vmatpush.bf16.msrb.mxu1 %v12817_v10 }
 0x545   : > { %v13326_v14 = vld [vmem:[%s18787_s3 + $0xeb0] sm:$0xf0] }
 0x546   : > { %v16971_v27 = vld [vmem:[%s18787_s3 + $0x854] sm:$0xf]  ;;  %v13329_v62 = vor.u32 %v17171_v12, %v13326_v14  ;;  %7932 = vmatpush.bf16.msrb.mxu2 %v13073_v16 }
 0x547   : > { %v12526_v23 = vld [vmem:[%s18787_s3 + $0x870] sm:$0xf0] }
 0x548   : > { %v17035_v28 = vld [vmem:[%s18787_s3 + $0xa54] sm:$0xf]  ;;  %v12529_v41 = vor.u32 %v16971_v27, %v12526_v23  ;;  %7945 = vmatpush.bf16.msrb.mxu3 %v13329_v62 }
 0x549   : > { %v12782_v35 = vld [vmem:[%s18787_s3 + $0xa70] sm:$0xf0] }
 0x54a   : > { %v17099_v19 = vld [vmem:[%s18787_s3 + $0xc54] sm:$0xf]  ;;  %v12785_v47 = vor.u32 %v17035_v28, %v12782_v35  ;;  %7907 = vmatpush.bf16.msrb.mxu0 %v12529_v41 }
 0x54b   : > { %v13038_v40 = vld [vmem:[%s18787_s3 + $0xc70] sm:$0xf0] }
 0x54c   : > { %v17163_v13 = vld [vmem:[%s18787_s3 + $0xe54] sm:$0xf]  ;;  %v13041_v50 = vor.u32 %v17099_v19, %v13038_v40  ;;  %7920 = vmatpush.bf16.msrb.mxu1 %v12785_v47 }
 0x54d   : > { %v13294_v33 = vld [vmem:[%s18787_s3 + $0xe70] sm:$0xf0] }
 0x54e   : > { %v16963_v46 = vld [vmem:[%s18787_s3 + $0x814] sm:$0xf]  ;;  %v13297_v55 = vor.u32 %v17163_v13, %v13294_v33  ;;  %7933 = vmatpush.bf16.msrb.mxu2 %v13041_v50 }
 0x54f   : > { %v12494_v17 = vld [vmem:[%s18787_s3 + $0x830] sm:$0xf0] }
 0x550   : > { %v17027_v58 = vld [vmem:[%s18787_s3 + $0xa14] sm:$0xf]  ;;  %v12497_v63 = vor.u32 %v16963_v46, %v12494_v17  ;;  %7946 = vmatpush.bf16.msrb.mxu3 %v13297_v55 }
 0x551   : > { %v12750_v11 = vld [vmem:[%s18787_s3 + $0xa30] sm:$0xf0] }
 0x552   : > { %v17091_v59 = vld [vmem:[%s18787_s3 + $0xc14] sm:$0xf]  ;;  %v12753_v20 = vor.u32 %v17027_v58, %v12750_v11  ;;  %7908 = vmatpush.bf16.msrb.mxu0 %v12497_v63 }
 0x553   : > { %v13006_v56 = vld [vmem:[%s18787_s3 + $0xc30] sm:$0xf0] }
 0x554   : > { %v17155_v3 = vld [vmem:[%s18787_s3 + $0xe14] sm:$0xf]  ;;  %v13009_v8 = vor.u32 %v17091_v59, %v13006_v56  ;;  %7921 = vmatpush.bf16.msrb.mxu1 %v12753_v20 }
 0x555   : > { %v13262_v49 = vld [vmem:[%s18787_s3 + $0xe30] sm:$0xf0]  ;;  %7909 = vmatmul.bf16.vlgmr.msrb.gmra.mxu0 %v18983_v42 }
 0x556   : > { %v17275_v44 = vld [vmem:[%s18787_s3 + $0x11d4] sm:$0xf]  ;;  %v13265_v0 = vor.u32 %v17155_v3, %v13262_v49  ;;  %7934 = vmatpush.bf16.msrb.mxu2 %v13009_v8  ;;  %v20513_v8 = vpop.f32.mrf.mxu1 }
 0x557   : > { %v13742_v60 = vld [vmem:[%s18787_s3 + $0x11f0] sm:$0xf0]  ;;  %7922 = vmatmul.bf16.vlgmr.msrb.gmra.mxu1 %v18987_v45 }
 0x558   : > { %v17339_v61 = vld [vmem:[%s18787_s3 + $0x13d4] sm:$0xf]  ;;  %v13745_v6 = vor.u32 %v17275_v44, %v13742_v60  ;;  %7947 = vmatpush.bf16.msrb.mxu3 %v13265_v0 }
 0x559   : > { %v13998_v1 = vld [vmem:[%s18787_s3 + $0x13f0] sm:$0xf0]  ;;  %7935 = vmatmul.bf16.vlgmr.msrb.gmra.mxu2 %v18979_v39 }
 0x55a   : > { %v17403_v2 = vld [vmem:[%s18787_s3 + $0x15d4] sm:$0xf]  ;;  %v14001_v37 = vor.u32 %v17339_v61, %v13998_v1  ;;  %7953 = vmatpush.bf16.msra.mxu0 %v13745_v6  ;;  %v20508_v61 = vpop.f32.mrf.mxu0 }
 0x55b   : > { %v14254_v4 = vld [vmem:[%s18787_s3 + $0x15f0] sm:$0xf0]  ;;  %7948 = vmatmul.bf16.vlgmr.msrb.gmra.mxu3 %v18985_v43 }
 0x55c   : > { %v17467_v38 = vld [vmem:[%s18787_s3 + $0x17d4] sm:$0xf]  ;;  %v14257_v52 = vor.u32 %v17403_v2, %v14254_v4  ;;  %7966 = vmatpush.bf16.msra.mxu1 %v14001_v37 }
 0x55d   : > { %v14510_v9 = vld [vmem:[%s18787_s3 + $0x17f0] sm:$0xf0] }
 0x55e   : > { %v17267_v54 = vld [vmem:[%s18787_s3 + $0x1194] sm:$0xf]  ;;  %v14513_v14 = vor.u32 %v17467_v38, %v14510_v9  ;;  %7979 = vmatpush.bf16.msra.mxu2 %v14257_v52 }
 0x55f   : > { %v13710_v57 = vld [vmem:[%s18787_s3 + $0x11b0] sm:$0xf0] }
 0x560   : > { %v17331_v12 = vld [vmem:[%s18787_s3 + $0x1394] sm:$0xf]  ;;  %v13713_v23 = vor.u32 %v17267_v54, %v13710_v57  ;;  %7992 = vmatpush.bf16.msra.mxu3 %v14513_v14 }
 0x561   : > { %v13966_v51 = vld [vmem:[%s18787_s3 + $0x13b0] sm:$0xf0] }
 0x562   : > { %v17395_v18 = vld [vmem:[%s18787_s3 + $0x1594] sm:$0xf]  ;;  %v13969_v28 = vor.u32 %v17331_v12, %v13966_v51  ;;  %7954 = vmatpush.bf16.msra.mxu0 %v13713_v23 }
 0x563   : > { %v14222_v10 = vld [vmem:[%s18787_s3 + $0x15b0] sm:$0xf0] }
 0x564   : > { %v17459_v16 = vld [vmem:[%s18787_s3 + $0x1794] sm:$0xf]  ;;  %v14225_v48 = vor.u32 %v17395_v18, %v14222_v10  ;;  %7967 = vmatpush.bf16.msra.mxu1 %v13969_v28  ;;  %v20523_v10 = vpop.f32.mrf.mxu2 }
 0x565   : > { %v14478_v27 = vld [vmem:[%s18787_s3 + $0x17b0] sm:$0xf0] }
 0x566   : > { %v17259_v62 = vld [vmem:[%s18787_s3 + $0x1154] sm:$0xf]  ;;  %v14481_v40 = vor.u32 %v17459_v16, %v14478_v27  ;;  %7980 = vmatpush.bf16.msra.mxu2 %v14225_v48  ;;  %v20528_v48 = vpop.f32.mrf.mxu3 }
 0x567   : > { %v13678_v35 = vld [vmem:[%s18787_s3 + $0x1170] sm:$0xf0] }
 0x568   : > { %v17323_v19 = vld [vmem:[%s18787_s3 + $0x1354] sm:$0xf]  ;;  %v13681_v47 = vor.u32 %v17259_v62, %v13678_v35  ;;  %7993 = vmatpush.bf16.msra.mxu3 %v14481_v40  ;;  %v7704_v40 = vpop.f32.mrf.mxu0 }
 0x569   : > { %v13934_v13 = vld [vmem:[%s18787_s3 + $0x1370] sm:$0xf0] }
 0x56a   : > { %v17387_v33 = vld [vmem:[%s18787_s3 + $0x1554] sm:$0xf]  ;;  %v13937_v50 = vor.u32 %v17323_v19, %v13934_v13  ;;  %7955 = vmatpush.bf16.msra.mxu0 %v13681_v47  ;;  %v7717_v47 = vpop.f32.mrf.mxu1 }
 0x56b   : > { %v14190_v41 = vld [vmem:[%s18787_s3 + $0x1570] sm:$0xf0] }
 0x56c   : > { %v17451_v46 = vld [vmem:[%s18787_s3 + $0x1754] sm:$0xf]  ;;  %v14193_v58 = vor.u32 %v17387_v33, %v14190_v41  ;;  %7968 = vmatpush.bf16.msra.mxu1 %v13937_v50 }
 0x56d   : > { %v14446_v17 = vld [vmem:[%s18787_s3 + $0x1770] sm:$0xf0] }
 0x56e   : > { %v17251_v11 = vld [vmem:[%s18787_s3 + $0x1114] sm:$0xf]  ;;  %v14449_v55 = vor.u32 %v17451_v46, %v14446_v17  ;;  %7981 = vmatpush.bf16.msra.mxu2 %v14193_v58 }
 0x56f   : > { %v13646_v59 = vld [vmem:[%s18787_s3 + $0x1130] sm:$0xf0] }
 0x570   : > { %v17315_v25 = vld [vmem:[%s18787_s3 + $0x1314] sm:$0xf]  ;;  %v13649_v60 = vor.u32 %v17251_v11, %v13646_v59  ;;  %7994 = vmatpush.bf16.msra.mxu3 %v14449_v55 }
 0x571   : > { %v13902_v56 = vld [vmem:[%s18787_s3 + $0x1330] sm:$0xf0] }
 0x572   : > { %v17379_v3 = vld [vmem:[%s18787_s3 + $0x1514] sm:$0xf]  ;;  %v13905_v63 = vor.u32 %v17315_v25, %v13902_v56  ;;  %7956 = vmatpush.bf16.msra.mxu0 %v13649_v60 }
 0x573   : > { %v14158_v49 = vld [vmem:[%s18787_s3 + $0x1530] sm:$0xf0] }
 0x574   : > { %v17443_v53 = vld [vmem:[%s18787_s3 + $0x1714] sm:$0xf]  ;;  %v14161_v1 = vor.u32 %v17379_v3, %v14158_v49  ;;  %7969 = vmatpush.bf16.msra.mxu1 %v13905_v63 }
 0x575   : > { %v14414_v44 = vld [vmem:[%s18787_s3 + $0x1730] sm:$0xf0] }
 0x576   : > { %v17243_v2 = vld [vmem:[%s18787_s3 + $0x10d4] sm:$0xf]  ;;  %v14417_v38 = vor.u32 %v17443_v53, %v14414_v44  ;;  %7982 = vmatpush.bf16.msra.mxu2 %v14161_v1 }
 0x577   : > { %v13614_v4 = vld [vmem:[%s18787_s3 + $0x10f0] sm:$0xf0] }
 0x578   : > { %v17307_v20 = vld [vmem:[%s18787_s3 + $0x12d4] sm:$0xf]  ;;  %v13617_v54 = vor.u32 %v17243_v2, %v13614_v4  ;;  %7995 = vmatpush.bf16.msra.mxu3 %v14417_v38  ;;  %v7730_v2 = vpop.f32.mrf.mxu2 }
 0x579   : > { %v13870_v9 = vld [vmem:[%s18787_s3 + $0x12f0] sm:$0xf0] }
 0x57a   : > { %v17371_v0 = vld [vmem:[%s18787_s3 + $0x14d4] sm:$0xf]  ;;  %v13873_v57 = vor.u32 %v17307_v20, %v13870_v9  ;;  %7957 = vmatpush.bf16.msra.mxu0 %v13617_v54 }
 0x57b   : > { %v14126_v6 = vld [vmem:[%s18787_s3 + $0x14f0] sm:$0xf0] }
 0x57c   : > { %v17435_v37 = vld [vmem:[%s18787_s3 + $0x16d4] sm:$0xf]  ;;  %v14129_v12 = vor.u32 %v17371_v0, %v14126_v6  ;;  %7970 = vmatpush.bf16.msra.mxu1 %v13873_v57  ;;  %v7743_v0 = vpop.f32.mrf.mxu3 }
 0x57d   : > { %v14382_v52 = vld [vmem:[%s18787_s3 + $0x16f0] sm:$0xf0] }
 0x57e   : > { %v17235_v14 = vld [vmem:[%s18787_s3 + $0x1094] sm:$0xf]  ;;  %v14385_v16 = vor.u32 %v17435_v37, %v14382_v52  ;;  %7983 = vmatpush.bf16.msra.mxu2 %v14129_v12 }
 0x57f   : > { %v13582_v51 = vld [vmem:[%s18787_s3 + $0x10b0] sm:$0xf0] }
 0x580   : > { %v17299_v18 = vld [vmem:[%s18787_s3 + $0x1294] sm:$0xf]  ;;  %v13585_v19 = vor.u32 %v17235_v14, %v13582_v51  ;;  %7996 = vmatpush.bf16.msra.mxu3 %v14385_v16 }
 0x581   : > { %v13838_v27 = vld [vmem:[%s18787_s3 + $0x12b0] sm:$0xf0] }
 0x582   : > { %v17363_v23 = vld [vmem:[%s18787_s3 + $0x1494] sm:$0xf]  ;;  %v13841_v13 = vor.u32 %v17299_v18, %v13838_v27  ;;  %7958 = vmatpush.bf16.msra.mxu0 %v13585_v19 }
 0x583   : > { %v14094_v28 = vld [vmem:[%s18787_s3 + $0x14b0] sm:$0xf0] }
 0x584   : > { %v17427_v62 = vld [vmem:[%s18787_s3 + $0x1694] sm:$0xf]  ;;  %v14097_v33 = vor.u32 %v17363_v23, %v14094_v28  ;;  %7971 = vmatpush.bf16.msra.mxu1 %v13841_v13 }
 0x585   : > { %v14350_v35 = vld [vmem:[%s18787_s3 + $0x16b0] sm:$0xf0] }
 0x586   : > { %v17227_v41 = vld [vmem:[%s18787_s3 + $0x1054] sm:$0xf]  ;;  %v14353_v50 = vor.u32 %v17427_v62, %v14350_v35  ;;  %7984 = vmatpush.bf16.msra.mxu2 %v14097_v33 }
 0x587   : > { %v13550_v46 = vld [vmem:[%s18787_s3 + $0x1070] sm:$0xf0] }
 0x588   : > { %v17291_v17 = vld [vmem:[%s18787_s3 + $0x1254] sm:$0xf]  ;;  %v13553_v56 = vor.u32 %v17227_v41, %v13550_v46  ;;  %7997 = vmatpush.bf16.msra.mxu3 %v14353_v50 }
 0x589   : > { %v13806_v58 = vld [vmem:[%s18787_s3 + $0x1270] sm:$0xf0] }
 0x58a   : > { %v17355_v11 = vld [vmem:[%s18787_s3 + $0x1454] sm:$0xf]  ;;  %v13809_v53 = vor.u32 %v17291_v17, %v13806_v58  ;;  %7959 = vmatpush.bf16.msra.mxu0 %v13553_v56 }
 0x58b   : > { %v14062_v59 = vld [vmem:[%s18787_s3 + $0x1470] sm:$0xf0] }
 0x58c   : > { %v17419_v25 = vld [vmem:[%s18787_s3 + $0x1654] sm:$0xf]  ;;  %v14065_v44 = vor.u32 %v17355_v11, %v14062_v59  ;;  %7972 = vmatpush.bf16.msra.mxu1 %v13809_v53 }
 0x58d   : > { %v14318_v55 = vld [vmem:[%s18787_s3 + $0x1670] sm:$0xf0] }
 0x58e   : > { %v17219_v3 = vld [vmem:[%s18787_s3 + $0x1014] sm:$0xf]  ;;  %v14321_v4 = vor.u32 %v17419_v25, %v14318_v55  ;;  %7985 = vmatpush.bf16.msra.mxu2 %v14065_v44 }
 0x58f   : > { %v13518_v49 = vld [vmem:[%s18787_s3 + $0x1030] sm:$0xf0] }
 0x590   : > { %v17283_v60 = vld [vmem:[%s18787_s3 + $0x1214] sm:$0xf]  ;;  %v13521_v54 = vor.u32 %v17219_v3, %v13518_v49  ;;  %7998 = vmatpush.bf16.msra.mxu3 %v14321_v4 }
 0x591   : > { %v13774_v63 = vld [vmem:[%s18787_s3 + $0x1230] sm:$0xf0] }
 0x592   : > { %v17347_v1 = vld [vmem:[%s18787_s3 + $0x1414] sm:$0xf]  ;;  %v13777_v51 = vor.u32 %v17283_v60, %v13774_v63  ;;  %7960 = vmatpush.bf16.msra.mxu0 %v13521_v54  ;;  %v20582_v54 = vpop.f32.mrf.mxu0 }
 0x593   : > { %v14030_v20 = vld [vmem:[%s18787_s3 + $0x1430] sm:$0xf0] }
 0x594   : > { %v17411_v38 = vld [vmem:[%s18787_s3 + $0x1614] sm:$0xf]  ;;  %v14033_v18 = vor.u32 %v17347_v1, %v14030_v20  ;;  %7973 = vmatpush.bf16.msra.mxu1 %v13777_v51  ;;  %v20586_v51 = vpop.f32.mrf.mxu1 }
 0x595   : > { %v14286_v9 = vld [vmem:[%s18787_s3 + $0x1630] sm:$0xf0]  ;;  %7961 = vmatmul.bf16.vlgmr.msra.gmra.mxu0 %v19054_v26 }
 0x596   : > { %v17531_v6 = vld [vmem:[%s18787_s3 + $0x19d4] sm:$0xf]  ;;  %v14289_v23 = vor.u32 %v17411_v38, %v14286_v9  ;;  %7986 = vmatpush.bf16.msra.mxu2 %v14033_v18 }
 0x597   : > { %v14766_v37 = vld [vmem:[%s18787_s3 + $0x19f0] sm:$0xf0]  ;;  %7974 = vmatmul.bf16.vlgmr.msra.gmra.mxu1 %v19061_v31 }
 0x598   : > { %v17595_v52 = vld [vmem:[%s18787_s3 + $0x1bd4] sm:$0xf]  ;;  %v14769_v28 = vor.u32 %v17531_v6, %v14766_v37  ;;  %7999 = vmatpush.bf16.msra.mxu3 %v14289_v23 }
 0x599   : > { %v15022_v57 = vld [vmem:[%s18787_s3 + $0x1bf0] sm:$0xf0]  ;;  %7987 = vmatmul.bf16.vlgmr.msra.gmra.mxu2 %v19059_v30 }
 0x59a   : > { %v17659_v12 = vld [vmem:[%s18787_s3 + $0x1dd4] sm:$0xf]  ;;  %v15025_v62 = vor.u32 %v17595_v52, %v15022_v57  ;;  %8005 = vmatpush.bf16.msrb.mxu0 %v14769_v28 }
 0x59b   : > { %v15278_v14 = vld [vmem:[%s18787_s3 + $0x1df0] sm:$0xf0]  ;;  %8000 = vmatmul.bf16.vlgmr.msra.gmra.mxu3 %v19065_v34 }
 0x59c   : > { %v17723_v16 = vld [vmem:[%s18787_s3 + $0x1fd4] sm:$0xf]  ;;  %v15281_v35 = vor.u32 %v17659_v12, %v15278_v14  ;;  %8018 = vmatpush.bf16.msrb.mxu1 %v15025_v62 }
 0x59d   : > { %v15534_v27 = vld [vmem:[%s18787_s3 + $0x1ff0] sm:$0xf0] }
 0x59e   : > { %v17523_v19 = vld [vmem:[%s18787_s3 + $0x1994] sm:$0xf]  ;;  %v15537_v33 = vor.u32 %v17723_v16, %v15534_v27  ;;  %8031 = vmatpush.bf16.msrb.mxu2 %v15281_v35 }
 0x59f   : > { %v14734_v40 = vld [vmem:[%s18787_s3 + $0x19b0] sm:$0xf0] }
 0x5a0   : > { %v17587_v13 = vld [vmem:[%s18787_s3 + $0x1b94] sm:$0xf]  ;;  %v14737_v58 = vor.u32 %v17523_v19, %v14734_v40  ;;  %8044 = vmatpush.bf16.msrb.mxu3 %v15537_v33 }
 0x5a1   : > { %v14990_v41 = vld [vmem:[%s18787_s3 + $0x1bb0] sm:$0xf0] }
 0x5a2   : > { %v17651_v46 = vld [vmem:[%s18787_s3 + $0x1d94] sm:$0xf]  ;;  %v14993_v11 = vor.u32 %v17587_v13, %v14990_v41  ;;  %8006 = vmatpush.bf16.msrb.mxu0 %v14737_v58 }
 0x5a3   : > { %v15246_v17 = vld [vmem:[%s18787_s3 + $0x1db0] sm:$0xf0] }
 0x5a4   : > { %v17715_v47 = vld [vmem:[%s18787_s3 + $0x1f94] sm:$0xf]  ;;  %v15249_v59 = vor.u32 %v17651_v46, %v15246_v17  ;;  %8019 = vmatpush.bf16.msrb.mxu1 %v14993_v11  ;;  %v7703_v46 = vadd.f32 %v20508_v61, %v20454_v15 }
 0x5a5   : > { %v15502_v50 = vld [vmem:[%s18787_s3 + $0x1fb0] sm:$0xf0] }
 0x5a6   : > { %v17515_v25 = vld [vmem:[%s18787_s3 + $0x1954] sm:$0xf]  ;;  %v15505_v3 = vor.u32 %v17715_v47, %v15502_v50  ;;  %8032 = vmatpush.bf16.msrb.mxu2 %v15249_v59 }
 0x5a7   : > { %v14702_v55 = vld [vmem:[%s18787_s3 + $0x1970] sm:$0xf0] }
 0x5a8   : > { %v17579_v56 = vld [vmem:[%s18787_s3 + $0x1b54] sm:$0xf]  ;;  %v14705_v1 = vor.u32 %v17515_v25, %v14702_v55  ;;  %8045 = vmatpush.bf16.msrb.mxu3 %v15505_v3  ;;  %v20601_v25 = vpop.f32.mrf.mxu2 }
 0x5a9   : > { %v14958_v49 = vld [vmem:[%s18787_s3 + $0x1b70] sm:$0xf0] }
 0x5aa   : > { %v17643_v53 = vld [vmem:[%s18787_s3 + $0x1d54] sm:$0xf]  ;;  %v14961_v2 = vor.u32 %v17579_v56, %v14958_v49  ;;  %8007 = vmatpush.bf16.msrb.mxu0 %v14705_v1  ;;  %v20606_v49 = vpop.f32.mrf.mxu3 }
 0x5ab   : > { %v15214_v44 = vld [vmem:[%s18787_s3 + $0x1d70] sm:$0xf0] }
 0x5ac   : > { %v17707_v60 = vld [vmem:[%s18787_s3 + $0x1f54] sm:$0xf]  ;;  %v15217_v4 = vor.u32 %v17643_v53, %v15214_v44  ;;  %8020 = vmatpush.bf16.msrb.mxu1 %v14961_v2  ;;  %v7756_v53 = vpop.f32.mrf.mxu0 }
 0x5ad   : > { %v15470_v63 = vld [vmem:[%s18787_s3 + $0x1f70] sm:$0xf0] }
 0x5ae   : > { %v17507_v20 = vld [vmem:[%s18787_s3 + $0x1914] sm:$0xf]  ;;  %v15473_v0 = vor.u32 %v17707_v60, %v15470_v63  ;;  %8033 = vmatpush.bf16.msrb.mxu2 %v15217_v4  ;;  %v7769_v60 = vpop.f32.mrf.mxu1  ;;  %v7716_v63 = vadd.f32 %v20513_v8, %v7703_v46  ;;  %v11956_v46 = vld [vmem:[%s18787_s3 + $0x3d8] sm:$0xf] }
 0x5af   : > { %v14670_v38 = vld [vmem:[%s18787_s3 + $0x1930] sm:$0xf0] }
 0x5b0   : > { %v17571_v9 = vld [vmem:[%s18787_s3 + $0x1b14] sm:$0xf]  ;;  %v14673_v14 = vor.u32 %v17507_v20, %v14670_v38  ;;  %8046 = vmatpush.bf16.msrb.mxu3 %v15473_v0 }
 0x5b1   : > { %v14926_v6 = vld [vmem:[%s18787_s3 + $0x1b30] sm:$0xf0] }
 0x5b2   : > { %v17635_v37 = vld [vmem:[%s18787_s3 + $0x1d14] sm:$0xf]  ;;  %v14929_v18 = vor.u32 %v17571_v9, %v14926_v6  ;;  %8008 = vmatpush.bf16.msrb.mxu0 %v14673_v14 }
 0x5b3   : > { %v15182_v52 = vld [vmem:[%s18787_s3 + $0x1d30] sm:$0xf0] }
 0x5b4   : > { %v17699_v57 = vld [vmem:[%s18787_s3 + $0x1f14] sm:$0xf]  ;;  %v15185_v16 = vor.u32 %v17635_v37, %v15182_v52  ;;  %8021 = vmatpush.bf16.msrb.mxu1 %v14929_v18  ;;  %v7729_v18 = vadd.f32 %v20523_v10, %v7716_v63  ;;  %v11700_v10 = vld [vmem:[%s18787_s3 + $0x1d8] sm:$0xf] }
 0x5b5   : > { %v15438_v12 = vld [vmem:[%s18787_s3 + $0x1f30] sm:$0xf0] }
 0x5b6   : > { %v17499_v27 = vld [vmem:[%s18787_s3 + $0x18d4] sm:$0xf]  ;;  %v15441_v62 = vor.u32 %v17699_v57, %v15438_v12  ;;  %8034 = vmatpush.bf16.msrb.mxu2 %v15185_v16 }
 0x5b7   : > { %v14638_v23 = vld [vmem:[%s18787_s3 + $0x18f0] sm:$0xf0] }
 0x5b8   : > { %v17563_v28 = vld [vmem:[%s18787_s3 + $0x1ad4] sm:$0xf]  ;;  %v14641_v41 = vor.u32 %v17499_v27, %v14638_v23  ;;  %8047 = vmatpush.bf16.msrb.mxu3 %v15441_v62 }
 0x5b9   : > { %v14894_v35 = vld [vmem:[%s18787_s3 + $0x1af0] sm:$0xf0] }
 0x5ba   : > { %v17627_v19 = vld [vmem:[%s18787_s3 + $0x1cd4] sm:$0xf]  ;;  %v14897_v17 = vor.u32 %v17563_v28, %v14894_v35  ;;  %8009 = vmatpush.bf16.msrb.mxu0 %v14641_v41  ;;  %v16768_v41 = vld [vmem:[%s18787_s3 + $0x1f4] sm:$0xf0] }
 0x5bb   : > { %v15150_v40 = vld [vmem:[%s18787_s3 + $0x1cf0] sm:$0xf0]  ;;  %v11701_v53 = vor.u32 %v16768_v41, %v11700_v10  ;;  %v16808_v41 = vld [vmem:[%s18787_s3 + $0x334] sm:$0xf0] }
 0x5bc   : > { %v17691_v13 = vld [vmem:[%s18787_s3 + $0x1ed4] sm:$0xf]  ;;  %v15153_v47 = vor.u32 %v17627_v19, %v15150_v40  ;;  %8022 = vmatpush.bf16.msrb.mxu1 %v14897_v17  ;;  %v7795_v17 = vpop.f32.mrf.mxu3 }
 0x5bd   : > { %v15406_v33 = vld [vmem:[%s18787_s3 + $0x1ef0] sm:$0xf0]  ;;  %v16872_v17 = vld [vmem:[%s18787_s3 + $0x534] sm:$0xf0] }
 0x5be   : > { %v17491_v50 = vld [vmem:[%s18787_s3 + $0x1894] sm:$0xf]  ;;  %v15409_v59 = vor.u32 %v17691_v13, %v15406_v33  ;;  %8035 = vmatpush.bf16.msrb.mxu2 %v15153_v47  ;;  %v7782_v33 = vpop.f32.mrf.mxu2 }
 0x5bf   : > { %v14606_v58 = vld [vmem:[%s18787_s3 + $0x18b0] sm:$0xf0]  ;;  %v11860_v33 = vld [vmem:[%s18787_s3 + $0x318] sm:$0xf] }
 0x5c0   : > { %v17555_v11 = vld [vmem:[%s18787_s3 + $0x1a94] sm:$0xf]  ;;  %v14609_v44 = vor.u32 %v17491_v50, %v14606_v58  ;;  %8048 = vmatpush.bf16.msrb.mxu3 %v15409_v59  ;;  %v16832_v50 = vld [vmem:[%s18787_s3 + $0x3f4] sm:$0xf0]  ;;  %v7742_v59 = vadd.f32 %v20528_v48, %v7729_v18 }
 0x5c1   : > { %v14862_v55 = vld [vmem:[%s18787_s3 + $0x1ab0] sm:$0xf0]  ;;  %v12212_v58 = vld [vmem:[%s18787_s3 + $0x5d8] sm:$0xf]  ;;  %v11957_v60 = vor.u32 %v16832_v50, %v11956_v46  ;;  %v7806_v50 = vpop.f32.mrf.mxu0 }
 0x5c2   : > { %v17619_v56 = vld [vmem:[%s18787_s3 + $0x1c94] sm:$0xf]  ;;  %v14865_v1 = vor.u32 %v17555_v11, %v14862_v55  ;;  %8010 = vmatpush.bf16.msrb.mxu0 %v14609_v44  ;;  %v16896_v11 = vld [vmem:[%s18787_s3 + $0x5f4] sm:$0xf0]  ;;  %v7755_v44 = vadd.f32 %v20582_v54, %v7742_v59 }
 0x5c3   : > { %v15118_v3 = vld [vmem:[%s18787_s3 + $0x1cb0] sm:$0xf0]  ;;  %v12213_v63 = vor.u32 %v16896_v11, %v12212_v58  ;;  %v16760_v48 = vld [vmem:[%s18787_s3 + $0x1b4] sm:$0xf0] }
 0x5c4   : > { %v17683_v15 = vld [vmem:[%s18787_s3 + $0x1e94] sm:$0xf]  ;;  %v15121_v2 = vor.u32 %v17619_v56, %v15118_v3  ;;  %8023 = vmatpush.bf16.msrb.mxu1 %v14865_v1  ;;  %v12468_v3 = vld [vmem:[%s18787_s3 + $0x7d8] sm:$0xf] }
 0x5c5   : > { %v15374_v61 = vld [vmem:[%s18787_s3 + $0x1eb0] sm:$0xf0]  ;;  %v11668_v1 = vld [vmem:[%s18787_s3 + $0x198] sm:$0xf] }
 0x5c6   : > { %v17483_v4 = vld [vmem:[%s18787_s3 + $0x1854] sm:$0xf]  ;;  %v15377_v9 = vor.u32 %v17683_v15, %v15374_v61  ;;  %8036 = vmatpush.bf16.msrb.mxu2 %v15121_v2  ;;  %v16960_v15 = vld [vmem:[%s18787_s3 + $0x7f4] sm:$0xf0]  ;;  %v11669_v54 = vor.u32 %v16760_v48, %v11668_v1 }
 0x5c7   : > { %v14574_v20 = vld [vmem:[%s18787_s3 + $0x1870] sm:$0xf0]  ;;  %v11924_v2 = vld [vmem:[%s18787_s3 + $0x398] sm:$0xf] }
 0x5c8   : > { %v17547_v38 = vld [vmem:[%s18787_s3 + $0x1a54] sm:$0xf]  ;;  %v14577_v57 = vor.u32 %v17483_v4, %v14574_v20  ;;  %8049 = vmatpush.bf16.msrb.mxu3 %v15377_v9  ;;  %v12469_v4 = vor.u32 %v16960_v15, %v12468_v3  ;;  %v16824_v20 = vld [vmem:[%s18787_s3 + $0x3b4] sm:$0xf0]  ;;  %v11861_v3 = vor.u32 %v16808_v41, %v11860_v33 }
 0x5c9   : > { %v14830_v0 = vld [vmem:[%s18787_s3 + $0x1a70] sm:$0xf0]  ;;  %v16888_v9 = vld [vmem:[%s18787_s3 + $0x5b4] sm:$0xf0] }
 0x5ca   : > { %v17611_v6 = vld [vmem:[%s18787_s3 + $0x1c54] sm:$0xf]  ;;  %v14833_v16 = vor.u32 %v17547_v38, %v14830_v0  ;;  %8011 = vmatpush.bf16.msrb.mxu0 %v14577_v57  ;;  %v12180_v38 = vld [vmem:[%s18787_s3 + $0x598] sm:$0xf] }
 0x5cb   : > { %v15086_v37 = vld [vmem:[%s18787_s3 + $0x1c70] sm:$0xf0]  ;;  %v12436_v0 = vld [vmem:[%s18787_s3 + $0x798] sm:$0xf] }
 0x5cc   : > { %v17675_v52 = vld [vmem:[%s18787_s3 + $0x1e54] sm:$0xf]  ;;  %v15089_v27 = vor.u32 %v17611_v6, %v15086_v37  ;;  %8024 = vmatpush.bf16.msrb.mxu1 %v14833_v16  ;;  %v16952_v6 = vld [vmem:[%s18787_s3 + $0x7b4] sm:$0xf0]  ;;  %v7768_v37 = vadd.f32 %v20586_v51, %v7755_v44 }
 0x5cd   : > { %v15342_v8 = vld [vmem:[%s18787_s3 + $0x1e70] sm:$0xf0]  ;;  %v11636_v57 = vld [vmem:[%s18787_s3 + $0x158] sm:$0xf]  ;;  %v12437_v18 = vor.u32 %v16952_v6, %v12436_v0 }
 0x5ce   : > { %v17475_v12 = vld [vmem:[%s18787_s3 + $0x1814] sm:$0xf]  ;;  %v15345_v35 = vor.u32 %v17675_v52, %v15342_v8  ;;  %8037 = vmatpush.bf16.msrb.mxu2 %v15089_v27  ;;  %v11925_v52 = vor.u32 %v16824_v20, %v11924_v2  ;;  %v12181_v8 = vor.u32 %v16888_v9, %v12180_v38  ;;  %v16816_v16 = vld [vmem:[%s18787_s3 + $0x374] sm:$0xf0]  ;;  %v7781_v51 = vadd.f32 %v20601_v25, %v7768_v37 }
 0x5cf   : > { %v14542_v14 = vld [vmem:[%s18787_s3 + $0x1830] sm:$0xf0]  ;;  %v12148_v27 = vld [vmem:[%s18787_s3 + $0x558] sm:$0xf] }
 0x5d0   : > { %v17539_v23 = vld [vmem:[%s18787_s3 + $0x1a14] sm:$0xf]  ;;  %v14545_v47 = vor.u32 %v17475_v12, %v14542_v14  ;;  %8050 = vmatpush.bf16.msrb.mxu3 %v15345_v35  ;;  %v16752_v12 = vld [vmem:[%s18787_s3 + $0x174] sm:$0xf0] }
 0x5d1   : > { %v14798_v28 = vld [vmem:[%s18787_s3 + $0x1a30] sm:$0xf0]  ;;  %v11892_v14 = vld [vmem:[%s18787_s3 + $0x358] sm:$0xf]  ;;  %v11637_v35 = vor.u32 %v16752_v12, %v11636_v57 }
 0x5d2   : > { %v17603_v62 = vld [vmem:[%s18787_s3 + $0x1c14] sm:$0xf]  ;;  %v14801_v55 = vor.u32 %v17539_v23, %v14798_v28  ;;  %8012 = vmatpush.bf16.msrb.mxu0 %v14545_v47  ;;  %v16880_v23 = vld [vmem:[%s18787_s3 + $0x574] sm:$0xf0]  ;;  %v7794_v47 = vadd.f32 %v20606_v49, %v7781_v51  ;;  %v597_v51 = vld [vmem:[#allocation2 + $0x8] sm:$0xff] }
 0x5d3   : > { %v15054_v19 = vld [vmem:[%s18787_s3 + $0x1c30] sm:$0xf0]  ;;  %v12404_v28 = vld [vmem:[%s18787_s3 + $0x758] sm:$0xf] }
 0x5d4   : > { %v17667_v40 = vld [vmem:[%s18787_s3 + $0x1e14] sm:$0xf]  ;;  %v15057_v56 = vor.u32 %v17603_v62, %v15054_v19  ;;  %8025 = vmatpush.bf16.msrb.mxu1 %v14801_v55  ;;  %v16944_v62 = vld [vmem:[%s18787_s3 + $0x774] sm:$0xf0]  ;;  %v11893_v19 = vor.u32 %v16816_v16, %v11892_v14  ;;  %v7819_v55 = vpop.f32.mrf.mxu1 }
 0x5d5   : > { %v15310_v13 = vld [vmem:[%s18787_s3 + $0x1e30] sm:$0xf0]  ;;  %8013 = vmatmul.bf16.vlgmr.msrb.gmra.mxu0 %v19132_v24  ;;  %v11604_v25 = vld [vmem:[%s18787_s3 + $0x118] sm:$0xf]  ;;  %v12405_v10 = vor.u32 %v16944_v62, %v12404_v28 }
 0x5d6   : > { %v15313_v61 = vor.u32 %v17667_v40, %v15310_v13  ;;  %8038 = vmatpush.bf16.msrb.mxu2 %v15057_v56  ;;  %8057 = vmatpush.bf16.msra.mxu0 %v11701_v53  ;;  %v12149_v40 = vor.u32 %v16880_v23, %v12148_v27  ;;  %v16744_v13 = vld [vmem:[%s18787_s3 + $0x134] sm:$0xf0]  ;;  %v7807_v56 = vadd.f32 %v7806_v50, %v7794_v47  ;;  %v7808_v23 = vpop.f32.mrf.mxu0 }
 0x5d7   : > { %8026 = vmatmul.bf16.vlgmr.msrb.gmra.mxu1 %v19139_v32  ;;  %v12116_v46 = vld [vmem:[%s18787_s3 + $0x518] sm:$0xf]  ;;  %v11605_v59 = vor.u32 %v16744_v13, %v11604_v25 }
 0x5d8   : > { %8051 = vmatpush.bf16.msrb.mxu3 %v15313_v61  ;;  %8070 = vmatpush.bf16.msra.mxu1 %v11957_v60  ;;  %v12372_v58 = vld [vmem:[%s18787_s3 + $0x718] sm:$0xf]  ;;  %v12117_v15 = vor.u32 %v16872_v17, %v12116_v46  ;;  %v7820_v20 = vadd.f32 %v7819_v55, %v7807_v56 }
 0x5d9   : > { %8039 = vmatmul.bf16.vlgmr.msrb.gmra.mxu2 %v19137_v29  ;;  %v16936_v11 = vld [vmem:[%s18787_s3 + $0x734] sm:$0xf0] }
 0x5da   : > { %8083 = vmatpush.bf16.msra.mxu2 %v12213_v63  ;;  %8058 = vmatpush.bf16.msra.mxu0 %v11669_v54  ;;  %v11572_v61 = vld [vmem:[%s18787_s3 + $0xd8] sm:$0xf]  ;;  %v12373_v44 = vor.u32 %v16936_v11, %v12372_v58 }
 0x5db   : > { %8052 = vmatmul.bf16.vlgmr.msrb.gmra.mxu3 %v19143_v36  ;;  %v16736_v53 = vld [vmem:[%s18787_s3 + $0xf4] sm:$0xf0] }
 0x5dc   : > { %8096 = vmatpush.bf16.msra.mxu3 %v12469_v4  ;;  %8071 = vmatpush.bf16.msra.mxu1 %v11925_v52  ;;  %v11828_v49 = vld [vmem:[%s18787_s3 + $0x2d8] sm:$0xf]  ;;  %v11573_v4 = vor.u32 %v16736_v53, %v11572_v61  ;;  %v7832_v52 = vpop.f32.mrf.mxu2  ;;  %v7821_v62 = vpop.f32.mrf.mxu1 }
 0x5dd   : > { %v16800_v60 = vld [vmem:[%s18787_s3 + $0x2f4] sm:$0xf0]  ;;  %v7833_v14 = vadd.f32 %v7832_v52, %v7820_v20 }
 0x5de   : > { %8084 = vmatpush.bf16.msra.mxu2 %v12181_v8  ;;  %8059 = vmatpush.bf16.msra.mxu0 %v11637_v35  ;;  %v12084_v63 = vld [vmem:[%s18787_s3 + $0x4d8] sm:$0xf]  ;;  %v11829_v38 = vor.u32 %v16800_v60, %v11828_v49 }
 0x5df   : > { %v16864_v1 = vld [vmem:[%s18787_s3 + $0x4f4] sm:$0xf0] }
 0x5e0   : > { %8097 = vmatpush.bf16.msra.mxu3 %v12437_v18  ;;  %8072 = vmatpush.bf16.msra.mxu1 %v11893_v19  ;;  %v12340_v48 = vld [vmem:[%s18787_s3 + $0x6d8] sm:$0xf]  ;;  %v12085_v9 = vor.u32 %v16864_v1, %v12084_v63  ;;  %v7845_v18 = vpop.f32.mrf.mxu3 }
 0x5e1   : > { %v16928_v2 = vld [vmem:[%s18787_s3 + $0x6f4] sm:$0xf0]  ;;  %v7846_v35 = vadd.f32 %v7845_v18, %v7833_v14 }
 0x5e2   : > { %8085 = vmatpush.bf16.msra.mxu2 %v12149_v40  ;;  %8060 = vmatpush.bf16.msra.mxu0 %v11605_v59  ;;  %v11540_v0 = vld [vmem:[%s18787_s3 + $0x98] sm:$0xf]  ;;  %v12341_v37 = vor.u32 %v16928_v2, %v12340_v48 }
 0x5e3   : > { %v16728_v6 = vld [vmem:[%s18787_s3 + $0xb4] sm:$0xf0]  ;;  %v8477_v47 = vadd.f32 %v7846_v35, %v597_v51 }
 0x5e4   : > { %8098 = vmatpush.bf16.msra.mxu3 %v12405_v10  ;;  %8073 = vmatpush.bf16.msra.mxu1 %v11861_v3  ;;  %v11796_v54 = vld [vmem:[%s18787_s3 + $0x298] sm:$0xf]  ;;  %v11541_v28 = vor.u32 %v16728_v6, %v11540_v0  ;;  %v7834_v1 = vpop.f32.mrf.mxu2 }
 0x5e5   : > { %v16792_v8 = vld [vmem:[%s18787_s3 + $0x2b4] sm:$0xf0]  ;;  %8485 = vst [vmem:[#allocation2 + $0x8] sm:$0xff] %v8477_v47 }
 0x5e6   : > { %8086 = vmatpush.bf16.msra.mxu2 %v12117_v15  ;;  %v12052_v57 = vld [vmem:[%s18787_s3 + $0x498] sm:$0xf]  ;;  %8061 = vmatpush.bf16.msra.mxu0 %v11573_v4  ;;  %v11797_v19 = vor.u32 %v16792_v8, %v11796_v54 }
 0x5e7   : > { %v16856_v12 = vld [vmem:[%s18787_s3 + $0x4b4] sm:$0xf0] }
 0x5e8   : > { %8099 = vmatpush.bf16.msra.mxu3 %v12373_v44  ;;  %v12308_v16 = vld [vmem:[%s18787_s3 + $0x698] sm:$0xf]  ;;  %8074 = vmatpush.bf16.msra.mxu1 %v11829_v38  ;;  %v12053_v40 = vor.u32 %v16856_v12, %v12052_v57  ;;  %v7847_v20 = vpop.f32.mrf.mxu3 }
 0x5e9   : > { %v16920_v27 = vld [vmem:[%s18787_s3 + $0x6b4] sm:$0xf0] }
 0x5ea   : > { %8087 = vmatpush.bf16.msra.mxu2 %v12085_v9  ;;  %v11508_v25 = vld [vmem:[%s18787_s3 + $0x58] sm:$0xf]  ;;  %v12309_v10 = vor.u32 %v16920_v27, %v12308_v16  ;;  %8062 = vmatpush.bf16.msra.mxu0 %v11541_v28 }
 0x5eb   : > { %v16720_v13 = vld [vmem:[%s18787_s3 + $0x74] sm:$0xf0] }
 0x5ec   : > { %v11764_v33 = vld [vmem:[%s18787_s3 + $0x258] sm:$0xf]  ;;  %8100 = vmatpush.bf16.msra.mxu3 %v12341_v37  ;;  %v11509_v11 = vor.u32 %v16720_v13, %v11508_v25  ;;  %8075 = vmatpush.bf16.msra.mxu1 %v11797_v19 }
 0x5ed   : > { %v16784_v41 = vld [vmem:[%s18787_s3 + $0x274] sm:$0xf0] }
 0x5ee   : > { %v12020_v46 = vld [vmem:[%s18787_s3 + $0x458] sm:$0xf]  ;;  %8088 = vmatpush.bf16.msra.mxu2 %v12053_v40  ;;  %v11765_v3 = vor.u32 %v16784_v41, %v11764_v33  ;;  %8063 = vmatpush.bf16.msra.mxu0 %v11509_v11 }
 0x5ef   : > { %v16848_v17 = vld [vmem:[%s18787_s3 + $0x474] sm:$0xf0] }
 0x5f0   : > { %v12276_v50 = vld [vmem:[%s18787_s3 + $0x658] sm:$0xf]  ;;  %v12021_v15 = vor.u32 %v16848_v17, %v12020_v46  ;;  %8101 = vmatpush.bf16.msra.mxu3 %v12309_v10  ;;  %8076 = vmatpush.bf16.msra.mxu1 %v11765_v3 }
 0x5f1   : > { %v16912_v58 = vld [vmem:[%s18787_s3 + $0x674] sm:$0xf0] }
 0x5f2   : > { %v11476_v59 = vld [vmem:[%s18787_s3 + $0x18] sm:$0xf]  ;;  %v12277_v49 = vor.u32 %v16912_v58, %v12276_v50  ;;  %8089 = vmatpush.bf16.msra.mxu2 %v12021_v15 }
 0x5f3   : > { %v16712_v55 = vld [vmem:[%s18787_s3 + $0x34] sm:$0xf0] }
 0x5f4   : > { %v11732_v56 = vld [vmem:[%s18787_s3 + $0x218] sm:$0xf]  ;;  %v11477_v38 = vor.u32 %v16712_v55, %v11476_v59  ;;  %8102 = vmatpush.bf16.msra.mxu3 %v12277_v49 }
 0x5f5   : > { %v16776_v61 = vld [vmem:[%s18787_s3 + $0x234] sm:$0xf0] }
 0x5f6   : > { %v11988_v53 = vld [vmem:[%s18787_s3 + $0x418] sm:$0xf]  ;;  %v11733_v54 = vor.u32 %v16776_v61, %v11732_v56  ;;  %8064 = vmatpush.bf16.msra.mxu0 %v11477_v38 }
 0x5f7   : > { %v16840_v44 = vld [vmem:[%s18787_s3 + $0x434] sm:$0xf0] }
 0x5f8   : > { %v12244_v60 = vld [vmem:[%s18787_s3 + $0x618] sm:$0xf]  ;;  %v11989_v37 = vor.u32 %v16840_v44, %v11988_v53  ;;  %8077 = vmatpush.bf16.msra.mxu1 %v11733_v54  ;;  %v7871_v54 = vpop.f32.mrf.mxu1 }
 0x5f9   : > { %v16904_v63 = vld [vmem:[%s18787_s3 + $0x634] sm:$0xf0]  ;;  %8065 = vmatmul.bf16.vlgmr.msra.gmra.mxu0 %v18924_v21 }
 0x5fa   : > { %v12724_v48 = vld [vmem:[%s18787_s3 + $0x9d8] sm:$0xf]  ;;  %v12245_v57 = vor.u32 %v16904_v63, %v12244_v60  ;;  %8090 = vmatpush.bf16.msra.mxu2 %v11989_v37 }
 0x5fb   : > { %v17024_v2 = vld [vmem:[%s18787_s3 + $0x9f4] sm:$0xf0]  ;;  %8078 = vmatmul.bf16.vlgmr.msra.gmra.mxu1 %v18927_v22 }
 0x5fc   : > { %v12980_v4 = vld [vmem:[%s18787_s3 + $0xbd8] sm:$0xf]  ;;  %v12725_v12 = vor.u32 %v17024_v2, %v12724_v48  ;;  %8103 = vmatpush.bf16.msra.mxu3 %v12245_v57 }
 0x5fd   : > { %v17088_v9 = vld [vmem:[%s18787_s3 + $0xbf4] sm:$0xf0]  ;;  %8091 = vmatmul.bf16.vlgmr.msra.gmra.mxu2 %v18910_v5 }
 0x5fe   : > { %v13236_v0 = vld [vmem:[%s18787_s3 + $0xdd8] sm:$0xf]  ;;  %v12981_v14 = vor.u32 %v17088_v9, %v12980_v4  ;;  %8109 = vmatpush.bf16.msrb.mxu0 %v12725_v12  ;;  %v7858_v4 = vpop.f32.mrf.mxu0 }
 0x5ff   : > { %v17152_v6 = vld [vmem:[%s18787_s3 + $0xdf4] sm:$0xf0]  ;;  %8104 = vmatmul.bf16.vlgmr.msra.gmra.mxu3 %v18913_v7  ;;  %v7872_v12 = vadd.f32 %v7871_v54, %v7858_v4 }
 0x600   : > { %v13492_v52 = vld [vmem:[%s18787_s3 + $0xfd8] sm:$0xf]  ;;  %v13237_v18 = vor.u32 %v17152_v6, %v13236_v0  ;;  %8122 = vmatpush.bf16.msrb.mxu1 %v12981_v14 }
 0x601   : > { %v17216_v8 = vld [vmem:[%s18787_s3 + $0xff4] sm:$0xf0] }
 0x602   : > { %v12692_v16 = vld [vmem:[%s18787_s3 + $0x998] sm:$0xf]  ;;  %v13493_v51 = vor.u32 %v17216_v8, %v13492_v52  ;;  %8135 = vmatpush.bf16.msrb.mxu2 %v13237_v18 }
 0x603   : > { %v17016_v27 = vld [vmem:[%s18787_s3 + $0x9b4] sm:$0xf0] }
 0x604   : > { %v12948_v23 = vld [vmem:[%s18787_s3 + $0xb98] sm:$0xf]  ;;  %v12693_v25 = vor.u32 %v17016_v27, %v12692_v16  ;;  %8148 = vmatpush.bf16.msrb.mxu3 %v13493_v51 }
 0x605   : > { %v17080_v28 = vld [vmem:[%s18787_s3 + $0xbb4] sm:$0xf0] }
 0x606   : > { %v13204_v62 = vld [vmem:[%s18787_s3 + $0xd98] sm:$0xf]  ;;  %v12949_v13 = vor.u32 %v17080_v28, %v12948_v23  ;;  %8110 = vmatpush.bf16.msrb.mxu0 %v12693_v25 }
 0x607   : > { %v17144_v35 = vld [vmem:[%s18787_s3 + $0xdb4] sm:$0xf0] }
 0x608   : > { %v13460_v19 = vld [vmem:[%s18787_s3 + $0xf98] sm:$0xf]  ;;  %v13205_v33 = vor.u32 %v17144_v35, %v13204_v62  ;;  %8123 = vmatpush.bf16.msrb.mxu1 %v12949_v13  ;;  %v7884_v35 = vpop.f32.mrf.mxu2 }
 0x609   : > { %v17208_v40 = vld [vmem:[%s18787_s3 + $0xfb4] sm:$0xf0] }
 0x60a   : > { %v12660_v10 = vld [vmem:[%s18787_s3 + $0x958] sm:$0xf]  ;;  %v13461_v17 = vor.u32 %v17208_v40, %v13460_v19  ;;  %8136 = vmatpush.bf16.msrb.mxu2 %v13205_v33  ;;  %v7885_v33 = vadd.f32 %v7884_v35, %v7872_v12 }
 0x60b   : > { %v17008_v41 = vld [vmem:[%s18787_s3 + $0x974] sm:$0xf0] }
 0x60c   : > { %v12916_v46 = vld [vmem:[%s18787_s3 + $0xb58] sm:$0xf]  ;;  %v12661_v55 = vor.u32 %v17008_v41, %v12660_v10  ;;  %8149 = vmatpush.bf16.msrb.mxu3 %v13461_v17  ;;  %v7897_v10 = vpop.f32.mrf.mxu3 }
 0x60d   : > { %v17072_v47 = vld [vmem:[%s18787_s3 + $0xb74] sm:$0xf0] }
 0x60e   : > { %v13172_v50 = vld [vmem:[%s18787_s3 + $0xd58] sm:$0xf]  ;;  %v12917_v56 = vor.u32 %v17072_v47, %v12916_v46  ;;  %8111 = vmatpush.bf16.msrb.mxu0 %v12661_v55  ;;  %v20753_v47 = vadd.f32 %v7897_v10, %v7885_v33 }
 0x60f   : > { %v17136_v58 = vld [vmem:[%s18787_s3 + $0xd74] sm:$0xf0] }
 0x610   : > { %v13428_v11 = vld [vmem:[%s18787_s3 + $0xf58] sm:$0xf]  ;;  %v13173_v3 = vor.u32 %v17136_v58, %v13172_v50  ;;  %8124 = vmatpush.bf16.msrb.mxu1 %v12917_v56  ;;  %v7860_v50 = vpop.f32.mrf.mxu0 }
 0x611   : > { %v17200_v59 = vld [vmem:[%s18787_s3 + $0xf74] sm:$0xf0] }
 0x612   : > { %v12628_v15 = vld [vmem:[%s18787_s3 + $0x918] sm:$0xf]  ;;  %v13429_v49 = vor.u32 %v17200_v59, %v13428_v11  ;;  %8137 = vmatpush.bf16.msrb.mxu2 %v13173_v3  ;;  %v7873_v3 = vpop.f32.mrf.mxu1 }
 0x613   : > { %v17000_v61 = vld [vmem:[%s18787_s3 + $0x934] sm:$0xf0] }
 0x614   : > { %v12884_v53 = vld [vmem:[%s18787_s3 + $0xb18] sm:$0xf]  ;;  %v12629_v2 = vor.u32 %v17000_v61, %v12628_v15  ;;  %8150 = vmatpush.bf16.msrb.mxu3 %v13429_v49 }
 0x615   : > { %v17064_v44 = vld [vmem:[%s18787_s3 + $0xb34] sm:$0xf0] }
 0x616   : > { %v13140_v60 = vld [vmem:[%s18787_s3 + $0xd18] sm:$0xf]  ;;  %v12885_v20 = vor.u32 %v17064_v44, %v12884_v53  ;;  %8112 = vmatpush.bf16.msrb.mxu0 %v12629_v2 }
 0x617   : > { %v17128_v63 = vld [vmem:[%s18787_s3 + $0xd34] sm:$0xf0] }
 0x618   : > { %v13396_v1 = vld [vmem:[%s18787_s3 + $0xf18] sm:$0xf]  ;;  %v13141_v38 = vor.u32 %v17128_v63, %v13140_v60  ;;  %8125 = vmatpush.bf16.msrb.mxu1 %v12885_v20 }
 0x619   : > { %v17192_v48 = vld [vmem:[%s18787_s3 + $0xf34] sm:$0xf0] }
 0x61a   : > { %v12596_v9 = vld [vmem:[%s18787_s3 + $0x8d8] sm:$0xf]  ;;  %v13397_v37 = vor.u32 %v17192_v48, %v13396_v1  ;;  %8138 = vmatpush.bf16.msrb.mxu2 %v13141_v38 }
 0x61b   : > { %v16992_v0 = vld [vmem:[%s18787_s3 + $0x8f4] sm:$0xf0] }
 0x61c   : > { %v12852_v6 = vld [vmem:[%s18787_s3 + $0xad8] sm:$0xf]  ;;  %v12597_v16 = vor.u32 %v16992_v0, %v12596_v9  ;;  %8151 = vmatpush.bf16.msrb.mxu3 %v13397_v37  ;;  %v7886_v0 = vpop.f32.mrf.mxu2 }
 0x61d   : > { %v17056_v52 = vld [vmem:[%s18787_s3 + $0xaf4] sm:$0xf0] }
 0x61e   : > { %v13108_v8 = vld [vmem:[%s18787_s3 + $0xcd8] sm:$0xf]  ;;  %v12853_v27 = vor.u32 %v17056_v52, %v12852_v6  ;;  %8113 = vmatpush.bf16.msrb.mxu0 %v12597_v16 }
 0x61f   : > { %v17120_v57 = vld [vmem:[%s18787_s3 + $0xcf4] sm:$0xf0] }
 0x620   : > { %v13364_v14 = vld [vmem:[%s18787_s3 + $0xed8] sm:$0xf]  ;;  %v13109_v23 = vor.u32 %v17120_v57, %v13108_v8  ;;  %8126 = vmatpush.bf16.msrb.mxu1 %v12853_v27  ;;  %v7899_v8 = vpop.f32.mrf.mxu3 }
 0x621   : > { %v17184_v18 = vld [vmem:[%s18787_s3 + $0xef4] sm:$0xf0] }
 0x622   : > { %v12564_v51 = vld [vmem:[%s18787_s3 + $0x898] sm:$0xf]  ;;  %v13365_v19 = vor.u32 %v17184_v18, %v13364_v14  ;;  %8139 = vmatpush.bf16.msrb.mxu2 %v13109_v23 }
 0x623   : > { %v16984_v28 = vld [vmem:[%s18787_s3 + $0x8b4] sm:$0xf0] }
 0x624   : > { %v12820_v62 = vld [vmem:[%s18787_s3 + $0xa98] sm:$0xf]  ;;  %v12565_v17 = vor.u32 %v16984_v28, %v12564_v51  ;;  %8152 = vmatpush.bf16.msrb.mxu3 %v13365_v19 }
 0x625   : > { %v17048_v40 = vld [vmem:[%s18787_s3 + $0xab4] sm:$0xf0] }
 0x626   : > { %v13076_v25 = vld [vmem:[%s18787_s3 + $0xc98] sm:$0xf]  ;;  %v12821_v58 = vor.u32 %v17048_v40, %v12820_v62  ;;  %8114 = vmatpush.bf16.msrb.mxu0 %v12565_v17 }
 0x627   : > { %v17112_v13 = vld [vmem:[%s18787_s3 + $0xcb4] sm:$0xf0] }
 0x628   : > { %v13332_v41 = vld [vmem:[%s18787_s3 + $0xe98] sm:$0xf]  ;;  %v13077_v11 = vor.u32 %v17112_v13, %v13076_v25  ;;  %8127 = vmatpush.bf16.msrb.mxu1 %v12821_v58 }
 0x629   : > { %v17176_v46 = vld [vmem:[%s18787_s3 + $0xeb4] sm:$0xf0] }
 0x62a   : > { %v12532_v59 = vld [vmem:[%s18787_s3 + $0x858] sm:$0xf]  ;;  %v13333_v15 = vor.u32 %v17176_v46, %v13332_v41  ;;  %8140 = vmatpush.bf16.msrb.mxu2 %v13077_v11 }
 0x62b   : > { %v16976_v55 = vld [vmem:[%s18787_s3 + $0x874] sm:$0xf0] }
 0x62c   : > { %v12788_v56 = vld [vmem:[%s18787_s3 + $0xa58] sm:$0xf]  ;;  %v12533_v63 = vor.u32 %v16976_v55, %v12532_v59  ;;  %8153 = vmatpush.bf16.msrb.mxu3 %v13333_v15 }
 0x62d   : > { %v17040_v61 = vld [vmem:[%s18787_s3 + $0xa74] sm:$0xf0] }
 0x62e   : > { %v13044_v53 = vld [vmem:[%s18787_s3 + $0xc58] sm:$0xf]  ;;  %v12789_v2 = vor.u32 %v17040_v61, %v12788_v56  ;;  %8115 = vmatpush.bf16.msrb.mxu0 %v12533_v63 }
 0x62f   : > { %v17104_v49 = vld [vmem:[%s18787_s3 + $0xc74] sm:$0xf0] }
 0x630   : > { %v13300_v44 = vld [vmem:[%s18787_s3 + $0xe58] sm:$0xf]  ;;  %v13045_v4 = vor.u32 %v17104_v49, %v13044_v53  ;;  %8128 = vmatpush.bf16.msrb.mxu1 %v12789_v2 }
 0x631   : > { %v17168_v60 = vld [vmem:[%s18787_s3 + $0xe74] sm:$0xf0] }
 0x632   : > { %v12500_v1 = vld [vmem:[%s18787_s3 + $0x818] sm:$0xf]  ;;  %v13301_v6 = vor.u32 %v17168_v60, %v13300_v44  ;;  %8141 = vmatpush.bf16.msrb.mxu2 %v13045_v4 }
 0x633   : > { %v16968_v48 = vld [vmem:[%s18787_s3 + $0x834] sm:$0xf0] }
 0x634   : > { %v12756_v20 = vld [vmem:[%s18787_s3 + $0xa18] sm:$0xf]  ;;  %v12501_v18 = vor.u32 %v16968_v48, %v12500_v1  ;;  %8154 = vmatpush.bf16.msrb.mxu3 %v13301_v6 }
 0x635   : > { %v17032_v38 = vld [vmem:[%s18787_s3 + $0xa34] sm:$0xf0] }
 0x636   : > { %v13012_v9 = vld [vmem:[%s18787_s3 + $0xc18] sm:$0xf]  ;;  %v12757_v51 = vor.u32 %v17032_v38, %v12756_v20  ;;  %8116 = vmatpush.bf16.msrb.mxu0 %v12501_v18 }
 0x637   : > { %v17096_v54 = vld [vmem:[%s18787_s3 + $0xc34] sm:$0xf0] }
 0x638   : > { %v13268_v37 = vld [vmem:[%s18787_s3 + $0xe18] sm:$0xf]  ;;  %v13013_v28 = vor.u32 %v17096_v54, %v13012_v9  ;;  %8129 = vmatpush.bf16.msrb.mxu1 %v12757_v51 }
 0x639   : > { %v17160_v52 = vld [vmem:[%s18787_s3 + $0xe34] sm:$0xf0]  ;;  %8117 = vmatmul.bf16.vlgmr.msrb.gmra.mxu0 %v18983_v42 }
 0x63a   : > { %v13748_v57 = vld [vmem:[%s18787_s3 + $0x11d8] sm:$0xf]  ;;  %v13269_v19 = vor.u32 %v17160_v52, %v13268_v37  ;;  %8142 = vmatpush.bf16.msrb.mxu2 %v13013_v28  ;;  %v20812_v28 = vpop.f32.mrf.mxu1 }
 0x63b   : > { %v17280_v12 = vld [vmem:[%s18787_s3 + $0x11f4] sm:$0xf0]  ;;  %8130 = vmatmul.bf16.vlgmr.msrb.gmra.mxu1 %v18987_v45 }
 0x63c   : > { %v14004_v14 = vld [vmem:[%s18787_s3 + $0x13d8] sm:$0xf]  ;;  %v13749_v40 = vor.u32 %v17280_v12, %v13748_v57  ;;  %8155 = vmatpush.bf16.msrb.mxu3 %v13269_v19 }
 0x63d   : > { %v17344_v16 = vld [vmem:[%s18787_s3 + $0x13f4] sm:$0xf0]  ;;  %8143 = vmatmul.bf16.vlgmr.msrb.gmra.mxu2 %v18979_v39 }
 0x63e   : > { %v14260_v27 = vld [vmem:[%s18787_s3 + $0x15d8] sm:$0xf]  ;;  %v14005_v25 = vor.u32 %v17344_v16, %v14004_v14  ;;  %8161 = vmatpush.bf16.msra.mxu0 %v13749_v40  ;;  %v20807_v14 = vpop.f32.mrf.mxu0 }
 0x63f   : > { %v17408_v23 = vld [vmem:[%s18787_s3 + $0x15f4] sm:$0xf0]  ;;  %8156 = vmatmul.bf16.vlgmr.msrb.gmra.mxu3 %v18985_v43 }
 0x640   : > { %v14516_v62 = vld [vmem:[%s18787_s3 + $0x17d8] sm:$0xf]  ;;  %v14261_v13 = vor.u32 %v17408_v23, %v14260_v27  ;;  %8174 = vmatpush.bf16.msra.mxu1 %v14005_v25 }
 0x641   : > { %v17472_v35 = vld [vmem:[%s18787_s3 + $0x17f4] sm:$0xf0] }
 0x642   : > { %v13716_v33 = vld [vmem:[%s18787_s3 + $0x1198] sm:$0xf]  ;;  %v14517_v46 = vor.u32 %v17472_v35, %v14516_v62  ;;  %8187 = vmatpush.bf16.msra.mxu2 %v14261_v13 }
 0x643   : > { %v17272_v10 = vld [vmem:[%s18787_s3 + $0x11b4] sm:$0xf0] }
 0x644   : > { %v13972_v41 = vld [vmem:[%s18787_s3 + $0x1398] sm:$0xf]  ;;  %v13717_v55 = vor.u32 %v17272_v10, %v13716_v33  ;;  %8200 = vmatpush.bf16.msra.mxu3 %v14517_v46 }
 0x645   : > { %v17336_v17 = vld [vmem:[%s18787_s3 + $0x13b4] sm:$0xf0] }
 0x646   : > { %v14228_v50 = vld [vmem:[%s18787_s3 + $0x1598] sm:$0xf]  ;;  %v13973_v56 = vor.u32 %v17336_v17, %v13972_v41  ;;  %8162 = vmatpush.bf16.msra.mxu0 %v13717_v55 }
 0x647   : > { %v17400_v58 = vld [vmem:[%s18787_s3 + $0x15b4] sm:$0xf0] }
 0x648   : > { %v14484_v11 = vld [vmem:[%s18787_s3 + $0x1798] sm:$0xf]  ;;  %v14229_v3 = vor.u32 %v17400_v58, %v14228_v50  ;;  %8175 = vmatpush.bf16.msra.mxu1 %v13973_v56  ;;  %v20822_v58 = vpop.f32.mrf.mxu2 }
 0x649   : > { %v17464_v59 = vld [vmem:[%s18787_s3 + $0x17b4] sm:$0xf0] }
 0x64a   : > { %v13684_v15 = vld [vmem:[%s18787_s3 + $0x1158] sm:$0xf]  ;;  %v14485_v49 = vor.u32 %v17464_v59, %v14484_v11  ;;  %8188 = vmatpush.bf16.msra.mxu2 %v14229_v3  ;;  %v20827_v3 = vpop.f32.mrf.mxu3 }
 0x64b   : > { %v17264_v61 = vld [vmem:[%s18787_s3 + $0x1174] sm:$0xf0] }
 0x64c   : > { %v13940_v53 = vld [vmem:[%s18787_s3 + $0x1358] sm:$0xf]  ;;  %v13685_v2 = vor.u32 %v17264_v61, %v13684_v15  ;;  %8201 = vmatpush.bf16.msra.mxu3 %v14485_v49  ;;  %v7912_v49 = vpop.f32.mrf.mxu0 }
 0x64d   : > { %v17328_v44 = vld [vmem:[%s18787_s3 + $0x1374] sm:$0xf0] }
 0x64e   : > { %v14196_v60 = vld [vmem:[%s18787_s3 + $0x1558] sm:$0xf]  ;;  %v13941_v4 = vor.u32 %v17328_v44, %v13940_v53  ;;  %8163 = vmatpush.bf16.msra.mxu0 %v13685_v2  ;;  %v7925_v2 = vpop.f32.mrf.mxu1 }
 0x64f   : > { %v17392_v63 = vld [vmem:[%s18787_s3 + $0x1574] sm:$0xf0] }
 0x650   : > { %v14452_v1 = vld [vmem:[%s18787_s3 + $0x1758] sm:$0xf]  ;;  %v14197_v20 = vor.u32 %v17392_v63, %v14196_v60  ;;  %8176 = vmatpush.bf16.msra.mxu1 %v13941_v4 }
 0x651   : > { %v17456_v48 = vld [vmem:[%s18787_s3 + $0x1774] sm:$0xf0] }
 0x652   : > { %v13652_v38 = vld [vmem:[%s18787_s3 + $0x1118] sm:$0xf]  ;;  %v14453_v6 = vor.u32 %v17456_v48, %v14452_v1  ;;  %8189 = vmatpush.bf16.msra.mxu2 %v14197_v20 }
 0x653   : > { %v17256_v9 = vld [vmem:[%s18787_s3 + $0x1134] sm:$0xf0] }
 0x654   : > { %v13908_v0 = vld [vmem:[%s18787_s3 + $0x1318] sm:$0xf]  ;;  %v13653_v12 = vor.u32 %v17256_v9, %v13652_v38  ;;  %8202 = vmatpush.bf16.msra.mxu3 %v14453_v6 }
 0x655   : > { %v17320_v54 = vld [vmem:[%s18787_s3 + $0x1334] sm:$0xf0] }
 0x656   : > { %v14164_v37 = vld [vmem:[%s18787_s3 + $0x1518] sm:$0xf]  ;;  %v13909_v18 = vor.u32 %v17320_v54, %v13908_v0  ;;  %8164 = vmatpush.bf16.msra.mxu0 %v13653_v12 }
 0x657   : > { %v17384_v52 = vld [vmem:[%s18787_s3 + $0x1534] sm:$0xf0] }
 0x658   : > { %v14420_v8 = vld [vmem:[%s18787_s3 + $0x1718] sm:$0xf]  ;;  %v14165_v16 = vor.u32 %v17384_v52, %v14164_v37  ;;  %8177 = vmatpush.bf16.msra.mxu1 %v13909_v18 }
 0x659   : > { %v17448_v57 = vld [vmem:[%s18787_s3 + $0x1734] sm:$0xf0] }
 0x65a   : > { %v13620_v27 = vld [vmem:[%s18787_s3 + $0x10d8] sm:$0xf]  ;;  %v14421_v62 = vor.u32 %v17448_v57, %v14420_v8  ;;  %8190 = vmatpush.bf16.msra.mxu2 %v14165_v16 }
 0x65b   : > { %v17248_v23 = vld [vmem:[%s18787_s3 + $0x10f4] sm:$0xf0] }
 0x65c   : > { %v13876_v51 = vld [vmem:[%s18787_s3 + $0x12d8] sm:$0xf]  ;;  %v13621_v33 = vor.u32 %v17248_v23, %v13620_v27  ;;  %8203 = vmatpush.bf16.msra.mxu3 %v14421_v62  ;;  %v7938_v27 = vpop.f32.mrf.mxu2 }
 0x65d   : > { %v17312_v35 = vld [vmem:[%s18787_s3 + $0x12f4] sm:$0xf0] }
 0x65e   : > { %v14132_v19 = vld [vmem:[%s18787_s3 + $0x14d8] sm:$0xf]  ;;  %v13877_v10 = vor.u32 %v17312_v35, %v13876_v51  ;;  %8165 = vmatpush.bf16.msra.mxu0 %v13621_v33 }
 0x65f   : > { %v17376_v40 = vld [vmem:[%s18787_s3 + $0x14f4] sm:$0xf0] }
 0x660   : > { %v14388_v25 = vld [vmem:[%s18787_s3 + $0x16d8] sm:$0xf]  ;;  %v14133_v41 = vor.u32 %v17376_v40, %v14132_v19  ;;  %8178 = vmatpush.bf16.msra.mxu1 %v13877_v10  ;;  %v7951_v19 = vpop.f32.mrf.mxu3 }
 0x661   : > { %v17440_v13 = vld [vmem:[%s18787_s3 + $0x16f4] sm:$0xf0] }
 0x662   : > { %v13588_v46 = vld [vmem:[%s18787_s3 + $0x1098] sm:$0xf]  ;;  %v14389_v11 = vor.u32 %v17440_v13, %v14388_v25  ;;  %8191 = vmatpush.bf16.msra.mxu2 %v14133_v41 }
 0x663   : > { %v17240_v17 = vld [vmem:[%s18787_s3 + $0x10b4] sm:$0xf0] }
 0x664   : > { %v13844_v50 = vld [vmem:[%s18787_s3 + $0x1298] sm:$0xf]  ;;  %v13589_v53 = vor.u32 %v17240_v17, %v13588_v46  ;;  %8204 = vmatpush.bf16.msra.mxu3 %v14389_v11 }
 0x665   : > { %v17304_v59 = vld [vmem:[%s18787_s3 + $0x12b4] sm:$0xf0] }
 0x666   : > { %v14100_v55 = vld [vmem:[%s18787_s3 + $0x1498] sm:$0xf]  ;;  %v13845_v44 = vor.u32 %v17304_v59, %v13844_v50  ;;  %8166 = vmatpush.bf16.msra.mxu0 %v13589_v53 }
 0x667   : > { %v17368_v56 = vld [vmem:[%s18787_s3 + $0x14b4] sm:$0xf0] }
 0x668   : > { %v14356_v15 = vld [vmem:[%s18787_s3 + $0x1698] sm:$0xf]  ;;  %v14101_v60 = vor.u32 %v17368_v56, %v14100_v55  ;;  %8179 = vmatpush.bf16.msra.mxu1 %v13845_v44 }
 0x669   : > { %v17432_v61 = vld [vmem:[%s18787_s3 + $0x16b4] sm:$0xf0] }
 0x66a   : > { %v13556_v63 = vld [vmem:[%s18787_s3 + $0x1058] sm:$0xf]  ;;  %v14357_v4 = vor.u32 %v17432_v61, %v14356_v15  ;;  %8192 = vmatpush.bf16.msra.mxu2 %v14101_v60 }
 0x66b   : > { %v17232_v1 = vld [vmem:[%s18787_s3 + $0x1074] sm:$0xf0] }
 0x66c   : > { %v13812_v48 = vld [vmem:[%s18787_s3 + $0x1258] sm:$0xf]  ;;  %v13557_v54 = vor.u32 %v17232_v1, %v13556_v63  ;;  %8205 = vmatpush.bf16.msra.mxu3 %v14357_v4 }
 0x66d   : > { %v17296_v20 = vld [vmem:[%s18787_s3 + $0x1274] sm:$0xf0] }
 0x66e   : > { %v14068_v38 = vld [vmem:[%s18787_s3 + $0x1458] sm:$0xf]  ;;  %v13813_v8 = vor.u32 %v17296_v20, %v13812_v48  ;;  %8167 = vmatpush.bf16.msra.mxu0 %v13557_v54 }
 0x66f   : > { %v17360_v9 = vld [vmem:[%s18787_s3 + $0x1474] sm:$0xf0] }
 0x670   : > { %v14324_v0 = vld [vmem:[%s18787_s3 + $0x1658] sm:$0xf]  ;;  %v14069_v57 = vor.u32 %v17360_v9, %v14068_v38  ;;  %8180 = vmatpush.bf16.msra.mxu1 %v13813_v8 }
 0x671   : > { %v17424_v6 = vld [vmem:[%s18787_s3 + $0x1674] sm:$0xf0] }
 0x672   : > { %v13524_v37 = vld [vmem:[%s18787_s3 + $0x1018] sm:$0xf]  ;;  %v14325_v23 = vor.u32 %v17424_v6, %v14324_v0  ;;  %8193 = vmatpush.bf16.msra.mxu2 %v14069_v57 }
 0x673   : > { %v17224_v52 = vld [vmem:[%s18787_s3 + $0x1034] sm:$0xf0] }
 0x674   : > { %v13780_v12 = vld [vmem:[%s18787_s3 + $0x1218] sm:$0xf]  ;;  %v13525_v33 = vor.u32 %v17224_v52, %v13524_v37  ;;  %8206 = vmatpush.bf16.msra.mxu3 %v14325_v23 }
 0x675   : > { %v17288_v18 = vld [vmem:[%s18787_s3 + $0x1234] sm:$0xf0] }
 0x676   : > { %v14036_v16 = vld [vmem:[%s18787_s3 + $0x1418] sm:$0xf]  ;;  %v13781_v17 = vor.u32 %v17288_v18, %v13780_v12  ;;  %8168 = vmatpush.bf16.msra.mxu0 %v13525_v33  ;;  %v20881_v33 = vpop.f32.mrf.mxu0 }
 0x677   : > { %v17352_v51 = vld [vmem:[%s18787_s3 + $0x1434] sm:$0xf0] }
 0x678   : > { %v14292_v62 = vld [vmem:[%s18787_s3 + $0x1618] sm:$0xf]  ;;  %v14037_v50 = vor.u32 %v17352_v51, %v14036_v16  ;;  %8181 = vmatpush.bf16.msra.mxu1 %v13781_v17  ;;  %v20885_v17 = vpop.f32.mrf.mxu1 }
 0x679   : > { %v17416_v35 = vld [vmem:[%s18787_s3 + $0x1634] sm:$0xf0]  ;;  %8169 = vmatmul.bf16.vlgmr.msra.gmra.mxu0 %v19054_v26 }
 0x67a   : > { %v14772_v40 = vld [vmem:[%s18787_s3 + $0x19d8] sm:$0xf]  ;;  %v14293_v55 = vor.u32 %v17416_v35, %v14292_v62  ;;  %8194 = vmatpush.bf16.msra.mxu2 %v14037_v50 }
 0x67b   : > { %v17536_v25 = vld [vmem:[%s18787_s3 + $0x19f4] sm:$0xf0]  ;;  %8182 = vmatmul.bf16.vlgmr.msra.gmra.mxu1 %v19061_v31 }
 0x67c   : > { %v15028_v13 = vld [vmem:[%s18787_s3 + $0x1bd8] sm:$0xf]  ;;  %v14773_v56 = vor.u32 %v17536_v25, %v14772_v40  ;;  %8207 = vmatpush.bf16.msra.mxu3 %v14293_v55 }
 0x67d   : > { %v17600_v10 = vld [vmem:[%s18787_s3 + $0x1bf4] sm:$0xf0]  ;;  %8195 = vmatmul.bf16.vlgmr.msra.gmra.mxu2 %v19059_v30 }
 0x67e   : > { %v15284_v41 = vld [vmem:[%s18787_s3 + $0x1dd8] sm:$0xf]  ;;  %v15029_v15 = vor.u32 %v17600_v10, %v15028_v13  ;;  %8213 = vmatpush.bf16.msrb.mxu0 %v14773_v56 }
 0x67f   : > { %v17664_v46 = vld [vmem:[%s18787_s3 + $0x1df4] sm:$0xf0]  ;;  %8208 = vmatmul.bf16.vlgmr.msra.gmra.mxu3 %v19065_v34 }
 0x680   : > { %v15540_v11 = vld [vmem:[%s18787_s3 + $0x1fd8] sm:$0xf]  ;;  %v15285_v61 = vor.u32 %v17664_v46, %v15284_v41  ;;  %8226 = vmatpush.bf16.msrb.mxu1 %v15029_v15 }
 0x681   : > { %v17728_v59 = vld [vmem:[%s18787_s3 + $0x1ff4] sm:$0xf0] }
 0x682   : > { %v14740_v53 = vld [vmem:[%s18787_s3 + $0x1998] sm:$0xf]  ;;  %v15541_v60 = vor.u32 %v17728_v59, %v15540_v11  ;;  %8239 = vmatpush.bf16.msrb.mxu2 %v15285_v61 }
 0x683   : > { %v17528_v49 = vld [vmem:[%s18787_s3 + $0x19b4] sm:$0xf0] }
 0x684   : > { %v14996_v44 = vld [vmem:[%s18787_s3 + $0x1b98] sm:$0xf]  ;;  %v14741_v20 = vor.u32 %v17528_v49, %v14740_v53  ;;  %8252 = vmatpush.bf16.msrb.mxu3 %v15541_v60 }
 0x685   : > { %v17592_v63 = vld [vmem:[%s18787_s3 + $0x1bb4] sm:$0xf0] }
 0x686   : > { %v15252_v1 = vld [vmem:[%s18787_s3 + $0x1d98] sm:$0xf]  ;;  %v14997_v38 = vor.u32 %v17592_v63, %v14996_v44  ;;  %8214 = vmatpush.bf16.msrb.mxu0 %v14741_v20 }
 0x687   : > { %v17656_v48 = vld [vmem:[%s18787_s3 + $0x1db4] sm:$0xf0] }
 0x688   : > { %v15508_v2 = vld [vmem:[%s18787_s3 + $0x1f98] sm:$0xf]  ;;  %v15253_v9 = vor.u32 %v17656_v48, %v15252_v1  ;;  %8227 = vmatpush.bf16.msrb.mxu1 %v14997_v38  ;;  %v7911_v1 = vadd.f32 %v20807_v14, %v20753_v47 }
 0x689   : > { %v17720_v4 = vld [vmem:[%s18787_s3 + $0x1fb4] sm:$0xf0] }
 0x68a   : > { %v14708_v0 = vld [vmem:[%s18787_s3 + $0x1958] sm:$0xf]  ;;  %v15509_v37 = vor.u32 %v17720_v4, %v15508_v2  ;;  %8240 = vmatpush.bf16.msrb.mxu2 %v15253_v9 }
 0x68b   : > { %v17520_v6 = vld [vmem:[%s18787_s3 + $0x1974] sm:$0xf0] }
 0x68c   : > { %v14964_v54 = vld [vmem:[%s18787_s3 + $0x1b58] sm:$0xf]  ;;  %v14709_v16 = vor.u32 %v17520_v6, %v14708_v0  ;;  %8253 = vmatpush.bf16.msrb.mxu3 %v15509_v37  ;;  %v20900_v0 = vpop.f32.mrf.mxu2 }
 0x68d   : > { %v17584_v52 = vld [vmem:[%s18787_s3 + $0x1b74] sm:$0xf0] }
 0x68e   : > { %v15220_v8 = vld [vmem:[%s18787_s3 + $0x1d58] sm:$0xf]  ;;  %v14965_v27 = vor.u32 %v17584_v52, %v14964_v54  ;;  %8215 = vmatpush.bf16.msrb.mxu0 %v14709_v16  ;;  %v20905_v52 = vpop.f32.mrf.mxu3 }
 0x68f   : > { %v17648_v57 = vld [vmem:[%s18787_s3 + $0x1d74] sm:$0xf0] }
 0x690   : > { %v15476_v12 = vld [vmem:[%s18787_s3 + $0x1f58] sm:$0xf]  ;;  %v15221_v23 = vor.u32 %v17648_v57, %v15220_v8  ;;  %8228 = vmatpush.bf16.msrb.mxu1 %v14965_v27  ;;  %v7964_v8 = vpop.f32.mrf.mxu0 }
 0x691   : > { %v17712_v18 = vld [vmem:[%s18787_s3 + $0x1f74] sm:$0xf0] }
 0x692   : > { %v14676_v51 = vld [vmem:[%s18787_s3 + $0x1918] sm:$0xf]  ;;  %v15477_v19 = vor.u32 %v17712_v18, %v15476_v12  ;;  %8241 = vmatpush.bf16.msrb.mxu2 %v15221_v23  ;;  %v7977_v12 = vpop.f32.mrf.mxu1  ;;  %v7924_v18 = vadd.f32 %v20812_v28, %v7911_v1  ;;  %v16828_v1 = vld [vmem:[%s18787_s3 + $0x3dc] sm:$0xf] }
 0x693   : > { %v17512_v62 = vld [vmem:[%s18787_s3 + $0x1934] sm:$0xf0] }
 0x694   : > { %v14932_v35 = vld [vmem:[%s18787_s3 + $0x1b18] sm:$0xf]  ;;  %v14677_v46 = vor.u32 %v17512_v62, %v14676_v51  ;;  %8254 = vmatpush.bf16.msrb.mxu3 %v15477_v19 }
 0x695   : > { %v17576_v40 = vld [vmem:[%s18787_s3 + $0x1b34] sm:$0xf0] }
 0x696   : > { %v15188_v25 = vld [vmem:[%s18787_s3 + $0x1d18] sm:$0xf]  ;;  %v14933_v50 = vor.u32 %v17576_v40, %v14932_v35  ;;  %8216 = vmatpush.bf16.msrb.mxu0 %v14677_v46 }
 0x697   : > { %v17640_v13 = vld [vmem:[%s18787_s3 + $0x1d34] sm:$0xf0] }
 0x698   : > { %v15444_v10 = vld [vmem:[%s18787_s3 + $0x1f18] sm:$0xf]  ;;  %v15189_v11 = vor.u32 %v17640_v13, %v15188_v25  ;;  %8229 = vmatpush.bf16.msrb.mxu1 %v14933_v50  ;;  %v7937_v50 = vadd.f32 %v20822_v58, %v7924_v18  ;;  %v16764_v58 = vld [vmem:[%s18787_s3 + $0x1dc] sm:$0xf] }
 0x699   : > { %v17704_v41 = vld [vmem:[%s18787_s3 + $0x1f34] sm:$0xf0] }
 0x69a   : > { %v14644_v59 = vld [vmem:[%s18787_s3 + $0x18d8] sm:$0xf]  ;;  %v15445_v15 = vor.u32 %v17704_v41, %v15444_v10  ;;  %8242 = vmatpush.bf16.msrb.mxu2 %v15189_v11 }
 0x69b   : > { %v17504_v55 = vld [vmem:[%s18787_s3 + $0x18f4] sm:$0xf0] }
 0x69c   : > { %v14900_v56 = vld [vmem:[%s18787_s3 + $0x1ad8] sm:$0xf]  ;;  %v14645_v63 = vor.u32 %v17504_v55, %v14644_v59  ;;  %8255 = vmatpush.bf16.msrb.mxu3 %v15445_v15 }
 0x69d   : > { %v17568_v61 = vld [vmem:[%s18787_s3 + $0x1af4] sm:$0xf0] }
 0x69e   : > { %v15156_v53 = vld [vmem:[%s18787_s3 + $0x1cd8] sm:$0xf]  ;;  %v14901_v48 = vor.u32 %v17568_v61, %v14900_v56  ;;  %8217 = vmatpush.bf16.msrb.mxu0 %v14645_v63  ;;  %v11702_v63 = vld [vmem:[%s18787_s3 + $0x1f8] sm:$0xf0] }
 0x69f   : > { %v17632_v49 = vld [vmem:[%s18787_s3 + $0x1cf4] sm:$0xf0]  ;;  %v11705_v8 = vor.u32 %v16764_v58, %v11702_v63  ;;  %v11862_v63 = vld [vmem:[%s18787_s3 + $0x338] sm:$0xf0] }
 0x6a0   : > { %v15412_v44 = vld [vmem:[%s18787_s3 + $0x1ed8] sm:$0xf]  ;;  %v15157_v2 = vor.u32 %v17632_v49, %v15156_v53  ;;  %8230 = vmatpush.bf16.msrb.mxu1 %v14901_v48  ;;  %v8003_v48 = vpop.f32.mrf.mxu3 }
 0x6a1   : > { %v17696_v60 = vld [vmem:[%s18787_s3 + $0x1ef4] sm:$0xf0]  ;;  %v12118_v48 = vld [vmem:[%s18787_s3 + $0x538] sm:$0xf0] }
 0x6a2   : > { %v14612_v4 = vld [vmem:[%s18787_s3 + $0x1898] sm:$0xf]  ;;  %v15413_v9 = vor.u32 %v17696_v60, %v15412_v44  ;;  %8243 = vmatpush.bf16.msrb.mxu2 %v15157_v2  ;;  %v7990_v60 = vpop.f32.mrf.mxu2 }
 0x6a3   : > { %v17496_v20 = vld [vmem:[%s18787_s3 + $0x18b4] sm:$0xf0]  ;;  %v16804_v60 = vld [vmem:[%s18787_s3 + $0x31c] sm:$0xf] }
 0x6a4   : > { %v14868_v38 = vld [vmem:[%s18787_s3 + $0x1a98] sm:$0xf]  ;;  %v14613_v57 = vor.u32 %v17496_v20, %v14612_v4  ;;  %8256 = vmatpush.bf16.msrb.mxu3 %v15413_v9  ;;  %v11958_v4 = vld [vmem:[%s18787_s3 + $0x3f8] sm:$0xf0]  ;;  %v7950_v9 = vadd.f32 %v20827_v3, %v7937_v50 }
 0x6a5   : > { %v17560_v6 = vld [vmem:[%s18787_s3 + $0x1ab4] sm:$0xf0]  ;;  %v16892_v20 = vld [vmem:[%s18787_s3 + $0x5dc] sm:$0xf]  ;;  %v11961_v12 = vor.u32 %v16828_v1, %v11958_v4  ;;  %v8014_v4 = vpop.f32.mrf.mxu0 }
 0x6a6   : > { %v15124_v54 = vld [vmem:[%s18787_s3 + $0x1c98] sm:$0xf]  ;;  %v14869_v16 = vor.u32 %v17560_v6, %v14868_v38  ;;  %8218 = vmatpush.bf16.msrb.mxu0 %v14613_v57  ;;  %v12214_v38 = vld [vmem:[%s18787_s3 + $0x5f8] sm:$0xf0]  ;;  %v7963_v57 = vadd.f32 %v20881_v33, %v7950_v9 }
 0x6a7   : > { %v17624_v37 = vld [vmem:[%s18787_s3 + $0x1cb4] sm:$0xf0]  ;;  %v12217_v18 = vor.u32 %v16892_v20, %v12214_v38  ;;  %v11670_v3 = vld [vmem:[%s18787_s3 + $0x1b8] sm:$0xf0] }
 0x6a8   : > { %v15380_v47 = vld [vmem:[%s18787_s3 + $0x1e98] sm:$0xf]  ;;  %v15125_v27 = vor.u32 %v17624_v37, %v15124_v54  ;;  %8231 = vmatpush.bf16.msrb.mxu1 %v14869_v16  ;;  %v16956_v37 = vld [vmem:[%s18787_s3 + $0x7dc] sm:$0xf] }
 0x6a9   : > { %v17688_v14 = vld [vmem:[%s18787_s3 + $0x1eb4] sm:$0xf0]  ;;  %v16756_v16 = vld [vmem:[%s18787_s3 + $0x19c] sm:$0xf] }
 0x6aa   : > { %v14580_v23 = vld [vmem:[%s18787_s3 + $0x1858] sm:$0xf]  ;;  %v15381_v35 = vor.u32 %v17688_v14, %v15380_v47  ;;  %8244 = vmatpush.bf16.msrb.mxu2 %v15125_v27  ;;  %v12470_v47 = vld [vmem:[%s18787_s3 + $0x7f8] sm:$0xf0]  ;;  %v11673_v33 = vor.u32 %v16756_v16, %v11670_v3 }
 0x6ab   : > { %v17488_v51 = vld [vmem:[%s18787_s3 + $0x1874] sm:$0xf0]  ;;  %v16820_v27 = vld [vmem:[%s18787_s3 + $0x39c] sm:$0xf] }
 0x6ac   : > { %v14836_v62 = vld [vmem:[%s18787_s3 + $0x1a58] sm:$0xf]  ;;  %v14581_v10 = vor.u32 %v17488_v51, %v14580_v23  ;;  %8257 = vmatpush.bf16.msrb.mxu3 %v15381_v35  ;;  %v12473_v23 = vor.u32 %v16956_v37, %v12470_v47  ;;  %v11926_v51 = vld [vmem:[%s18787_s3 + $0x3b8] sm:$0xf0]  ;;  %v11865_v37 = vor.u32 %v16804_v60, %v11862_v63 }
 0x6ad   : > { %v17552_v19 = vld [vmem:[%s18787_s3 + $0x1a74] sm:$0xf0]  ;;  %v12182_v35 = vld [vmem:[%s18787_s3 + $0x5b8] sm:$0xf0] }
 0x6ae   : > { %v15092_v40 = vld [vmem:[%s18787_s3 + $0x1c58] sm:$0xf]  ;;  %v14837_v11 = vor.u32 %v17552_v19, %v14836_v62  ;;  %8219 = vmatpush.bf16.msrb.mxu0 %v14581_v10  ;;  %v16884_v62 = vld [vmem:[%s18787_s3 + $0x59c] sm:$0xf] }
 0x6af   : > { %v17616_v25 = vld [vmem:[%s18787_s3 + $0x1c74] sm:$0xf0]  ;;  %v16948_v19 = vld [vmem:[%s18787_s3 + $0x79c] sm:$0xf] }
 0x6b0   : > { %v15348_v13 = vld [vmem:[%s18787_s3 + $0x1e58] sm:$0xf]  ;;  %v15093_v59 = vor.u32 %v17616_v25, %v15092_v40  ;;  %8232 = vmatpush.bf16.msrb.mxu1 %v14837_v11  ;;  %v12438_v40 = vld [vmem:[%s18787_s3 + $0x7b8] sm:$0xf0]  ;;  %v7976_v25 = vadd.f32 %v20885_v17, %v7963_v57 }
 0x6b1   : > { %v17680_v28 = vld [vmem:[%s18787_s3 + $0x1e74] sm:$0xf0]  ;;  %v16748_v10 = vld [vmem:[%s18787_s3 + $0x15c] sm:$0xf]  ;;  %v12441_v50 = vor.u32 %v16948_v19, %v12438_v40 }
 0x6b2   : > { %v14548_v41 = vld [vmem:[%s18787_s3 + $0x1818] sm:$0xf]  ;;  %v15349_v61 = vor.u32 %v17680_v28, %v15348_v13  ;;  %8245 = vmatpush.bf16.msrb.mxu2 %v15093_v59  ;;  %v11929_v13 = vor.u32 %v16820_v27, %v11926_v51  ;;  %v12185_v28 = vor.u32 %v16884_v62, %v12182_v35  ;;  %v11894_v11 = vld [vmem:[%s18787_s3 + $0x378] sm:$0xf0]  ;;  %v7989_v17 = vadd.f32 %v20900_v0, %v7976_v25 }
 0x6b3   : > { %v17480_v46 = vld [vmem:[%s18787_s3 + $0x1834] sm:$0xf0]  ;;  %v16876_v59 = vld [vmem:[%s18787_s3 + $0x55c] sm:$0xf] }
 0x6b4   : > { %v14804_v55 = vld [vmem:[%s18787_s3 + $0x1a18] sm:$0xf]  ;;  %v14549_v2 = vor.u32 %v17480_v46, %v14548_v41  ;;  %8258 = vmatpush.bf16.msrb.mxu3 %v15349_v61  ;;  %v11638_v41 = vld [vmem:[%s18787_s3 + $0x178] sm:$0xf0] }
 0x6b5   : > { %v17544_v56 = vld [vmem:[%s18787_s3 + $0x1a34] sm:$0xf0]  ;;  %v16812_v46 = vld [vmem:[%s18787_s3 + $0x35c] sm:$0xf]  ;;  %v11641_v61 = vor.u32 %v16748_v10, %v11638_v41 }
 0x6b6   : > { %v15060_v15 = vld [vmem:[%s18787_s3 + $0x1c18] sm:$0xf]  ;;  %v14805_v6 = vor.u32 %v17544_v56, %v14804_v55  ;;  %8220 = vmatpush.bf16.msrb.mxu0 %v14549_v2  ;;  %v12150_v55 = vld [vmem:[%s18787_s3 + $0x578] sm:$0xf0]  ;;  %v8002_v2 = vadd.f32 %v20905_v52, %v7989_v17  ;;  %v598_v17 = vld [vmem:[#allocation2 + $0x20] sm:$0xff] }
 0x6b7   : > { %v17608_v53 = vld [vmem:[%s18787_s3 + $0x1c34] sm:$0xf0]  ;;  %v16940_v56 = vld [vmem:[%s18787_s3 + $0x75c] sm:$0xf] }
 0x6b8   : > { %v15316_v49 = vld [vmem:[%s18787_s3 + $0x1e18] sm:$0xf]  ;;  %v15061_v54 = vor.u32 %v17608_v53, %v15060_v15  ;;  %8233 = vmatpush.bf16.msrb.mxu1 %v14805_v6  ;;  %v12406_v15 = vld [vmem:[%s18787_s3 + $0x778] sm:$0xf0]  ;;  %v11897_v53 = vor.u32 %v16812_v46, %v11894_v11  ;;  %v8027_v6 = vpop.f32.mrf.mxu1 }
 0x6b9   : > { %v17672_v44 = vld [vmem:[%s18787_s3 + $0x1e34] sm:$0xf0]  ;;  %8221 = vmatmul.bf16.vlgmr.msrb.gmra.mxu0 %v19132_v24  ;;  %v16740_v0 = vld [vmem:[%s18787_s3 + $0x11c] sm:$0xf]  ;;  %v12409_v58 = vor.u32 %v16940_v56, %v12406_v15 }
 0x6ba   : > { %v15317_v14 = vor.u32 %v17672_v44, %v15316_v49  ;;  %8246 = vmatpush.bf16.msrb.mxu2 %v15061_v54  ;;  %8265 = vmatpush.bf16.msra.mxu0 %v11705_v8  ;;  %v12153_v49 = vor.u32 %v16876_v59, %v12150_v55  ;;  %v11606_v44 = vld [vmem:[%s18787_s3 + $0x138] sm:$0xf0]  ;;  %v8015_v54 = vadd.f32 %v8014_v4, %v8002_v2  ;;  %v8016_v55 = vpop.f32.mrf.mxu0 }
 0x6bb   : > { %8234 = vmatmul.bf16.vlgmr.msrb.gmra.mxu1 %v19139_v32  ;;  %v16868_v1 = vld [vmem:[%s18787_s3 + $0x51c] sm:$0xf]  ;;  %v11609_v9 = vor.u32 %v16740_v0, %v11606_v44 }
 0x6bc   : > { %8259 = vmatpush.bf16.msrb.mxu3 %v15317_v14  ;;  %8278 = vmatpush.bf16.msra.mxu1 %v11961_v12  ;;  %v16932_v20 = vld [vmem:[%s18787_s3 + $0x71c] sm:$0xf]  ;;  %v12121_v47 = vor.u32 %v16868_v1, %v12118_v48  ;;  %v8028_v51 = vadd.f32 %v8027_v6, %v8015_v54 }
 0x6bd   : > { %8247 = vmatmul.bf16.vlgmr.msrb.gmra.mxu2 %v19137_v29  ;;  %v12374_v38 = vld [vmem:[%s18787_s3 + $0x738] sm:$0xf0] }
 0x6be   : > { %8291 = vmatpush.bf16.msra.mxu2 %v12217_v18  ;;  %8266 = vmatpush.bf16.msra.mxu0 %v11673_v33  ;;  %v16732_v14 = vld [vmem:[%s18787_s3 + $0xdc] sm:$0xf]  ;;  %v12377_v57 = vor.u32 %v16932_v20, %v12374_v38 }
 0x6bf   : > { %8260 = vmatmul.bf16.vlgmr.msrb.gmra.mxu3 %v19143_v36  ;;  %v11574_v8 = vld [vmem:[%s18787_s3 + $0xf8] sm:$0xf0] }
 0x6c0   : > { %8304 = vmatpush.bf16.msra.mxu3 %v12473_v23  ;;  %8279 = vmatpush.bf16.msra.mxu1 %v11929_v13  ;;  %v16796_v52 = vld [vmem:[%s18787_s3 + $0x2dc] sm:$0xf]  ;;  %v11577_v23 = vor.u32 %v16732_v14, %v11574_v8  ;;  %v8040_v13 = vpop.f32.mrf.mxu2  ;;  %v8029_v15 = vpop.f32.mrf.mxu1 }
 0x6c1   : > { %v11830_v12 = vld [vmem:[%s18787_s3 + $0x2f8] sm:$0xf0]  ;;  %v8041_v46 = vadd.f32 %v8040_v13, %v8028_v51 }
 0x6c2   : > { %8292 = vmatpush.bf16.msra.mxu2 %v12185_v28  ;;  %8267 = vmatpush.bf16.msra.mxu0 %v11641_v61  ;;  %v16860_v18 = vld [vmem:[%s18787_s3 + $0x4dc] sm:$0xf]  ;;  %v11833_v62 = vor.u32 %v16796_v52, %v11830_v12 }
 0x6c3   : > { %v12086_v16 = vld [vmem:[%s18787_s3 + $0x4f8] sm:$0xf0] }
 0x6c4   : > { %8305 = vmatpush.bf16.msra.mxu3 %v12441_v50  ;;  %8280 = vmatpush.bf16.msra.mxu1 %v11897_v53  ;;  %v16924_v3 = vld [vmem:[%s18787_s3 + $0x6dc] sm:$0xf]  ;;  %v12089_v35 = vor.u32 %v16860_v18, %v12086_v16  ;;  %v8053_v50 = vpop.f32.mrf.mxu3 }
 0x6c5   : > { %v12342_v27 = vld [vmem:[%s18787_s3 + $0x6f8] sm:$0xf0]  ;;  %v8054_v61 = vadd.f32 %v8053_v50, %v8041_v46 }
 0x6c6   : > { %8293 = vmatpush.bf16.msra.mxu2 %v12153_v49  ;;  %8268 = vmatpush.bf16.msra.mxu0 %v11609_v9  ;;  %v16724_v19 = vld [vmem:[%s18787_s3 + $0x9c] sm:$0xf]  ;;  %v12345_v25 = vor.u32 %v16924_v3, %v12342_v27 }
 0x6c7   : > { %v11542_v40 = vld [vmem:[%s18787_s3 + $0xb8] sm:$0xf0]  ;;  %v8478_v2 = vadd.f32 %v8054_v61, %v598_v17 }
 0x6c8   : > { %8306 = vmatpush.bf16.msra.mxu3 %v12409_v58  ;;  %8281 = vmatpush.bf16.msra.mxu1 %v11865_v37  ;;  %v16788_v33 = vld [vmem:[%s18787_s3 + $0x29c] sm:$0xf]  ;;  %v11545_v56 = vor.u32 %v16724_v19, %v11542_v40  ;;  %v8042_v16 = vpop.f32.mrf.mxu2 }
 0x6c9   : > { %v11798_v28 = vld [vmem:[%s18787_s3 + $0x2b8] sm:$0xf0]  ;;  %8486 = vst [vmem:[#allocation2 + $0x20] sm:$0xff] %v8478_v2 }
 0x6ca   : > { %8294 = vmatpush.bf16.msra.mxu2 %v12121_v47  ;;  %v16852_v10 = vld [vmem:[%s18787_s3 + $0x49c] sm:$0xf]  ;;  %8269 = vmatpush.bf16.msra.mxu0 %v11577_v23  ;;  %v11801_v53 = vor.u32 %v16788_v33, %v11798_v28 }
 0x6cb   : > { %v12054_v41 = vld [vmem:[%s18787_s3 + $0x4b8] sm:$0xf0] }
 0x6cc   : > { %8307 = vmatpush.bf16.msra.mxu3 %v12377_v57  ;;  %v16916_v11 = vld [vmem:[%s18787_s3 + $0x69c] sm:$0xf]  ;;  %8282 = vmatpush.bf16.msra.mxu1 %v11833_v62  ;;  %v12057_v49 = vor.u32 %v16852_v10, %v12054_v41  ;;  %v8055_v51 = vpop.f32.mrf.mxu3 }
 0x6cd   : > { %v12310_v59 = vld [vmem:[%s18787_s3 + $0x6b8] sm:$0xf0] }
 0x6ce   : > { %8295 = vmatpush.bf16.msra.mxu2 %v12089_v35  ;;  %v16716_v0 = vld [vmem:[%s18787_s3 + $0x5c] sm:$0xf]  ;;  %v12313_v58 = vor.u32 %v16916_v11, %v12310_v59  ;;  %8270 = vmatpush.bf16.msra.mxu0 %v11545_v56 }
 0x6cf   : > { %v11510_v44 = vld [vmem:[%s18787_s3 + $0x78] sm:$0xf0] }
 0x6d0   : > { %v16780_v60 = vld [vmem:[%s18787_s3 + $0x25c] sm:$0xf]  ;;  %8308 = vmatpush.bf16.msra.mxu3 %v12345_v25  ;;  %v11513_v38 = vor.u32 %v16716_v0, %v11510_v44  ;;  %8283 = vmatpush.bf16.msra.mxu1 %v11801_v53 }
 0x6d1   : > { %v11766_v63 = vld [vmem:[%s18787_s3 + $0x278] sm:$0xf0] }
 0x6d2   : > { %v16844_v1 = vld [vmem:[%s18787_s3 + $0x45c] sm:$0xf]  ;;  %8296 = vmatpush.bf16.msra.mxu2 %v12057_v49  ;;  %v11769_v37 = vor.u32 %v16780_v60, %v11766_v63  ;;  %8271 = vmatpush.bf16.msra.mxu0 %v11513_v38 }
 0x6d3   : > { %v12022_v48 = vld [vmem:[%s18787_s3 + $0x478] sm:$0xf0] }
 0x6d4   : > { %v16908_v4 = vld [vmem:[%s18787_s3 + $0x65c] sm:$0xf]  ;;  %v12025_v47 = vor.u32 %v16844_v1, %v12022_v48  ;;  %8309 = vmatpush.bf16.msra.mxu3 %v12313_v58  ;;  %8284 = vmatpush.bf16.msra.mxu1 %v11769_v37 }
 0x6d5   : > { %v12278_v20 = vld [vmem:[%s18787_s3 + $0x678] sm:$0xf0] }
 0x6d6   : > { %v16708_v9 = vld [vmem:[%s18787_s3 + $0x1c] sm:$0xf]  ;;  %v12281_v52 = vor.u32 %v16908_v4, %v12278_v20  ;;  %8297 = vmatpush.bf16.msra.mxu2 %v12025_v47 }
 0x6d7   : > { %v11478_v6 = vld [vmem:[%s18787_s3 + $0x38] sm:$0xf0] }
 0x6d8   : > { %v16772_v54 = vld [vmem:[%s18787_s3 + $0x21c] sm:$0xf]  ;;  %v11481_v62 = vor.u32 %v16708_v9, %v11478_v6  ;;  %8310 = vmatpush.bf16.msra.mxu3 %v12281_v52 }
 0x6d9   : > { %v11734_v14 = vld [vmem:[%s18787_s3 + $0x238] sm:$0xf0] }
 0x6da   : > { %v16836_v8 = vld [vmem:[%s18787_s3 + $0x41c] sm:$0xf]  ;;  %v11737_v33 = vor.u32 %v16772_v54, %v11734_v14  ;;  %8272 = vmatpush.bf16.msra.mxu0 %v11481_v62  ;;  %v8079_v62 = vpop.f32.mrf.mxu1 }
 0x6db   : > { %v11990_v57 = vld [vmem:[%s18787_s3 + $0x438] sm:$0xf0] }
 0x6dc   : > { %v16900_v12 = vld [vmem:[%s18787_s3 + $0x61c] sm:$0xf]  ;;  %v11993_v25 = vor.u32 %v16836_v8, %v11990_v57  ;;  %8285 = vmatpush.bf16.msra.mxu1 %v11737_v33 }
 0x6dd   : > { %v12246_v18 = vld [vmem:[%s18787_s3 + $0x638] sm:$0xf0]  ;;  %8273 = vmatmul.bf16.vlgmr.msra.gmra.mxu0 %v18924_v21 }
 0x6de   : > { %v17020_v3 = vld [vmem:[%s18787_s3 + $0x9dc] sm:$0xf]  ;;  %v12249_v10 = vor.u32 %v16900_v12, %v12246_v18  ;;  %8298 = vmatpush.bf16.msra.mxu2 %v11993_v25  ;;  %v8066_v18 = vpop.f32.mrf.mxu0 }
 0x6df   : > { %v12726_v27 = vld [vmem:[%s18787_s3 + $0x9f8] sm:$0xf0]  ;;  %8286 = vmatmul.bf16.vlgmr.msra.gmra.mxu1 %v18927_v22  ;;  %v8080_v25 = vadd.f32 %v8079_v62, %v8066_v18 }
 0x6e0   : > { %v17084_v23 = vld [vmem:[%s18787_s3 + $0xbdc] sm:$0xf]  ;;  %v12729_v41 = vor.u32 %v17020_v3, %v12726_v27  ;;  %8311 = vmatpush.bf16.msra.mxu3 %v12249_v10 }
 0x6e1   : > { %v12982_v35 = vld [vmem:[%s18787_s3 + $0xbf8] sm:$0xf0]  ;;  %8299 = vmatmul.bf16.vlgmr.msra.gmra.mxu2 %v18910_v5 }
 0x6e2   : > { %v17148_v19 = vld [vmem:[%s18787_s3 + $0xddc] sm:$0xf]  ;;  %v12985_v46 = vor.u32 %v17084_v23, %v12982_v35  ;;  %8317 = vmatpush.bf16.msrb.mxu0 %v12729_v41 }
 0x6e3   : > { %v13238_v40 = vld [vmem:[%s18787_s3 + $0xdf8] sm:$0xf0]  ;;  %8312 = vmatmul.bf16.vlgmr.msra.gmra.mxu3 %v18913_v7 }
 0x6e4   : > { %v17212_v13 = vld [vmem:[%s18787_s3 + $0xfdc] sm:$0xf]  ;;  %v13241_v50 = vor.u32 %v17148_v19, %v13238_v40  ;;  %8330 = vmatpush.bf16.msrb.mxu1 %v12985_v46 }
 0x6e5   : > { %v13494_v28 = vld [vmem:[%s18787_s3 + $0xff8] sm:$0xf0] }
 0x6e6   : > { %v17012_v11 = vld [vmem:[%s18787_s3 + $0x99c] sm:$0xf]  ;;  %v13497_v17 = vor.u32 %v17212_v13, %v13494_v28  ;;  %8343 = vmatpush.bf16.msrb.mxu2 %v13241_v50 }
 0x6e7   : > { %v12694_v59 = vld [vmem:[%s18787_s3 + $0x9b8] sm:$0xf0] }
 0x6e8   : > { %v17076_v55 = vld [vmem:[%s18787_s3 + $0xb9c] sm:$0xf]  ;;  %v12697_v0 = vor.u32 %v17012_v11, %v12694_v59  ;;  %8356 = vmatpush.bf16.msrb.mxu3 %v13497_v17 }
 0x6e9   : > { %v12950_v56 = vld [vmem:[%s18787_s3 + $0xbb8] sm:$0xf0] }
 0x6ea   : > { %v17140_v15 = vld [vmem:[%s18787_s3 + $0xd9c] sm:$0xf]  ;;  %v12953_v44 = vor.u32 %v17076_v55, %v12950_v56  ;;  %8318 = vmatpush.bf16.msrb.mxu0 %v12697_v0  ;;  %v8092_v55 = vpop.f32.mrf.mxu2 }
 0x6eb   : > { %v13206_v61 = vld [vmem:[%s18787_s3 + $0xdb8] sm:$0xf0] }
 0x6ec   : > { %v17204_v53 = vld [vmem:[%s18787_s3 + $0xf9c] sm:$0xf]  ;;  %v13209_v60 = vor.u32 %v17140_v15, %v13206_v61  ;;  %8331 = vmatpush.bf16.msrb.mxu1 %v12953_v44 }
 0x6ed   : > { %v13462_v49 = vld [vmem:[%s18787_s3 + $0xfb8] sm:$0xf0] }
 0x6ee   : > { %v17004_v58 = vld [vmem:[%s18787_s3 + $0x95c] sm:$0xf]  ;;  %v13465_v48 = vor.u32 %v17204_v53, %v13462_v49  ;;  %8344 = vmatpush.bf16.msrb.mxu2 %v13209_v60  ;;  %v8093_v53 = vadd.f32 %v8092_v55, %v8080_v25  ;;  %v8105_v49 = vpop.f32.mrf.mxu3 }
 0x6ef   : > { %v12662_v63 = vld [vmem:[%s18787_s3 + $0x978] sm:$0xf0] }
 0x6f0   : > { %v17068_v1 = vld [vmem:[%s18787_s3 + $0xb5c] sm:$0xf]  ;;  %v12665_v6 = vor.u32 %v17004_v58, %v12662_v63  ;;  %8357 = vmatpush.bf16.msrb.mxu3 %v13465_v48  ;;  %v21052_v58 = vadd.f32 %v8105_v49, %v8093_v53  ;;  %v8068_v63 = vpop.f32.mrf.mxu0 }
 0x6f1   : > { %v12918_v2 = vld [vmem:[%s18787_s3 + $0xb78] sm:$0xf0] }
 0x6f2   : > { %v17132_v4 = vld [vmem:[%s18787_s3 + $0xd5c] sm:$0xf]  ;;  %v12921_v54 = vor.u32 %v17068_v1, %v12918_v2  ;;  %8319 = vmatpush.bf16.msrb.mxu0 %v12665_v6  ;;  %v8094_v18 = vpop.f32.mrf.mxu2 }
 0x6f3   : > { %v13174_v20 = vld [vmem:[%s18787_s3 + $0xd78] sm:$0xf0] }
 0x6f4   : > { %v17196_v38 = vld [vmem:[%s18787_s3 + $0xf5c] sm:$0xf]  ;;  %v13177_v37 = vor.u32 %v17132_v4, %v13174_v20  ;;  %8332 = vmatpush.bf16.msrb.mxu1 %v12921_v54 }
 0x6f5   : > { %v13430_v9 = vld [vmem:[%s18787_s3 + $0xf78] sm:$0xf0] }
 0x6f6   : > { %v16996_v5 = vld [vmem:[%s18787_s3 + $0x91c] sm:$0xf]  ;;  %v13433_v21 = vor.u32 %v17196_v38, %v13430_v9  ;;  %8345 = vmatpush.bf16.msrb.mxu2 %v13177_v37  ;;  %v8081_v38 = vpop.f32.mrf.mxu1 }
 0x6f7   : > { %v12630_v47 = vld [vmem:[%s18787_s3 + $0x938] sm:$0xf0] }
 0x6f8   : > { %v17060_v14 = vld [vmem:[%s18787_s3 + $0xb1c] sm:$0xf]  ;;  %v12633_v22 = vor.u32 %v16996_v5, %v12630_v47  ;;  %8358 = vmatpush.bf16.msrb.mxu3 %v13433_v21  ;;  %v21106_v18 = vpop.f32.mrf.mxu0 }
 0x6f9   : > { %v12886_v8 = vld [vmem:[%s18787_s3 + $0xb38] sm:$0xf0] }
 0x6fa   : > { %v17124_v7 = vld [vmem:[%s18787_s3 + $0xd1c] sm:$0xf]  ;;  %v12889_v16 = vor.u32 %v17060_v14, %v12886_v8  ;;  %8320 = vmatpush.bf16.msrb.mxu0 %v12633_v22 }
 0x6fb   : > { %v13142_v52 = vld [vmem:[%s18787_s3 + $0xd38] sm:$0xf0] }
 0x6fc   : > { %v17188_v57 = vld [vmem:[%s18787_s3 + $0xf1c] sm:$0xf]  ;;  %v13145_v3 = vor.u32 %v17124_v7, %v13142_v52  ;;  %8333 = vmatpush.bf16.msrb.mxu1 %v12889_v16 }
 0x6fd   : > { %v13398_v12 = vld [vmem:[%s18787_s3 + $0xf38] sm:$0xf0] }
 0x6fe   : > { %v16988_v27 = vld [vmem:[%s18787_s3 + $0x8dc] sm:$0xf]  ;;  %v13401_v35 = vor.u32 %v17188_v57, %v13398_v12  ;;  %8346 = vmatpush.bf16.msrb.mxu2 %v13145_v3 }
 0x6ff   : > { %v12598_v23 = vld [vmem:[%s18787_s3 + $0x8f8] sm:$0xf0] }
 0x700   : > { %v17052_v51 = vld [vmem:[%s18787_s3 + $0xadc] sm:$0xf]  ;;  %v12601_v10 = vor.u32 %v16988_v27, %v12598_v23  ;;  %8359 = vmatpush.bf16.msrb.mxu3 %v13401_v35 }
 0x701   : > { %v12854_v19 = vld [vmem:[%s18787_s3 + $0xaf8] sm:$0xf0] }
 0x702   : > { %v17116_v40 = vld [vmem:[%s18787_s3 + $0xcdc] sm:$0xf]  ;;  %v12857_v41 = vor.u32 %v17052_v51, %v12854_v19  ;;  %8321 = vmatpush.bf16.msrb.mxu0 %v12601_v10  ;;  %v8107_v51 = vpop.f32.mrf.mxu3 }
 0x703   : > { %v13110_v33 = vld [vmem:[%s18787_s3 + $0xcf8] sm:$0xf0] }
 0x704   : > { %v17180_v13 = vld [vmem:[%s18787_s3 + $0xedc] sm:$0xf]  ;;  %v13113_v46 = vor.u32 %v17116_v40, %v13110_v33  ;;  %8334 = vmatpush.bf16.msrb.mxu1 %v12857_v41 }
 0x705   : > { %v13366_v28 = vld [vmem:[%s18787_s3 + $0xef8] sm:$0xf0] }
 0x706   : > { %v16980_v50 = vld [vmem:[%s18787_s3 + $0x89c] sm:$0xf]  ;;  %v13369_v17 = vor.u32 %v17180_v13, %v13366_v28  ;;  %8347 = vmatpush.bf16.msrb.mxu2 %v13113_v46 }
 0x707   : > { %v12566_v11 = vld [vmem:[%s18787_s3 + $0x8b8] sm:$0xf0] }
 0x708   : > { %v17044_v59 = vld [vmem:[%s18787_s3 + $0xa9c] sm:$0xf]  ;;  %v12569_v60 = vor.u32 %v16980_v50, %v12566_v11  ;;  %8360 = vmatpush.bf16.msrb.mxu3 %v13369_v17 }
 0x709   : > { %v12822_v56 = vld [vmem:[%s18787_s3 + $0xab8] sm:$0xf0] }
 0x70a   : > { %v17108_v15 = vld [vmem:[%s18787_s3 + $0xc9c] sm:$0xf]  ;;  %v12825_v1 = vor.u32 %v17044_v59, %v12822_v56  ;;  %8322 = vmatpush.bf16.msrb.mxu0 %v12569_v60 }
 0x70b   : > { %v13078_v61 = vld [vmem:[%s18787_s3 + $0xcb8] sm:$0xf0] }
 0x70c   : > { %v17172_v0 = vld [vmem:[%s18787_s3 + $0xe9c] sm:$0xf]  ;;  %v13081_v48 = vor.u32 %v17108_v15, %v13078_v61  ;;  %8335 = vmatpush.bf16.msrb.mxu1 %v12825_v1 }
 0x70d   : > { %v13334_v44 = vld [vmem:[%s18787_s3 + $0xeb8] sm:$0xf0] }
 0x70e   : > { %v16972_v2 = vld [vmem:[%s18787_s3 + $0x85c] sm:$0xf]  ;;  %v13337_v9 = vor.u32 %v17172_v0, %v13334_v44  ;;  %8348 = vmatpush.bf16.msrb.mxu2 %v13081_v48 }
 0x70f   : > { %v12534_v4 = vld [vmem:[%s18787_s3 + $0x878] sm:$0xf0] }
 0x710   : > { %v17036_v20 = vld [vmem:[%s18787_s3 + $0xa5c] sm:$0xf]  ;;  %v12537_v14 = vor.u32 %v16972_v2, %v12534_v4  ;;  %8361 = vmatpush.bf16.msrb.mxu3 %v13337_v9 }
 0x711   : > { %v12790_v6 = vld [vmem:[%s18787_s3 + $0xa78] sm:$0xf0] }
 0x712   : > { %v17100_v54 = vld [vmem:[%s18787_s3 + $0xc5c] sm:$0xf]  ;;  %v12793_v7 = vor.u32 %v17036_v20, %v12790_v6  ;;  %8323 = vmatpush.bf16.msrb.mxu0 %v12537_v14 }
 0x713   : > { %v13046_v37 = vld [vmem:[%s18787_s3 + $0xc78] sm:$0xf0] }
 0x714   : > { %v17164_v5 = vld [vmem:[%s18787_s3 + $0xe5c] sm:$0xf]  ;;  %v13049_v52 = vor.u32 %v17100_v54, %v13046_v37  ;;  %8336 = vmatpush.bf16.msrb.mxu1 %v12793_v7 }
 0x715   : > { %v13302_v47 = vld [vmem:[%s18787_s3 + $0xe78] sm:$0xf0] }
 0x716   : > { %v16964_v21 = vld [vmem:[%s18787_s3 + $0x81c] sm:$0xf]  ;;  %v13305_v16 = vor.u32 %v17164_v5, %v13302_v47  ;;  %8349 = vmatpush.bf16.msrb.mxu2 %v13049_v52 }
 0x717   : > { %v12502_v8 = vld [vmem:[%s18787_s3 + $0x838] sm:$0xf0] }
 0x718   : > { %v17028_v57 = vld [vmem:[%s18787_s3 + $0xa1c] sm:$0xf]  ;;  %v12505_v40 = vor.u32 %v16964_v21, %v12502_v8  ;;  %8362 = vmatpush.bf16.msrb.mxu3 %v13305_v16 }
 0x719   : > { %v12758_v12 = vld [vmem:[%s18787_s3 + $0xa38] sm:$0xf0] }
 0x71a   : > { %v17092_v22 = vld [vmem:[%s18787_s3 + $0xc1c] sm:$0xf]  ;;  %v12761_v28 = vor.u32 %v17028_v57, %v12758_v12  ;;  %8324 = vmatpush.bf16.msrb.mxu0 %v12505_v40 }
 0x71b   : > { %v13014_v3 = vld [vmem:[%s18787_s3 + $0xc38] sm:$0xf0] }
 0x71c   : > { %v17156_v27 = vld [vmem:[%s18787_s3 + $0xe1c] sm:$0xf]  ;;  %v13017_v10 = vor.u32 %v17092_v22, %v13014_v3  ;;  %8337 = vmatpush.bf16.msrb.mxu1 %v12761_v28 }
 0x71d   : > { %v13270_v23 = vld [vmem:[%s18787_s3 + $0xe38] sm:$0xf0]  ;;  %8325 = vmatmul.bf16.vlgmr.msrb.gmra.mxu0 %v18983_v42 }
 0x71e   : > { %v17276_v62 = vld [vmem:[%s18787_s3 + $0x11dc] sm:$0xf]  ;;  %v13273_v50 = vor.u32 %v17156_v27, %v13270_v23  ;;  %8350 = vmatpush.bf16.msrb.mxu2 %v13017_v10 }
 0x71f   : > { %v13750_v35 = vld [vmem:[%s18787_s3 + $0x11f8] sm:$0xf0]  ;;  %8338 = vmatmul.bf16.vlgmr.msrb.gmra.mxu1 %v18987_v45 }
 0x720   : > { %v17340_v19 = vld [vmem:[%s18787_s3 + $0x13dc] sm:$0xf]  ;;  %v13753_v11 = vor.u32 %v17276_v62, %v13750_v35  ;;  %8363 = vmatpush.bf16.msrb.mxu3 %v13273_v50  ;;  %v21111_v62 = vpop.f32.mrf.mxu1 }
 0x721   : > { %v14006_v33 = vld [vmem:[%s18787_s3 + $0x13f8] sm:$0xf0]  ;;  %8351 = vmatmul.bf16.vlgmr.msrb.gmra.mxu2 %v18979_v39 }
 0x722   : > { %v17404_v25 = vld [vmem:[%s18787_s3 + $0x15dc] sm:$0xf]  ;;  %v14009_v59 = vor.u32 %v17340_v19, %v14006_v33  ;;  %8369 = vmatpush.bf16.msra.mxu0 %v13753_v11 }
 0x723   : > { %v14262_v13 = vld [vmem:[%s18787_s3 + $0x15f8] sm:$0xf0]  ;;  %8364 = vmatmul.bf16.vlgmr.msrb.gmra.mxu3 %v18985_v43 }
 0x724   : > { %v17468_v41 = vld [vmem:[%s18787_s3 + $0x17dc] sm:$0xf]  ;;  %v14265_v55 = vor.u32 %v17404_v25, %v14262_v13  ;;  %8382 = vmatpush.bf16.msra.mxu1 %v14009_v59  ;;  %v21121_v59 = vpop.f32.mrf.mxu2 }
 0x725   : > { %v14518_v46 = vld [vmem:[%s18787_s3 + $0x17f8] sm:$0xf0] }
 0x726   : > { %v17268_v17 = vld [vmem:[%s18787_s3 + $0x119c] sm:$0xf]  ;;  %v14521_v61 = vor.u32 %v17468_v41, %v14518_v46  ;;  %8395 = vmatpush.bf16.msra.mxu2 %v14265_v55 }
 0x727   : > { %v13718_v56 = vld [vmem:[%s18787_s3 + $0x11b8] sm:$0xf0] }
 0x728   : > { %v17332_v15 = vld [vmem:[%s18787_s3 + $0x139c] sm:$0xf]  ;;  %v13721_v63 = vor.u32 %v17268_v17, %v13718_v56  ;;  %8408 = vmatpush.bf16.msra.mxu3 %v14521_v61  ;;  %v21126_v61 = vpop.f32.mrf.mxu3 }
 0x729   : > { %v13974_v53 = vld [vmem:[%s18787_s3 + $0x13b8] sm:$0xf0] }
 0x72a   : > { %v17396_v49 = vld [vmem:[%s18787_s3 + $0x159c] sm:$0xf]  ;;  %v13977_v1 = vor.u32 %v17332_v15, %v13974_v53  ;;  %8370 = vmatpush.bf16.msra.mxu0 %v13721_v63 }
 0x72b   : > { %v14230_v0 = vld [vmem:[%s18787_s3 + $0x15b8] sm:$0xf0] }
 0x72c   : > { %v17460_v44 = vld [vmem:[%s18787_s3 + $0x179c] sm:$0xf]  ;;  %v14233_v48 = vor.u32 %v17396_v49, %v14230_v0  ;;  %8383 = vmatpush.bf16.msra.mxu1 %v13977_v1 }
 0x72d   : > { %v14486_v60 = vld [vmem:[%s18787_s3 + $0x17b8] sm:$0xf0] }
 0x72e   : > { %v17260_v2 = vld [vmem:[%s18787_s3 + $0x115c] sm:$0xf]  ;;  %v14489_v38 = vor.u32 %v17460_v44, %v14486_v60  ;;  %8396 = vmatpush.bf16.msra.mxu2 %v14233_v48  ;;  %v8120_v44 = vpop.f32.mrf.mxu0 }
 0x72f   : > { %v13686_v4 = vld [vmem:[%s18787_s3 + $0x1178] sm:$0xf0] }
 0x730   : > { %v17324_v20 = vld [vmem:[%s18787_s3 + $0x135c] sm:$0xf]  ;;  %v13689_v47 = vor.u32 %v17260_v2, %v13686_v4  ;;  %8409 = vmatpush.bf16.msra.mxu3 %v14489_v38  ;;  %v8133_v4 = vpop.f32.mrf.mxu1 }
 0x731   : > { %v13942_v9 = vld [vmem:[%s18787_s3 + $0x1378] sm:$0xf0] }
 0x732   : > { %v17388_v6 = vld [vmem:[%s18787_s3 + $0x155c] sm:$0xf]  ;;  %v13945_v39 = vor.u32 %v17324_v20, %v13942_v9  ;;  %8371 = vmatpush.bf16.msra.mxu0 %v13689_v47 }
 0x733   : > { %v14198_v54 = vld [vmem:[%s18787_s3 + $0x1578] sm:$0xf0] }
 0x734   : > { %v17452_v37 = vld [vmem:[%s18787_s3 + $0x175c] sm:$0xf]  ;;  %v14201_v14 = vor.u32 %v17388_v6, %v14198_v54  ;;  %8384 = vmatpush.bf16.msra.mxu1 %v13945_v39 }
 0x735   : > { %v14454_v5 = vld [vmem:[%s18787_s3 + $0x1778] sm:$0xf0] }
 0x736   : > { %v17252_v21 = vld [vmem:[%s18787_s3 + $0x111c] sm:$0xf]  ;;  %v14457_v43 = vor.u32 %v17452_v37, %v14454_v5  ;;  %8397 = vmatpush.bf16.msra.mxu2 %v14201_v14 }
 0x737   : > { %v13654_v8 = vld [vmem:[%s18787_s3 + $0x1138] sm:$0xf0] }
 0x738   : > { %v17316_v42 = vld [vmem:[%s18787_s3 + $0x131c] sm:$0xf]  ;;  %v13657_v45 = vor.u32 %v17252_v21, %v13654_v8  ;;  %8410 = vmatpush.bf16.msra.mxu3 %v14457_v43 }
 0x739   : > { %v13910_v7 = vld [vmem:[%s18787_s3 + $0x1338] sm:$0xf0] }
 0x73a   : > { %v17380_v52 = vld [vmem:[%s18787_s3 + $0x151c] sm:$0xf]  ;;  %v13913_v16 = vor.u32 %v17316_v42, %v13910_v7  ;;  %8372 = vmatpush.bf16.msra.mxu0 %v13657_v45  ;;  %v8146_v7 = vpop.f32.mrf.mxu2  ;;  %v8159_v45 = vpop.f32.mrf.mxu3 }
 0x73b   : > { %v14166_v57 = vld [vmem:[%s18787_s3 + $0x1538] sm:$0xf0] }
 0x73c   : > { %v17444_v12 = vld [vmem:[%s18787_s3 + $0x171c] sm:$0xf]  ;;  %v14169_v3 = vor.u32 %v17380_v52, %v14166_v57  ;;  %8385 = vmatpush.bf16.msra.mxu1 %v13913_v16 }
 0x73d   : > { %v14422_v22 = vld [vmem:[%s18787_s3 + $0x1738] sm:$0xf0] }
 0x73e   : > { %v17244_v27 = vld [vmem:[%s18787_s3 + $0x10dc] sm:$0xf]  ;;  %v14425_v35 = vor.u32 %v17444_v12, %v14422_v22  ;;  %8398 = vmatpush.bf16.msra.mxu2 %v14169_v3 }
 0x73f   : > { %v13622_v23 = vld [vmem:[%s18787_s3 + $0x10f8] sm:$0xf0] }
 0x740   : > { %v17308_v51 = vld [vmem:[%s18787_s3 + $0x12dc] sm:$0xf]  ;;  %v13625_v28 = vor.u32 %v17244_v27, %v13622_v23  ;;  %8411 = vmatpush.bf16.msra.mxu3 %v14425_v35 }
 0x741   : > { %v13878_v19 = vld [vmem:[%s18787_s3 + $0x12f8] sm:$0xf0] }
 0x742   : > { %v17372_v40 = vld [vmem:[%s18787_s3 + $0x14dc] sm:$0xf]  ;;  %v13881_v10 = vor.u32 %v17308_v51, %v13878_v19  ;;  %8373 = vmatpush.bf16.msra.mxu0 %v13625_v28 }
 0x743   : > { %v14134_v33 = vld [vmem:[%s18787_s3 + $0x14f8] sm:$0xf0] }
 0x744   : > { %v17436_v25 = vld [vmem:[%s18787_s3 + $0x16dc] sm:$0xf]  ;;  %v14137_v41 = vor.u32 %v17372_v40, %v14134_v33  ;;  %8386 = vmatpush.bf16.msra.mxu1 %v13881_v10 }
 0x745   : > { %v14390_v13 = vld [vmem:[%s18787_s3 + $0x16f8] sm:$0xf0] }
 0x746   : > { %v17236_v46 = vld [vmem:[%s18787_s3 + $0x109c] sm:$0xf]  ;;  %v14393_v55 = vor.u32 %v17436_v25, %v14390_v13  ;;  %8399 = vmatpush.bf16.msra.mxu2 %v14137_v41 }
 0x747   : > { %v13590_v50 = vld [vmem:[%s18787_s3 + $0x10b8] sm:$0xf0] }
 0x748   : > { %v17300_v11 = vld [vmem:[%s18787_s3 + $0x129c] sm:$0xf]  ;;  %v13593_v0 = vor.u32 %v17236_v46, %v13590_v50  ;;  %8412 = vmatpush.bf16.msra.mxu3 %v14393_v55 }
 0x749   : > { %v13846_v17 = vld [vmem:[%s18787_s3 + $0x12b8] sm:$0xf0] }
 0x74a   : > { %v17364_v56 = vld [vmem:[%s18787_s3 + $0x149c] sm:$0xf]  ;;  %v13849_v60 = vor.u32 %v17300_v11, %v13846_v17  ;;  %8374 = vmatpush.bf16.msra.mxu0 %v13593_v0 }
 0x74b   : > { %v14102_v15 = vld [vmem:[%s18787_s3 + $0x14b8] sm:$0xf0] }
 0x74c   : > { %v17428_v53 = vld [vmem:[%s18787_s3 + $0x169c] sm:$0xf]  ;;  %v14105_v63 = vor.u32 %v17364_v56, %v14102_v15  ;;  %8387 = vmatpush.bf16.msra.mxu1 %v13849_v60 }
 0x74d   : > { %v14358_v49 = vld [vmem:[%s18787_s3 + $0x16b8] sm:$0xf0] }
 0x74e   : > { %v17228_v1 = vld [vmem:[%s18787_s3 + $0x105c] sm:$0xf]  ;;  %v14361_v20 = vor.u32 %v17428_v53, %v14358_v49  ;;  %8400 = vmatpush.bf16.msra.mxu2 %v14105_v63 }
 0x74f   : > { %v13558_v48 = vld [vmem:[%s18787_s3 + $0x1078] sm:$0xf0] }
 0x750   : > { %v17292_v2 = vld [vmem:[%s18787_s3 + $0x125c] sm:$0xf]  ;;  %v13561_v5 = vor.u32 %v17228_v1, %v13558_v48  ;;  %8413 = vmatpush.bf16.msra.mxu3 %v14361_v20 }
 0x751   : > { %v13814_v38 = vld [vmem:[%s18787_s3 + $0x1278] sm:$0xf0] }
 0x752   : > { %v17356_v9 = vld [vmem:[%s18787_s3 + $0x145c] sm:$0xf]  ;;  %v13817_v14 = vor.u32 %v17292_v2, %v13814_v38  ;;  %8375 = vmatpush.bf16.msra.mxu0 %v13561_v5 }
 0x753   : > { %v14070_v6 = vld [vmem:[%s18787_s3 + $0x1478] sm:$0xf0] }
 0x754   : > { %v17420_v54 = vld [vmem:[%s18787_s3 + $0x165c] sm:$0xf]  ;;  %v14073_v21 = vor.u32 %v17356_v9, %v14070_v6  ;;  %8388 = vmatpush.bf16.msra.mxu1 %v13817_v14 }
 0x755   : > { %v14326_v37 = vld [vmem:[%s18787_s3 + $0x1678] sm:$0xf0] }
 0x756   : > { %v17220_v47 = vld [vmem:[%s18787_s3 + $0x101c] sm:$0xf]  ;;  %v14329_v52 = vor.u32 %v17420_v54, %v14326_v37  ;;  %8401 = vmatpush.bf16.msra.mxu2 %v14073_v21 }
 0x757   : > { %v13526_v39 = vld [vmem:[%s18787_s3 + $0x1038] sm:$0xf0] }
 0x758   : > { %v17284_v8 = vld [vmem:[%s18787_s3 + $0x121c] sm:$0xf]  ;;  %v13529_v23 = vor.u32 %v17220_v47, %v13526_v39  ;;  %8414 = vmatpush.bf16.msra.mxu3 %v14329_v52  ;;  %v21184_v52 = vpop.f32.mrf.mxu1 }
 0x759   : > { %v13782_v42 = vld [vmem:[%s18787_s3 + $0x1238] sm:$0xf0] }
 0x75a   : > { %v17348_v43 = vld [vmem:[%s18787_s3 + $0x141c] sm:$0xf]  ;;  %v13785_v40 = vor.u32 %v17284_v8, %v13782_v42  ;;  %8376 = vmatpush.bf16.msra.mxu0 %v13529_v23 }
 0x75b   : > { %v14038_v57 = vld [vmem:[%s18787_s3 + $0x1438] sm:$0xf0] }
 0x75c   : > { %v17412_v12 = vld [vmem:[%s18787_s3 + $0x161c] sm:$0xf]  ;;  %v14041_v33 = vor.u32 %v17348_v43, %v14038_v57  ;;  %8389 = vmatpush.bf16.msra.mxu1 %v13785_v40 }
 0x75d   : > { %v14294_v22 = vld [vmem:[%s18787_s3 + $0x1638] sm:$0xf0]  ;;  %8377 = vmatmul.bf16.vlgmr.msra.gmra.mxu0 %v19054_v26 }
 0x75e   : > { %v17532_v16 = vld [vmem:[%s18787_s3 + $0x19dc] sm:$0xf]  ;;  %v14297_v28 = vor.u32 %v17412_v12, %v14294_v22  ;;  %8402 = vmatpush.bf16.msra.mxu2 %v14041_v33  ;;  %v8119_v33 = vadd.f32 %v21106_v18, %v21052_v58 }
 0x75f   : > { %v14774_v3 = vld [vmem:[%s18787_s3 + $0x19f8] sm:$0xf0]  ;;  %8390 = vmatmul.bf16.vlgmr.msra.gmra.mxu1 %v19061_v31 }
 0x760   : > { %v17596_v27 = vld [vmem:[%s18787_s3 + $0x1bdc] sm:$0xf]  ;;  %v14777_v10 = vor.u32 %v17532_v16, %v14774_v3  ;;  %8415 = vmatpush.bf16.msra.mxu3 %v14297_v28 }
 0x761   : > { %v15030_v51 = vld [vmem:[%s18787_s3 + $0x1bf8] sm:$0xf0]  ;;  %8403 = vmatmul.bf16.vlgmr.msra.gmra.mxu2 %v19059_v30 }
 0x762   : > { %v17660_v35 = vld [vmem:[%s18787_s3 + $0x1ddc] sm:$0xf]  ;;  %v15033_v41 = vor.u32 %v17596_v27, %v15030_v51  ;;  %8421 = vmatpush.bf16.msrb.mxu0 %v14777_v10 }
 0x763   : > { %v15286_v19 = vld [vmem:[%s18787_s3 + $0x1df8] sm:$0xf0]  ;;  %8416 = vmatmul.bf16.vlgmr.msra.gmra.mxu3 %v19065_v34  ;;  %v21180_v34 = vpop.f32.mrf.mxu0 }
 0x764   : > { %v17724_v25 = vld [vmem:[%s18787_s3 + $0x1fdc] sm:$0xf]  ;;  %v15289_v46 = vor.u32 %v17660_v35, %v15286_v19  ;;  %8434 = vmatpush.bf16.msrb.mxu1 %v15033_v41 }
 0x765   : > { %v15542_v13 = vld [vmem:[%s18787_s3 + $0x1ff8] sm:$0xf0] }
 0x766   : > { %v17524_v50 = vld [vmem:[%s18787_s3 + $0x199c] sm:$0xf]  ;;  %v15545_v17 = vor.u32 %v17724_v25, %v15542_v13  ;;  %8447 = vmatpush.bf16.msrb.mxu2 %v15289_v46 }
 0x767   : > { %v14742_v11 = vld [vmem:[%s18787_s3 + $0x19b8] sm:$0xf0] }
 0x768   : > { %v17588_v55 = vld [vmem:[%s18787_s3 + $0x1b9c] sm:$0xf]  ;;  %v14745_v44 = vor.u32 %v17524_v50, %v14742_v11  ;;  %8460 = vmatpush.bf16.msrb.mxu3 %v15545_v17  ;;  %v21199_v50 = vpop.f32.mrf.mxu2 }
 0x769   : > { %v14998_v56 = vld [vmem:[%s18787_s3 + $0x1bb8] sm:$0xf0] }
 0x76a   : > { %v17652_v15 = vld [vmem:[%s18787_s3 + $0x1d9c] sm:$0xf]  ;;  %v15001_v60 = vor.u32 %v17588_v55, %v14998_v56  ;;  %8422 = vmatpush.bf16.msrb.mxu0 %v14745_v44  ;;  %v8209_v56 = vpop.f32.mrf.mxu3 }
 0x76b   : > { %v15254_v53 = vld [vmem:[%s18787_s3 + $0x1db8] sm:$0xf0] }
 0x76c   : > { %v17716_v49 = vld [vmem:[%s18787_s3 + $0x1f9c] sm:$0xf]  ;;  %v15257_v63 = vor.u32 %v17652_v15, %v15254_v53  ;;  %8435 = vmatpush.bf16.msrb.mxu1 %v15001_v60  ;;  %v8172_v15 = vpop.f32.mrf.mxu0 }
 0x76d   : > { %v15510_v0 = vld [vmem:[%s18787_s3 + $0x1fb8] sm:$0xf0] }
 0x76e   : > { %v17516_v1 = vld [vmem:[%s18787_s3 + $0x195c] sm:$0xf]  ;;  %v15513_v4 = vor.u32 %v17716_v49, %v15510_v0  ;;  %8448 = vmatpush.bf16.msrb.mxu2 %v15257_v63  ;;  %v8185_v49 = vpop.f32.mrf.mxu1  ;;  %v8132_v0 = vadd.f32 %v21111_v62, %v8119_v33 }
 0x76f   : > { %v14710_v48 = vld [vmem:[%s18787_s3 + $0x1978] sm:$0xf0] }
 0x770   : > { %v17580_v2 = vld [vmem:[%s18787_s3 + $0x1b5c] sm:$0xf]  ;;  %v14713_v26 = vor.u32 %v17516_v1, %v14710_v48  ;;  %8461 = vmatpush.bf16.msrb.mxu3 %v15513_v4 }
 0x771   : > { %v14966_v20 = vld [vmem:[%s18787_s3 + $0x1b78] sm:$0xf0] }
 0x772   : > { %v17644_v38 = vld [vmem:[%s18787_s3 + $0x1d5c] sm:$0xf]  ;;  %v14969_v37 = vor.u32 %v17580_v2, %v14966_v20  ;;  %8423 = vmatpush.bf16.msrb.mxu0 %v14713_v26 }
 0x773   : > { %v15222_v9 = vld [vmem:[%s18787_s3 + $0x1d78] sm:$0xf0] }
 0x774   : > { %v17708_v6 = vld [vmem:[%s18787_s3 + $0x1f5c] sm:$0xf]  ;;  %v15225_v5 = vor.u32 %v17644_v38, %v15222_v9  ;;  %8436 = vmatpush.bf16.msrb.mxu1 %v14969_v37 }
 0x775   : > { %v15478_v54 = vld [vmem:[%s18787_s3 + $0x1f78] sm:$0xf0] }
 0x776   : > { %v17508_v47 = vld [vmem:[%s18787_s3 + $0x191c] sm:$0xf]  ;;  %v15481_v31 = vor.u32 %v17708_v6, %v15478_v54  ;;  %8449 = vmatpush.bf16.msrb.mxu2 %v15225_v5  ;;  %v8145_v54 = vadd.f32 %v21121_v59, %v8132_v0 }
 0x777   : > { %v14678_v39 = vld [vmem:[%s18787_s3 + $0x1938] sm:$0xf0] }
 0x778   : > { %v17572_v30 = vld [vmem:[%s18787_s3 + $0x1b1c] sm:$0xf]  ;;  %v14681_v7 = vor.u32 %v17508_v47, %v14678_v39  ;;  %8462 = vmatpush.bf16.msrb.mxu3 %v15481_v31  ;;  %v8158_v59 = vadd.f32 %v21126_v61, %v8145_v54 }
 0x779   : > { %v14934_v14 = vld [vmem:[%s18787_s3 + $0x1b38] sm:$0xf0] }
 0x77a   : > { %v17636_v21 = vld [vmem:[%s18787_s3 + $0x1d1c] sm:$0xf]  ;;  %v14937_v57 = vor.u32 %v17572_v30, %v14934_v14  ;;  %8424 = vmatpush.bf16.msrb.mxu0 %v14681_v7  ;;  %v8211_v7 = vpop.f32.mrf.mxu3 }
 0x77b   : > { %v15190_v8 = vld [vmem:[%s18787_s3 + $0x1d38] sm:$0xf0] }
 0x77c   : > { %v17700_v42 = vld [vmem:[%s18787_s3 + $0x1f1c] sm:$0xf]  ;;  %v15193_v12 = vor.u32 %v17636_v21, %v15190_v8  ;;  %8437 = vmatpush.bf16.msrb.mxu1 %v14937_v57  ;;  %v8198_v8 = vpop.f32.mrf.mxu2 }
 0x77d   : > { %v15446_v43 = vld [vmem:[%s18787_s3 + $0x1f38] sm:$0xf0] }
 0x77e   : > { %v17500_v22 = vld [vmem:[%s18787_s3 + $0x18dc] sm:$0xf]  ;;  %v15449_v3 = vor.u32 %v17700_v42, %v15446_v43  ;;  %8450 = vmatpush.bf16.msrb.mxu2 %v15193_v12 }
 0x77f   : > { %v14646_v45 = vld [vmem:[%s18787_s3 + $0x18f8] sm:$0xf0] }
 0x780   : > { %v17564_v16 = vld [vmem:[%s18787_s3 + $0x1adc] sm:$0xf]  ;;  %v14649_v40 = vor.u32 %v17500_v22, %v14646_v45  ;;  %8463 = vmatpush.bf16.msrb.mxu3 %v15449_v3 }
 0x781   : > { %v14902_v27 = vld [vmem:[%s18787_s3 + $0x1af8] sm:$0xf0] }
 0x782   : > { %v17628_v23 = vld [vmem:[%s18787_s3 + $0x1cdc] sm:$0xf]  ;;  %v14905_v25 = vor.u32 %v17564_v16, %v14902_v27  ;;  %8425 = vmatpush.bf16.msrb.mxu0 %v14649_v40  ;;  %v8171_v16 = vadd.f32 %v21180_v34, %v8158_v59  ;;  %v8261_v33 = vpop.f32.mrf.mxu3 }
 0x783   : > { %v15158_v51 = vld [vmem:[%s18787_s3 + $0x1cf8] sm:$0xf0] }
 0x784   : > { %v17692_v35 = vld [vmem:[%s18787_s3 + $0x1edc] sm:$0xf]  ;;  %v15161_v13 = vor.u32 %v17628_v23, %v15158_v51  ;;  %8438 = vmatpush.bf16.msrb.mxu1 %v14905_v25  ;;  %v8184_v3 = vadd.f32 %v21184_v52, %v8171_v16  ;;  %v8222_v23 = vpop.f32.mrf.mxu0  ;;  %v8235_v51 = vpop.f32.mrf.mxu1  ;;  %v599_v52 = vld [vmem:[#allocation2 + $0x28] sm:$0xff] }
 0x785   : > { %v15414_v19 = vld [vmem:[%s18787_s3 + $0x1ef8] sm:$0xf0] }
 0x786   : > { %v17492_v28 = vld [vmem:[%s18787_s3 + $0x189c] sm:$0xf]  ;;  %v15417_v46 = vor.u32 %v17692_v35, %v15414_v19  ;;  %8451 = vmatpush.bf16.msrb.mxu2 %v15161_v13  ;;  %v8197_v61 = vadd.f32 %v21199_v50, %v8184_v3  ;;  %v8248_v19 = vpop.f32.mrf.mxu2 }
 0x787   : > { %v14614_v10 = vld [vmem:[%s18787_s3 + $0x18b8] sm:$0xf0] }
 0x788   : > { %v17556_v41 = vld [vmem:[%s18787_s3 + $0x1a9c] sm:$0xf]  ;;  %v14617_v53 = vor.u32 %v17492_v28, %v14614_v10  ;;  %8464 = vmatpush.bf16.msrb.mxu3 %v15417_v46  ;;  %v8210_v27 = vadd.f32 %v8209_v56, %v8197_v61 }
 0x789   : > { %v14870_v11 = vld [vmem:[%s18787_s3 + $0x1ab8] sm:$0xf0] }
 0x78a   : > { %v17620_v55 = vld [vmem:[%s18787_s3 + $0x1c9c] sm:$0xf]  ;;  %v14873_v44 = vor.u32 %v17556_v41, %v14870_v11  ;;  %8426 = vmatpush.bf16.msrb.mxu0 %v14617_v53  ;;  %v8223_v34 = vadd.f32 %v8222_v23, %v8210_v27 }
 0x78b   : > { %v15126_v17 = vld [vmem:[%s18787_s3 + $0x1cb8] sm:$0xf0] }
 0x78c   : > { %v17684_v58 = vld [vmem:[%s18787_s3 + $0x1e9c] sm:$0xf]  ;;  %v15129_v60 = vor.u32 %v17620_v55, %v15126_v17  ;;  %8439 = vmatpush.bf16.msrb.mxu1 %v14873_v44  ;;  %v8236_v35 = vadd.f32 %v8235_v51, %v8223_v34  ;;  %v8224_v25 = vpop.f32.mrf.mxu0  ;;  %v8237_v13 = vpop.f32.mrf.mxu1 }
 0x78d   : > { %v15382_v18 = vld [vmem:[%s18787_s3 + $0x1eb8] sm:$0xf0] }
 0x78e   : > { %v17484_v63 = vld [vmem:[%s18787_s3 + $0x185c] sm:$0xf]  ;;  %v15385_v2 = vor.u32 %v17684_v58, %v15382_v18  ;;  %8452 = vmatpush.bf16.msrb.mxu2 %v15129_v60  ;;  %v8249_v40 = vadd.f32 %v8248_v19, %v8236_v35 }
 0x78f   : > { %v14582_v1 = vld [vmem:[%s18787_s3 + $0x1878] sm:$0xf0] }
 0x790   : > { %v17548_v48 = vld [vmem:[%s18787_s3 + $0x1a5c] sm:$0xf]  ;;  %v14585_v6 = vor.u32 %v17484_v63, %v14582_v1  ;;  %8465 = vmatpush.bf16.msrb.mxu3 %v15385_v2 }
 0x791   : > { %v14838_v4 = vld [vmem:[%s18787_s3 + $0x1a78] sm:$0xf0] }
 0x792   : > { %v17612_v20 = vld [vmem:[%s18787_s3 + $0x1c5c] sm:$0xf]  ;;  %v14841_v26 = vor.u32 %v17548_v48, %v14838_v4  ;;  %8427 = vmatpush.bf16.msrb.mxu0 %v14585_v6 }
 0x793   : > { %v15094_v38 = vld [vmem:[%s18787_s3 + $0x1c78] sm:$0xf0] }
 0x794   : > { %v17676_v9 = vld [vmem:[%s18787_s3 + $0x1e5c] sm:$0xf]  ;;  %v15097_v37 = vor.u32 %v17612_v20, %v15094_v38  ;;  %8440 = vmatpush.bf16.msrb.mxu1 %v14841_v26  ;;  %v8274_v10 = vpop.f32.mrf.mxu0  ;;  %v8287_v41 = vpop.f32.mrf.mxu1 }
 0x795   : > { %v15350_v62 = vld [vmem:[%s18787_s3 + $0x1e78] sm:$0xf0]  ;;  %v8288_v46 = vadd.f32 %v8287_v41, %v8274_v10 }
 0x796   : > { %v17476_v5 = vld [vmem:[%s18787_s3 + $0x181c] sm:$0xf]  ;;  %v15353_v30 = vor.u32 %v17676_v9, %v15350_v62  ;;  %8453 = vmatpush.bf16.msrb.mxu2 %v15097_v37 }
 0x797   : > { %v14550_v47 = vld [vmem:[%s18787_s3 + $0x1838] sm:$0xf0] }
 0x798   : > { %v17540_v39 = vld [vmem:[%s18787_s3 + $0x1a1c] sm:$0xf]  ;;  %v14553_v57 = vor.u32 %v17476_v5, %v14550_v47  ;;  %8466 = vmatpush.bf16.msrb.mxu3 %v15353_v30 }
 0x799   : > { %v14806_v31 = vld [vmem:[%s18787_s3 + $0x1a38] sm:$0xf0] }
 0x79a   : > { %v17604_v14 = vld [vmem:[%s18787_s3 + $0x1c1c] sm:$0xf]  ;;  %v14809_v12 = vor.u32 %v17540_v39, %v14806_v31  ;;  %8428 = vmatpush.bf16.msrb.mxu0 %v14553_v57 }
 0x79b   : > { %v15062_v21 = vld [vmem:[%s18787_s3 + $0x1c38] sm:$0xf0] }
 0x79c   : > { %v17668_v42 = vld [vmem:[%s18787_s3 + $0x1e1c] sm:$0xf]  ;;  %v15065_v22 = vor.u32 %v17604_v14, %v15062_v21  ;;  %8441 = vmatpush.bf16.msrb.mxu1 %v14809_v12  ;;  %v8276_v17 = vpop.f32.mrf.mxu0  ;;  %v8289_v56 = vpop.f32.mrf.mxu1 }
 0x79d   : > { %v15318_v43 = vld [vmem:[%s18787_s3 + $0x1e38] sm:$0xf0]  ;;  %8429 = vmatmul.bf16.vlgmr.msrb.gmra.mxu0 %v19132_v24  ;;  %v8262_v24 = vadd.f32 %v8261_v33, %v8249_v40 }
 0x79e   : > { %v15321_v45 = vor.u32 %v17668_v42, %v15318_v43  ;;  %8454 = vmatpush.bf16.msrb.mxu2 %v15065_v22  ;;  %v600_v12 = vld [vmem:[#allocation2 + $0x38] sm:$0xff] }
 0x79f   : > { %8442 = vmatmul.bf16.vlgmr.msrb.gmra.mxu1 %v19139_v32  ;;  %v8479_v28 = vadd.f32 %v8262_v24, %v599_v52  ;;  %v8250_v32 = vpop.f32.mrf.mxu2 }
 0x7a0   : > { %8467 = vmatpush.bf16.msrb.mxu3 %v15321_v45 }
 0x7a1   : > { %8455 = vmatmul.bf16.vlgmr.msrb.gmra.mxu2 %v19137_v29  ;;  %8487 = vst [vmem:[#allocation2 + $0x28] sm:$0xff] %v8479_v28  ;;  %v8263_v29 = vpop.f32.mrf.mxu3 }
 0x7a3   : > { %8468 = vmatmul.bf16.vlgmr.msrb.gmra.mxu3 %v19143_v36 }
 0x7a4   : > { %v8326_v15 = vpop.f32.mrf.mxu0  ;;  %v8339_v53 = vpop.f32.mrf.mxu1 }
 0x7a7   : > { %v8300_v36 = vpop.f32.mrf.mxu2 }
 0x7a8   : > { %v8301_v50 = vadd.f32 %v8300_v36, %v8288_v46 }
 0x7a9   : > { %v8313_v11 = vpop.f32.mrf.mxu3 }
 0x7aa   : > { %v8314_v55 = vadd.f32 %v8313_v11, %v8301_v50 }
 0x7ac   : > { %v8328_v44 = vpop.f32.mrf.mxu0  ;;  %v8341_v60 = vpop.f32.mrf.mxu1  ;;  %v8327_v4 = vadd.f32 %v8326_v15, %v8314_v55 }
 0x7ae   : > { %v8340_v62 = vadd.f32 %v8339_v53, %v8327_v4 }
 0x7af   : > { %v8302_v58 = vpop.f32.mrf.mxu2 }
 0x7b1   : > { %v8315_v18 = vpop.f32.mrf.mxu3 }
 0x7b7   : > { %v8352_v49 = vpop.f32.mrf.mxu2 }
 0x7b8   : > { %v8353_v54 = vadd.f32 %v8352_v49, %v8340_v62 }
 0x7b9   : > { %v8365_v0 = vpop.f32.mrf.mxu3 }
 0x7ba   : > { %v8366_v5 = vadd.f32 %v8365_v0, %v8353_v54 }
 0x7bf   : > { %v8354_v63 = vpop.f32.mrf.mxu2 }
 0x7c1   : > { %v8367_v1 = vpop.f32.mrf.mxu3 }
 0x7da   : > { %v8378_v48 = vpop.f32.mrf.mxu0 }
 0x7db   : > { %v8379_v47 = vadd.f32 %v8378_v48, %v8366_v5 }
 0x7dc   : > { %v8391_v2 = vpop.f32.mrf.mxu1 }
 0x7dd   : > { %v8392_v39 = vadd.f32 %v8391_v2, %v8379_v47 }
 0x7e2   : > { %v8380_v9 = vpop.f32.mrf.mxu0 }
 0x7e4   : > { %v8404_v20 = vpop.f32.mrf.mxu2  ;;  %v8393_v6 = vpop.f32.mrf.mxu1 }
 0x7e5   : > { %v8405_v30 = vadd.f32 %v8404_v20, %v8392_v39 }
 0x7e6   : > { %v8417_v38 = vpop.f32.mrf.mxu3 }
 0x7e7   : > { %v8418_v31 = vadd.f32 %v8417_v38, %v8405_v30 }
 0x7ec   : > { %v8406_v26 = vpop.f32.mrf.mxu2 }
 0x7ee   : > { %v8419_v37 = vpop.f32.mrf.mxu3 }
 0x81a   : > { %v8430_v14 = vpop.f32.mrf.mxu0 }
 0x81b   : > { %v8431_v8 = vadd.f32 %v8430_v14, %v8418_v31 }
 0x81c   : > { %v8443_v21 = vpop.f32.mrf.mxu1 }
 0x81d   : > { %v8444_v42 = vadd.f32 %v8443_v21, %v8431_v8 }
 0x822   : > { %v8432_v59 = vpop.f32.mrf.mxu0 }
 0x824   : > { %v8456_v43 = vpop.f32.mrf.mxu2  ;;  %v8445_v22 = vpop.f32.mrf.mxu1 }
 0x825   : > { %v8457_v7 = vadd.f32 %v8456_v43, %v8444_v42 }
 0x826   : > { %v8469_v57 = vpop.f32.mrf.mxu3 }
 0x827   : > { %v8470_v45 = vadd.f32 %v8469_v57, %v8457_v7 }
 0x829   : > { %v8480_v16 = vadd.f32 %v8470_v45, %v600_v12 }
 0x82a   : > { %8492 = sbr.rel (%p15546_p1) target bundleno = 2758 (0xac6), region = 116 }
 0x82b   : > { %8488 = vst [vmem:[#allocation2 + $0x38] sm:$0xff] %v8480_v16 }
 0x82c   : > { %v8458_v3 = vpop.f32.mrf.mxu2 }
 0x82e   : > { %v8471_v61 = vpop.f32.mrf.mxu3 }
 0x82f   : > { %v15661_v27 = vld [vmem:[#allocation11 + $0xe0] sm:$0xf]  ;;  %v17759_v23 = vld [vmem:[#allocation11 + $0xec] sm:$0xf0] }
 0x830   : > { %v15789_v51 = vld [vmem:[#allocation11 + $0x1e0] sm:$0xf]  ;;  %v15662_v34 = vor.u32 %v17759_v23, %v15661_v27  ;;  %v17791_v35 = vld [vmem:[#allocation11 + $0x1ec] sm:$0xf0] }
 0x831   : > { %v15917_v19 = vld [vmem:[#allocation11 + $0x2e0] sm:$0xf]  ;;  %v17823_v40 = vld [vmem:[#allocation11 + $0x2ec] sm:$0xf0]  ;;  %v15790_v33 = vor.u32 %v17791_v35, %v15789_v51 }
 0x832   : > { %v15918_v25 = vor.u32 %v17823_v40, %v15917_v19  ;;  %v16045_v52 = vld [vmem:[#allocation11 + $0x3e0] sm:$0xf]  ;;  %v17855_v13 = vld [vmem:[#allocation11 + $0x3ec] sm:$0xf0]  ;;  %10372 = vmatpush.bf16.msra.mxu0 %v15662_v34 }
 0x833   : > { %v15645_v24 = vld [vmem:[#allocation11 + $0xc0] sm:$0xf]  ;;  %v16046_v28 = vor.u32 %v17855_v13, %v16045_v52  ;;  %v17755_v32 = vld [vmem:[#allocation11 + $0xcc] sm:$0xf0]  ;;  %10385 = vmatpush.bf16.msra.mxu1 %v15790_v33 }
 0x834   : > { %v15773_v29 = vld [vmem:[#allocation11 + $0x1c0] sm:$0xf]  ;;  %v17787_v10 = vld [vmem:[#allocation11 + $0x1cc] sm:$0xf0]  ;;  %10398 = vmatpush.bf16.msra.mxu2 %v15918_v25  ;;  %v15646_v41 = vor.u32 %v17755_v32, %v15645_v24 }
 0x835   : > { %v15774_v46 = vor.u32 %v17787_v10, %v15773_v29  ;;  %v15901_v36 = vld [vmem:[#allocation11 + $0x2c0] sm:$0xf]  ;;  %v17819_v50 = vld [vmem:[#allocation11 + $0x2cc] sm:$0xf0]  ;;  %10411 = vmatpush.bf16.msra.mxu3 %v16046_v28 }
 0x836   : > { %v16029_v11 = vld [vmem:[#allocation11 + $0x3c0] sm:$0xf]  ;;  %v15902_v55 = vor.u32 %v17819_v50, %v15901_v36  ;;  %v17851_v17 = vld [vmem:[#allocation11 + $0x3cc] sm:$0xf0]  ;;  %10373 = vmatpush.bf16.msra.mxu0 %v15646_v41 }
 0x837   : > { %v15629_v56 = vld [vmem:[#allocation11 + $0xa0] sm:$0xf]  ;;  %v17751_v58 = vld [vmem:[#allocation11 + $0xac] sm:$0xf0]  ;;  %v16030_v18 = vor.u32 %v17851_v17, %v16029_v11  ;;  %10386 = vmatpush.bf16.msra.mxu1 %v15774_v46 }
 0x838   : > { %v15757_v15 = vld [vmem:[#allocation11 + $0x1a0] sm:$0xf]  ;;  %v17783_v53 = vld [vmem:[#allocation11 + $0x1ac] sm:$0xf0]  ;;  %v15630_v0 = vor.u32 %v17751_v58, %v15629_v56  ;;  %10399 = vmatpush.bf16.msra.mxu2 %v15902_v55 }
 0x839   : > { %v15885_v49 = vld [vmem:[#allocation11 + $0x2a0] sm:$0xf]  ;;  %v17815_v44 = vld [vmem:[#allocation11 + $0x2ac] sm:$0xf0]  ;;  %v15758_v1 = vor.u32 %v17783_v53, %v15757_v15  ;;  %10412 = vmatpush.bf16.msra.mxu3 %v16030_v18 }
 0x83a   : > { %v16013_v60 = vld [vmem:[#allocation11 + $0x3a0] sm:$0xf]  ;;  %v17847_v63 = vld [vmem:[#allocation11 + $0x3ac] sm:$0xf0]  ;;  %v15886_v48 = vor.u32 %v17815_v44, %v15885_v49  ;;  %10374 = vmatpush.bf16.msra.mxu0 %v15630_v0 }
 0x83b   : > { %v15613_v2 = vld [vmem:[#allocation11 + $0x80] sm:$0xf]  ;;  %v17747_v4 = vld [vmem:[#allocation11 + $0x8c] sm:$0xf0]  ;;  %v16014_v38 = vor.u32 %v17847_v63, %v16013_v60  ;;  %10387 = vmatpush.bf16.msra.mxu1 %v15758_v1 }
 0x83c   : > { %v15741_v20 = vld [vmem:[#allocation11 + $0x180] sm:$0xf]  ;;  %v17779_v9 = vld [vmem:[#allocation11 + $0x18c] sm:$0xf0]  ;;  %v15614_v37 = vor.u32 %v17747_v4, %v15613_v2  ;;  %10400 = vmatpush.bf16.msra.mxu2 %v15886_v48 }
 0x83d   : > { %v15869_v62 = vld [vmem:[#allocation11 + $0x280] sm:$0xf]  ;;  %v17811_v6 = vld [vmem:[#allocation11 + $0x28c] sm:$0xf0]  ;;  %v15742_v5 = vor.u32 %v17779_v9, %v15741_v20  ;;  %10413 = vmatpush.bf16.msra.mxu3 %v16014_v38 }
 0x83e   : > { %v15997_v54 = vld [vmem:[#allocation11 + $0x380] sm:$0xf]  ;;  %v17843_v26 = vld [vmem:[#allocation11 + $0x38c] sm:$0xf0]  ;;  %v15870_v47 = vor.u32 %v17811_v6, %v15869_v62  ;;  %10375 = vmatpush.bf16.msra.mxu0 %v15614_v37 }
 0x83f   : > { %v15597_v39 = vld [vmem:[#allocation11 + $0x60] sm:$0xf]  ;;  %v17743_v30 = vld [vmem:[#allocation11 + $0x6c] sm:$0xf0]  ;;  %v15998_v14 = vor.u32 %v17843_v26, %v15997_v54  ;;  %10388 = vmatpush.bf16.msra.mxu1 %v15742_v5 }
 0x840   : > { %v15725_v31 = vld [vmem:[#allocation11 + $0x160] sm:$0xf]  ;;  %v17775_v21 = vld [vmem:[#allocation11 + $0x16c] sm:$0xf0]  ;;  %v15598_v57 = vor.u32 %v17743_v30, %v15597_v39  ;;  %10401 = vmatpush.bf16.msra.mxu2 %v15870_v47 }
 0x841   : > { %v15853_v8 = vld [vmem:[#allocation11 + $0x260] sm:$0xf]  ;;  %v17807_v42 = vld [vmem:[#allocation11 + $0x26c] sm:$0xf0]  ;;  %v15726_v59 = vor.u32 %v17775_v21, %v15725_v31  ;;  %10414 = vmatpush.bf16.msra.mxu3 %v15998_v14 }
 0x842   : > { %v15981_v43 = vld [vmem:[#allocation11 + $0x360] sm:$0xf]  ;;  %v17839_v7 = vld [vmem:[#allocation11 + $0x36c] sm:$0xf0]  ;;  %v15854_v12 = vor.u32 %v17807_v42, %v15853_v8  ;;  %10376 = vmatpush.bf16.msra.mxu0 %v15598_v57 }
 0x843   : > { %v15581_v22 = vld [vmem:[#allocation11 + $0x40] sm:$0xf]  ;;  %v17739_v45 = vld [vmem:[#allocation11 + $0x4c] sm:$0xf0]  ;;  %v15982_v3 = vor.u32 %v17839_v7, %v15981_v43  ;;  %10389 = vmatpush.bf16.msra.mxu1 %v15726_v59 }
 0x844   : > { %v15709_v16 = vld [vmem:[#allocation11 + $0x140] sm:$0xf]  ;;  %v17771_v61 = vld [vmem:[#allocation11 + $0x14c] sm:$0xf0]  ;;  %v15582_v35 = vor.u32 %v17739_v45, %v15581_v22  ;;  %10402 = vmatpush.bf16.msra.mxu2 %v15854_v12 }
 0x845   : > { %v15837_v27 = vld [vmem:[#allocation11 + $0x240] sm:$0xf]  ;;  %v17803_v23 = vld [vmem:[#allocation11 + $0x24c] sm:$0xf0]  ;;  %v15710_v19 = vor.u32 %v17771_v61, %v15709_v16  ;;  %10415 = vmatpush.bf16.msra.mxu3 %v15982_v3 }
 0x846   : > { %v15965_v51 = vld [vmem:[#allocation11 + $0x340] sm:$0xf]  ;;  %v17835_v34 = vld [vmem:[#allocation11 + $0x34c] sm:$0xf0]  ;;  %v15838_v40 = vor.u32 %v17803_v23, %v15837_v27  ;;  %10377 = vmatpush.bf16.msra.mxu0 %v15582_v35 }
 0x847   : > { %v15565_v33 = vld [vmem:[#allocation11 + $0x20] sm:$0xf]  ;;  %v17735_v25 = vld [vmem:[#allocation11 + $0x2c] sm:$0xf0]  ;;  %v15966_v13 = vor.u32 %v17835_v34, %v15965_v51  ;;  %10390 = vmatpush.bf16.msra.mxu1 %v15710_v19 }
 0x848   : > { %v15693_v52 = vld [vmem:[#allocation11 + $0x120] sm:$0xf]  ;;  %v17767_v24 = vld [vmem:[#allocation11 + $0x12c] sm:$0xf0]  ;;  %v15566_v41 = vor.u32 %v17735_v25, %v15565_v33  ;;  %10403 = vmatpush.bf16.msra.mxu2 %v15838_v40 }
 0x849   : > { %v15821_v28 = vld [vmem:[#allocation11 + $0x220] sm:$0xf]  ;;  %v17799_v32 = vld [vmem:[#allocation11 + $0x22c] sm:$0xf0]  ;;  %v15694_v50 = vor.u32 %v17767_v24, %v15693_v52  ;;  %10416 = vmatpush.bf16.msra.mxu3 %v15966_v13 }
 0x84a   : > { %v15949_v29 = vld [vmem:[#allocation11 + $0x320] sm:$0xf]  ;;  %v17831_v10 = vld [vmem:[#allocation11 + $0x32c] sm:$0xf0]  ;;  %v15822_v11 = vor.u32 %v17799_v32, %v15821_v28  ;;  %10378 = vmatpush.bf16.msra.mxu0 %v15566_v41 }
 0x84b   : > { %v15549_v46 = vld [vmem:[#allocation11] sm:$0xf]  ;;  %v17731_v36 = vld [vmem:[#allocation11 + $0xc] sm:$0xf0]  ;;  %v15950_v58 = vor.u32 %v17831_v10, %v15949_v29  ;;  %10391 = vmatpush.bf16.msra.mxu1 %v15694_v50 }
 0x84c   : > { %v15677_v55 = vld [vmem:[#allocation11 + $0x100] sm:$0xf]  ;;  %v17763_v17 = vld [vmem:[#allocation11 + $0x10c] sm:$0xf0]  ;;  %v15550_v60 = vor.u32 %v17731_v36, %v15549_v46  ;;  %10404 = vmatpush.bf16.msra.mxu2 %v15822_v11 }
 0x84d   : > { %v15805_v56 = vld [vmem:[#allocation11 + $0x200] sm:$0xf]  ;;  %v17795_v18 = vld [vmem:[#allocation11 + $0x20c] sm:$0xf0]  ;;  %v15678_v2 = vor.u32 %v17763_v17, %v15677_v55  ;;  %10417 = vmatpush.bf16.msra.mxu3 %v15950_v58 }
 0x84e   : > { %v15933_v15 = vld [vmem:[#allocation11 + $0x300] sm:$0xf]  ;;  %v17827_v53 = vld [vmem:[#allocation11 + $0x30c] sm:$0xf0]  ;;  %v15806_v4 = vor.u32 %v17795_v18, %v15805_v56  ;;  %10379 = vmatpush.bf16.msra.mxu0 %v15550_v60 }
 0x84f   : > { %v16173_v49 = vld [vmem:[#allocation11 + $0x4e0] sm:$0xf]  ;;  %v17887_v0 = vld [vmem:[#allocation11 + $0x4ec] sm:$0xf0]  ;;  %v15934_v9 = vor.u32 %v17827_v53, %v15933_v15  ;;  %10392 = vmatpush.bf16.msra.mxu1 %v15678_v2 }
 0x850   : > { %v16301_v44 = vld [vmem:[#allocation11 + $0x5e0] sm:$0xf]  ;;  %v17919_v63 = vld [vmem:[#allocation11 + $0x5ec] sm:$0xf0]  ;;  %v16174_v62 = vor.u32 %v17887_v0, %v16173_v49  ;;  %10405 = vmatpush.bf16.msra.mxu2 %v15806_v4 }
 0x851   : > { %v16429_v1 = vld [vmem:[#allocation11 + $0x6e0] sm:$0xf]  ;;  %v17951_v48 = vld [vmem:[#allocation11 + $0x6ec] sm:$0xf0]  ;;  %v16302_v54 = vor.u32 %v17919_v63, %v16301_v44  ;;  %10418 = vmatpush.bf16.msra.mxu3 %v15934_v9 }
 0x852   : > { %v16557_v20 = vld [vmem:[#allocation11 + $0x7e0] sm:$0xf]  ;;  %v17983_v38 = vld [vmem:[#allocation11 + $0x7ec] sm:$0xf0]  ;;  %v16430_v26 = vor.u32 %v17951_v48, %v16429_v1  ;;  %10424 = vmatpush.bf16.msrb.mxu0 %v16174_v62 }
 0x853   : > { %v16157_v6 = vld [vmem:[#allocation11 + $0x4c0] sm:$0xf]  ;;  %v17883_v37 = vld [vmem:[#allocation11 + $0x4cc] sm:$0xf0]  ;;  %v16558_v39 = vor.u32 %v17983_v38, %v16557_v20  ;;  %10437 = vmatpush.bf16.msrb.mxu1 %v16302_v54 }
 0x854   : > { %v16285_v5 = vld [vmem:[#allocation11 + $0x5c0] sm:$0xf]  ;;  %v17915_v47 = vld [vmem:[#allocation11 + $0x5cc] sm:$0xf0]  ;;  %v16158_v43 = vor.u32 %v17883_v37, %v16157_v6  ;;  %10450 = vmatpush.bf16.msrb.mxu2 %v16430_v26 }
 0x855   : > { %v16413_v30 = vld [vmem:[#allocation11 + $0x6c0] sm:$0xf]  ;;  %v17947_v31 = vld [vmem:[#allocation11 + $0x6cc] sm:$0xf0]  ;;  %v16286_v22 = vor.u32 %v17915_v47, %v16285_v5  ;;  %10463 = vmatpush.bf16.msrb.mxu3 %v16558_v39 }
 0x856   : > { %v16541_v14 = vld [vmem:[#allocation11 + $0x7c0] sm:$0xf]  ;;  %v17979_v21 = vld [vmem:[#allocation11 + $0x7cc] sm:$0xf0]  ;;  %v16414_v45 = vor.u32 %v17947_v31, %v16413_v30  ;;  %10425 = vmatpush.bf16.msrb.mxu0 %v16158_v43  ;;  %v8493_v43 = vld [vmem:[#allocation2 + $0x30] sm:$0xff] }
 0x857   : > { %v21233_v8 = vld [vmem:[#allocation11 + $0x4a0] sm:$0xf]  ;;  %v21235_v42 = vld [vmem:[#allocation11 + $0x4ac] sm:$0xf0]  ;;  %v16542_v19 = vor.u32 %v17979_v21, %v16541_v14  ;;  %10438 = vmatpush.bf16.msrb.mxu1 %v16286_v22 }
 0x858   : > { %v21237_v7 = vld [vmem:[#allocation11 + $0x5a0] sm:$0xf]  ;;  %v21239_v57 = vld [vmem:[#allocation11 + $0x5ac] sm:$0xf0]  ;;  %v16142_v17 = vor.u32 %v21235_v42, %v21233_v8  ;;  %10451 = vmatpush.bf16.msrb.mxu2 %v16414_v45  ;;  %v21367_v45 = vld [vmem:[#allocation6] sm:$0xff] }
 0x859   : > { %v21241_v59 = vld [vmem:[#allocation11 + $0x6a0] sm:$0xf]  ;;  %v21243_v12 = vld [vmem:[#allocation11 + $0x6ac] sm:$0xf0]  ;;  %v16270_v15 = vor.u32 %v21239_v57, %v21237_v7  ;;  %10464 = vmatpush.bf16.msrb.mxu3 %v16542_v19 }
 0x85a   : > { %v21245_v16 = vld [vmem:[#allocation11 + $0x7a0] sm:$0xf]  ;;  %v21247_v3 = vld [vmem:[#allocation11 + $0x7ac] sm:$0xf0]  ;;  %v16398_v53 = vor.u32 %v21243_v12, %v21241_v59  ;;  %10426 = vmatpush.bf16.msrb.mxu0 %v16142_v17  ;;  %v8498_v17 = vld [vmem:[#allocation2 + $0x20] sm:$0xff] }
 0x85b   : > { %v21249_v61 = vld [vmem:[#allocation11 + $0x480] sm:$0xf]  ;;  %v21251_v27 = vld [vmem:[#allocation11 + $0x48c] sm:$0xf0]  ;;  %v16526_v60 = vor.u32 %v21247_v3, %v21245_v16  ;;  %10439 = vmatpush.bf16.msrb.mxu1 %v16270_v15  ;;  %v18593_v16 = vmov 8.0   ;;  %v8494_v3 = vld [vmem:[#allocation2] sm:$0xff] }
 0x85c   : > { %v21253_v23 = vld [vmem:[#allocation11 + $0x580] sm:$0xf]  ;;  %v21255_v51 = vld [vmem:[#allocation11 + $0x58c] sm:$0xf0]  ;;  %v16126_v63 = vor.u32 %v21251_v27, %v21249_v61  ;;  %10452 = vmatpush.bf16.msrb.mxu2 %v16398_v53  ;;  %18163 = vrcp.f32 %v18593_v16  ;;  %v8503_v27 = vperm.slane %v21367_v45, 0  ;;  %v8508_v15 = vperm.slane %v21367_v45, 5 }
 0x85d   : > { %v21257_v34 = vld [vmem:[#allocation11 + $0x680] sm:$0xf]  ;;  %v21259_v35 = vld [vmem:[#allocation11 + $0x68c] sm:$0xf0]  ;;  %v16254_v1 = vor.u32 %v21255_v51, %v21253_v23  ;;  %10465 = vmatpush.bf16.msrb.mxu3 %v16526_v60  ;;  %v8504_v23 = vperm.slane %v21367_v45, 1  ;;  %v8505_v51 = vperm.slane %v21367_v45, 2 }
 0x85e   : > { %v21261_v40 = vld [vmem:[#allocation11 + $0x780] sm:$0xf]  ;;  %v21263_v33 = vld [vmem:[#allocation11 + $0x78c] sm:$0xf0]  ;;  %v16382_v48 = vor.u32 %v21259_v35, %v21257_v34  ;;  %v8496_v34 = vld [vmem:[#allocation2 + $0x10] sm:$0xff]  ;;  %v8506_v35 = vperm.slane %v21367_v45, 3  ;;  %10427 = vmatpush.bf16.msrb.mxu0 %v16126_v63  ;;  %v8519_v53 = vadd.f32 %v8503_v27, %v8493_v43  ;;  %v8524_v21 = vadd.f32 %v8508_v15, %v8498_v17 }
 0x85f   : > { %v21265_v25 = vld [vmem:[#allocation11 + $0x460] sm:$0xf]  ;;  %v21267_v52 = vld [vmem:[#allocation11 + $0x46c] sm:$0xf0]  ;;  %v16510_v38 = vor.u32 %v21263_v33, %v21261_v40  ;;  %v8507_v33 = vperm.slane %v21367_v45, 4  ;;  %10440 = vmatpush.bf16.msrb.mxu1 %v16254_v1  ;;  %v8520_v60 = vadd.f32 %v8504_v23, %v8494_v3 }
 0x860   : > { %v21269_v13 = vld [vmem:[#allocation11 + $0x560] sm:$0xf]  ;;  %v21271_v24 = vld [vmem:[#allocation11 + $0x56c] sm:$0xf0]  ;;  %v16110_v9 = vor.u32 %v21267_v52, %v21265_v25  ;;  %v8509_v52 = vperm.slane %v21367_v45, 6  ;;  %10453 = vmatpush.bf16.msrb.mxu2 %v16382_v48  ;;  %v8522_v57 = vadd.f32 %v8506_v35, %v8496_v34  ;;  %v21384_v31 = vmax.f32 %v8519_v53, 0.0 }
 0x861   : > { %v21273_v28 = vld [vmem:[#allocation11 + $0x660] sm:$0xf]  ;;  %v21275_v32 = vld [vmem:[#allocation11 + $0x66c] sm:$0xf0]  ;;  %v16238_v62 = vor.u32 %v21271_v24, %v21269_v13  ;;  %10466 = vmatpush.bf16.msrb.mxu3 %v16510_v38  ;;  %v21386_v30 = vmax.f32 %v8520_v60, 0.0 }
 0x862   : > { %v21277_v29 = vld [vmem:[#allocation11 + $0x760] sm:$0xf]  ;;  %v21279_v10 = vld [vmem:[#allocation11 + $0x76c] sm:$0xf0]  ;;  %v16366_v6 = vor.u32 %v21275_v32, %v21273_v28  ;;  %v18164_v48 = vpop.eup %18163  ;;  %10428 = vmatpush.bf16.msrb.mxu0 %v16110_v9  ;;  %v21390_v38 = vmax.f32 %v8522_v57, 0.0  ;;  %v8535_v9 = vrot.slane %v21384_v31, 4 }
 0x863   : > { %v21281_v41 = vld [vmem:[#allocation11 + $0x440] sm:$0xf]  ;;  %v21283_v46 = vld [vmem:[#allocation11 + $0x44c] sm:$0xf0]  ;;  %v16494_v5 = vor.u32 %v21279_v10, %v21277_v29  ;;  %10441 = vmatpush.bf16.msrb.mxu1 %v16238_v62  ;;  %v8584_v57 = vmul.f32 8.0, %v18164_v48  ;;  %v8541_v23 = vrot.slane %v21386_v30, 4  ;;  %vm8588_vm0 = vweird.f32 %v18164_v48 }
 0x864   : > { %v21285_v36 = vld [vmem:[#allocation11 + $0x540] sm:$0xf]  ;;  %v21287_v50 = vld [vmem:[#allocation11 + $0x54c] sm:$0xf0]  ;;  %v16094_v47 = vor.u32 %v21283_v46, %v21281_v41  ;;  %10454 = vmatpush.bf16.msrb.mxu2 %v16366_v6  ;;  %v8553_v13 = vrot.slane %v21390_v38, 4  ;;  %v8536_v32 = vadd.f32 %v8535_v9, %v21384_v31 }
 0x865   : > { %v21289_v11 = vld [vmem:[#allocation11 + $0x640] sm:$0xf]  ;;  %v21291_v55 = vld [vmem:[#allocation11 + $0x64c] sm:$0xf0]  ;;  %v16222_v39 = vor.u32 %v21287_v50, %v21285_v36  ;;  %10467 = vmatpush.bf16.msrb.mxu3 %v16494_v5  ;;  %v8585_v62 = vsub.f32 1.0, %v8584_v57  ;;  %v8542_v6 = vadd.f32 %v8541_v23, %v21386_v30 }
 0x866   : > { %v21295_v56 = vld [vmem:[#allocation11 + $0x740] sm:$0xf]  ;;  %v21297_v58 = vld [vmem:[#allocation11 + $0x74c] sm:$0xf0]  ;;  %10429 = vmatpush.bf16.msrb.mxu0 %v16094_v47  ;;  %v8554_v10 = vadd.f32 %v8553_v13, %v21390_v38  ;;  %v21888_v34 = vor.u32 %v21291_v55, %v21289_v11  ;;  %v8537_v35 = vrot.slane %v8536_v32, 2 }
 0x867   : > { %v21299_v18 = vld [vmem:[#allocation11 + $0x420] sm:$0xf]  ;;  %v21305_v49 = vld [vmem:[#allocation11 + $0x42c] sm:$0xf0]  ;;  %10442 = vmatpush.bf16.msrb.mxu1 %v16222_v39  ;;  %v8543_v41 = vrot.slane %v8542_v6, 2  ;;  %v21889_v46 = vor.u32 %v21297_v58, %v21295_v56 }
 0x868   : > { %v21307_v0 = vld [vmem:[#allocation11 + $0x520] sm:$0xf]  ;;  %v21309_v44 = vld [vmem:[#allocation11 + $0x52c] sm:$0xf0]  ;;  %10455 = vmatpush.bf16.msrb.mxu2 %v21888_v34  ;;  %v21890_v11 = vor.u32 %v21305_v49, %v21299_v18  ;;  %v8510_v18 = vperm.slane %v21367_v45, 7 }
 0x869   : > { %v21319_v2 = vld [vmem:[#allocation11 + $0x620] sm:$0xf]  ;;  %v21321_v4 = vld [vmem:[#allocation11 + $0x62c] sm:$0xf0]  ;;  %10468 = vmatpush.bf16.msrb.mxu3 %v21889_v46  ;;  %v8544_v36 = vadd.f32 %v8543_v41, %v8542_v6  ;;  %v21891_v56 = vor.u32 %v21309_v44, %v21307_v0 }
 0x86a   : > { %v21323_v20 = vld [vmem:[#allocation11 + $0x720] sm:$0xf]  ;;  %v21333_v54 = vld [vmem:[#allocation11 + $0x72c] sm:$0xf0]  ;;  %10430 = vmatpush.bf16.msrb.mxu0 %v21890_v11  ;;  %v21892_v58 = vor.u32 %v21321_v4, %v21319_v2 }
 0x86b   : > { %v21335_v26 = vld [vmem:[#allocation11 + $0x400] sm:$0xf]  ;;  %v21337_v37 = vld [vmem:[#allocation11 + $0x40c] sm:$0xf0]  ;;  %10443 = vmatpush.bf16.msrb.mxu1 %v21891_v56  ;;  %v8545_v9 = vrot.slane %v8544_v36, 1  ;;  %v21893_v49 = vor.u32 %v21333_v54, %v21323_v20 }
 0x86c   : > { %v21353_v8 = vld [vmem:[#allocation11 + $0x500] sm:$0xf]  ;;  %v21355_v42 = vld [vmem:[#allocation11 + $0x50c] sm:$0xf0]  ;;  %10456 = vmatpush.bf16.msrb.mxu2 %v21892_v58  ;;  %v21894_v4 = vor.u32 %v21337_v37, %v21335_v26 }
 0x86d   : > { %v21363_v12 = vld [vmem:[#allocation11 + $0x600] sm:$0xf]  ;;  %v21365_v22 = vld [vmem:[#allocation11 + $0x60c] sm:$0xf0]  ;;  %10469 = vmatpush.bf16.msrb.mxu3 %v21893_v49  ;;  %v21895_v20 = vor.u32 %v21355_v42, %v21353_v8 }
 0x86e   : > { %v8495_v61 = vld [vmem:[#allocation2 + $0x18] sm:$0xff]  ;;  %v8497_v19 = vld [vmem:[#allocation2 + $0x8] sm:$0xff]  ;;  %v16318_v14 = vor.u32 %v21365_v22, %v21363_v12  ;;  %10431 = vmatpush.bf16.msrb.mxu0 %v21894_v4 }
 0x86f   : > { %v8499_v25 = vld [vmem:[#allocation2 + $0x28] sm:$0xff]  ;;  %v8521_v16 = vadd.f32 %v8505_v51, %v8495_v61  ;;  %v21378_v59 = vld [vmem:[#allocation11 + $0x700] sm:$0xf]  ;;  %v8523_v40 = vadd.f32 %v8507_v33, %v8497_v19  ;;  %v21396_v61 = vmax.f32 %v8524_v21, 0.0  ;;  %v8586_v19 = vmul.f32 %v18164_v48, %v8585_v62  ;;  %10444 = vmatpush.bf16.msrb.mxu1 %v21895_v20 }
 0x870   : > { %v21380_v63 = vld [vmem:[#allocation11 + $0x70c] sm:$0xf0]  ;;  %v8525_v7 = vadd.f32 %v8509_v52, %v8499_v25  ;;  %v8538_v52 = vadd.f32 %v8537_v35, %v8536_v32  ;;  %v8500_v44 = vld [vmem:[#allocation2 + $0x38] sm:$0xff]  ;;  %10457 = vmatpush.bf16.msrb.mxu2 %v16318_v14 }
 0x871   : > { %v21388_v1 = vmax.f32 %v8521_v16, 0.0  ;;  %v21392_v43 = vmax.f32 %v8523_v40, 0.0  ;;  %v16446_v27 = vor.u32 %v21380_v63, %v21378_v59  ;;  %v8555_v40 = vrot.slane %v8554_v10, 2 }
 0x872   : > { %v21394_v3 = vmax.f32 %v8525_v7, 0.0  ;;  %v8565_v7 = vrot.slane %v21396_v61, 4  ;;  %v8587_v17 = vadd.f32 %v18164_v48, %v8586_v19  ;;  %v8539_v60 = vrot.slane %v8538_v52, 1 }
 0x873   : > { %v8547_v21 = vrot.slane %v21388_v1, 4  ;;  %v8559_v24 = vrot.slane %v21392_v43, 4  ;;  %v8556_v39 = vadd.f32 %v8555_v40, %v8554_v10  ;;  %v8526_v6 = vadd.f32 %v8510_v18, %v8500_v44  ;;  %10470 = vmatpush.bf16.msrb.mxu3 %v16446_v27 }
 0x874   : > { %v8571_v28 = vrot.slane %v21394_v3, 4  ;;  %v8566_v50 = vadd.f32 %v8565_v7, %v21396_v61  ;;  %v21445_v16 = vsel %vm8588_vm0, %v18164_v48, %v8587_v17  ;;  %v8540_v13 = vadd.f32 %v8539_v60, %v8538_v52 }
 0x875   : > { %v8548_v29 = vadd.f32 %v8547_v21, %v21388_v1  ;;  %v8560_v5 = vadd.f32 %v8559_v24, %v21392_v43  ;;  %v8557_v23 = vrot.slane %v8556_v39, 1  ;;  %v8546_v24 = vadd.f32 %v8545_v9, %v8544_v36 }
 0x876   : > { %v8572_v51 = vadd.f32 %v8571_v28, %v21394_v3  ;;  %v8567_v2 = vrot.slane %v8566_v50, 2  ;;  %v8590_v54 = vmul.f32 %v21445_v16, %v8540_v13 }
 0x877   : > { %v8549_v47 = vrot.slane %v8548_v29, 2  ;;  %v8561_v33 = vrot.slane %v8560_v5, 2  ;;  %v8558_v28 = vadd.f32 %v8557_v23, %v8556_v39  ;;  %v8591_v62 = vmul.f32 %v21445_v16, %v8546_v24 }
 0x878   : > { %v8573_v25 = vrot.slane %v8572_v51, 2  ;;  %v21470_v12 = vsub.f32 %v21384_v31, %v8590_v54  ;;  %v8568_v22 = vadd.f32 %v8567_v2, %v8566_v50 }
 0x879   : > { %v8550_v55 = vadd.f32 %v8549_v47, %v8548_v29  ;;  %v8562_v15 = vadd.f32 %v8561_v33, %v8560_v5  ;;  %v8593_v37 = vmul.f32 %v21445_v16, %v8558_v28  ;;  %v21473_v14 = vsub.f32 %v21386_v30, %v8591_v62 }
 0x87a   : > { %v8574_v53 = vadd.f32 %v8573_v25, %v8572_v51  ;;  %v8606_v27 = vmul.f32 %v21470_v12, %v21470_v12  ;;  %v21488_v29 = vmax.f32 %v8526_v6, 0.0  ;;  %v8569_v51 = vrot.slane %v8568_v22, 1 }
 0x87b   : > { %v8551_v57 = vrot.slane %v8550_v55, 1  ;;  %v8563_v21 = vrot.slane %v8562_v15, 1  ;;  %v21479_v59 = vsub.f32 %v21390_v38, %v8593_v37  ;;  %v8607_v31 = vmul.f32 %v21473_v14, %v21473_v14 }
 0x87c   : > { %v8575_v0 = vrot.slane %v8574_v53, 1  ;;  %v8614_v10 = vrot.slane %v8606_v27, 4  ;;  %v8577_v47 = vrot.slane %v21488_v29, 4 }
 0x87d   : > { %v8552_v48 = vadd.f32 %v8551_v57, %v8550_v55  ;;  %v8564_v32 = vadd.f32 %v8563_v21, %v8562_v15  ;;  %v8620_v5 = vrot.slane %v8607_v31, 4 }
 0x87e   : > { %v8576_v45 = vadd.f32 %v8575_v0, %v8574_v53  ;;  %v8615_v41 = vadd.f32 %v8614_v10, %v8606_v27  ;;  %v8578_v53 = vadd.f32 %v8577_v47, %v21488_v29  ;;  %v21519_v27 = vld [vmem:[#allocation8] sm:$0xff] }
 0x87f   : > { %v8592_v26 = vmul.f32 %v21445_v16, %v8552_v48  ;;  %v8594_v8 = vmul.f32 %v21445_v16, %v8564_v32  ;;  %v8621_v46 = vadd.f32 %v8620_v5, %v8607_v31  ;;  %v21521_v31 = vld [vmem:[#allocation9] sm:$0xff]  ;;  %v8768_v10 = vperm.slane %v21519_v27, 0 }
 0x880   : > { %v8596_v42 = vmul.f32 %v21445_v16, %v8576_v45  ;;  %v8616_v17 = vrot.slane %v8615_v41, 2  ;;  %v8579_v13 = vrot.slane %v8578_v53, 2  ;;  %v8794_v5 = vperm.slane %v21521_v31, 0 }
 0x881   : > { %v21476_v7 = vsub.f32 %v21388_v1, %v8592_v26  ;;  %v21482_v63 = vsub.f32 %v21392_v43, %v8594_v8  ;;  %v8609_v1 = vmul.f32 %v21479_v59, %v21479_v59  ;;  %v8622_v36 = vrot.slane %v8621_v46, 2 }
 0x882   : > { %v21497_v43 = vsub.f32 %v21394_v3, %v8596_v42  ;;  %v8570_v3 = vadd.f32 %v8569_v51, %v8568_v22  ;;  %v8617_v55 = vadd.f32 %v8616_v17, %v8615_v41  ;;  %v8580_v26 = vadd.f32 %v8579_v13, %v8578_v53 }
 0x883   : > { %v8608_v30 = vmul.f32 %v21476_v7, %v21476_v7  ;;  %v8610_v38 = vmul.f32 %v21482_v63, %v21482_v63  ;;  %v8632_v35 = vrot.slane %v8609_v1, 4  ;;  %v8623_v39 = vadd.f32 %v8622_v36, %v8621_v46 }
 0x884   : > { %v8612_v52 = vmul.f32 %v21497_v43, %v21497_v43  ;;  %v8618_v9 = vrot.slane %v8617_v55, 1  ;;  %v8595_v49 = vmul.f32 %v21445_v16, %v8570_v3  ;;  %v8769_v51 = vperm.slane %v21519_v27, 1 }
 0x885   : > { %v8626_v34 = vrot.slane %v8608_v30, 4  ;;  %v8638_v19 = vrot.slane %v8610_v38, 4  ;;  %v8633_v33 = vadd.f32 %v8632_v35, %v8609_v1  ;;  %v8624_v18 = vrot.slane %v8623_v39, 1  ;;  %v21530_v35 = vld [vmem:[#allocation11 + $0xe4] sm:$0xf] }
 0x886   : > { %v8650_v60 = vrot.slane %v8612_v52, 4  ;;  %v8619_v0 = vadd.f32 %v8618_v9, %v8617_v55  ;;  %v21507_v32 = vsub.f32 %v21396_v61, %v8595_v49  ;;  %v8581_v1 = vrot.slane %v8580_v26, 1 }
 0x887   : > { %v8627_v40 = vadd.f32 %v8626_v34, %v8608_v30  ;;  %v8639_v25 = vadd.f32 %v8638_v19, %v8610_v38  ;;  %v8634_v11 = vrot.slane %v8633_v33, 2  ;;  %v8625_v44 = vadd.f32 %v8624_v18, %v8623_v39  ;;  %v21532_v19 = vld [vmem:[#allocation11 + $0xf0] sm:$0xf0] }
 0x888   : > { %v8651_v4 = vadd.f32 %v8650_v60, %v8612_v52  ;;  %v8662_v48 = vmul.f32 %v8619_v0, %v21445_v16  ;;  %v8611_v61 = vmul.f32 %v21507_v32, %v21507_v32  ;;  %v8795_v47 = vperm.slane %v21521_v31, 1 }
 0x889   : > { %v8628_v50 = vrot.slane %v8627_v40, 2  ;;  %v8640_v15 = vrot.slane %v8639_v25, 2  ;;  %v8635_v58 = vadd.f32 %v8634_v11, %v8633_v33  ;;  %v8663_v28 = vmul.f32 %v8625_v44, %v21445_v16 }
 0x88a   : > { %v8670_v62 = vadd.f32 1e-05, %v8662_v48  ;;  %v8652_v22 = vrot.slane %v8651_v4, 2  ;;  %v8644_v34 = vrot.slane %v8611_v61, 4  ;;  %v8771_v33 = vperm.slane %v21519_v27, 3 }
 0x88b   : > { %v8629_v56 = vadd.f32 %v8628_v50, %v8627_v40  ;;  %v8636_v23 = vrot.slane %v8635_v58, 1  ;;  %v8641_v21 = vadd.f32 %v8640_v15, %v8639_v25  ;;  %v21511_v6 = vadd.f32 1e-05, %v8663_v28 }
 0x88c   : > { %18165 = vrsqrt.f32 %v8670_v62  ;;  %v8653_v38 = vadd.f32 %v8652_v22, %v8651_v4  ;;  %v8770_v40 = vperm.slane %v21519_v27, 2  ;;  %v8582_v25 = vadd.f32 %v8581_v1, %v8580_v26  ;;  %v21580_v1 = vld [vmem:[#allocation11 + $0x1e4] sm:$0xf] }
 0x88d   : > { %v8630_v57 = vrot.slane %v8629_v56, 1  ;;  %v8637_v2 = vadd.f32 %v8636_v23, %v8635_v58  ;;  %v8642_v54 = vrot.slane %v8641_v21, 1  ;;  %18167 = vrsqrt.f32 %v21511_v6 }
 0x88e   : > { %v8796_v36 = vperm.slane %v21521_v31, 2  ;;  %v8654_v3 = vrot.slane %v8653_v38, 1  ;;  %v8797_v55 = vperm.slane %v21521_v31, 3  ;;  %v15666_v39 = vor.u32 %v21530_v35, %v21532_v19 }
 0x88f   : > { %v8631_v24 = vadd.f32 %v8630_v57, %v8629_v56  ;;  %v8665_v20 = vmul.f32 %v8637_v2, %v21445_v16  ;;  %v8643_v42 = vadd.f32 %v8642_v54, %v8641_v21  ;;  %v21545_v15 = vadd.f32 %v8644_v34, %v8611_v61 }
 0x890   : > { %vm8684_vm1 = vweird.f32 %v8670_v62  ;;  %vm8694_vm2 = vweird.f32 %v21511_v6  ;;  %v8597_v18 = vmul.f32 %v21445_v16, %v8582_v25  ;;  %v8655_v23 = vadd.f32 %v8654_v3, %v8653_v38 }
 0x891   : > { %v8664_v45 = vmul.f32 %v8631_v24, %v21445_v16  ;;  %v21515_v8 = vadd.f32 1e-05, %v8665_v20  ;;  %v8666_v30 = vmul.f32 %v8643_v42, %v21445_v16 }
 0x892   : > { %v18166_v46 = vpop.eup %18165  ;;  %v8668_v2 = vmul.f32 %v8655_v23, %v21445_v16 }
 0x893   : > { %v21513_v37 = vadd.f32 1e-05, %v8664_v45  ;;  %v21534_v41 = vadd.f32 1e-05, %v8666_v30  ;;  %v18168_v52 = vpop.eup %18167  ;;  %v8679_v17 = vmul.f32 %v18166_v46, %v8670_v62  ;;  %vm8685_vm4 = vweird.f32 %v18166_v46 }
 0x894   : > { %v8689_v11 = vmul.f32 %v18168_v52, %v21511_v6  ;;  %vm8695_vm5 = vweird.f32 %v18168_v52  ;;  %vm8714_vm6 = vweird.f32 %v21515_v8  ;;  %vm21557_vm8 = vmor %vm8684_vm1, %vm8685_vm4  ;;  %v21569_v42 = vadd.f32 1e-05, %v8668_v2  ;;  %v21582_v6 = vld [vmem:[#allocation11 + $0x1f0] sm:$0xf0]  ;;  %v17753_v2 = vld [vmem:[#allocation11 + $0xc4] sm:$0xf] }
 0x895   : > { %18169 = vrsqrt.f32 %v21513_v37  ;;  %v8680_v56 = vmul.f32 %v18166_v46, %v8679_v17  ;;  %vm8704_vm3 = vweird.f32 %v21513_v37  ;;  %vm21565_vm10 = vmor %vm8694_vm2, %vm8695_vm5  ;;  %v21572_v62 = vsub.f32 %v21488_v29, %v8597_v18 }
 0x896   : > { %18171 = vrsqrt.f32 %v21515_v8  ;;  %v8690_v60 = vmul.f32 %v18168_v52, %v8689_v11  ;;  %vm8724_vm12 = vweird.f32 %v21534_v41  ;;  %v21600_v11 = vld [vmem:[#allocation11 + $0x2e4] sm:$0xf]  ;;  %vm8744_vm0 = vweird.f32 %v21569_v42 }
 0x897   : > { %18173 = vrsqrt.f32 %v21534_v41  ;;  %v8681_v49 = vmul.f32 0.5, %v8680_v56 }
 0x898   : > { %v8691_v21 = vmul.f32 0.5, %v8690_v60  ;;  %18175 = vrsqrt.f32 %v21569_v42  ;;  %v15794_v60 = vor.u32 %v21580_v1, %v21582_v6  ;;  %v17849_v1 = vld [vmem:[#allocation11 + $0x3c4] sm:$0xf] }
 0x899   : > { %v8682_v13 = vsub.f32 1.5, %v8681_v49  ;;  %v17853_v49 = vld [vmem:[#allocation11 + $0x3e4] sm:$0xf] }
 0x89a   : > { %v8692_v48 = vsub.f32 1.5, %v8691_v21 }
 0x89b   : > { %v18170_v50 = vpop.eup %18169  ;;  %v8683_v20 = vmul.f32 %v18166_v46, %v8682_v13 }
 0x89c   : > { %v18172_v53 = vpop.eup %18171  ;;  %v8699_v58 = vmul.f32 %v18170_v50, %v21513_v37  ;;  %vm8705_vm7 = vweird.f32 %v18170_v50  ;;  %v8693_v22 = vmul.f32 %v18168_v52, %v8692_v48  ;;  %v15647_v48 = vld [vmem:[#allocation11 + $0xd0] sm:$0xf0]  ;;  %v17749_v37 = vld [vmem:[#allocation11 + $0xa4] sm:$0xf] }
 0x89d   : > { %v8709_v9 = vmul.f32 %v18172_v53, %v21515_v8  ;;  %v21553_v44 = vpop.eup %18173  ;;  %vm8715_vm9 = vweird.f32 %v18172_v53  ;;  %vm21576_vm11 = vmor %vm8704_vm3, %vm8705_vm7  ;;  %v8687_v29 = vsel %vm21557_vm8, %v18166_v46, %v8683_v20  ;;  %v21602_v46 = vld [vmem:[#allocation11 + $0x2f0] sm:$0xf0] }
 0x89e   : > { %v8700_v57 = vmul.f32 %v18170_v50, %v8699_v58  ;;  %v8719_v45 = vmul.f32 %v21553_v44, %v21534_v41  ;;  %vm21591_vm13 = vmor %vm8714_vm6, %vm8715_vm9  ;;  %vm8725_vm14 = vweird.f32 %v21553_v44  ;;  %v8758_v25 = vmul.f32 %v8687_v29, %v21470_v12  ;;  %v21636_v13 = vpop.eup %18175 }
 0x89f   : > { %v8710_v0 = vmul.f32 %v18172_v53, %v8709_v9  ;;  %v8697_v17 = vsel %vm21565_vm10, %v18168_v52, %v8693_v22  ;;  %v8646_v9 = vrot.slane %v21545_v15, 2  ;;  %v15922_v21 = vor.u32 %v21600_v11, %v21602_v46  ;;  %vm21624_vm15 = vmor %vm8724_vm12, %vm8725_vm14  ;;  %v15903_v22 = vld [vmem:[#allocation11 + $0x2d0] sm:$0xf0] }
 0x8a0   : > { %v8701_v24 = vmul.f32 0.5, %v8700_v57  ;;  %v8720_v38 = vmul.f32 %v21553_v44, %v8719_v45  ;;  %v8759_v8 = vmul.f32 %v8697_v17, %v21473_v14  ;;  %v8784_v12 = vmul.f32 %v8768_v10, %v8758_v25  ;;  %v16047_v57 = vld [vmem:[#allocation11 + $0x3f0] sm:$0xf0]  ;;  %v17781_v17 = vld [vmem:[#allocation11 + $0x1a4] sm:$0xf] }
 0x8a1   : > { %v8711_v28 = vmul.f32 0.5, %v8710_v0  ;;  %v8647_v10 = vadd.f32 %v8646_v9, %v21545_v15  ;;  %v8613_v0 = vmul.f32 %v21572_v62, %v21572_v62  ;;  %v16050_v15 = vor.u32 %v17853_v49, %v16047_v57  ;;  %v15775_v45 = vld [vmem:[#allocation11 + $0x1d0] sm:$0xf0]  ;;  %v17845_v49 = vld [vmem:[#allocation11 + $0x3a4] sm:$0xf] }
 0x8a2   : > { %v8702_v26 = vsub.f32 1.5, %v8701_v24  ;;  %v8721_v56 = vmul.f32 0.5, %v8720_v38  ;;  %v8785_v14 = vmul.f32 %v8769_v51, %v8759_v8  ;;  %v15631_v25 = vld [vmem:[#allocation11 + $0xb0] sm:$0xf0]  ;;  %vm8745_vm1 = vweird.f32 %v21636_v13 }
 0x8a3   : > { %v8712_v30 = vsub.f32 1.5, %v8711_v28  ;;  %v8648_v4 = vrot.slane %v8647_v10, 1  ;;  %v17785_v28 = vld [vmem:[#allocation11 + $0x1c4] sm:$0xf]  ;;  %v8656_v29 = vrot.slane %v8613_v0, 4  ;;  %v8798_v8 = vperm.slane %v21521_v31, 4  ;;  %vm21679_vm2 = vmor %vm8744_vm0, %vm8745_vm1 }
 0x8a4   : > { %v8703_v34 = vmul.f32 %v18170_v50, %v8702_v26  ;;  %v8722_v23 = vsub.f32 1.5, %v8721_v56  ;;  %v8811_v41 = vadd.f32 %v8795_v47, %v8785_v14  ;;  %v8739_v47 = vmul.f32 %v21636_v13, %v21569_v42  ;;  %v17817_v26 = vld [vmem:[#allocation11 + $0x2c4] sm:$0xf]  ;;  %v16015_v57 = vld [vmem:[#allocation11 + $0x3b0] sm:$0xf0] }
 0x8a5   : > { %v8713_v3 = vmul.f32 %v18172_v53, %v8712_v30  ;;  %v8649_v38 = vadd.f32 %v8648_v4, %v8647_v10  ;;  %v8657_v46 = vadd.f32 %v8656_v29, %v8613_v0  ;;  %v15906_v35 = vor.u32 %v17817_v26, %v15903_v22  ;;  %v17813_v56 = vld [vmem:[#allocation11 + $0x2a4] sm:$0xf]  ;;  %v15599_v26 = vld [vmem:[#allocation11 + $0x70] sm:$0xf0] }
 0x8a6   : > { %v8707_v58 = vsel %vm21576_vm11, %v18170_v50, %v8703_v34  ;;  %v21651_v54 = vpack.c.bf16 %v8811_v41, %v8811_v41  ;;  %v8740_v6 = vmul.f32 %v21636_v13, %v8739_v47  ;;  %v8774_v0 = vperm.slane %v21519_v27, 6  ;;  %v17809_v41 = vld [vmem:[#allocation11 + $0x284] sm:$0xf] }
 0x8a7   : > { %v8760_v52 = vmul.f32 %v8707_v58, %v21476_v7  ;;  %v8717_v18 = vsel %vm21591_vm13, %v18172_v53, %v8713_v3  ;;  %v8810_v53 = vadd.f32 %v8794_v5, %v8784_v12  ;;  %v8667_v11 = vmul.f32 %v8649_v38, %v21445_v16  ;;  %v15887_v58 = vld [vmem:[#allocation11 + $0x2b0] sm:$0xf0]  ;;  %v17805_v29 = vld [vmem:[#allocation11 + $0x264] sm:$0xf] }
 0x8a8   : > { %v8761_v50 = vmul.f32 %v8717_v18, %v21479_v59  ;;  %v8723_v59 = vmul.f32 %v21553_v44, %v8722_v23  ;;  %10393 = vmatmul.bf16.vlgmr.msra.gmra.mxu1 %v21651_v54  ;;  %v8741_v3 = vmul.f32 0.5, %v8740_v6  ;;  %v15634_v18 = vor.u32 %v17749_v37, %v15631_v25  ;;  %v17837_v25 = vld [vmem:[#allocation11 + $0x364] sm:$0xf] }
 0x8a9   : > { %v8786_v51 = vmul.f32 %v8770_v40, %v8760_v52  ;;  %v21642_v5 = vpack.c.bf16 %v8810_v53, %v8810_v53  ;;  %10489 = vmatpush.bf16.msra.mxu1 %v15794_v60  ;;  %v21673_v12 = vadd.f32 1e-05, %v8667_v11  ;;  %v8658_v52 = vrot.slane %v8657_v46, 2  ;;  %v17833_v23 = vld [vmem:[#allocation11 + $0x344] sm:$0xf] }
 0x8aa   : > { %v8787_v24 = vmul.f32 %v8771_v33, %v8761_v50  ;;  %v8727_v20 = vsel %vm21624_vm15, %v21553_v44, %v8723_v59  ;;  %v16031_v44 = vld [vmem:[#allocation11 + $0x3d0] sm:$0xf0]  ;;  %v8742_v9 = vsub.f32 1.5, %v8741_v3  ;;  %v17745_v50 = vld [vmem:[#allocation11 + $0x84] sm:$0xf]  ;;  %v15890_v53 = vor.u32 %v17813_v56, %v15887_v58 }
 0x8ab   : > { %v8812_v40 = vadd.f32 %v8796_v36, %v8786_v51  ;;  %v8762_v61 = vmul.f32 %v8727_v20, %v21482_v63  ;;  %v8772_v36 = vperm.slane %v21519_v27, 4  ;;  %10380 = vmatmul.bf16.vlgmr.msra.gmra.mxu0 %v21642_v5  ;;  %v15650_v63 = vor.u32 %v17753_v2, %v15647_v48  ;;  %v17777_v51 = vld [vmem:[#allocation11 + $0x184] sm:$0xf]  ;;  %v15743_v59 = vld [vmem:[#allocation11 + $0x190] sm:$0xf0] }
 0x8ac   : > { %v8813_v33 = vadd.f32 %v8797_v55, %v8787_v24  ;;  %10476 = vmatpush.bf16.msra.mxu0 %v15666_v39  ;;  %v15778_v55 = vor.u32 %v17785_v28, %v15775_v45  ;;  %v16034_v19 = vor.u32 %v17849_v1, %v16031_v44  ;;  %v15759_v39 = vld [vmem:[#allocation11 + $0x1b0] sm:$0xf0]  ;;  %v8743_v7 = vmul.f32 %v21636_v13, %v8742_v9  ;;  %v17841_v48 = vld [vmem:[#allocation11 + $0x384] sm:$0xf] }
 0x8ad   : > { %v21658_v30 = vpack.c.bf16 %v8812_v40, %v8812_v40  ;;  %v8788_v60 = vmul.f32 %v8772_v36, %v8762_v61  ;;  %v15762_v14 = vor.u32 %v17781_v17, %v15759_v39  ;;  %18177 = vrsqrt.f32 %v21673_v12  ;;  %v15871_v24 = vld [vmem:[#allocation11 + $0x290] sm:$0xf0]  ;;  %v17773_v1 = vld [vmem:[#allocation11 + $0x164] sm:$0xf] }
 0x8ae   : > { %v21662_v34 = vpack.c.bf16 %v8813_v33, %v8813_v33  ;;  %10490 = vmatpush.bf16.msra.mxu1 %v15778_v55  ;;  %v8659_v10 = vadd.f32 %v8658_v52, %v8657_v46  ;;  %v16018_v42 = vor.u32 %v17845_v49, %v16015_v57  ;;  %v8747_v2 = vsel %vm21679_vm2, %v21636_v13, %v8743_v7  ;;  %v15999_v28 = vld [vmem:[#allocation11 + $0x390] sm:$0xf0]  ;;  %v17741_v33 = vld [vmem:[#allocation11 + $0x64] sm:$0xf] }
 0x8af   : > { %10406 = vmatmul.bf16.vlgmr.msra.gmra.mxu2 %v21658_v30  ;;  %v8764_v45 = vmul.f32 %v8747_v2, %v21497_v43  ;;  %v8800_v20 = vperm.slane %v21521_v31, 6  ;;  %v15746_v47 = vor.u32 %v17777_v51, %v15743_v59  ;;  %v15874_v61 = vor.u32 %v17809_v41, %v15871_v24  ;;  %v15727_v44 = vld [vmem:[#allocation11 + $0x170] sm:$0xf0]  ;;  %v17769_v58 = vld [vmem:[#allocation11 + $0x144] sm:$0xf] }
 0x8b0   : > { %10419 = vmatmul.bf16.vlgmr.msra.gmra.mxu3 %v21662_v34  ;;  %10502 = vmatpush.bf16.msra.mxu2 %v15922_v21  ;;  %v15615_v21 = vld [vmem:[#allocation11 + $0x90] sm:$0xf0]  ;;  %v8660_v4 = vrot.slane %v8659_v10, 1  ;;  %v16002_v6 = vor.u32 %v17841_v48, %v15999_v28  ;;  %v15602_v37 = vor.u32 %v17741_v33, %v15599_v26  ;;  %v15730_v11 = vor.u32 %v17773_v1, %v15727_v44  ;;  %v17801_v52 = vld [vmem:[#allocation11 + $0x244] sm:$0xf] }
 0x8b1   : > { %10515 = vmatpush.bf16.msra.mxu3 %v16050_v15  ;;  %10477 = vmatpush.bf16.msra.mxu0 %v15650_v63  ;;  %v8814_v15 = vadd.f32 %v8798_v8, %v8788_v60  ;;  %v15618_v40 = vor.u32 %v17745_v50, %v15615_v21  ;;  %v8790_v36 = vmul.f32 %v8774_v0, %v8764_v45  ;;  %v15855_v43 = vld [vmem:[#allocation11 + $0x270] sm:$0xf0]  ;;  %vm8734_vm3 = vweird.f32 %v21673_v12  ;;  %v17733_v21 = vld [vmem:[#allocation11 + $0x24] sm:$0xf] }
 0x8b2   : > { %10491 = vmatpush.bf16.msra.mxu1 %v15762_v14  ;;  %v8661_v22 = vadd.f32 %v8660_v4, %v8659_v10  ;;  %v15983_v17 = vld [vmem:[#allocation11 + $0x370] sm:$0xf0]  ;;  %v15858_v56 = vor.u32 %v17805_v29, %v15855_v43  ;;  %v17765_v51 = vld [vmem:[#allocation11 + $0x124] sm:$0xf]  ;;  %v8773_v2 = vperm.slane %v21519_v27, 5 }
 0x8b3   : > { %v21691_v13 = vpop.eup %18177  ;;  %v21693_v38 = vpack.c.bf16 %v8814_v15, %v8814_v15  ;;  %v8816_v55 = vadd.f32 %v8800_v20, %v8790_v36  ;;  %v15711_v60 = vld [vmem:[#allocation11 + $0x150] sm:$0xf0]  ;;  %v15986_v9 = vor.u32 %v17837_v25, %v15983_v17  ;;  %v17797_v41 = vld [vmem:[#allocation11 + $0x224] sm:$0xf] }
 0x8b4   : > { %10503 = vmatpush.bf16.msra.mxu2 %v15906_v35  ;;  %v8669_v63 = vmul.f32 %v8661_v22, %v21445_v16  ;;  %v8729_v3 = vmul.f32 %v21691_v13, %v21673_v12  ;;  %v17737_v35 = vld [vmem:[#allocation11 + $0x44] sm:$0xf]  ;;  %vm8735_vm4 = vweird.f32 %v21691_v13  ;;  %v15967_v14 = vld [vmem:[#allocation11 + $0x350] sm:$0xf0]  ;;  %v15714_v50 = vor.u32 %v17769_v58, %v15711_v60 }
 0x8b5   : > { %10516 = vmatpush.bf16.msra.mxu3 %v16034_v19  ;;  %10478 = vmatpush.bf16.msra.mxu0 %v15634_v18  ;;  %v15583_v19 = vld [vmem:[#allocation11 + $0x50] sm:$0xf0]  ;;  %v21700_v39 = vpack.c.bf16 %v8816_v55, %v8816_v55  ;;  %vm21712_vm5 = vmor %vm8734_vm3, %vm8735_vm4  ;;  %v17729_v12 = vld [vmem:[#allocation11 + $0x4] sm:$0xf] }
 0x8b6   : > { %10492 = vmatpush.bf16.msra.mxu1 %v15746_v47  ;;  %v21698_v46 = vadd.f32 1e-05, %v8669_v63  ;;  %v8730_v8 = vmul.f32 %v21691_v13, %v8729_v3  ;;  %v15839_v18 = vld [vmem:[#allocation11 + $0x250] sm:$0xf0]  ;;  %v15586_v57 = vor.u32 %v17737_v35, %v15583_v19  ;;  %v17761_v47 = vld [vmem:[#allocation11 + $0x104] sm:$0xf] }
 0x8b7   : > { %v15567_v7 = vld [vmem:[#allocation11 + $0x30] sm:$0xf0]  ;;  %v17885_v36 = vld [vmem:[#allocation11 + $0x4e4] sm:$0xf] }
 0x8b8   : > { %10504 = vmatpush.bf16.msra.mxu2 %v15890_v53  ;;  %18179 = vrsqrt.f32 %v21698_v46  ;;  %v8731_v49 = vmul.f32 0.5, %v8730_v8  ;;  %v15842_v53 = vor.u32 %v17801_v52, %v15839_v18  ;;  %v15695_v59 = vld [vmem:[#allocation11 + $0x130] sm:$0xf0]  ;;  %v15570_v4 = vor.u32 %v17733_v21, %v15567_v7  ;;  %v17793_v43 = vld [vmem:[#allocation11 + $0x204] sm:$0xf] }
 0x8b9   : > { %10517 = vmatpush.bf16.msra.mxu3 %v16018_v42  ;;  %10479 = vmatpush.bf16.msra.mxu0 %v15618_v40  ;;  %v15970_v42 = vor.u32 %v17833_v23, %v15967_v14  ;;  %v15823_v24 = vld [vmem:[#allocation11 + $0x230] sm:$0xf0]  ;;  %v17829_v40 = vld [vmem:[#allocation11 + $0x324] sm:$0xf]  ;;  %v15698_v45 = vor.u32 %v17765_v51, %v15695_v59  ;;  %vm8754_vm6 = vweird.f32 %v21698_v46 }
 0x8ba   : > { %10493 = vmatpush.bf16.msra.mxu1 %v15730_v11  ;;  %v8732_v10 = vsub.f32 1.5, %v8731_v49  ;;  %v15951_v48 = vld [vmem:[#allocation11 + $0x330] sm:$0xf0]  ;;  %v15826_v22 = vor.u32 %v17797_v41, %v15823_v24  ;;  %v17917_v17 = vld [vmem:[#allocation11 + $0x5e4] sm:$0xf]  ;;  %v8775_v41 = vperm.slane %v21519_v27, 7 }
 0x8bb   : > { %10432 = vmatmul.bf16.vlgmr.msrb.gmra.mxu0 %v21693_v38  ;;  %v15551_v20 = vld [vmem:[#allocation11 + $0x10] sm:$0xf0]  ;;  %v15954_v29 = vor.u32 %v17829_v40, %v15951_v48  ;;  %v17881_v60 = vld [vmem:[#allocation11 + $0x4c4] sm:$0xf]  ;;  %v8801_v24 = vperm.slane %v21521_v31, 7 }
 0x8bc   : > { %10505 = vmatpush.bf16.msra.mxu2 %v15874_v61  ;;  %v8733_v15 = vmul.f32 %v21691_v13, %v8732_v10  ;;  %v15679_v61 = vld [vmem:[#allocation11 + $0x110] sm:$0xf0]  ;;  %v17913_v14 = vld [vmem:[#allocation11 + $0x5c4] sm:$0xf] }
 0x8bd   : > { %10518 = vmatpush.bf16.msra.mxu3 %v16002_v6  ;;  %10480 = vmatpush.bf16.msra.mxu0 %v15602_v37  ;;  %v16175_v1 = vld [vmem:[#allocation11 + $0x4f0] sm:$0xf0]  ;;  %v8799_v6 = vperm.slane %v21521_v31, 5  ;;  %v17825_v37 = vld [vmem:[#allocation11 + $0x304] sm:$0xf]  ;;  %v15682_v11 = vor.u32 %v17761_v47, %v15679_v61 }
 0x8be   : > { %v21718_v28 = vpop.eup %18179  ;;  %10494 = vmatpush.bf16.msra.mxu1 %v15714_v50  ;;  %v8737_v33 = vsel %vm21712_vm5, %v21691_v13, %v8733_v15  ;;  %v15807_v63 = vld [vmem:[#allocation11 + $0x210] sm:$0xf0]  ;;  %v15554_v13 = vor.u32 %v17729_v12, %v15551_v20  ;;  %v16178_v35 = vor.u32 %v17885_v36, %v16175_v1  ;;  %v17877_v0 = vld [vmem:[#allocation11 + $0x4a4] sm:$0xf] }
 0x8bf   : > { %10458 = vmatmul.bf16.vlgmr.msrb.gmra.mxu2 %v21700_v39  ;;  %v8749_v26 = vmul.f32 %v21718_v28, %v21698_v46  ;;  %v8763_v44 = vmul.f32 %v8737_v33, %v21507_v32  ;;  %v15935_v25 = vld [vmem:[#allocation11 + $0x310] sm:$0xf0]  ;;  %vm8755_vm7 = vweird.f32 %v21718_v28  ;;  %v15810_v58 = vor.u32 %v17793_v43, %v15807_v63  ;;  %v17941_v12 = vld [vmem:[#allocation11 + $0x6a4] sm:$0xf] }
 0x8c0   : > { %10506 = vmatpush.bf16.msra.mxu2 %v15858_v56  ;;  %v16303_v19 = vld [vmem:[#allocation11 + $0x5f0] sm:$0xf0]  ;;  %v17949_v56 = vld [vmem:[#allocation11 + $0x6e4] sm:$0xf]  ;;  %v15938_v18 = vor.u32 %v17825_v37, %v15935_v25  ;;  %vm21736_vm8 = vmor %vm8754_vm6, %vm8755_vm7 }
 0x8c1   : > { %10519 = vmatpush.bf16.msra.mxu3 %v15986_v9  ;;  %10481 = vmatpush.bf16.msra.mxu0 %v15586_v57  ;;  %v8750_v55 = vmul.f32 %v21718_v28, %v8749_v26  ;;  %v8789_v3 = vmul.f32 %v8773_v2, %v8763_v44  ;;  %v16431_v32 = vld [vmem:[#allocation11 + $0x6f0] sm:$0xf0]  ;;  %v16306_v57 = vor.u32 %v17917_v17, %v16303_v19  ;;  %v17873_v27 = vld [vmem:[#allocation11 + $0x484] sm:$0xf] }
 0x8c2   : > { %10495 = vmatpush.bf16.msra.mxu1 %v15698_v45  ;;  %v16159_v9 = vld [vmem:[#allocation11 + $0x4d0] sm:$0xf0]  ;;  %v16434_v23 = vor.u32 %v17949_v56, %v16431_v32  ;;  %v17981_v31 = vld [vmem:[#allocation11 + $0x7e4] sm:$0xf] }
 0x8c3   : > { %v8751_v8 = vmul.f32 0.5, %v8750_v55  ;;  %v8815_v52 = vadd.f32 %v8799_v6, %v8789_v3  ;;  %v16287_v50 = vld [vmem:[#allocation11 + $0x5d0] sm:$0xf0]  ;;  %v16162_v10 = vor.u32 %v17881_v60, %v16159_v9  ;;  %v17905_v61 = vld [vmem:[#allocation11 + $0x584] sm:$0xf] }
 0x8c4   : > { %10507 = vmatpush.bf16.msra.mxu2 %v15842_v53  ;;  %v17945_v53 = vld [vmem:[#allocation11 + $0x6c4] sm:$0xf]  ;;  %v16415_v51 = vld [vmem:[#allocation11 + $0x6d0] sm:$0xf0]  ;;  %v16290_v15 = vor.u32 %v17913_v14, %v16287_v50 }
 0x8c5   : > { %10520 = vmatpush.bf16.msra.mxu3 %v15970_v42  ;;  %10482 = vmatpush.bf16.msra.mxu0 %v15570_v4  ;;  %v8752_v49 = vsub.f32 1.5, %v8751_v8  ;;  %v21730_v21 = vpack.c.bf16 %v8815_v52, %v8815_v52  ;;  %v16143_v42 = vld [vmem:[#allocation11 + $0x4b0] sm:$0xf0]  ;;  %v16418_v2 = vor.u32 %v17945_v53, %v16415_v51  ;;  %v17909_v4 = vld [vmem:[#allocation11 + $0x5a4] sm:$0xf] }
 0x8c6   : > { %10496 = vmatpush.bf16.msra.mxu1 %v15682_v11  ;;  %v16146_v48 = vor.u32 %v17877_v0, %v16143_v42  ;;  %v16271_v45 = vld [vmem:[#allocation11 + $0x5b0] sm:$0xf0]  ;;  %v17937_v44 = vld [vmem:[#allocation11 + $0x684] sm:$0xf] }
 0x8c7   : > { %v8753_v59 = vmul.f32 %v21718_v28, %v8752_v49  ;;  %10445 = vmatmul.bf16.vlgmr.msrb.gmra.mxu1 %v21730_v21  ;;  %v16399_v20 = vld [vmem:[#allocation11 + $0x6b0] sm:$0xf0]  ;;  %v16274_v26 = vor.u32 %v17909_v4, %v16271_v45  ;;  %v17869_v43 = vld [vmem:[#allocation11 + $0x464] sm:$0xf] }
 0x8c8   : > { %10508 = vmatpush.bf16.msra.mxu2 %v15826_v22  ;;  %v16127_v47 = vld [vmem:[#allocation11 + $0x490] sm:$0xf0]  ;;  %v16402_v22 = vor.u32 %v17941_v12, %v16399_v20  ;;  %v17901_v3 = vld [vmem:[#allocation11 + $0x564] sm:$0xf]  ;;  %v15669_v20 = vld [vmem:[#allocation11 + $0xe8] sm:$0xf] }
 0x8c9   : > { %10521 = vmatpush.bf16.msra.mxu3 %v15954_v29  ;;  %10483 = vmatpush.bf16.msra.mxu0 %v15554_v13  ;;  %v8757_v46 = vsel %vm21736_vm8, %v21718_v28, %v8753_v59  ;;  %v16559_v33 = vld [vmem:[#allocation11 + $0x7f0] sm:$0xf0]  ;;  %v16130_v36 = vor.u32 %v17873_v27, %v16127_v47  ;;  %v17977_v13 = vld [vmem:[#allocation11 + $0x7c4] sm:$0xf]  ;;  %v17760_v27 = vld [vmem:[#allocation11 + $0xf4] sm:$0xf0] }
 0x8ca   : > { %10541 = vmatpush.bf16.msrb.mxu1 %v16306_v57  ;;  %v8765_v40 = vmul.f32 %v8757_v46, %v21572_v62  ;;  %v16255_v1 = vld [vmem:[#allocation11 + $0x590] sm:$0xf0]  ;;  %v16562_v29 = vor.u32 %v17981_v31, %v16559_v33  ;;  %v17933_v19 = vld [vmem:[#allocation11 + $0x664] sm:$0xf] }
 0x8cb   : > { %v16383_v6 = vld [vmem:[#allocation11 + $0x690] sm:$0xf0]  ;;  %v16258_v25 = vor.u32 %v17905_v61, %v16255_v1  ;;  %v17865_v8 = vld [vmem:[#allocation11 + $0x444] sm:$0xf]  ;;  %v15670_v1 = vor.u32 %v17760_v27, %v15669_v20  ;;  %v15877_v20 = vld [vmem:[#allocation11 + $0x288] sm:$0xf] }
 0x8cc   : > { %10509 = vmatpush.bf16.msra.mxu2 %v15810_v58  ;;  %10484 = vmatmul.bf16.vlgmr.msra.gmra.mxu0 %v21642_v5  ;;  %v8791_v28 = vmul.f32 %v8775_v41, %v8765_v40  ;;  %v16111_v63 = vld [vmem:[#allocation11 + $0x470] sm:$0xf0]  ;;  %v16386_v17 = vor.u32 %v17937_v44, %v16383_v6  ;;  %v17973_v60 = vld [vmem:[#allocation11 + $0x7a4] sm:$0xf]  ;;  %v17792_v44 = vld [vmem:[#allocation11 + $0x1f4] sm:$0xf0] }
 0x8cd   : > { %10528 = vmatpush.bf16.msrb.mxu0 %v16178_v35  ;;  %10522 = vmatpush.bf16.msra.mxu3 %v15938_v18  ;;  %v16543_v37 = vld [vmem:[#allocation11 + $0x7d0] sm:$0xf0]  ;;  %v16114_v11 = vor.u32 %v17869_v43, %v16111_v63  ;;  %v17897_v49 = vld [vmem:[#allocation11 + $0x544] sm:$0xf]  ;;  %v15925_v6 = vld [vmem:[#allocation11 + $0x2e8] sm:$0xf] }
 0x8ce   : > { %10542 = vmatpush.bf16.msrb.mxu1 %v16290_v15  ;;  %v8817_v62 = vadd.f32 %v8801_v24, %v8791_v28  ;;  %v16239_v35 = vld [vmem:[#allocation11 + $0x570] sm:$0xf0]  ;;  %v16546_v32 = vor.u32 %v17977_v13, %v16543_v37  ;;  %v17929_v14 = vld [vmem:[#allocation11 + $0x644] sm:$0xf]  ;;  %v17812_v27 = vld [vmem:[#allocation11 + $0x294] sm:$0xf0] }
 0x8cf   : > { %10510 = vmatmul.bf16.vlgmr.msra.gmra.mxu2 %v21658_v30  ;;  %v16367_v56 = vld [vmem:[#allocation11 + $0x670] sm:$0xf0]  ;;  %v16242_v52 = vor.u32 %v17901_v3, %v16239_v35  ;;  %v17969_v51 = vld [vmem:[#allocation11 + $0x784] sm:$0xf]  ;;  %v15781_v35 = vld [vmem:[#allocation11 + $0x1c8] sm:$0xf] }
 0x8d0   : > { %10554 = vmatpush.bf16.msrb.mxu2 %v16434_v23  ;;  %v21750_v55 = vpack.c.bf16 %v8817_v62, %v8817_v62  ;;  %v16095_v58 = vld [vmem:[#allocation11 + $0x450] sm:$0xf0]  ;;  %v16370_v18 = vor.u32 %v17933_v19, %v16367_v56  ;;  %v17893_v41 = vld [vmem:[#allocation11 + $0x524] sm:$0xf]  ;;  %v15797_v62 = vld [vmem:[#allocation11 + $0x1e8] sm:$0xf] }
 0x8d1   : > { %10529 = vmatpush.bf16.msrb.mxu0 %v16162_v10  ;;  %v16527_v9 = vld [vmem:[#allocation11 + $0x7b0] sm:$0xf0]  ;;  %v16098_v57 = vor.u32 %v17865_v8, %v16095_v58  ;;  %v17861_v10 = vld [vmem:[#allocation11 + $0x424] sm:$0xf]  ;;  %v15798_v3 = vor.u32 %v17792_v44, %v15797_v62  ;;  %v17788_v56 = vld [vmem:[#allocation11 + $0x1d4] sm:$0xf0] }
 0x8d2   : > { %10543 = vmatpush.bf16.msrb.mxu1 %v16274_v26  ;;  %10471 = vmatmul.bf16.vlgmr.msrb.gmra.mxu3 %v21750_v55  ;;  %v16223_v23 = vld [vmem:[#allocation11 + $0x550] sm:$0xf0]  ;;  %v16530_v7 = vor.u32 %v17973_v60, %v16527_v9  ;;  %v17925_v15 = vld [vmem:[#allocation11 + $0x624] sm:$0xf]  ;;  %v17820_v8 = vld [vmem:[#allocation11 + $0x2d4] sm:$0xf0] }
 0x8d3   : > { %10567 = vmatpush.bf16.msrb.mxu3 %v16562_v29  ;;  %v16351_v50 = vld [vmem:[#allocation11 + $0x650] sm:$0xf0]  ;;  %v16226_v0 = vor.u32 %v17897_v49, %v16223_v23  ;;  %v17965_v40 = vld [vmem:[#allocation11 + $0x764] sm:$0xf]  ;;  %v17824_v29 = vld [vmem:[#allocation11 + $0x2f4] sm:$0xf0]  ;;  %v15782_v49 = vor.u32 %v17788_v56, %v15781_v35 }
 0x8d4   : > { %10555 = vmatpush.bf16.msrb.mxu2 %v16418_v2  ;;  %v16079_v53 = vld [vmem:[#allocation11 + $0x430] sm:$0xf0]  ;;  %v16354_v42 = vor.u32 %v17929_v14, %v16351_v50  ;;  %v17889_v31 = vld [vmem:[#allocation11 + $0x504] sm:$0xf]  ;;  %v15765_v23 = vld [vmem:[#allocation11 + $0x1a8] sm:$0xf] }
 0x8d5   : > { %10530 = vmatpush.bf16.msrb.mxu0 %v16146_v48  ;;  %v16511_v59 = vld [vmem:[#allocation11 + $0x790] sm:$0xf0]  ;;  %v16082_v46 = vor.u32 %v17861_v10, %v16079_v53  ;;  %v17857_v48 = vld [vmem:[#allocation11 + $0x404] sm:$0xf]  ;;  %v17784_v50 = vld [vmem:[#allocation11 + $0x1b4] sm:$0xf0] }
 0x8d6   : > { %10544 = vmatpush.bf16.msrb.mxu1 %v16258_v25  ;;  %v16207_v24 = vld [vmem:[#allocation11 + $0x530] sm:$0xf0]  ;;  %v16514_v4 = vor.u32 %v17969_v51, %v16511_v59  ;;  %v17961_v43 = vld [vmem:[#allocation11 + $0x744] sm:$0xf]  ;;  %v15653_v25 = vld [vmem:[#allocation11 + $0xc8] sm:$0xf] }
 0x8d7   : > { %10568 = vmatpush.bf16.msrb.mxu3 %v16546_v32  ;;  %10497 = vmatmul.bf16.vlgmr.msra.gmra.mxu1 %v21651_v54  ;;  %v16335_v2 = vld [vmem:[#allocation11 + $0x630] sm:$0xf0]  ;;  %v16210_v47 = vor.u32 %v17893_v41, %v16207_v24  ;;  %v15909_v32 = vld [vmem:[#allocation11 + $0x2c8] sm:$0xf]  ;;  %v17957_v58 = vld [vmem:[#allocation11 + $0x724] sm:$0xf]  ;;  %v15766_v24 = vor.u32 %v17784_v50, %v15765_v23 }
 0x8d8   : > { %10556 = vmatpush.bf16.msrb.mxu2 %v16402_v22  ;;  %v16063_v45 = vld [vmem:[#allocation11 + $0x410] sm:$0xf0]  ;;  %v16338_v28 = vor.u32 %v17925_v15, %v16335_v2  ;;  %v17921_v22 = vld [vmem:[#allocation11 + $0x604] sm:$0xf]  ;;  %v17816_v10 = vld [vmem:[#allocation11 + $0x2b4] sm:$0xf0] }
 0x8d9   : > { %10531 = vmatpush.bf16.msrb.mxu0 %v16130_v36  ;;  %v16495_v12 = vld [vmem:[#allocation11 + $0x770] sm:$0xf0]  ;;  %v16066_v26 = vor.u32 %v17857_v48, %v16063_v45  ;;  %v17953_v53 = vld [vmem:[#allocation11 + $0x704] sm:$0xf]  ;;  %v16053_v59 = vld [vmem:[#allocation11 + $0x3e8] sm:$0xf] }
 0x8da   : > { %10545 = vmatpush.bf16.msrb.mxu1 %v16242_v52  ;;  %v16191_v33 = vld [vmem:[#allocation11 + $0x510] sm:$0xf0]  ;;  %v16498_v36 = vor.u32 %v17965_v40, %v16495_v12  ;;  %v15637_v52 = vld [vmem:[#allocation11 + $0xa8] sm:$0xf]  ;;  %v17780_v40 = vld [vmem:[#allocation11 + $0x194] sm:$0xf0] }
 0x8db   : > { %10569 = vmatpush.bf16.msrb.mxu3 %v16530_v7  ;;  %v16319_v61 = vld [vmem:[#allocation11 + $0x610] sm:$0xf0]  ;;  %v16194_v13 = vor.u32 %v17889_v31, %v16191_v33  ;;  %v15893_v7 = vld [vmem:[#allocation11 + $0x2a8] sm:$0xf]  ;;  %v17744_v31 = vld [vmem:[#allocation11 + $0x74] sm:$0xf0] }
 0x8dc   : > { %10557 = vmatpush.bf16.msrb.mxu2 %v16386_v17  ;;  %v16479_v63 = vld [vmem:[#allocation11 + $0x750] sm:$0xf0]  ;;  %v16322_v37 = vor.u32 %v17921_v22, %v16319_v61  ;;  %v17756_v17 = vld [vmem:[#allocation11 + $0xd4] sm:$0xf0]  ;;  %v15621_v41 = vld [vmem:[#allocation11 + $0x88] sm:$0xf]  ;;  %v15894_v15 = vor.u32 %v17816_v10, %v15893_v7 }
 0x8dd   : > { %10532 = vmatpush.bf16.msrb.mxu0 %v16114_v11  ;;  %v15926_v11 = vor.u32 %v17824_v29, %v15925_v6  ;;  %v16482_v19 = vor.u32 %v17961_v43, %v16479_v63  ;;  %v16463_v60 = vld [vmem:[#allocation11 + $0x730] sm:$0xf0]  ;;  %v15654_v9 = vor.u32 %v17756_v17, %v15653_v25  ;;  %v16037_v45 = vld [vmem:[#allocation11 + $0x3c8] sm:$0xf]  ;;  %v17776_v61 = vld [vmem:[#allocation11 + $0x174] sm:$0xf0] }
 0x8de   : > { %10546 = vmatpush.bf16.msrb.mxu1 %v16226_v0  ;;  %v16466_v14 = vor.u32 %v17957_v58, %v16463_v60  ;;  %v16447_v51 = vld [vmem:[#allocation11 + $0x710] sm:$0xf0]  ;;  %v15733_v22 = vld [vmem:[#allocation11 + $0x168] sm:$0xf]  ;;  %v17808_v6 = vld [vmem:[#allocation11 + $0x274] sm:$0xf0] }
 0x8df   : > { %10570 = vmatpush.bf16.msrb.mxu3 %v16514_v4  ;;  %v16450_v2 = vor.u32 %v17953_v53, %v16447_v51  ;;  %v15749_v4 = vld [vmem:[#allocation11 + $0x188] sm:$0xf]  ;;  %v17848_v29 = vld [vmem:[#allocation11 + $0x3b4] sm:$0xf0] }
 0x8e0   : > { %10558 = vmatpush.bf16.msrb.mxu2 %v16370_v18  ;;  %v17752_v18 = vld [vmem:[#allocation11 + $0xb4] sm:$0xf0]  ;;  %v15750_v33 = vor.u32 %v17780_v40, %v15749_v4  ;;  %v15861_v44 = vld [vmem:[#allocation11 + $0x268] sm:$0xf] }
 0x8e1   : > { %10533 = vmatpush.bf16.msrb.mxu0 %v16098_v57  ;;  %v15910_v57 = vor.u32 %v17820_v8, %v15909_v32  ;;  %v15638_v0 = vor.u32 %v17752_v18, %v15637_v52  ;;  %v15589_v43 = vld [vmem:[#allocation11 + $0x48] sm:$0xf]  ;;  %v17740_v63 = vld [vmem:[#allocation11 + $0x54] sm:$0xf0] }
 0x8e2   : > { %10547 = vmatpush.bf16.msrb.mxu1 %v16210_v47  ;;  %10523 = vmatmul.bf16.vlgmr.msra.gmra.mxu3 %v21662_v34  ;;  %v17852_v47 = vld [vmem:[#allocation11 + $0x3d4] sm:$0xf0]  ;;  %v15717_v25 = vld [vmem:[#allocation11 + $0x148] sm:$0xf]  ;;  %v15590_v35 = vor.u32 %v17740_v63, %v15589_v43 }
 0x8e3   : > { %10571 = vmatpush.bf16.msrb.mxu3 %v16498_v36  ;;  %v16038_v62 = vor.u32 %v17852_v47, %v16037_v45  ;;  %v16021_v36 = vld [vmem:[#allocation11 + $0x3a8] sm:$0xf]  ;;  %v17772_v17 = vld [vmem:[#allocation11 + $0x154] sm:$0xf0] }
 0x8e4   : > { %10559 = vmatpush.bf16.msrb.mxu2 %v16354_v42  ;;  %v17856_v42 = vld [vmem:[#allocation11 + $0x3f4] sm:$0xf0]  ;;  %v15573_v8 = vld [vmem:[#allocation11 + $0x28] sm:$0xf]  ;;  %v15718_v60 = vor.u32 %v17772_v17, %v15717_v25 }
 0x8e5   : > { %10534 = vmatpush.bf16.msrb.mxu0 %v16082_v46  ;;  %v17748_v46 = vld [vmem:[#allocation11 + $0x94] sm:$0xf0]  ;;  %v16054_v48 = vor.u32 %v17856_v42, %v16053_v59  ;;  %v15701_v52 = vld [vmem:[#allocation11 + $0x128] sm:$0xf] }
 0x8e6   : > { %10548 = vmatpush.bf16.msrb.mxu1 %v16194_v13  ;;  %v15622_v12 = vor.u32 %v17748_v46, %v15621_v41  ;;  %v15734_v13 = vor.u32 %v17776_v61, %v15733_v22  ;;  %v17804_v56 = vld [vmem:[#allocation11 + $0x254] sm:$0xf0]  ;;  %v15557_v10 = vld [vmem:[#allocation11 + $0x8] sm:$0xf] }
 0x8e7   : > { %10572 = vmatpush.bf16.msrb.mxu3 %v16482_v19  ;;  %v15845_v19 = vld [vmem:[#allocation11 + $0x248] sm:$0xf]  ;;  %v17844_v32 = vld [vmem:[#allocation11 + $0x394] sm:$0xf0] }
 0x8e8   : > { %10560 = vmatpush.bf16.msrb.mxu2 %v16338_v28  ;;  %v15605_v28 = vld [vmem:[#allocation11 + $0x68] sm:$0xf]  ;;  %v17736_v58 = vld [vmem:[#allocation11 + $0x34] sm:$0xf0] }
 0x8e9   : > { %10535 = vmatpush.bf16.msrb.mxu0 %v16066_v26  ;;  %10549 = vmatmul.bf16.vlgmr.msrb.gmra.mxu1 %v21730_v21  ;;  %v15878_v26 = vor.u32 %v17812_v27, %v15877_v20  ;;  %v17768_v18 = vld [vmem:[#allocation11 + $0x134] sm:$0xf0]  ;;  %v15574_v23 = vor.u32 %v17736_v58, %v15573_v8  ;;  %v16181_v59 = vld [vmem:[#allocation11 + $0x4e8] sm:$0xf] }
 0x8ea   : > { %10593 = vmatpush.bf16.msra.mxu1 %v15798_v3  ;;  %v16022_v3 = vor.u32 %v17848_v29, %v16021_v36  ;;  %v17800_v50 = vld [vmem:[#allocation11 + $0x234] sm:$0xf0]  ;;  %v15702_v51 = vor.u32 %v17768_v18, %v15701_v52  ;;  %v15973_v42 = vld [vmem:[#allocation11 + $0x348] sm:$0xf] }
 0x8eb   : > { %10573 = vmatpush.bf16.msrb.mxu3 %v16466_v14  ;;  %v15829_v14 = vld [vmem:[#allocation11 + $0x228] sm:$0xf]  ;;  %v17840_v7 = vld [vmem:[#allocation11 + $0x374] sm:$0xf0] }
 0x8ec   : > { %10561 = vmatpush.bf16.msrb.mxu2 %v16322_v37  ;;  %10536 = vmatmul.bf16.vlgmr.msrb.gmra.mxu0 %v21693_v38  ;;  %v15862_v37 = vor.u32 %v17808_v6, %v15861_v44  ;;  %v17732_v53 = vld [vmem:[#allocation11 + $0x14] sm:$0xf0]  ;;  %v15830_v41 = vor.u32 %v17800_v50, %v15829_v14  ;;  %v15685_v46 = vld [vmem:[#allocation11 + $0x108] sm:$0xf] }
 0x8ed   : > { %10580 = vmatpush.bf16.msra.mxu0 %v15670_v1  ;;  %v15606_v1 = vor.u32 %v17744_v31, %v15605_v28  ;;  %v15558_v4 = vor.u32 %v17732_v53, %v15557_v10  ;;  %v17796_v40 = vld [vmem:[#allocation11 + $0x214] sm:$0xf0]  ;;  %v16437_v27 = vld [vmem:[#allocation11 + $0x6e8] sm:$0xf] }
 0x8ee   : > { %10594 = vmatpush.bf16.msra.mxu1 %v15782_v49  ;;  %v17920_v45 = vld [vmem:[#allocation11 + $0x5f4] sm:$0xf0]  ;;  %v16165_v31 = vld [vmem:[#allocation11 + $0x4c8] sm:$0xf] }
 0x8ef   : > { %10562 = vmatmul.bf16.vlgmr.msrb.gmra.mxu2 %v21700_v39  ;;  %10574 = vmatpush.bf16.msrb.mxu3 %v16450_v2  ;;  %v17952_v47 = vld [vmem:[#allocation11 + $0x6f4] sm:$0xf0]  ;;  %v16421_v43 = vld [vmem:[#allocation11 + $0x6c8] sm:$0xf] }
 0x8f0   : > { %10606 = vmatpush.bf16.msra.mxu2 %v15926_v11  ;;  %v16005_v11 = vld [vmem:[#allocation11 + $0x388] sm:$0xf]  ;;  %v16438_v36 = vor.u32 %v17952_v47, %v16437_v27  ;;  %v17916_v44 = vld [vmem:[#allocation11 + $0x5d4] sm:$0xf0] }
 0x8f1   : > { %10581 = vmatpush.bf16.msra.mxu0 %v15654_v9  ;;  %v15846_v9 = vor.u32 %v17804_v56, %v15845_v19  ;;  %v16006_v49 = vor.u32 %v17844_v32, %v16005_v11  ;;  %v17832_v6 = vld [vmem:[#allocation11 + $0x334] sm:$0xf0]  ;;  %v15941_v25 = vld [vmem:[#allocation11 + $0x308] sm:$0xf] }
 0x8f2   : > { %10595 = vmatpush.bf16.msra.mxu1 %v15766_v24  ;;  %10575 = vmatmul.bf16.vlgmr.msrb.gmra.mxu3 %v21750_v55  ;;  %v17764_v24 = vld [vmem:[#allocation11 + $0x114] sm:$0xf0]  ;;  %v16277_v19 = vld [vmem:[#allocation11 + $0x5a8] sm:$0xf] }
 0x8f3   : > { %10619 = vmatpush.bf16.msra.mxu3 %v16054_v48  ;;  %v16309_v48 = vld [vmem:[#allocation11 + $0x5e8] sm:$0xf]  ;;  %v15686_v28 = vor.u32 %v17764_v24, %v15685_v46  ;;  %v17948_v63 = vld [vmem:[#allocation11 + $0x6d4] sm:$0xf0] }
 0x8f4   : > { %10607 = vmatpush.bf16.msra.mxu2 %v15910_v57  ;;  %v15989_v57 = vld [vmem:[#allocation11 + $0x368] sm:$0xf]  ;;  %v16310_v22 = vor.u32 %v17920_v45, %v16309_v48  ;;  %v17828_v11 = vld [vmem:[#allocation11 + $0x314] sm:$0xf0] }
 0x8f5   : > { %10582 = vmatpush.bf16.msra.mxu0 %v15638_v0  ;;  %v17888_v0 = vld [vmem:[#allocation11 + $0x4f4] sm:$0xf0]  ;;  %v15990_v2 = vor.u32 %v17840_v7, %v15989_v57  ;;  %v16565_v32 = vld [vmem:[#allocation11 + $0x7e8] sm:$0xf]  ;;  %v15942_v57 = vor.u32 %v17828_v11, %v15941_v25 }
 0x8f6   : > { %10596 = vmatpush.bf16.msra.mxu1 %v15750_v33  ;;  %v16182_v20 = vor.u32 %v17888_v0, %v16181_v59  ;;  %v17884_v33 = vld [vmem:[#allocation11 + $0x4d4] sm:$0xf0]  ;;  %v16405_v58 = vld [vmem:[#allocation11 + $0x6a8] sm:$0xf] }
 0x8f7   : > { %10620 = vmatpush.bf16.msra.mxu3 %v16038_v62  ;;  %v15957_v62 = vld [vmem:[#allocation11 + $0x328] sm:$0xf]  ;;  %v16166_v29 = vor.u32 %v17884_v33, %v16165_v31  ;;  %v17912_v56 = vld [vmem:[#allocation11 + $0x5b4] sm:$0xf0] }
 0x8f8   : > { %10608 = vmatpush.bf16.msra.mxu2 %v15894_v15  ;;  %v15813_v15 = vld [vmem:[#allocation11 + $0x208] sm:$0xf]  ;;  %v17876_v18 = vld [vmem:[#allocation11 + $0x494] sm:$0xf0] }
 0x8f9   : > { %10583 = vmatpush.bf16.msra.mxu0 %v15622_v12  ;;  %v17836_v12 = vld [vmem:[#allocation11 + $0x354] sm:$0xf0]  ;;  %v16133_v52 = vld [vmem:[#allocation11 + $0x488] sm:$0xf] }
 0x8fa   : > { %10597 = vmatpush.bf16.msra.mxu1 %v15734_v13  ;;  %v15974_v61 = vor.u32 %v17836_v12, %v15973_v42  ;;  %v16149_v13 = vld [vmem:[#allocation11 + $0x4a8] sm:$0xf]  ;;  %v17908_v50 = vld [vmem:[#allocation11 + $0x594] sm:$0xf0]  ;;  %v16134_v53 = vor.u32 %v17876_v18, %v16133_v52 }
 0x8fb   : > { %10621 = vmatpush.bf16.msra.mxu3 %v16022_v3  ;;  %v15958_v3 = vor.u32 %v17832_v6, %v15957_v62  ;;  %v16261_v14 = vld [vmem:[#allocation11 + $0x588] sm:$0xf]  ;;  %v17940_v59 = vld [vmem:[#allocation11 + $0x694] sm:$0xf0] }
 0x8fc   : > { %10609 = vmatpush.bf16.msra.mxu2 %v15878_v26  ;;  %v15814_v26 = vor.u32 %v17796_v40, %v15813_v15  ;;  %v16549_v10 = vld [vmem:[#allocation11 + $0x7c8] sm:$0xf]  ;;  %v17980_v0 = vld [vmem:[#allocation11 + $0x7d4] sm:$0xf0]  ;;  %v16262_v46 = vor.u32 %v17908_v50, %v16261_v14 }
 0x8fd   : > { %10584 = vmatpush.bf16.msra.mxu0 %v15606_v1  ;;  %v16293_v1 = vld [vmem:[#allocation11 + $0x5c8] sm:$0xf]  ;;  %v17936_v12 = vld [vmem:[#allocation11 + $0x674] sm:$0xf0] }
 0x8fe   : > { %10598 = vmatpush.bf16.msra.mxu1 %v15718_v60  ;;  %v16294_v17 = vor.u32 %v17916_v44, %v16293_v1  ;;  %v17944_v60 = vld [vmem:[#allocation11 + $0x6b4] sm:$0xf0]  ;;  %v16117_v42 = vld [vmem:[#allocation11 + $0x468] sm:$0xf] }
 0x8ff   : > { %10622 = vmatpush.bf16.msra.mxu3 %v16006_v49  ;;  %v16278_v49 = vor.u32 %v17912_v56, %v16277_v19  ;;  %v16245_v15 = vld [vmem:[#allocation11 + $0x568] sm:$0xf]  ;;  %v17868_v47 = vld [vmem:[#allocation11 + $0x454] sm:$0xf0] }
 0x900   : > { %10610 = vmatpush.bf16.msra.mxu2 %v15862_v37  ;;  %v17880_v37 = vld [vmem:[#allocation11 + $0x4b4] sm:$0xf0]  ;;  %v16533_v40 = vld [vmem:[#allocation11 + $0x7a8] sm:$0xf] }
 0x901   : > { %10585 = vmatpush.bf16.msra.mxu0 %v15590_v35  ;;  %v16422_v35 = vor.u32 %v17948_v63, %v16421_v43  ;;  %v16150_v8 = vor.u32 %v17880_v37, %v16149_v13  ;;  %v16373_v45 = vld [vmem:[#allocation11 + $0x668] sm:$0xf]  ;;  %v17932_v1 = vld [vmem:[#allocation11 + $0x654] sm:$0xf0] }
 0x902   : > { %10599 = vmatpush.bf16.msra.mxu1 %v15702_v51  ;;  %v16389_v51 = vld [vmem:[#allocation11 + $0x688] sm:$0xf]  ;;  %v16374_v31 = vor.u32 %v17936_v12, %v16373_v45  ;;  %v17972_v44 = vld [vmem:[#allocation11 + $0x794] sm:$0xf0]  ;;  %v15783_v45 = vld [vmem:[#allocation11 + $0x1d8] sm:$0xf0] }
 0x903   : > { %10623 = vmatpush.bf16.msra.mxu3 %v15990_v2  ;;  %v16390_v24 = vor.u32 %v17940_v59, %v16389_v51  ;;  %v17904_v2 = vld [vmem:[#allocation11 + $0x574] sm:$0xf0]  ;;  %v16101_v27 = vld [vmem:[#allocation11 + $0x448] sm:$0xf]  ;;  %v17822_v59 = vld [vmem:[#allocation11 + $0x2ec] sm:$0xf] }
 0x904   : > { %10611 = vmatpush.bf16.msra.mxu2 %v15846_v9  ;;  %v17984_v9 = vld [vmem:[#allocation11 + $0x7f4] sm:$0xf0]  ;;  %v16229_v33 = vld [vmem:[#allocation11 + $0x548] sm:$0xf]  ;;  %v16102_v62 = vor.u32 %v17868_v47, %v16101_v27  ;;  %v15911_v27 = vld [vmem:[#allocation11 + $0x2d8] sm:$0xf0] }
 0x905   : > { %10586 = vmatpush.bf16.msra.mxu0 %v15574_v23  ;;  %v16406_v23 = vor.u32 %v17944_v60, %v16405_v58  ;;  %v16566_v7 = vor.u32 %v17984_v9, %v16565_v32  ;;  %v16085_v6 = vld [vmem:[#allocation11 + $0x428] sm:$0xf]  ;;  %v17896_v37 = vld [vmem:[#allocation11 + $0x534] sm:$0xf0]  ;;  %v17758_v58 = vld [vmem:[#allocation11 + $0xec] sm:$0xf] }
 0x906   : > { %10600 = vmatpush.bf16.msra.mxu1 %v15686_v28  ;;  %v16246_v28 = vor.u32 %v17904_v2, %v16245_v15  ;;  %v16213_v13 = vld [vmem:[#allocation11 + $0x528] sm:$0xf]  ;;  %v17968_v19 = vld [vmem:[#allocation11 + $0x774] sm:$0xf0]  ;;  %v15671_v60 = vld [vmem:[#allocation11 + $0xf8] sm:$0xf0] }
 0x907   : > { %10624 = vmatpush.bf16.msra.mxu3 %v15974_v61  ;;  %v16517_v61 = vld [vmem:[#allocation11 + $0x788] sm:$0xf]  ;;  %v17860_v32 = vld [vmem:[#allocation11 + $0x414] sm:$0xf0]  ;;  %v15674_v51 = vor.u32 %v17758_v58, %v15671_v60  ;;  %v15655_v15 = vld [vmem:[#allocation11 + $0xd8] sm:$0xf0] }
 0x908   : > { %10612 = vmatpush.bf16.msra.mxu2 %v15830_v41  ;;  %v17872_v41 = vld [vmem:[#allocation11 + $0x474] sm:$0xf0]  ;;  %v16518_v25 = vor.u32 %v17972_v44, %v16517_v61  ;;  %v16341_v11 = vld [vmem:[#allocation11 + $0x628] sm:$0xf]  ;;  %v17814_v44 = vld [vmem:[#allocation11 + $0x2ac] sm:$0xf] }
 0x909   : > { %10587 = vmatpush.bf16.msra.mxu0 %v15558_v4  ;;  %10601 = vmatmul.bf16.vlgmr.msra.gmra.mxu1 %v21651_v54  ;;  %v16550_v4 = vor.u32 %v17980_v0, %v16549_v10  ;;  %v16118_v48 = vor.u32 %v17872_v41, %v16117_v42  ;;  %v16069_v56 = vld [vmem:[#allocation11 + $0x408] sm:$0xf]  ;;  %v17924_v50 = vld [vmem:[#allocation11 + $0x614] sm:$0xf0]  ;;  %v15799_v10 = vld [vmem:[#allocation11 + $0x1f8] sm:$0xf0] }
 0x90a   : > { %10645 = vmatpush.bf16.msrb.mxu1 %v16310_v22  ;;  %v16485_v9 = vld [vmem:[#allocation11 + $0x748] sm:$0xf]  ;;  %v16070_v14 = vor.u32 %v17860_v32, %v16069_v56  ;;  %v15927_v0 = vld [vmem:[#allocation11 + $0x2f8] sm:$0xf0]  ;;  %v17960_v12 = vld [vmem:[#allocation11 + $0x734] sm:$0xf0] }
 0x90b   : > { %10625 = vmatpush.bf16.msra.mxu3 %v15958_v3  ;;  %v16197_v18 = vld [vmem:[#allocation11 + $0x508] sm:$0xf]  ;;  %v15879_v58 = vld [vmem:[#allocation11 + $0x298] sm:$0xf0]  ;;  %v17850_v60 = vld [vmem:[#allocation11 + $0x3cc] sm:$0xf] }
 0x90c   : > { %10613 = vmatpush.bf16.msra.mxu2 %v15814_v26  ;;  %10588 = vmatmul.bf16.vlgmr.msra.gmra.mxu0 %v21642_v5  ;;  %v17900_v26 = vld [vmem:[#allocation11 + $0x554] sm:$0xf0] }
 0x90d   : > { %10632 = vmatpush.bf16.msrb.mxu0 %v16182_v20  ;;  %v17976_v20 = vld [vmem:[#allocation11 + $0x7b4] sm:$0xf0]  ;;  %v16230_v43 = vor.u32 %v17900_v26, %v16229_v33  ;;  %v15639_v33 = vld [vmem:[#allocation11 + $0xb8] sm:$0xf0] }
 0x90e   : > { %10646 = vmatpush.bf16.msrb.mxu1 %v16294_v17  ;;  %v16534_v22 = vor.u32 %v17976_v20, %v16533_v40  ;;  %v16501_v17 = vld [vmem:[#allocation11 + $0x768] sm:$0xf]  ;;  %v15930_v40 = vor.u32 %v17822_v59, %v15927_v0  ;;  %v17818_v20 = vld [vmem:[#allocation11 + $0x2cc] sm:$0xf]  ;;  %v16023_v59 = vld [vmem:[#allocation11 + $0x3b8] sm:$0xf0] }
 0x90f   : > { %10614 = vmatmul.bf16.vlgmr.msra.gmra.mxu2 %v21658_v30  ;;  %10626 = vmatpush.bf16.msra.mxu3 %v15942_v57  ;;  %v16325_v57 = vld [vmem:[#allocation11 + $0x608] sm:$0xf]  ;;  %v15914_v61 = vor.u32 %v17818_v20, %v15911_v27  ;;  %v17802_v20 = vld [vmem:[#allocation11 + $0x24c] sm:$0xf]  ;;  %v15847_v27 = vld [vmem:[#allocation11 + $0x258] sm:$0xf0] }
 0x910   : > { %10658 = vmatpush.bf16.msrb.mxu2 %v16438_v36  ;;  %v16357_v36 = vld [vmem:[#allocation11 + $0x648] sm:$0xf]  ;;  %v16326_v41 = vor.u32 %v17924_v50, %v16325_v57  ;;  %v15607_v57 = vld [vmem:[#allocation11 + $0x78] sm:$0xf0] }
 0x911   : > { %10633 = vmatpush.bf16.msrb.mxu0 %v16166_v29  ;;  %v17864_v29 = vld [vmem:[#allocation11 + $0x434] sm:$0xf0]  ;;  %v16358_v63 = vor.u32 %v17932_v1, %v16357_v36  ;;  %v15767_v36 = vld [vmem:[#allocation11 + $0x1b8] sm:$0xf0] }
 0x912   : > { %10647 = vmatpush.bf16.msrb.mxu1 %v16278_v49  ;;  %10627 = vmatmul.bf16.vlgmr.msra.gmra.mxu3 %v21662_v34  ;;  %v16086_v3 = vor.u32 %v17864_v29, %v16085_v6  ;;  %v17892_v49 = vld [vmem:[#allocation11 + $0x514] sm:$0xf0]  ;;  %v15895_v6 = vld [vmem:[#allocation11 + $0x2b8] sm:$0xf0]  ;;  %v17854_v29 = vld [vmem:[#allocation11 + $0x3ec] sm:$0xf] }
 0x913   : > { %10671 = vmatpush.bf16.msrb.mxu3 %v16566_v7  ;;  %v17790_v7 = vld [vmem:[#allocation11 + $0x1ec] sm:$0xf]  ;;  %v16198_v42 = vor.u32 %v17892_v49, %v16197_v18  ;;  %v17956_v1 = vld [vmem:[#allocation11 + $0x714] sm:$0xf0]  ;;  %v15735_v50 = vld [vmem:[#allocation11 + $0x178] sm:$0xf0] }
 0x914   : > { %10659 = vmatpush.bf16.msrb.mxu2 %v16422_v35  ;;  %v17928_v35 = vld [vmem:[#allocation11 + $0x634] sm:$0xf0]  ;;  %v17742_v49 = vld [vmem:[#allocation11 + $0x6c] sm:$0xf] }
 0x915   : > { %10634 = vmatpush.bf16.msrb.mxu0 %v16150_v8  ;;  %v16214_v8 = vor.u32 %v17896_v37, %v16213_v13  ;;  %v16342_v52 = vor.u32 %v17928_v35, %v16341_v11  ;;  %v17746_v37 = vld [vmem:[#allocation11 + $0x8c] sm:$0xf]  ;;  %v15610_v0 = vor.u32 %v17742_v49, %v15607_v57  ;;  %v15815_v57 = vld [vmem:[#allocation11 + $0x218] sm:$0xf0] }
 0x916   : > { %10648 = vmatpush.bf16.msrb.mxu1 %v16262_v46  ;;  %v15802_v46 = vor.u32 %v17790_v7, %v15799_v10  ;;  %v17778_v35 = vld [vmem:[#allocation11 + $0x18c] sm:$0xf] }
 0x917   : > { %10672 = vmatpush.bf16.msrb.mxu3 %v16550_v4  ;;  %v16469_v4 = vld [vmem:[#allocation11 + $0x728] sm:$0xf]  ;;  %v17806_v10 = vld [vmem:[#allocation11 + $0x26c] sm:$0xf] }
 0x918   : > { %10660 = vmatpush.bf16.msrb.mxu2 %v16406_v23  ;;  %v16502_v23 = vor.u32 %v17968_v19, %v16501_v17  ;;  %v16470_v26 = vor.u32 %v17960_v12, %v16469_v4  ;;  %v15751_v19 = vld [vmem:[#allocation11 + $0x198] sm:$0xf0]  ;;  %v17770_v4 = vld [vmem:[#allocation11 + $0x14c] sm:$0xf] }
 0x919   : > { %10635 = vmatpush.bf16.msrb.mxu0 %v16134_v53  ;;  %v17964_v53 = vld [vmem:[#allocation11 + $0x754] sm:$0xf0]  ;;  %v15754_v18 = vor.u32 %v17778_v35, %v15751_v19  ;;  %v15687_v35 = vld [vmem:[#allocation11 + $0x118] sm:$0xf0]  ;;  %v17834_v19 = vld [vmem:[#allocation11 + $0x34c] sm:$0xf] }
 0x91a   : > { %10649 = vmatpush.bf16.msrb.mxu1 %v16246_v28  ;;  %v16486_v2 = vor.u32 %v17964_v53, %v16485_v9  ;;  %v16039_v9 = vld [vmem:[#allocation11 + $0x3d8] sm:$0xf0] }
 0x91b   : > { %10673 = vmatpush.bf16.msrb.mxu3 %v16534_v22  ;;  %v16453_v22 = vld [vmem:[#allocation11 + $0x708] sm:$0xf]  ;;  %v16042_v7 = vor.u32 %v17850_v60, %v16039_v9  ;;  %v15863_v53 = vld [vmem:[#allocation11 + $0x278] sm:$0xf0]  ;;  %v17794_v60 = vld [vmem:[#allocation11 + $0x20c] sm:$0xf] }
 0x91c   : > { %10661 = vmatpush.bf16.msrb.mxu2 %v16390_v24  ;;  %v17754_v24 = vld [vmem:[#allocation11 + $0xcc] sm:$0xf]  ;;  %v16454_v17 = vor.u32 %v17956_v1, %v16453_v22  ;;  %v15575_v22 = vld [vmem:[#allocation11 + $0x38] sm:$0xf0] }
 0x91d   : > { %10636 = vmatpush.bf16.msrb.mxu0 %v16118_v48  ;;  %v17786_v48 = vld [vmem:[#allocation11 + $0x1cc] sm:$0xf]  ;;  %v15658_v47 = vor.u32 %v17754_v24, %v15655_v15  ;;  %v15866_v15 = vor.u32 %v17806_v10, %v15863_v53  ;;  %v16439_v53 = vld [vmem:[#allocation11 + $0x6f8] sm:$0xf0] }
 0x91e   : > { %10650 = vmatpush.bf16.msrb.mxu1 %v16230_v43  ;;  %v15786_v28 = vor.u32 %v17786_v48, %v15783_v45  ;;  %v16055_v43 = vld [vmem:[#allocation11 + $0x3f8] sm:$0xf0]  ;;  %v17886_v9 = vld [vmem:[#allocation11 + $0x4ec] sm:$0xf] }
 0x91f   : > { %10674 = vmatpush.bf16.msrb.mxu3 %v16518_v25  ;;  %v15623_v25 = vld [vmem:[#allocation11 + $0x98] sm:$0xf0]  ;;  %v16058_v56 = vor.u32 %v17854_v29, %v16055_v43  ;;  %v17838_v29 = vld [vmem:[#allocation11 + $0x36c] sm:$0xf] }
 0x920   : > { %10662 = vmatpush.bf16.msrb.mxu2 %v16374_v31  ;;  %v17750_v31 = vld [vmem:[#allocation11 + $0xac] sm:$0xf]  ;;  %v15991_v43 = vld [vmem:[#allocation11 + $0x378] sm:$0xf0] }
 0x921   : > { %10637 = vmatpush.bf16.msrb.mxu0 %v16102_v62  ;;  %v17782_v62 = vld [vmem:[#allocation11 + $0x1ac] sm:$0xf] }
 0x922   : > { %10651 = vmatpush.bf16.msrb.mxu1 %v16214_v8  ;;  %v15770_v13 = vor.u32 %v17782_v62, %v15767_v36  ;;  %v17810_v8 = vld [vmem:[#allocation11 + $0x28c] sm:$0xf]  ;;  %v15703_v36 = vld [vmem:[#allocation11 + $0x138] sm:$0xf0] }
 0x923   : > { %10675 = vmatpush.bf16.msrb.mxu3 %v16502_v23  ;;  %v15882_v23 = vor.u32 %v17810_v8, %v15879_v58  ;;  %v17766_v62 = vld [vmem:[#allocation11 + $0x12c] sm:$0xf] }
 0x924   : > { %10663 = vmatpush.bf16.msrb.mxu2 %v16358_v63  ;;  %v15642_v63 = vor.u32 %v17750_v31, %v15639_v33  ;;  %v17950_v10 = vld [vmem:[#allocation11 + $0x6ec] sm:$0xf] }
 0x925   : > { %10638 = vmatpush.bf16.msrb.mxu0 %v16086_v3  ;;  %v15898_v3 = vor.u32 %v17814_v44, %v15895_v6  ;;  %v21768_v32 = vpop.f32.mrf.mxu1  ;;  %v17798_v44 = vld [vmem:[#allocation11 + $0x22c] sm:$0xf]  ;;  %v15831_v6 = vld [vmem:[#allocation11 + $0x238] sm:$0xf0] }
 0x926   : > { %10652 = vmatpush.bf16.msrb.mxu1 %v16198_v42  ;;  %v15834_v8 = vor.u32 %v17798_v44, %v15831_v6  ;;  %v17910_v6 = vld [vmem:[#allocation11 + $0x5ac] sm:$0xf] }
 0x927   : > { %10676 = vmatpush.bf16.msrb.mxu3 %v16486_v2 }
 0x928   : > { %10664 = vmatpush.bf16.msrb.mxu2 %v16342_v52  ;;  %v21766_v11 = vpop.f32.mrf.mxu0  ;;  %v15626_v52 = vor.u32 %v17746_v37, %v15623_v25  ;;  %v21775_v37 = vld [vmem:[#allocation12] sm:$0xf]  ;;  %v15706_v25 = vor.u32 %v17766_v62, %v15703_v36 }
 0x929   : > { %10639 = vmatpush.bf16.msrb.mxu0 %v16070_v14  ;;  %10653 = vmatmul.bf16.vlgmr.msrb.gmra.mxu1 %v21730_v21  ;;  %v17774_v14 = vld [vmem:[#allocation11 + $0x16c] sm:$0xf] }
 0x92a   : > { %10697 = vmatpush.bf16.msra.mxu1 %v15802_v46  ;;  %v15738_v42 = vor.u32 %v17774_v14, %v15735_v50  ;;  %v15591_v46 = vld [vmem:[#allocation11 + $0x58] sm:$0xf0] }
 0x92b   : > { %10677 = vmatpush.bf16.msrb.mxu3 %v16470_v26  ;;  %v17734_v26 = vld [vmem:[#allocation11 + $0x2c] sm:$0xf]  ;;  %v16311_v14 = vld [vmem:[#allocation11 + $0x5f8] sm:$0xf0] }
 0x92c   : > { %10665 = vmatpush.bf16.msrb.mxu2 %v16326_v41  ;;  %10640 = vmatmul.bf16.vlgmr.msrb.gmra.mxu0 %v21693_v38  ;;  %v17738_v41 = vld [vmem:[#allocation11 + $0x4c] sm:$0xf]  ;;  %v15975_v50 = vld [vmem:[#allocation11 + $0x358] sm:$0xf0] }
 0x92d   : > { %10684 = vmatpush.bf16.msra.mxu0 %v15674_v51  ;;  %v17846_v51 = vld [vmem:[#allocation11 + $0x3ac] sm:$0xf]  ;;  %v10396_v12 = vpop.f32.mrf.mxu1  ;;  %v15594_v31 = vor.u32 %v17738_v41, %v15591_v46 }
 0x92e   : > { %10698 = vmatpush.bf16.msra.mxu1 %v15786_v28  ;;  %v16026_v48 = vor.u32 %v17846_v51, %v16023_v59  ;;  %v16007_v28 = vld [vmem:[#allocation11 + $0x398] sm:$0xf0]  ;;  %v17882_v46 = vld [vmem:[#allocation11 + $0x4cc] sm:$0xf] }
 0x92f   : > { %10666 = vmatmul.bf16.vlgmr.msrb.gmra.mxu2 %v21700_v39  ;;  %10678 = vmatpush.bf16.msrb.mxu3 %v16454_v17  ;;  %v15559_v17 = vld [vmem:[#allocation11 + $0x18] sm:$0xf0] }
 0x930   : > { %10710 = vmatpush.bf16.msra.mxu2 %v15930_v40  ;;  %v10383_v2 = vpop.f32.mrf.mxu0  ;;  %v15719_v40 = vld [vmem:[#allocation11 + $0x158] sm:$0xf0] }
 0x931   : > { %10685 = vmatpush.bf16.msra.mxu0 %v15658_v47  ;;  %v17842_v47 = vld [vmem:[#allocation11 + $0x38c] sm:$0xf]  ;;  %v15722_v33 = vor.u32 %v17770_v4, %v15719_v40  ;;  %v15978_v2 = vor.u32 %v17834_v19, %v15975_v50  ;;  %v16442_v40 = vor.u32 %v17950_v10, %v16439_v53  ;;  %v16295_v12 = vld [vmem:[#allocation11 + $0x5d8] sm:$0xf0] }
 0x932   : > { %10699 = vmatpush.bf16.msra.mxu1 %v15770_v13  ;;  %10679 = vmatmul.bf16.vlgmr.msrb.gmra.mxu3 %v21750_v55  ;;  %v21771_v24 = vpop.f32.mrf.mxu2  ;;  %v16010_v1 = vor.u32 %v17842_v47, %v16007_v28  ;;  %v17730_v13 = vld [vmem:[#allocation11 + $0xc] sm:$0xf]  ;;  %v16423_v47 = vld [vmem:[#allocation11 + $0x6d8] sm:$0xf0] }
 0x933   : > { %10723 = vmatpush.bf16.msra.mxu3 %v16058_v56  ;;  %v21773_v45 = vpop.f32.mrf.mxu3  ;;  %v17830_v4 = vld [vmem:[#allocation11 + $0x32c] sm:$0xf]  ;;  %v16135_v19 = vld [vmem:[#allocation11 + $0x498] sm:$0xf0] }
 0x934   : > { %10711 = vmatpush.bf16.msra.mxu2 %v15914_v61  ;;  %v15850_v61 = vor.u32 %v17802_v20, %v15847_v27  ;;  %v15959_v20 = vld [vmem:[#allocation11 + $0x338] sm:$0xf0]  ;;  %v17946_v27 = vld [vmem:[#allocation11 + $0x6cc] sm:$0xf] }
 0x935   : > { %10686 = vmatpush.bf16.msra.mxu0 %v15642_v63  ;;  %v15578_v63 = vor.u32 %v17734_v26, %v15575_v22  ;;  %v17878_v26 = vld [vmem:[#allocation11 + $0x4ac] sm:$0xf]  ;;  %v16151_v22 = vld [vmem:[#allocation11 + $0x4b8] sm:$0xf0]  ;;  %v15962_v36 = vor.u32 %v17830_v4, %v15959_v20  ;;  %v16426_v44 = vor.u32 %v17946_v27, %v16423_v47 }
 0x936   : > { %10700 = vmatpush.bf16.msra.mxu1 %v15754_v18  ;;  %v15994_v18 = vor.u32 %v17838_v29, %v15991_v43  ;;  %v16279_v29 = vld [vmem:[#allocation11 + $0x5b8] sm:$0xf0]  ;;  %v17898_v20 = vld [vmem:[#allocation11 + $0x54c] sm:$0xf] }
 0x937   : > { %10724 = vmatpush.bf16.msra.mxu3 %v16042_v7  ;;  %v15562_v7 = vor.u32 %v17730_v13, %v15559_v17  ;;  %v15943_v43 = vld [vmem:[#allocation11 + $0x318] sm:$0xf0] }
 0x938   : > { %10712 = vmatpush.bf16.msra.mxu2 %v15898_v3  ;;  %v17762_v3 = vld [vmem:[#allocation11 + $0x10c] sm:$0xf]  ;;  %v21777_v58 = vpop.f32.mrf.mxu0  ;;  %v16407_v13 = vld [vmem:[#allocation11 + $0x6b8] sm:$0xf0] }
 0x939   : > { %10687 = vmatpush.bf16.msra.mxu0 %v15626_v52  ;;  %v16183_v52 = vld [vmem:[#allocation11 + $0x4f8] sm:$0xf0]  ;;  %v15690_v51 = vor.u32 %v17762_v3, %v15687_v35  ;;  %v16282_v3 = vor.u32 %v17910_v6, %v16279_v29  ;;  %v17874_v35 = vld [vmem:[#allocation11 + $0x48c] sm:$0xf] }
 0x93a   : > { %10701 = vmatpush.bf16.msra.mxu1 %v15738_v42  ;;  %v10409_v56 = vpop.f32.mrf.mxu2  ;;  %v16186_v59 = vor.u32 %v17886_v9, %v16183_v52  ;;  %v15818_v42 = vor.u32 %v17794_v60, %v15815_v57  ;;  %v16567_v17 = vld [vmem:[#allocation11 + $0x7f8] sm:$0xf0]  ;;  %v17906_v9 = vld [vmem:[#allocation11 + $0x58c] sm:$0xf] }
 0x93b   : > { %10725 = vmatpush.bf16.msra.mxu3 %v16026_v48  ;;  %v10422_v49 = vpop.f32.mrf.mxu3  ;;  %v17914_v48 = vld [vmem:[#allocation11 + $0x5cc] sm:$0xf]  ;;  %v16551_v57 = vld [vmem:[#allocation11 + $0x7d8] sm:$0xf0] }
 0x93c   : > { %10713 = vmatpush.bf16.msra.mxu2 %v15882_v23  ;;  %v17918_v23 = vld [vmem:[#allocation11 + $0x5ec] sm:$0xf]  ;;  %v16119_v10 = vld [vmem:[#allocation11 + $0x478] sm:$0xf0] }
 0x93d   : > { %10688 = vmatpush.bf16.msra.mxu0 %v15610_v0  ;;  %v9084_v0 = vperm.slane %v21775_v37, 0  ;;  %v16314_v41 = vor.u32 %v17918_v23, %v16311_v14  ;;  %v17978_v49 = vld [vmem:[#allocation11 + $0x7cc] sm:$0xf]  ;;  %v16231_v27 = vld [vmem:[#allocation11 + $0x558] sm:$0xf0] }
 0x93e   : > { %10702 = vmatpush.bf16.msra.mxu1 %v15722_v33  ;;  %v16298_v33 = vor.u32 %v17914_v48, %v16295_v12  ;;  %v16103_v48 = vld [vmem:[#allocation11 + $0x458] sm:$0xf0]  ;;  %v17894_v29 = vld [vmem:[#allocation11 + $0x52c] sm:$0xf] }
 0x93f   : > { %10726 = vmatpush.bf16.msra.mxu3 %v16010_v1  ;;  %v10382_v62 = vadd.f32 %v21766_v11, %v9084_v0  ;;  %v17826_v1 = vld [vmem:[#allocation11 + $0x30c] sm:$0xf]  ;;  %v16154_v11 = vor.u32 %v17878_v26, %v16151_v22  ;;  %v16554_v0 = vor.u32 %v17978_v49, %v16551_v57  ;;  %v16327_v49 = vld [vmem:[#allocation11 + $0x618] sm:$0xf0] }
 0x940   : > { %10714 = vmatpush.bf16.msra.mxu2 %v15866_v15  ;;  %v16167_v15 = vld [vmem:[#allocation11 + $0x4d8] sm:$0xf0] }
 0x941   : > { %10689 = vmatpush.bf16.msra.mxu0 %v15594_v31  ;;  %v16170_v28 = vor.u32 %v17882_v46, %v16167_v15  ;;  %v10395_v56 = vadd.f32 %v21768_v32, %v10382_v62  ;;  %v17974_v46 = vld [vmem:[#allocation11 + $0x7ac] sm:$0xf]  ;;  %v16535_v15 = vld [vmem:[#allocation11 + $0x7b8] sm:$0xf0] }
 0x942   : > { %10703 = vmatpush.bf16.msra.mxu1 %v15706_v25  ;;  %v21780_v31 = vpop.f32.mrf.mxu2  ;;  %v17982_v25 = vld [vmem:[#allocation11 + $0x7ec] sm:$0xf]  ;;  %v16538_v47 = vor.u32 %v17974_v46, %v16535_v15  ;;  %v16519_v62 = vld [vmem:[#allocation11 + $0x798] sm:$0xf0]  ;;  %v17992_v46 = vld [vmem:[#allocation17 + $0x38] sm:$0xff] }
 0x943   : > { %10727 = vmatpush.bf16.msra.mxu3 %v15994_v18  ;;  %v16570_v52 = vor.u32 %v17982_v25, %v16567_v17  ;;  %v16391_v18 = vld [vmem:[#allocation11 + $0x698] sm:$0xf0]  ;;  %v10408_v32 = vadd.f32 %v21771_v24, %v10395_v56  ;;  %v17858_v56 = vld [vmem:[#allocation11 + $0x40c] sm:$0xf] }
 0x944   : > { %10715 = vmatpush.bf16.msra.mxu2 %v15850_v61  ;;  %v10435_v61 = vpop.f32.mrf.mxu0  ;;  %v10446_v23 = vpop.f32.mrf.mxu1  ;;  %v16343_v25 = vld [vmem:[#allocation11 + $0x638] sm:$0xf0] }
 0x945   : > { %10690 = vmatpush.bf16.msra.mxu0 %v15578_v63  ;;  %v17942_v63 = vld [vmem:[#allocation11 + $0x6ac] sm:$0xf]  ;;  %v10421_v24 = vadd.f32 %v21773_v45, %v10408_v32  ;;  %v16087_v45 = vld [vmem:[#allocation11 + $0x438] sm:$0xf0] }
 0x946   : > { %10704 = vmatpush.bf16.msra.mxu1 %v15690_v51  ;;  %v16410_v60 = vor.u32 %v17942_v63, %v16407_v13  ;;  %v17902_v51 = vld [vmem:[#allocation11 + $0x56c] sm:$0xf] }
 0x947   : > { %10728 = vmatpush.bf16.msra.mxu3 %v15978_v2  ;;  %v10434_v22 = vadd.f32 %v21777_v58, %v10421_v24  ;;  %v17970_v61 = vld [vmem:[#allocation11 + $0x78c] sm:$0xf]  ;;  %v16455_v24 = vld [vmem:[#allocation11 + $0x718] sm:$0xf0] }
 0x948   : > { %10716 = vmatpush.bf16.msra.mxu2 %v15834_v8  ;;  %v15946_v8 = vor.u32 %v17826_v1, %v15943_v43  ;;  %v16234_v1 = vor.u32 %v17898_v20, %v16231_v27  ;;  %v16215_v43 = vld [vmem:[#allocation11 + $0x538] sm:$0xf0]  ;;  %v16522_v63 = vor.u32 %v17970_v61, %v16519_v62  ;;  %v17926_v13 = vld [vmem:[#allocation11 + $0x62c] sm:$0xf] }
 0x949   : > { %10691 = vmatpush.bf16.msra.mxu0 %v15562_v7  ;;  %10705 = vmatmul.bf16.vlgmr.msra.gmra.mxu1 %v21651_v54  ;;  %v17938_v54 = vld [vmem:[#allocation11 + $0x68c] sm:$0xf]  ;;  %v10447_v58 = vadd.f32 %v10446_v23, %v10434_v22  ;;  %v16487_v23 = vld [vmem:[#allocation11 + $0x758] sm:$0xf0]  ;;  %v17990_v22 = vld [vmem:[#allocation17 + $0x28] sm:$0xff] }
 0x94a   : > { %10749 = vmatpush.bf16.msrb.mxu1 %v16314_v41  ;;  %v10461_v50 = vpop.f32.mrf.mxu2  ;;  %v17870_v7 = vld [vmem:[#allocation11 + $0x46c] sm:$0xf]  ;;  %v16394_v53 = vor.u32 %v17938_v54, %v16391_v18  ;;  %v16375_v41 = vld [vmem:[#allocation11 + $0x678] sm:$0xf0] }
 0x94b   : > { %10729 = vmatpush.bf16.msra.mxu3 %v15962_v36  ;;  %v16122_v2 = vor.u32 %v17870_v7, %v16119_v10  ;;  %v17922_v18 = vld [vmem:[#allocation11 + $0x60c] sm:$0xf]  ;;  %v17991_v27 = vld [vmem:[#allocation17 + $0x30] sm:$0xff] }
 0x94c   : > { %10717 = vmatpush.bf16.msra.mxu2 %v15818_v42  ;;  %10692 = vmatmul.bf16.vlgmr.msra.gmra.mxu0 %v21642_v5  ;;  %v16263_v5 = vld [vmem:[#allocation11 + $0x598] sm:$0xf0]  ;;  %v17934_v42 = vld [vmem:[#allocation11 + $0x66c] sm:$0xf]  ;;  %v10485_v26 = vpop.f32.mrf.mxu0  ;;  %v10448_v36 = vpop.f32.mrf.mxu1 }
 0x94d   : > { %10736 = vmatpush.bf16.msrb.mxu0 %v16186_v59  ;;  %v16266_v14 = vor.u32 %v17906_v9, %v16263_v5  ;;  %v16247_v59 = vld [vmem:[#allocation11 + $0x578] sm:$0xf0]  ;;  %v16378_v12 = vor.u32 %v17934_v42, %v16375_v41  ;;  %v16346_v9 = vor.u32 %v17926_v13, %v16343_v25  ;;  %v17890_v5 = vld [vmem:[#allocation11 + $0x50c] sm:$0xf] }
 0x94e   : > { %10750 = vmatpush.bf16.msrb.mxu1 %v16298_v33  ;;  %v16250_v4 = vor.u32 %v17902_v51, %v16247_v59  ;;  %v16359_v33 = vld [vmem:[#allocation11 + $0x658] sm:$0xf0]  ;;  %v17958_v42 = vld [vmem:[#allocation11 + $0x72c] sm:$0xf] }
 0x94f   : > { %10718 = vmatmul.bf16.vlgmr.msra.gmra.mxu2 %v21658_v30  ;;  %v16138_v30 = vor.u32 %v17874_v35, %v16135_v19  ;;  %10730 = vmatpush.bf16.msra.mxu3 %v15946_v8  ;;  %v16218_v19 = vor.u32 %v17894_v29, %v16215_v43  ;;  %v16071_v8 = vld [vmem:[#allocation11 + $0x418] sm:$0xf0]  ;;  %v17989_v36 = vld [vmem:[#allocation17 + $0x20] sm:$0xff] }
 0x950   : > { %10762 = vmatpush.bf16.msrb.mxu2 %v16442_v40  ;;  %v17866_v40 = vld [vmem:[#allocation11 + $0x44c] sm:$0xf]  ;;  %v16471_v41 = vld [vmem:[#allocation11 + $0x738] sm:$0xf0] }
 0x951   : > { %10737 = vmatpush.bf16.msrb.mxu0 %v16170_v28  ;;  %v17930_v28 = vld [vmem:[#allocation11 + $0x64c] sm:$0xf] }
 0x952   : > { %10751 = vmatpush.bf16.msrb.mxu1 %v16282_v3  ;;  %10731 = vmatmul.bf16.vlgmr.msra.gmra.mxu3 %v21662_v34  ;;  %v16106_v34 = vor.u32 %v17866_v40, %v16103_v48  ;;  %v16362_v6 = vor.u32 %v17930_v28, %v16359_v33  ;;  %v21791_v17 = vpop.f32.mrf.mxu2  ;;  %v16503_v3 = vld [vmem:[#allocation11 + $0x778] sm:$0xf0]  ;;  %v17954_v48 = vld [vmem:[#allocation11 + $0x70c] sm:$0xf] }
 0x953   : > { %10775 = vmatpush.bf16.msrb.mxu3 %v16570_v52  ;;  %v16199_v52 = vld [vmem:[#allocation11 + $0x518] sm:$0xf0]  ;;  %v16458_v33 = vor.u32 %v17954_v48, %v16455_v24 }
 0x954   : > { %10763 = vmatpush.bf16.msrb.mxu2 %v16426_v44  ;;  %v17862_v44 = vld [vmem:[#allocation11 + $0x42c] sm:$0xf]  ;;  %v10487_v57 = vpop.f32.mrf.mxu0  ;;  %v10498_v7 = vpop.f32.mrf.mxu1  ;;  %v16202_v10 = vor.u32 %v17890_v5, %v16199_v52  ;;  %v17999_v24 = vld [vmem:[#allocation17 + $0x70] sm:$0xff] }
 0x955   : > { %10738 = vmatpush.bf16.msrb.mxu0 %v16154_v11  ;;  %v17966_v11 = vld [vmem:[#allocation11 + $0x76c] sm:$0xf]  ;;  %v16090_v35 = vor.u32 %v17862_v44, %v16087_v45  ;;  %v10472_v50 = vpop.f32.mrf.mxu3 }
 0x956   : > { %10752 = vmatpush.bf16.msrb.mxu1 %v16266_v14  ;;  %v16506_v54 = vor.u32 %v17966_v11, %v16503_v3  ;;  %v16074_v14 = vor.u32 %v17858_v56, %v16071_v8  ;;  %v17985_v52 = vld [vmem:[#allocation17] sm:$0xff] }
 0x957   : > { %10776 = vmatpush.bf16.msrb.mxu3 %v16554_v0 }
 0x958   : > { %10764 = vmatpush.bf16.msrb.mxu2 %v16410_v60  ;;  %v10460_v60 = vadd.f32 %v21780_v31, %v10447_v58  ;;  %v9085_v31 = vperm.slane %v21775_v37, 1  ;;  %v17987_v58 = vld [vmem:[#allocation17 + $0x10] sm:$0xff] }
 0x959   : > { %10739 = vmatpush.bf16.msrb.mxu0 %v16138_v30  ;;  %v17962_v30 = vld [vmem:[#allocation11 + $0x74c] sm:$0xf] }
 0x95a   : > { %10753 = vmatpush.bf16.msrb.mxu1 %v16250_v4  ;;  %v10473_v32 = vadd.f32 %v10472_v50, %v10460_v60  ;;  %v16490_v51 = vor.u32 %v17962_v30, %v16487_v23  ;;  %v10513_v59 = vpop.f32.mrf.mxu2  ;;  %v16474_v4 = vor.u32 %v17958_v42, %v16471_v41  ;;  %v18000_v42 = vld [vmem:[#allocation17 + $0x78] sm:$0xff] }
 0x95b   : > { %10777 = vmatpush.bf16.msrb.mxu3 %v16538_v47 }
 0x95c   : > { %10765 = vmatpush.bf16.msrb.mxu2 %v16394_v53  ;;  %v16330_v53 = vor.u32 %v17922_v18, %v16327_v49  ;;  %v10788_v0 = vmax.f32 %v10473_v32, 0.0  ;;  %v10500_v20 = vpop.f32.mrf.mxu1 }
 0x95d   : > { %10740 = vmatpush.bf16.msrb.mxu0 %v16122_v2  ;;  %v10486_v2 = vadd.f32 %v10485_v26, %v9085_v31 }
 0x95e   : > { %10754 = vmatpush.bf16.msrb.mxu1 %v16234_v1  ;;  %v10792_v15 = vrot.slane %v10788_v0, 4 }
 0x95f   : > { %10778 = vmatpush.bf16.msrb.mxu3 %v16522_v63  ;;  %v10499_v28 = vadd.f32 %v10498_v7, %v10486_v2 }
 0x960   : > { %10766 = vmatpush.bf16.msrb.mxu2 %v16378_v12  ;;  %v10793_v40 = vadd.f32 %v10792_v15, %v10788_v0  ;;  %v10474_v12 = vpop.f32.mrf.mxu3 }
 0x961   : > { %10741 = vmatpush.bf16.msrb.mxu0 %v16106_v34 }
 0x962   : > { %10755 = vmatpush.bf16.msrb.mxu1 %v16218_v19  ;;  %v10794_v47 = vrot.slane %v10793_v40, 2  ;;  %v17986_v19 = vld [vmem:[#allocation17 + $0x8] sm:$0xff] }
 0x963   : > { %10779 = vmatpush.bf16.msrb.mxu3 %v16506_v54 }
 0x964   : > { %10767 = vmatpush.bf16.msrb.mxu2 %v16362_v6  ;;  %v10795_v26 = vadd.f32 %v10794_v47, %v10793_v40  ;;  %v17988_v6 = vld [vmem:[#allocation17 + $0x18] sm:$0xff] }
 0x965   : > { %10742 = vmatpush.bf16.msrb.mxu0 %v16090_v35  ;;  %v21809_v40 = vld [vmem:[#allocation14] sm:$0xf] }
 0x966   : > { %10756 = vmatpush.bf16.msrb.mxu1 %v16202_v10  ;;  %v10796_v61 = vrot.slane %v10795_v26, 1  ;;  %v10550_v44 = vpop.f32.mrf.mxu1  ;;  %v10906_v47 = vperm.slane %v21809_v40, 0 }
 0x967   : > { %10780 = vmatpush.bf16.msrb.mxu3 %v16490_v51 }
 0x968   : > { %10768 = vmatpush.bf16.msrb.mxu2 %v16346_v9  ;;  %v10797_v62 = vadd.f32 %v10796_v61, %v10795_v26  ;;  %v21819_v26 = vld [vmem:[%s21874_s11] sm:$0xff]  ;;  %v17998_v61 = vld [vmem:[#allocation17 + $0x68] sm:$0xff] }
 0x969   : > { %10743 = vmatpush.bf16.msrb.mxu0 %v16074_v14  ;;  %10757 = vmatmul.bf16.vlgmr.msrb.gmra.mxu1 %v21730_v21  ;;  %v10537_v34 = vpop.f32.mrf.mxu0  ;;  %v10524_v21 = vpop.f32.mrf.mxu3 }
 0x96a   : > { %11223 = vmatpush.bf16.msra.mxu1 %v18000_v42 }
 0x96b   : > { %10781 = vmatpush.bf16.msrb.mxu3 %v16474_v4 }
 0x96c   : > { %10769 = vmatpush.bf16.msrb.mxu2 %v16330_v53  ;;  %10744 = vmatmul.bf16.vlgmr.msrb.gmra.mxu0 %v21693_v38  ;;  %v10512_v38 = vadd.f32 %v21791_v17, %v10499_v28 }
 0x96d   : > { %11210 = vmatpush.bf16.msra.mxu0 %v17992_v46 }
 0x96e   : > { %v10525_v1 = vadd.f32 %v10524_v21, %v10512_v38  ;;  %v10552_v35 = vpop.f32.mrf.mxu1  ;;  %11224 = vmatpush.bf16.msra.mxu1 %v17999_v24 }
 0x96f   : > { %10770 = vmatmul.bf16.vlgmr.msrb.gmra.mxu2 %v21700_v39  ;;  %10782 = vmatpush.bf16.msrb.mxu3 %v16458_v33  ;;  %v10816_v39 = vmul.f32 %v10797_v62, %v21445_v16 }
 0x970   : > { %v10538_v43 = vadd.f32 %v10537_v34, %v10525_v1  ;;  %v10934_v1 = vunpack.c.l.bf16 %v21819_v26 }
 0x971   : > { %11211 = vmatpush.bf16.msra.mxu0 %v17991_v27  ;;  %v21801_v45 = vsub.f32 %v10788_v0, %v10816_v39  ;;  %v10539_v25 = vpop.f32.mrf.mxu0  ;;  %v10526_v17 = vpop.f32.mrf.mxu3  ;;  %v21813_v27 = vld [vmem:[#allocation15] sm:$0xf] }
 0x972   : > { %10783 = vmatmul.bf16.vlgmr.msrb.gmra.mxu3 %v21750_v55  ;;  %v10563_v63 = vpop.f32.mrf.mxu2  ;;  %v10551_v3 = vadd.f32 %v10550_v44, %v10538_v43  ;;  %v10920_v34 = vperm.slane %v21813_v27, 0  ;;  %11225 = vmatpush.bf16.msra.mxu1 %v17998_v61  ;;  %v9086_v44 = vperm.slane %v21775_v37, 2  ;;  %v17996_v25 = vld [vmem:[#allocation17 + $0x58] sm:$0xff] }
 0x973   : > { %v10824_v29 = vmul.f32 %v21801_v45, %v21801_v45 }
 0x974   : > { %v10564_v8 = vadd.f32 %v10563_v63, %v10551_v3 }
 0x975   : > { %11212 = vmatpush.bf16.msra.mxu0 %v17990_v22  ;;  %v10828_v13 = vrot.slane %v10824_v29, 4 }
 0x977   : > { %v10829_v11 = vadd.f32 %v10828_v13, %v10824_v29 }
 0x979   : > { %11213 = vmatpush.bf16.msra.mxu0 %v17989_v36  ;;  %v10830_v55 = vrot.slane %v10829_v11, 2  ;;  %v10576_v5 = vpop.f32.mrf.mxu3 }
 0x97a   : > { %v10565_v60 = vpop.f32.mrf.mxu2  ;;  %v10577_v18 = vadd.f32 %v10576_v5, %v10564_v8  ;;  %v17994_v5 = vld [vmem:[#allocation17 + $0x48] sm:$0xff] }
 0x97b   : > { %v10831_v56 = vadd.f32 %v10830_v55, %v10829_v11 }
 0x97c   : > { %v10789_v57 = vmax.f32 %v10577_v18, 0.0 }
 0x97d   : > { %11214 = vmatpush.bf16.msra.mxu0 %v17988_v6  ;;  %v10832_v9 = vrot.slane %v10831_v56, 1  ;;  %v17997_v6 = vld [vmem:[#allocation17 + $0x60] sm:$0xff] }
 0x97e   : > { %v10798_v23 = vrot.slane %v10789_v57, 4  ;;  %11226 = vmatpush.bf16.msra.mxu1 %v17997_v6 }
 0x97f   : > { %v10833_v54 = vadd.f32 %v10832_v9, %v10831_v56  ;;  %v17995_v56 = vld [vmem:[#allocation17 + $0x50] sm:$0xff] }
 0x980   : > { %v10799_v14 = vadd.f32 %v10798_v23, %v10789_v57 }
 0x981   : > { %11215 = vmatpush.bf16.msra.mxu0 %v17987_v58  ;;  %v10852_v49 = vmul.f32 %v10833_v54, %v21445_v16  ;;  %v10578_v50 = vpop.f32.mrf.mxu3 }
 0x982   : > { %v10800_v7 = vrot.slane %v10799_v14, 2  ;;  %11227 = vmatpush.bf16.msra.mxu1 %v17996_v25 }
 0x983   : > { %v10856_v30 = vadd.f32 1e-05, %v10852_v49  ;;  %v17993_v49 = vld [vmem:[#allocation17 + $0x40] sm:$0xff] }
 0x984   : > { %v10801_v10 = vadd.f32 %v10800_v7, %v10799_v14 }
 0x985   : > { %11216 = vmatpush.bf16.msra.mxu0 %v17986_v19  ;;  %18181 = vrsqrt.f32 %v10856_v30  ;;  %vm10866_vm10 = vweird.f32 %v10856_v30 }
 0x986   : > { %v10802_v31 = vrot.slane %v10801_v10, 1  ;;  %v10602_v15 = vpop.f32.mrf.mxu1  ;;  %11228 = vmatpush.bf16.msra.mxu1 %v17995_v56  ;;  %v18004_v56 = vld [vmem:[#allocation17 + $0x98] sm:$0xff] }
 0x988   : > { %v10803_v51 = vadd.f32 %v10802_v31, %v10801_v10 }
 0x989   : > { %11217 = vmatpush.bf16.msra.mxu0 %v17985_v52  ;;  %v10589_v0 = vpop.f32.mrf.mxu0 }
 0x98a   : > { %v10817_v41 = vmul.f32 %v10803_v51, %v21445_v16  ;;  %v10590_v58 = vadd.f32 %v10589_v0, %v9086_v44  ;;  %11229 = vmatpush.bf16.msra.mxu1 %v17994_v5  ;;  %v18008_v44 = vld [vmem:[#allocation17 + $0xb8] sm:$0xff] }
 0x98b   : > { %v18182_v32 = vpop.eup %18181  ;;  %11236 = vmatpush.bf16.msra.mxu2 %v18008_v44 }
 0x98c   : > { %v10861_v53 = vmul.f32 %v18182_v32, %v10856_v30  ;;  %v21807_v2 = vsub.f32 %v10789_v57, %v10817_v41  ;;  %vm10867_vm9 = vweird.f32 %v18182_v32  ;;  %v10603_v19 = vadd.f32 %v10602_v15, %v10590_v58 }
 0x98d   : > { %vm10868_vm11 = vmor %vm10866_vm10, %vm10867_vm9 }
 0x98e   : > { %v10862_v59 = vmul.f32 %v18182_v32, %v10861_v53  ;;  %v10825_v12 = vmul.f32 %v21807_v2, %v21807_v2  ;;  %v10604_v21 = vpop.f32.mrf.mxu1  ;;  %11230 = vmatpush.bf16.msra.mxu1 %v17993_v49 }
 0x990   : > { %v10863_v46 = vmul.f32 0.5, %v10862_v59  ;;  %v10834_v28 = vrot.slane %v10825_v12, 4  ;;  %v10907_v59 = vperm.slane %v21809_v40, 1 }
 0x991   : > { %v10591_v22 = vpop.f32.mrf.mxu0 }
 0x992   : > { %v10864_v4 = vsub.f32 1.5, %v10863_v46  ;;  %v10615_v48 = vpop.f32.mrf.mxu2  ;;  %v10835_v62 = vadd.f32 %v10834_v28, %v10825_v12  ;;  %v10921_v46 = vperm.slane %v21813_v27, 1  ;;  %v10935_v12 = vunpack.c.h.bf16 %v21819_v26 }
 0x993   : > { %v10616_v9 = vadd.f32 %v10615_v48, %v10603_v19 }
 0x994   : > { %v10865_v20 = vmul.f32 %v18182_v32, %v10864_v4  ;;  %v10836_v39 = vrot.slane %v10835_v62, 2 }
 0x995   : > { %v10628_v13 = vpop.f32.mrf.mxu3 }
 0x996   : > { %v10869_v33 = vsel %vm10868_vm11, %v18182_v32, %v10865_v20  ;;  %v10837_v43 = vadd.f32 %v10836_v39, %v10835_v62  ;;  %v10629_v18 = vadd.f32 %v10628_v13, %v10616_v9 }
 0x997   : > { %v10900_v38 = vmul.f32 %v10869_v33, %v21801_v45 }
 0x998   : > { %v10838_v17 = vrot.slane %v10837_v43, 1 }
 0x999   : > { %v10914_v36 = vmul.f32 %v10906_v47, %v10900_v38 }
 0x99a   : > { %v10617_v29 = vpop.f32.mrf.mxu2  ;;  %v10839_v11 = vadd.f32 %v10838_v17, %v10837_v43  ;;  %v18007_v43 = vld [vmem:[#allocation17 + $0xb0] sm:$0xff] }
 0x99b   : > { %v10928_v63 = vadd.f32 %v10920_v34, %v10914_v36  ;;  %11237 = vmatpush.bf16.msra.mxu2 %v18007_v43 }
 0x99c   : > { %v10853_v35 = vmul.f32 %v10839_v11, %v21445_v16 }
 0x99d   : > { %v10938_v45 = vmul.f32 %v10934_v1, %v10928_v63  ;;  %v10630_v60 = vpop.f32.mrf.mxu3 }
 0x99e   : > { %v10857_v8 = vadd.f32 1e-05, %v10853_v35  ;;  %v9087_v60 = vperm.slane %v21775_v37, 3 }
 0x99f   : > { %v10942_v3 = vmul.f32 1.6666666, %v10938_v45  ;;  %v18006_v45 = vld [vmem:[#allocation17 + $0xa8] sm:$0xff] }
 0x9a0   : > { %18183 = vrsqrt.f32 %v10857_v8  ;;  %vm10876_vm13 = vweird.f32 %v10857_v8  ;;  %11238 = vmatpush.bf16.msra.mxu2 %v18006_v45 }
 0x9a1   : > { %v10946_v55 = vpack.c.bf16 %v10942_v3, %v10942_v3  ;;  %v18005_v3 = vld [vmem:[#allocation17 + $0xa0] sm:$0xff] }
 0x9a3   : > { %11218 = vmatmul.bf16.vlgmr.msra.gmra.mxu0 %v10946_v55 }
 0x9a4   : > { %11239 = vmatpush.bf16.msra.mxu2 %v18005_v3 }
 0x9a6   : > { %v10654_v54 = vpop.f32.mrf.mxu1  ;;  %v18184_v57 = vpop.eup %18183 }
 0x9a7   : > { %v10871_v30 = vmul.f32 %v18184_v57, %v10857_v8  ;;  %vm10877_vm12 = vweird.f32 %v18184_v57 }
 0x9a8   : > { %vm10878_vm14 = vmor %vm10876_vm13, %vm10877_vm12  ;;  %11240 = vmatpush.bf16.msra.mxu2 %v18004_v56  ;;  %v18012_v56 = vld [vmem:[#allocation17 + $0xd8] sm:$0xff] }
 0x9a9   : > { %v10641_v52 = vpop.f32.mrf.mxu0  ;;  %v10872_v14 = vmul.f32 %v18184_v57, %v10871_v30  ;;  %v18002_v30 = vld [vmem:[#allocation17 + $0x88] sm:$0xff] }
 0x9aa   : > { %v10642_v23 = vadd.f32 %v10641_v52, %v10629_v18 }
 0x9ab   : > { %v10873_v7 = vmul.f32 0.5, %v10872_v14 }
 0x9ac   : > { %v10655_v31 = vadd.f32 %v10654_v54, %v10642_v23  ;;  %v18003_v54 = vld [vmem:[#allocation17 + $0x90] sm:$0xff] }
 0x9ad   : > { %v10874_v53 = vsub.f32 1.5, %v10873_v7  ;;  %11241 = vmatpush.bf16.msra.mxu2 %v18003_v54  ;;  %v18001_v7 = vld [vmem:[#allocation17 + $0x80] sm:$0xff]  ;;  %v18010_v54 = vld [vmem:[#allocation17 + $0xc8] sm:$0xff] }
 0x9ae   : > { %v10656_v32 = vpop.f32.mrf.mxu1 }
 0x9af   : > { %v10875_v51 = vmul.f32 %v18184_v57, %v10874_v53 }
 0x9b1   : > { %v10643_v10 = vpop.f32.mrf.mxu0  ;;  %v10879_v42 = vsel %vm10878_vm14, %v18184_v57, %v10875_v51  ;;  %11242 = vmatpush.bf16.msra.mxu2 %v18002_v30 }
 0x9b2   : > { %v10667_v50 = vpop.f32.mrf.mxu2  ;;  %v10901_v41 = vmul.f32 %v10879_v42, %v21807_v2 }
 0x9b3   : > { %v10668_v0 = vadd.f32 %v10667_v50, %v10655_v31 }
 0x9b4   : > { %v10915_v48 = vmul.f32 %v10907_v59, %v10901_v41 }
 0x9b5   : > { %v10680_v4 = vpop.f32.mrf.mxu3  ;;  %11243 = vmatpush.bf16.msra.mxu2 %v18001_v7 }
 0x9b6   : > { %v10681_v24 = vadd.f32 %v10680_v4, %v10668_v0  ;;  %v10929_v47 = vadd.f32 %v10921_v46, %v10915_v48  ;;  %v10908_v4 = vperm.slane %v21809_v40, 2 }
 0x9b8   : > { %v10790_v20 = vmax.f32 %v10681_v24, 0.0  ;;  %v10939_v33 = vmul.f32 %v10935_v12, %v10929_v47  ;;  %v21837_v12 = vld [vmem:[%s21874_s11 + $0x8] sm:$0xff] }
 0x9ba   : > { %v10669_v15 = vpop.f32.mrf.mxu2  ;;  %v10804_v28 = vrot.slane %v10790_v20, 4  ;;  %v10943_v61 = vmul.f32 1.6666666, %v10939_v33 }
 0x9bc   : > { %v10805_v22 = vadd.f32 %v10804_v28, %v10790_v20  ;;  %v10947_v34 = vpack.c.bf16 %v10943_v61, %v10943_v61  ;;  %v10922_v28 = vperm.slane %v21813_v27, 2 }
 0x9bd   : > { %v10682_v38 = vpop.f32.mrf.mxu3 }
 0x9be   : > { %v10806_v62 = vrot.slane %v10805_v22, 2  ;;  %11231 = vmatmul.bf16.vlgmr.msra.gmra.mxu1 %v10947_v34  ;;  %v10936_v38 = vunpack.c.l.bf16 %v21837_v12 }
 0x9c0   : > { %v10807_v21 = vadd.f32 %v10806_v62, %v10805_v22 }
 0x9c2   : > { %v10808_v2 = vrot.slane %v10807_v21, 1 }
 0x9c4   : > { %v10809_v1 = vadd.f32 %v10808_v2, %v10807_v21 }
 0x9c6   : > { %v10706_v39 = vpop.f32.mrf.mxu1  ;;  %v10818_v6 = vmul.f32 %v10809_v1, %v21445_v16 }
 0x9c8   : > { %v10822_v26 = vsub.f32 %v10790_v20, %v10818_v6 }
 0x9c9   : > { %v10693_v36 = vpop.f32.mrf.mxu0 }
 0x9ca   : > { %v10826_v63 = vmul.f32 %v10822_v26, %v10822_v26  ;;  %v10694_v52 = vadd.f32 %v10693_v36, %v9087_v60 }
 0x9cc   : > { %v10840_v17 = vrot.slane %v10826_v63, 4  ;;  %v10707_v57 = vadd.f32 %v10706_v39, %v10694_v52 }
 0x9ce   : > { %v10708_v25 = vpop.f32.mrf.mxu1  ;;  %v10841_v58 = vadd.f32 %v10840_v17, %v10826_v63  ;;  %v18016_v63 = vld [vmem:[#allocation17 + $0xf8] sm:$0xff]  ;;  %v18015_v17 = vld [vmem:[#allocation17 + $0xf0] sm:$0xff] }
 0x9cf   : > { %11249 = vmatpush.bf16.msra.mxu3 %v18016_v63 }
 0x9d0   : > { %v10842_v11 = vrot.slane %v10841_v58, 2 }
 0x9d1   : > { %v10695_v13 = vpop.f32.mrf.mxu0 }
 0x9d2   : > { %v10719_v29 = vpop.f32.mrf.mxu2  ;;  %v10843_v55 = vadd.f32 %v10842_v11, %v10841_v58  ;;  %v18014_v11 = vld [vmem:[#allocation17 + $0xe8] sm:$0xff] }
 0x9d3   : > { %v10720_v50 = vadd.f32 %v10719_v29, %v10707_v57  ;;  %11250 = vmatpush.bf16.msra.mxu3 %v18015_v17 }
 0x9d4   : > { %v10844_v8 = vrot.slane %v10843_v55, 1 }
 0x9d5   : > { %v10732_v19 = vpop.f32.mrf.mxu3 }
 0x9d6   : > { %v10845_v9 = vadd.f32 %v10844_v8, %v10843_v55  ;;  %v10733_v37 = vadd.f32 %v10732_v19, %v10720_v50  ;;  %v18013_v55 = vld [vmem:[#allocation17 + $0xe0] sm:$0xff] }
 0x9d7   : > { %11251 = vmatpush.bf16.msra.mxu3 %v18014_v11 }
 0x9d8   : > { %v10854_v5 = vmul.f32 %v10845_v9, %v21445_v16  ;;  %v18011_v9 = vld [vmem:[#allocation17 + $0xd0] sm:$0xff] }
 0x9da   : > { %v10721_v35 = vpop.f32.mrf.mxu2  ;;  %v10858_v18 = vadd.f32 1e-05, %v10854_v5 }
 0x9db   : > { %11252 = vmatpush.bf16.msra.mxu3 %v18013_v55 }
 0x9dc   : > { %18185 = vrsqrt.f32 %v10858_v18  ;;  %vm10886_vm0 = vweird.f32 %v10858_v18 }
 0x9dd   : > { %v10734_v49 = vpop.f32.mrf.mxu3 }
 0x9df   : > { %11253 = vmatpush.bf16.msra.mxu3 %v18012_v56 }
 0x9e2   : > { %v18186_v10 = vpop.eup %18185 }
 0x9e3   : > { %v10881_v32 = vmul.f32 %v18186_v10, %v10858_v18  ;;  %vm10887_vm15 = vweird.f32 %v18186_v10  ;;  %11254 = vmatpush.bf16.msra.mxu3 %v18011_v9  ;;  %v18009_v18 = vld [vmem:[#allocation17 + $0xc0] sm:$0xff] }
 0x9e4   : > { %vm10888_vm1 = vmor %vm10886_vm0, %vm10887_vm15 }
 0x9e5   : > { %v10882_v31 = vmul.f32 %v18186_v10, %v10881_v32 }
 0x9e6   : > { %v10758_v14 = vpop.f32.mrf.mxu1 }
 0x9e7   : > { %v10883_v0 = vmul.f32 0.5, %v10882_v31  ;;  %11255 = vmatpush.bf16.msra.mxu3 %v18010_v54  ;;  %v10923_v31 = vperm.slane %v21813_v27, 3 }
 0x9e9   : > { %v10745_v23 = vpop.f32.mrf.mxu0  ;;  %v10884_v41 = vsub.f32 1.5, %v10883_v0 }
 0x9ea   : > { %v10746_v53 = vadd.f32 %v10745_v23, %v10733_v37 }
 0x9eb   : > { %v10885_v15 = vmul.f32 %v18186_v10, %v10884_v41  ;;  %11256 = vmatpush.bf16.msra.mxu3 %v18009_v18 }
 0x9ec   : > { %v10759_v46 = vadd.f32 %v10758_v14, %v10746_v53 }
 0x9ed   : > { %v10889_v24 = vsel %vm10888_vm1, %v18186_v10, %v10885_v15 }
 0x9ee   : > { %v10760_v42 = vpop.f32.mrf.mxu1  ;;  %v10902_v20 = vmul.f32 %v10889_v24, %v10822_v26 }
 0x9f0   : > { %v10916_v22 = vmul.f32 %v10908_v4, %v10902_v20 }
 0x9f1   : > { %v10747_v59 = vpop.f32.mrf.mxu0 }
 0x9f2   : > { %v10771_v51 = vpop.f32.mrf.mxu2  ;;  %v10930_v34 = vadd.f32 %v10922_v28, %v10916_v22 }
 0x9f3   : > { %v10772_v48 = vadd.f32 %v10771_v51, %v10759_v46  ;;  %v10937_v51 = vunpack.c.h.bf16 %v21837_v12  ;;  %v18162_v46 = vld [vmem:[#allocation18] ss:$0 sm:$0xff] }
 0x9f4   : > { %v10940_v2 = vmul.f32 %v10936_v38, %v10930_v34 }
 0x9f5   : > { %v10784_v33 = vpop.f32.mrf.mxu3 }
 0x9f6   : > { %v10785_v61 = vadd.f32 %v10784_v33, %v10772_v48  ;;  %v10944_v39 = vmul.f32 1.6666666, %v10940_v2 }
 0x9f8   : > { %v10791_v62 = vmax.f32 %v10785_v61, 0.0  ;;  %v10948_v6 = vpack.c.bf16 %v10944_v39, %v10944_v39 }
 0x9fa   : > { %v10773_v47 = vpop.f32.mrf.mxu2  ;;  %v10810_v21 = vrot.slane %v10791_v62, 4  ;;  %11244 = vmatmul.bf16.vlgmr.msra.gmra.mxu2 %v10948_v6 }
 0x9fc   : > { %v10811_v36 = vadd.f32 %v10810_v21, %v10791_v62 }
 0x9fd   : > { %v10786_v1 = vpop.f32.mrf.mxu3 }
 0x9fe   : > { %v10812_v44 = vrot.slane %v10811_v36, 2 }
 0xa00   : > { %v10813_v29 = vadd.f32 %v10812_v44, %v10811_v36 }
 0xa02   : > { %v10814_v26 = vrot.slane %v10813_v29, 1 }
 0xa04   : > { %v10815_v43 = vadd.f32 %v10814_v26, %v10813_v29 }
 0xa06   : > { %v10819_v13 = vmul.f32 %v10815_v43, %v21445_v16 }
 0xa08   : > { %v10823_v25 = vsub.f32 %v10791_v62, %v10819_v13 }
 0xa0a   : > { %v10827_v45 = vmul.f32 %v10823_v25, %v10823_v25 }
 0xa0c   : > { %v10846_v58 = vrot.slane %v10827_v45, 4 }
 0xa0e   : > { %v10847_v3 = vadd.f32 %v10846_v58, %v10827_v45 }
 0xa10   : > { %v10848_v35 = vrot.slane %v10847_v3, 2 }
 0xa12   : > { %v10849_v19 = vadd.f32 %v10848_v35, %v10847_v3 }
 0xa14   : > { %v10850_v8 = vrot.slane %v10849_v19, 1 }
 0xa16   : > { %v10851_v60 = vadd.f32 %v10850_v8, %v10849_v19 }
 0xa18   : > { %v10855_v5 = vmul.f32 %v10851_v60, %v21445_v16  ;;  %v10909_v16 = vperm.slane %v21809_v40, 3 }
 0xa1a   : > { %v10859_v52 = vadd.f32 1e-05, %v10855_v5 }
 0xa1c   : > { %18187 = vrsqrt.f32 %v10859_v52  ;;  %vm10896_vm3 = vweird.f32 %v10859_v52 }
 0xa20   : > { %v11219_v30 = vpop.f32.mrf.mxu0 }
 0xa21   : > { %v11220_v15 = vadd.f32 %v18162_v46, %v11219_v30 }
 0xa22   : > { %v18188_v49 = vpop.eup %18187 }
 0xa23   : > { %v10891_v57 = vmul.f32 %v18188_v49, %v10859_v52  ;;  %vm10897_vm2 = vweird.f32 %v18188_v49 }
 0xa24   : > { %vm10898_vm4 = vmor %vm10896_vm3, %vm10897_vm2 }
 0xa25   : > { %v10892_v23 = vmul.f32 %v18188_v49, %v10891_v57 }
 0xa27   : > { %v10893_v14 = vmul.f32 0.5, %v10892_v23 }
 0xa28   : > { %v11221_v10 = vpop.f32.mrf.mxu0 }
 0xa29   : > { %v10894_v50 = vsub.f32 1.5, %v10893_v14 }
 0xa2b   : > { %v10895_v7 = vmul.f32 %v18188_v49, %v10894_v50 }
 0xa2d   : > { %v10899_v32 = vsel %vm10898_vm4, %v18188_v49, %v10895_v7 }
 0xa2e   : > { %v10903_v37 = vmul.f32 %v10899_v32, %v10823_v25 }
 0xa30   : > { %v10917_v53 = vmul.f32 %v10909_v16, %v10903_v37 }
 0xa32   : > { %v10931_v59 = vadd.f32 %v10923_v31, %v10917_v53 }
 0xa34   : > { %v10941_v0 = vmul.f32 %v10937_v51, %v10931_v59 }
 0xa36   : > { %v10945_v42 = vmul.f32 1.6666666, %v10941_v0 }
 0xa38   : > { %v10949_v41 = vpack.c.bf16 %v10945_v42, %v10945_v42 }
 0xa3a   : > { %11257 = vmatmul.bf16.vlgmr.msra.gmra.mxu3 %v10949_v41 }
 0xa3b   : > { %v11232_v4 = vpop.f32.mrf.mxu1 }
 0xa3c   : > { %v11233_v48 = vadd.f32 %v11232_v4, %v11220_v15 }
 0xa43   : > { %v11234_v24 = vpop.f32.mrf.mxu1 }
 0xa7d   : > { %v11245_v20 = vpop.f32.mrf.mxu2 }
 0xa7e   : > { %v11246_v40 = vadd.f32 %v11245_v20, %v11233_v48 }
 0xa85   : > { %v11247_v47 = vpop.f32.mrf.mxu2 }
 0xabd   : > { %v11258_v28 = vpop.f32.mrf.mxu3 }
 0xabe   : > { %v11259_v33 = vadd.f32 %v11258_v28, %v11246_v40 }
 0xac0   : > { %11262 = vst [vmem:[#allocation20] sm:$0xff] %v11259_v33 }
 0xac5   : > { %v11260_v27 = vpop.f32.mrf.mxu3 }
 0xac6 PF: > { %p18110_p3 = scmp.eq.s32.totalorder %s18684_s28, 1  ;;  %s18594_s30 = smov [#allocation20]  }
 0xac7   : > { %s11269_s4 = sshll.u32 %s18594_s30, 4  ;;  %s11271_s6 = sshll.u32 %s21875_s12, 4  ;;  %s11270_s4 = int_to_ptr.vmem [resolvable:$true] %s11269_s4  ;;  %s11272_s6 = int_to_ptr.hbm [resolvable:$true] %s11271_s6 }
 0xac8   : > { %18056 = dma.vmem_to_hbm [thread:$0]  (%p18110_p3), %s11270_s4, 128, %s11272_s6, [#allocation5]  }
 0xac9   : > { %18558 = dma.done.wait (%p18110_p3), [#allocation5], 128  }
 0xaca   : > { %18560 = vsyncadd (%p18110_p3), [#allocation5], 4294967168 }
 0xacb PF: > { %p28_p12 = scmp.ge.s32.totalorder %s18745_s25, 4   ;;  %s21912_s21 = smov %s18567_s22 }
 0xacc   : > { %s21913_s22 = smov %s18571_s23  ;;  %s21914_s23 = smov %s18756_s2 }
 0xacd   : > { %s21915_s24 = smov %s18745_s25  ;;  %30 = sbr.rel (!%p28_p12) target bundleno = 14 (0xe), region = 152 }
 0xad2   :  { %11285 = vsyncpa [#allocation4], 1 }
 0xad3   :  { %11287 = vsyncpa [#allocation4 + $0x1], 1 }
 0xad4   :  { %11288 = vsyncpa [#allocation7], 1 }
 0xad5   :  { %11289 = vsyncpa [#allocation10], 1 }
 0xad6   :  { %11290 = vsyncpa [#allocation13], 1 }
 0xad7   :  { %11291 = vsyncpa [#allocation16], 1 }
 0xad8   :  { %11292 = vsyncpa [#allocation19], 1 }
 0xad9   :  { %11293 = vsyncpa [#allocation5], 1 }
 0xada   :  { %11295 = vsyncpa [#allocation5 + $0x1], 1 }

</bundles_post_ra>
